<compile_context>
chip_gen: v7x
topology: tpu7x:2x2x1
jax: 0.10.0
libtpu: 0.0.40
codegen_flags: <defaults>
</compile_context>

<pallas_src>
import jax
import jax.numpy as jnp
from jax.experimental import pallas as pl
from jax.experimental.pallas import tpu as pltpu

N_SAMPLES = 2 ** 14
N_FRAMES = N_SAMPLES // 256          # 64
N_CLUSTERS = 512
MODEL_DIM = 128
N_VOICES = 16
N_PROFILES = 16
BATCH = 2
SLOPE = 0.2
BF16 = jnp.bfloat16
HEAD_DIM = 3 * MODEL_DIM             # fused heads: [to_harm(256) | to_f0(32) | pad(96)]


# ---------------------------------------------------------------------------
# in-kernel helpers (operate on values; weights arrive as bf16, math in f32)
# ---------------------------------------------------------------------------

def _leaky(x):
    # leaky_relu(x, 0.2) == max(x, 0.2*x) for 0 < slope < 1 (mul + max on the VPU)
    return jnp.maximum(x, SLOPE * x)


def _shift(x, o):
    """Zero-padded frame shift: out[t] = x[t + o] if 0 <= t+o < L else 0.

    XLU sublane rotation (pltpu.roll follows jnp.roll semantics:
    out[t] = x[(t - shift) % L], so shift = (-o) % L) plus a VPU iota boundary
    mask to kill the wrapped rows.  No MXU work.
    """
    if o == 0:
        return x
    L = x.shape[0]
    r = pltpu.roll(x, shift=(-o) % L, axis=0)
    src = jax.lax.broadcasted_iota(jnp.int32, x.shape, 0) + o
    return jnp.where((src >= 0) & (src < L), r, 0.0)


def _conv_taps(x, w, b_row, dilation=1):
    """'same' Conv1d over frames, torch semantics (stride 1, pad = d*(K-1)//2).

    x: (L, Cin) f32; w: (K, Cin, Cout) bf16; b_row: (1, Cout) f32.
    One shifted bf16 MXU matmul per tap, accumulated in f32.
    """
    K, Cin, Cout = w.shape
    pad = dilation * (K - 1) // 2
    acc = jnp.zeros((x.shape[0], Cout), jnp.float32)
    for k in range(K):
        o = k * dilation - pad
        if Cin == 1:
            # degenerate K=1 contraction: broadcast-mul on the VPU, shift the product
            acc = acc + _shift(x * w[k].astype(jnp.float32), o)
        else:
            acc = acc + jnp.dot(_shift(x, o).astype(BF16), w[k],
                                preferred_element_type=jnp.float32)
    return acc + b_row


def _dilated_block(x, w_packed, b_row, d):
    """DilatedBlock with the trailing 1x1 conv folded into the dilated taps.

    x: (L, 128) f32; w_packed: (3*128, 128) bf16 laid out as taps [-d, 0, +d].
    The three 128-lane-aligned shifted slabs are concatenated along channels so the
    whole block is a single (L,384)x(384,128) bf16 MXU matmul + residual + leaky.
    """
    xcat = jnp.concatenate([_shift(x, -d), x, _shift(x, d)], axis=1).astype(BF16)
    h = jnp.dot(xcat, w_packed, preferred_element_type=jnp.float32) + b_row
    return _leaky(h + x)


# ---------------------------------------------------------------------------
# fused Generator kernel (per batch element)
# ---------------------------------------------------------------------------

def _gen_kernel(emb_ref, nrm_ref,
                aw0, ab0, aw1, ab1, aw2, ab2,
                rw, rb, ctx_w, ctx_b, net_w, net_b,
                hw, hb, om_w, om_b,
                x_out, h_out, r_out, m_out):
    f32 = jnp.float32

    # ---- EmbedAmp: Conv1d(1,16,7,p3) lrelu Conv1d(16,32,7,p3) lrelu Conv1d(32,128,7,p3) ----
    nrm = nrm_ref[0].astype(f32)                                   # (F, 1)
    h = _leaky(_conv_taps(nrm, aw0[...], ab0[...]))
    h = _leaky(_conv_taps(h, aw1[...], ab1[...]))
    amp = _conv_taps(h, aw2[...], ab2[...])                        # (F, 128), no trailing act

    # ---- EmbedConditioning.reduce on cat([emb, amp], -1): first Linear split in halves ----
    x = (jnp.dot(emb_ref[0], rw[0], preferred_element_type=f32)
         + jnp.dot(amp.astype(BF16), rw[1], preferred_element_type=f32) + rb[0])
    x = _leaky(x)
    x = _leaky(jnp.dot(x.astype(BF16), rw[2], preferred_element_type=f32) + rb[1])
    x = jnp.dot(x.astype(BF16), rw[3], preferred_element_type=f32) + rb[2]   # final, no act

    # ---- ConditioningContext.context (d = 1,3,9) + Generator.net (d = 1,3,9,1) ----
    for i, d in enumerate((1, 3, 9)):
        x = _dilated_block(x, ctx_w[i], ctx_b[i], d)
    for i, d in enumerate((1, 3, 9, 1)):
        x = _dilated_block(x, net_w[i], net_b[i], d)
    x_out[0] = x.astype(x_out.dtype)

    # ---- fused 1x1 heads: [to_harm (256) | to_f0 (32) | zero pad (96)] -> lane-dense N=384 ----
    h_out[0] = (jnp.dot(x.astype(BF16), hw[...], preferred_element_type=f32)
                + hb[...]).astype(h_out.dtype)

    # ---- j = x.mean(frames); to_rooms | to_mix fused block-diagonal LinearOutputStacks ----
    j = jnp.mean(x, axis=0, keepdims=True)                         # (1, 128)
    hcat = jnp.concatenate([j, j], axis=1)                         # (1, 256) = [rooms | mix] paths
    for i in range(3):
        hcat = _leaky(jnp.dot(hcat.astype(BF16), om_w[i],
                              preferred_element_type=f32) + om_b[i])
    hcat = jnp.dot(hcat.astype(BF16), om_w[3], preferred_element_type=f32) + om_b[3]
    r_out[0] = hcat[:, :MODEL_DIM].astype(r_out.dtype)
    m_logit = hcat[:, MODEL_DIM:]
    m_out[0] = (1.0 / (1.0 + jnp.exp(-m_logit))).astype(m_out.dtype)   # sigmoid; lane 0 is real


# ---------------------------------------------------------------------------
# pallas_call wrapper
# ---------------------------------------------------------------------------

def _full_spec(a):
    zeros = (0,) * a.ndim
    return pl.BlockSpec(tuple(a.shape), lambda b, _z=zeros: _z)


def _batch_spec(a):
    blk = (1,) + tuple(a.shape[1:])
    rest = (0,) * (a.ndim - 1)
    return pl.BlockSpec(blk, lambda b, _r=rest: (b,) + _r)


def _generator_call(p, emb_g, norms3):
    B = emb_g.shape[0]
    args = (emb_g, norms3,
            p['amp_w'][0], p['amp_b'][0], p['amp_w'][1], p['amp_b'][1],
            p['amp_w'][2], p['amp_b'][2],
            p['red_w'], p['red_b'],
            p['ctx_w'], p['ctx_b'], p['net_w'], p['net_b'],
            p['heads_w'], p['heads_b'], p['om_w'], p['om_b'])
    in_specs = [_batch_spec(emb_g), _batch_spec(norms3)]
    in_specs += [_full_spec(a) for a in args[2:]]
    return pl.pallas_call(
        _gen_kernel,
        out_shape=(
            jax.ShapeDtypeStruct((B, N_FRAMES, MODEL_DIM), jnp.float32),   # net features
            jax.ShapeDtypeStruct((B, N_FRAMES, HEAD_DIM), BF16),           # fused heads
            jax.ShapeDtypeStruct((B, 1, MODEL_DIM), jnp.float32),          # rooms (lane-padded)
            jax.ShapeDtypeStruct((B, 1, MODEL_DIM), jnp.float32),          # mix   (lane-padded)
        ),
        grid=(B,),
        in_specs=in_specs,
        out_specs=(
            pl.BlockSpec((1, N_FRAMES, MODEL_DIM), lambda b: (b, 0, 0)),
            pl.BlockSpec((1, N_FRAMES, HEAD_DIM), lambda b: (b, 0, 0)),
            pl.BlockSpec((1, 1, MODEL_DIM), lambda b: (b, 0, 0)),
            pl.BlockSpec((1, 1, MODEL_DIM), lambda b: (b, 0, 0)),
        ),
        compiler_params=pltpu.CompilerParams(dimension_semantics=("parallel",)),
    )(*args)


# ---------------------------------------------------------------------------
# parameters (uniform(-0.1, 0.1) ~ make_initializer(0.1)); pre-folded / packed for TPU
# ---------------------------------------------------------------------------

def _init_params(key):
    keys = iter(jax.random.split(key, 96))
    u = lambda shape: jax.random.uniform(next(keys), shape, jnp.float32, -0.1, 0.1)

    def conv_w(cout, cin, k):                 # torch (Cout,Cin,K) -> (K, Cin, Cout) f32
        return jnp.transpose(u((cout, cin, k)), (2, 1, 0))

    def conv_b(cout):
        return u((cout,)).reshape(1, cout)

    def lin_wT(cin, cout):                    # torch (out,in) -> (in,out) f32
        return jnp.transpose(u((cout, cin)))

    def lin_b(cout):
        return u((cout,)).reshape(1, cout)

    p = {'emb': u((N_CLUSTERS, MODEL_DIM)).astype(BF16)}           # nn.Embedding(512, 128)

    # EmbedAmp
    p['amp_w'] = [conv_w(16, 1, 7).astype(BF16), conv_w(32, 16, 7).astype(BF16),
                  conv_w(MODEL_DIM, 32, 7).astype(BF16)]
    p['amp_b'] = [conv_b(16), conv_b(32), conv_b(MODEL_DIM)]

    # LinearOutputStack(128, 2, out=128, in=256): 2 hidden Linear+LReLU, final Linear (no act)
    w0 = lin_wT(2 * MODEL_DIM, MODEL_DIM)                          # (256,128), split in halves
    p['red_w'] = jnp.stack([w0[:MODEL_DIM], w0[MODEL_DIM:],
                            lin_wT(MODEL_DIM, MODEL_DIM),
                            lin_wT(MODEL_DIM, MODEL_DIM)]).astype(BF16)
    p['red_b'] = jnp.stack([lin_b(MODEL_DIM), lin_b(MODEL_DIM), lin_b(MODEL_DIM)])

    def dblock_folded():
        # 1x1 conv folded into the dilated taps (exact: no nonlinearity in between),
        # then taps packed along the contraction axis -> (3*128, 128).
        wd = conv_w(MODEL_DIM, MODEL_DIM, 3)                       # (3, 128, 128)
        bd = conv_b(MODEL_DIM)                                     # (1, 128)
        w1 = conv_w(MODEL_DIM, MODEL_DIM, 1)[0]                    # (128, 128)
        b1 = conv_b(MODEL_DIM)
        wf = jnp.einsum('kio,oj->kij', wd, w1).reshape(3 * MODEL_DIM, MODEL_DIM)
        bf_ = bd @ w1 + b1
        return wf.astype(BF16), bf_

    ctx = [dblock_folded() for _ in range(3)]                      # cond.context
    p['ctx_w'] = jnp.stack([c[0] for c in ctx])
    p['ctx_b'] = jnp.stack([c[1] for c in ctx])
    net = [dblock_folded() for _ in range(4)]                      # Generator.net
    p['net_w'] = jnp.stack([c[0] for c in net])
    p['net_b'] = jnp.stack([c[1] for c in net])

    # fused 1x1 heads: [to_harm (256) | to_f0 (32) | zero pad (96)] -> (128, 384)
    harm_w = conv_w(N_PROFILES * N_VOICES, MODEL_DIM, 1)[0]        # (128, 256)
    f0_w = conv_w(2 * N_VOICES, MODEL_DIM, 1)[0]                   # (128, 32)
    p['heads_w'] = jnp.concatenate(
        [harm_w, f0_w, jnp.zeros((MODEL_DIM, HEAD_DIM - 288), jnp.float32)],
        axis=1).astype(BF16)
    p['heads_b'] = jnp.concatenate(
        [conv_b(N_PROFILES * N_VOICES), conv_b(2 * N_VOICES),
         jnp.zeros((1, HEAD_DIM - 288), jnp.float32)], axis=1)

    # to_rooms / to_mix: LinearOutputStack(128, 3, out=K), fused block-diagonally so the
    # M=1 epilogue runs 4 matmuls instead of 8; final layers lane-padded to 128.
    def stack_layers(out_dim):
        ws = [lin_wT(MODEL_DIM, MODEL_DIM) for _ in range(3)]
        bs = [lin_b(MODEL_DIM) for _ in range(3)]
        wf = jnp.pad(lin_wT(MODEL_DIM, out_dim), ((0, 0), (0, MODEL_DIM - out_dim)))
        bf_ = jnp.pad(lin_b(out_dim), ((0, 0), (0, MODEL_DIM - out_dim)))
        return ws + [wf], bs + [bf_]

    rw_, rb_ = stack_layers(8)
    mw_, mb_ = stack_layers(1)
    D = MODEL_DIM
    om_w, om_b = [], []
    for i in range(4):
        w = jnp.zeros((2 * D, 2 * D), jnp.float32)
        w = w.at[:D, :D].set(rw_[i]).at[D:, D:].set(mw_[i])
        om_w.append(w)
        om_b.append(jnp.concatenate([rb_[i], mb_[i]], axis=1))
    p['om_w'] = jnp.stack(om_w).astype(BF16)
    p['om_b'] = jnp.stack(om_b)
    return p


# ---------------------------------------------------------------------------
# forward pass
# ---------------------------------------------------------------------------

def generator_forward(p, indices, norms):
    B = indices.shape[0]
    emb_g = jnp.take(p['emb'], indices, axis=0)                    # (B, F, 128) bf16
    norms3 = norms.reshape(B, N_FRAMES, 1).astype(jnp.float32)

    x_nlc, heads, rooms_pad, mix_pad = _generator_call(p, emb_g, norms3)

    x = jnp.transpose(x_nlc, (0, 2, 1))                            # (B, 128, F)
    heads_f = heads.astype(jnp.float32)
    harm = jnp.transpose(heads_f[..., :256], (0, 2, 1))            # (B, 256, F)
    f0 = jnp.transpose(heads_f[..., 256:288], (0, 2, 1))           # (B, 32, F)
    rooms = rooms_pad[:, 0, :8]                                    # (B, 8)
    mix = mix_pad[:, 0, :1].reshape(B, 1, 1)                       # (B, 1, 1), sigmoid applied
    # TODO(synk): HarmonicModel / NoiseModel / NeuralReverb synthesis and the wet-dry mix are
    # not defined in the spec; return the computed features and head outputs instead of `signal`.
    return x, f0, harm, rooms, mix


# ---------------------------------------------------------------------------

if __name__ == "__main__":
    key = jax.random.PRNGKey(0)
    pkey, ikey, nkey = jax.random.split(key, 3)
    params = _init_params(pkey)

    indices = jax.random.randint(ikey, (BATCH, N_FRAMES), 0, N_CLUSTERS, jnp.int32)
    norms = jax.random.uniform(nkey, (BATCH, N_FRAMES), jnp.float32)

    fwd = jax.jit(generator_forward)
    x, f0, harm, rooms, mix = fwd(params, indices, norms)
    jax.block_until_ready((x, f0, harm, rooms, mix))

    assert x.shape == (BATCH, MODEL_DIM, N_FRAMES)
    assert f0.shape == (BATCH, 2 * N_VOICES, N_FRAMES)
    assert harm.shape == (BATCH, N_PROFILES * N_VOICES, N_FRAMES)
    assert rooms.shape == (BATCH, 8)
    assert mix.shape == (BATCH, 1, 1)
    print("KERNEL_OK")
</pallas_src>

<mosaic_0001>
module attributes {stable_mosaic.version = 11 : i64} {
  func.func @_gen_kernel(%arg0: i32, %arg1: memref<1x64x128xbf16, #tpu.memory_space<vmem>>, %arg2: memref<1x64x1xf32, #tpu.memory_space<vmem>>, %arg3: memref<7x1x16xbf16, #tpu.memory_space<vmem>>, %arg4: memref<1x16xf32, #tpu.memory_space<vmem>>, %arg5: memref<7x16x32xbf16, #tpu.memory_space<vmem>>, %arg6: memref<1x32xf32, #tpu.memory_space<vmem>>, %arg7: memref<7x32x128xbf16, #tpu.memory_space<vmem>>, %arg8: memref<1x128xf32, #tpu.memory_space<vmem>>, %arg9: memref<4x128x128xbf16, #tpu.memory_space<vmem>>, %arg10: memref<3x1x128xf32, #tpu.memory_space<vmem>>, %arg11: memref<3x384x128xbf16, #tpu.memory_space<vmem>>, %arg12: memref<3x1x128xf32, #tpu.memory_space<vmem>>, %arg13: memref<4x384x128xbf16, #tpu.memory_space<vmem>>, %arg14: memref<4x1x128xf32, #tpu.memory_space<vmem>>, %arg15: memref<128x384xbf16, #tpu.memory_space<vmem>>, %arg16: memref<1x384xf32, #tpu.memory_space<vmem>>, %arg17: memref<4x256x256xbf16, #tpu.memory_space<vmem>>, %arg18: memref<4x1x256xf32, #tpu.memory_space<vmem>>, %arg19: memref<1x64x128xf32, #tpu.memory_space<vmem>>, %arg20: memref<1x64x384xbf16, #tpu.memory_space<vmem>>, %arg21: memref<1x1x128xf32, #tpu.memory_space<vmem>>, %arg22: memref<1x1x128xf32, #tpu.memory_space<vmem>>) attributes {dimension_semantics = [#tpu.dimension_semantics<parallel>], iteration_bounds = array<i64: 2>, scalar_prefetch = 0 : i64, scratch_operands = 0 : i64, tpu.core_type = #tpu.core_type<tc>, window_params = [{transform_indices = @transform_0, window_bounds = array<i64: 1, 64, 128>}, {transform_indices = @transform_1, window_bounds = array<i64: 1, 64, 1>}, {pipeline_mode = #tpu.pipeline_mode<synchronous>, transform_indices = @transform_2, window_bounds = array<i64: 7, 1, 16>}, {pipeline_mode = #tpu.pipeline_mode<synchronous>, transform_indices = @transform_3, window_bounds = array<i64: 1, 16>}, {pipeline_mode = #tpu.pipeline_mode<synchronous>, transform_indices = @transform_4, window_bounds = array<i64: 7, 16, 32>}, {pipeline_mode = #tpu.pipeline_mode<synchronous>, transform_indices = @transform_5, window_bounds = array<i64: 1, 32>}, {pipeline_mode = #tpu.pipeline_mode<synchronous>, transform_indices = @transform_6, window_bounds = array<i64: 7, 32, 128>}, {pipeline_mode = #tpu.pipeline_mode<synchronous>, transform_indices = @transform_7, window_bounds = array<i64: 1, 128>}, {pipeline_mode = #tpu.pipeline_mode<synchronous>, transform_indices = @transform_8, window_bounds = array<i64: 4, 128, 128>}, {pipeline_mode = #tpu.pipeline_mode<synchronous>, transform_indices = @transform_9, window_bounds = array<i64: 3, 1, 128>}, {pipeline_mode = #tpu.pipeline_mode<synchronous>, transform_indices = @transform_10, window_bounds = array<i64: 3, 384, 128>}, {pipeline_mode = #tpu.pipeline_mode<synchronous>, transform_indices = @transform_11, window_bounds = array<i64: 3, 1, 128>}, {pipeline_mode = #tpu.pipeline_mode<synchronous>, transform_indices = @transform_12, window_bounds = array<i64: 4, 384, 128>}, {pipeline_mode = #tpu.pipeline_mode<synchronous>, transform_indices = @transform_13, window_bounds = array<i64: 4, 1, 128>}, {pipeline_mode = #tpu.pipeline_mode<synchronous>, transform_indices = @transform_14, window_bounds = array<i64: 128, 384>}, {pipeline_mode = #tpu.pipeline_mode<synchronous>, transform_indices = @transform_15, window_bounds = array<i64: 1, 384>}, {pipeline_mode = #tpu.pipeline_mode<synchronous>, transform_indices = @transform_16, window_bounds = array<i64: 4, 256, 256>}, {pipeline_mode = #tpu.pipeline_mode<synchronous>, transform_indices = @transform_17, window_bounds = array<i64: 4, 1, 256>}, {transform_indices = @transform_18, window_bounds = array<i64: 1, 64, 128>}, {transform_indices = @transform_19, window_bounds = array<i64: 1, 64, 384>}, {transform_indices = @transform_20, window_bounds = array<i64: 1, 1, 128>}, {transform_indices = @transform_21, window_bounds = array<i64: 1, 1, 128>}]} {
    %c0 = arith.constant 0 : index
    %c0_0 = arith.constant 0 : index
    %c0_1 = arith.constant 0 : index
    %0 = vector.load %arg2[%c0, %c0_0, %c0_1] : memref<1x64x1xf32, #tpu.memory_space<vmem>>, vector<1x64x1xf32>
    %1 = vector.shape_cast %0 : vector<1x64x1xf32> to vector<64x1xf32>
    %c0_2 = arith.constant 0 : index
    %c0_3 = arith.constant 0 : index
    %c0_4 = arith.constant 0 : index
    %2 = vector.load %arg3[%c0_2, %c0_3, %c0_4] : memref<7x1x16xbf16, #tpu.memory_space<vmem>>, vector<7x1x16xbf16>
    %c0_5 = arith.constant 0 : index
    %c0_6 = arith.constant 0 : index
    %3 = vector.load %arg4[%c0_5, %c0_6] : memref<1x16xf32, #tpu.memory_space<vmem>>, vector<1x16xf32>
    %cst = arith.constant 0.000000e+00 : f32
    %4 = vector.broadcast %cst : f32 to vector<64x16xf32>
    %5 = vector.extract_strided_slice %2 {offsets = [0, 0, 0], sizes = [1, 1, 16], strides = [1, 1, 1]} : vector<7x1x16xbf16> to vector<1x1x16xbf16>
    %6 = vector.shape_cast %5 : vector<1x1x16xbf16> to vector<1x16xbf16>
    %7 = arith.extf %6 : vector<1x16xbf16> to vector<1x16xf32>
    %8 = vector.broadcast %1 : vector<64x1xf32> to vector<64x16xf32>
    %9 = vector.broadcast %7 : vector<1x16xf32> to vector<64x16xf32>
    %10 = arith.mulf %8, %9 : vector<64x16xf32>
    %c3_i32 = arith.constant 3 : i32
    %11 = tpu.dynamic_rotate %10 by %c3_i32 dim 0 : vector<64x16xf32>, i32 -> vector<64x16xf32>
    %12 = tpu.iota {dimensions = array<i32: 0>} : vector<64x16xi32>
    %c-3_i32 = arith.constant -3 : i32
    %13 = vector.broadcast %c-3_i32 : i32 to vector<64x16xi32>
    %14 = arith.addi %12, %13 : vector<64x16xi32>
    %c0_i32 = arith.constant 0 : i32
    %15 = vector.broadcast %c0_i32 : i32 to vector<64x16xi32>
    %16 = arith.cmpi sge, %14, %15 : vector<64x16xi32>
    %c64_i32 = arith.constant 64 : i32
    %17 = vector.broadcast %c64_i32 : i32 to vector<64x16xi32>
    %18 = arith.cmpi slt, %14, %17 : vector<64x16xi32>
    %19 = arith.andi %16, %18 : vector<64x16xi1>
    %cst_7 = arith.constant 0.000000e+00 : f32
    %20 = vector.broadcast %cst_7 : f32 to vector<64x16xf32>
    %21 = arith.select %19, %11, %20 : vector<64x16xi1>, vector<64x16xf32>
    %22 = arith.addf %4, %21 : vector<64x16xf32>
    %23 = vector.extract_strided_slice %2 {offsets = [1, 0, 0], sizes = [1, 1, 16], strides = [1, 1, 1]} : vector<7x1x16xbf16> to vector<1x1x16xbf16>
    %24 = vector.shape_cast %23 : vector<1x1x16xbf16> to vector<1x16xbf16>
    %25 = arith.extf %24 : vector<1x16xbf16> to vector<1x16xf32>
    %26 = vector.broadcast %1 : vector<64x1xf32> to vector<64x16xf32>
    %27 = vector.broadcast %25 : vector<1x16xf32> to vector<64x16xf32>
    %28 = arith.mulf %26, %27 : vector<64x16xf32>
    %c2_i32 = arith.constant 2 : i32
    %29 = tpu.dynamic_rotate %28 by %c2_i32 dim 0 : vector<64x16xf32>, i32 -> vector<64x16xf32>
    %30 = tpu.iota {dimensions = array<i32: 0>} : vector<64x16xi32>
    %c-2_i32 = arith.constant -2 : i32
    %31 = vector.broadcast %c-2_i32 : i32 to vector<64x16xi32>
    %32 = arith.addi %30, %31 : vector<64x16xi32>
    %c0_i32_8 = arith.constant 0 : i32
    %33 = vector.broadcast %c0_i32_8 : i32 to vector<64x16xi32>
    %34 = arith.cmpi sge, %32, %33 : vector<64x16xi32>
    %c64_i32_9 = arith.constant 64 : i32
    %35 = vector.broadcast %c64_i32_9 : i32 to vector<64x16xi32>
    %36 = arith.cmpi slt, %32, %35 : vector<64x16xi32>
    %37 = arith.andi %34, %36 : vector<64x16xi1>
    %cst_10 = arith.constant 0.000000e+00 : f32
    %38 = vector.broadcast %cst_10 : f32 to vector<64x16xf32>
    %39 = arith.select %37, %29, %38 : vector<64x16xi1>, vector<64x16xf32>
    %40 = arith.addf %22, %39 : vector<64x16xf32>
    %41 = vector.extract_strided_slice %2 {offsets = [2, 0, 0], sizes = [1, 1, 16], strides = [1, 1, 1]} : vector<7x1x16xbf16> to vector<1x1x16xbf16>
    %42 = vector.shape_cast %41 : vector<1x1x16xbf16> to vector<1x16xbf16>
    %43 = arith.extf %42 : vector<1x16xbf16> to vector<1x16xf32>
    %44 = vector.broadcast %1 : vector<64x1xf32> to vector<64x16xf32>
    %45 = vector.broadcast %43 : vector<1x16xf32> to vector<64x16xf32>
    %46 = arith.mulf %44, %45 : vector<64x16xf32>
    %c1_i32 = arith.constant 1 : i32
    %47 = tpu.dynamic_rotate %46 by %c1_i32 dim 0 : vector<64x16xf32>, i32 -> vector<64x16xf32>
    %48 = tpu.iota {dimensions = array<i32: 0>} : vector<64x16xi32>
    %c-1_i32 = arith.constant -1 : i32
    %49 = vector.broadcast %c-1_i32 : i32 to vector<64x16xi32>
    %50 = arith.addi %48, %49 : vector<64x16xi32>
    %c0_i32_11 = arith.constant 0 : i32
    %51 = vector.broadcast %c0_i32_11 : i32 to vector<64x16xi32>
    %52 = arith.cmpi sge, %50, %51 : vector<64x16xi32>
    %c64_i32_12 = arith.constant 64 : i32
    %53 = vector.broadcast %c64_i32_12 : i32 to vector<64x16xi32>
    %54 = arith.cmpi slt, %50, %53 : vector<64x16xi32>
    %55 = arith.andi %52, %54 : vector<64x16xi1>
    %cst_13 = arith.constant 0.000000e+00 : f32
    %56 = vector.broadcast %cst_13 : f32 to vector<64x16xf32>
    %57 = arith.select %55, %47, %56 : vector<64x16xi1>, vector<64x16xf32>
    %58 = arith.addf %40, %57 : vector<64x16xf32>
    %59 = vector.extract_strided_slice %2 {offsets = [3, 0, 0], sizes = [1, 1, 16], strides = [1, 1, 1]} : vector<7x1x16xbf16> to vector<1x1x16xbf16>
    %60 = vector.shape_cast %59 : vector<1x1x16xbf16> to vector<1x16xbf16>
    %61 = arith.extf %60 : vector<1x16xbf16> to vector<1x16xf32>
    %62 = vector.broadcast %1 : vector<64x1xf32> to vector<64x16xf32>
    %63 = vector.broadcast %61 : vector<1x16xf32> to vector<64x16xf32>
    %64 = arith.mulf %62, %63 : vector<64x16xf32>
    %65 = arith.addf %58, %64 : vector<64x16xf32>
    %66 = vector.extract_strided_slice %2 {offsets = [4, 0, 0], sizes = [1, 1, 16], strides = [1, 1, 1]} : vector<7x1x16xbf16> to vector<1x1x16xbf16>
    %67 = vector.shape_cast %66 : vector<1x1x16xbf16> to vector<1x16xbf16>
    %68 = arith.extf %67 : vector<1x16xbf16> to vector<1x16xf32>
    %69 = vector.broadcast %1 : vector<64x1xf32> to vector<64x16xf32>
    %70 = vector.broadcast %68 : vector<1x16xf32> to vector<64x16xf32>
    %71 = arith.mulf %69, %70 : vector<64x16xf32>
    %c63_i32 = arith.constant 63 : i32
    %72 = tpu.dynamic_rotate %71 by %c63_i32 dim 0 : vector<64x16xf32>, i32 -> vector<64x16xf32>
    %73 = tpu.iota {dimensions = array<i32: 0>} : vector<64x16xi32>
    %c1_i32_14 = arith.constant 1 : i32
    %74 = vector.broadcast %c1_i32_14 : i32 to vector<64x16xi32>
    %75 = arith.addi %73, %74 : vector<64x16xi32>
    %c0_i32_15 = arith.constant 0 : i32
    %76 = vector.broadcast %c0_i32_15 : i32 to vector<64x16xi32>
    %77 = arith.cmpi sge, %75, %76 : vector<64x16xi32>
    %c64_i32_16 = arith.constant 64 : i32
    %78 = vector.broadcast %c64_i32_16 : i32 to vector<64x16xi32>
    %79 = arith.cmpi slt, %75, %78 : vector<64x16xi32>
    %80 = arith.andi %77, %79 : vector<64x16xi1>
    %cst_17 = arith.constant 0.000000e+00 : f32
    %81 = vector.broadcast %cst_17 : f32 to vector<64x16xf32>
    %82 = arith.select %80, %72, %81 : vector<64x16xi1>, vector<64x16xf32>
    %83 = arith.addf %65, %82 : vector<64x16xf32>
    %84 = vector.extract_strided_slice %2 {offsets = [5, 0, 0], sizes = [1, 1, 16], strides = [1, 1, 1]} : vector<7x1x16xbf16> to vector<1x1x16xbf16>
    %85 = vector.shape_cast %84 : vector<1x1x16xbf16> to vector<1x16xbf16>
    %86 = arith.extf %85 : vector<1x16xbf16> to vector<1x16xf32>
    %87 = vector.broadcast %1 : vector<64x1xf32> to vector<64x16xf32>
    %88 = vector.broadcast %86 : vector<1x16xf32> to vector<64x16xf32>
    %89 = arith.mulf %87, %88 : vector<64x16xf32>
    %c62_i32 = arith.constant 62 : i32
    %90 = tpu.dynamic_rotate %89 by %c62_i32 dim 0 : vector<64x16xf32>, i32 -> vector<64x16xf32>
    %91 = tpu.iota {dimensions = array<i32: 0>} : vector<64x16xi32>
    %c2_i32_18 = arith.constant 2 : i32
    %92 = vector.broadcast %c2_i32_18 : i32 to vector<64x16xi32>
    %93 = arith.addi %91, %92 : vector<64x16xi32>
    %c0_i32_19 = arith.constant 0 : i32
    %94 = vector.broadcast %c0_i32_19 : i32 to vector<64x16xi32>
    %95 = arith.cmpi sge, %93, %94 : vector<64x16xi32>
    %c64_i32_20 = arith.constant 64 : i32
    %96 = vector.broadcast %c64_i32_20 : i32 to vector<64x16xi32>
    %97 = arith.cmpi slt, %93, %96 : vector<64x16xi32>
    %98 = arith.andi %95, %97 : vector<64x16xi1>
    %cst_21 = arith.constant 0.000000e+00 : f32
    %99 = vector.broadcast %cst_21 : f32 to vector<64x16xf32>
    %100 = arith.select %98, %90, %99 : vector<64x16xi1>, vector<64x16xf32>
    %101 = arith.addf %83, %100 : vector<64x16xf32>
    %102 = vector.extract_strided_slice %2 {offsets = [6, 0, 0], sizes = [1, 1, 16], strides = [1, 1, 1]} : vector<7x1x16xbf16> to vector<1x1x16xbf16>
    %103 = vector.shape_cast %102 : vector<1x1x16xbf16> to vector<1x16xbf16>
    %104 = arith.extf %103 : vector<1x16xbf16> to vector<1x16xf32>
    %105 = vector.broadcast %1 : vector<64x1xf32> to vector<64x16xf32>
    %106 = vector.broadcast %104 : vector<1x16xf32> to vector<64x16xf32>
    %107 = arith.mulf %105, %106 : vector<64x16xf32>
    %c61_i32 = arith.constant 61 : i32
    %108 = tpu.dynamic_rotate %107 by %c61_i32 dim 0 : vector<64x16xf32>, i32 -> vector<64x16xf32>
    %109 = tpu.iota {dimensions = array<i32: 0>} : vector<64x16xi32>
    %c3_i32_22 = arith.constant 3 : i32
    %110 = vector.broadcast %c3_i32_22 : i32 to vector<64x16xi32>
    %111 = arith.addi %109, %110 : vector<64x16xi32>
    %c0_i32_23 = arith.constant 0 : i32
    %112 = vector.broadcast %c0_i32_23 : i32 to vector<64x16xi32>
    %113 = arith.cmpi sge, %111, %112 : vector<64x16xi32>
    %c64_i32_24 = arith.constant 64 : i32
    %114 = vector.broadcast %c64_i32_24 : i32 to vector<64x16xi32>
    %115 = arith.cmpi slt, %111, %114 : vector<64x16xi32>
    %116 = arith.andi %113, %115 : vector<64x16xi1>
    %cst_25 = arith.constant 0.000000e+00 : f32
    %117 = vector.broadcast %cst_25 : f32 to vector<64x16xf32>
    %118 = arith.select %116, %108, %117 : vector<64x16xi1>, vector<64x16xf32>
    %119 = arith.addf %101, %118 : vector<64x16xf32>
    %120 = vector.broadcast %3 : vector<1x16xf32> to vector<64x16xf32>
    %121 = arith.addf %119, %120 : vector<64x16xf32>
    %cst_26 = arith.constant 2.000000e-01 : f32
    %122 = vector.broadcast %cst_26 : f32 to vector<64x16xf32>
    %123 = arith.mulf %122, %121 : vector<64x16xf32>
    %124 = arith.maximumf %121, %123 : vector<64x16xf32>
    %c0_27 = arith.constant 0 : index
    %c0_28 = arith.constant 0 : index
    %c0_29 = arith.constant 0 : index
    %125 = vector.load %arg5[%c0_27, %c0_28, %c0_29] : memref<7x16x32xbf16, #tpu.memory_space<vmem>>, vector<7x16x32xbf16>
    %c0_30 = arith.constant 0 : index
    %c0_31 = arith.constant 0 : index
    %126 = vector.load %arg6[%c0_30, %c0_31] : memref<1x32xf32, #tpu.memory_space<vmem>>, vector<1x32xf32>
    %cst_32 = arith.constant 0.000000e+00 : f32
    %127 = vector.broadcast %cst_32 : f32 to vector<64x32xf32>
    %c3_i32_33 = arith.constant 3 : i32
    %128 = tpu.dynamic_rotate %124 by %c3_i32_33 dim 0 : vector<64x16xf32>, i32 -> vector<64x16xf32>
    %129 = tpu.iota {dimensions = array<i32: 0>} : vector<64x16xi32>
    %c-3_i32_34 = arith.constant -3 : i32
    %130 = vector.broadcast %c-3_i32_34 : i32 to vector<64x16xi32>
    %131 = arith.addi %129, %130 : vector<64x16xi32>
    %c0_i32_35 = arith.constant 0 : i32
    %132 = vector.broadcast %c0_i32_35 : i32 to vector<64x16xi32>
    %133 = arith.cmpi sge, %131, %132 : vector<64x16xi32>
    %c64_i32_36 = arith.constant 64 : i32
    %134 = vector.broadcast %c64_i32_36 : i32 to vector<64x16xi32>
    %135 = arith.cmpi slt, %131, %134 : vector<64x16xi32>
    %136 = arith.andi %133, %135 : vector<64x16xi1>
    %cst_37 = arith.constant 0.000000e+00 : f32
    %137 = vector.broadcast %cst_37 : f32 to vector<64x16xf32>
    %138 = arith.select %136, %128, %137 : vector<64x16xi1>, vector<64x16xf32>
    %139 = arith.truncf %138 : vector<64x16xf32> to vector<64x16xbf16>
    %140 = vector.extract_strided_slice %125 {offsets = [0, 0, 0], sizes = [1, 16, 32], strides = [1, 1, 1]} : vector<7x16x32xbf16> to vector<1x16x32xbf16>
    %141 = vector.shape_cast %140 : vector<1x16x32xbf16> to vector<16x32xbf16>
    %cst_38 = arith.constant dense<0.000000e+00> : vector<64x32xf32>
    %142 = tpu.matmul %139, %141, %cst_38 {dimension_numbers = #tpu.dot_dimension_numbers<[1], [0], [0], [1], [0, 0, 1, 1], [], []>} : vector<64x16xbf16>, vector<16x32xbf16>, vector<64x32xf32> -> vector<64x32xf32>
    %143 = arith.addf %127, %142 : vector<64x32xf32>
    %c2_i32_39 = arith.constant 2 : i32
    %144 = tpu.dynamic_rotate %124 by %c2_i32_39 dim 0 : vector<64x16xf32>, i32 -> vector<64x16xf32>
    %145 = tpu.iota {dimensions = array<i32: 0>} : vector<64x16xi32>
    %c-2_i32_40 = arith.constant -2 : i32
    %146 = vector.broadcast %c-2_i32_40 : i32 to vector<64x16xi32>
    %147 = arith.addi %145, %146 : vector<64x16xi32>
    %c0_i32_41 = arith.constant 0 : i32
    %148 = vector.broadcast %c0_i32_41 : i32 to vector<64x16xi32>
    %149 = arith.cmpi sge, %147, %148 : vector<64x16xi32>
    %c64_i32_42 = arith.constant 64 : i32
    %150 = vector.broadcast %c64_i32_42 : i32 to vector<64x16xi32>
    %151 = arith.cmpi slt, %147, %150 : vector<64x16xi32>
    %152 = arith.andi %149, %151 : vector<64x16xi1>
    %cst_43 = arith.constant 0.000000e+00 : f32
    %153 = vector.broadcast %cst_43 : f32 to vector<64x16xf32>
    %154 = arith.select %152, %144, %153 : vector<64x16xi1>, vector<64x16xf32>
    %155 = arith.truncf %154 : vector<64x16xf32> to vector<64x16xbf16>
    %156 = vector.extract_strided_slice %125 {offsets = [1, 0, 0], sizes = [1, 16, 32], strides = [1, 1, 1]} : vector<7x16x32xbf16> to vector<1x16x32xbf16>
    %157 = vector.shape_cast %156 : vector<1x16x32xbf16> to vector<16x32xbf16>
    %cst_44 = arith.constant dense<0.000000e+00> : vector<64x32xf32>
    %158 = tpu.matmul %155, %157, %cst_44 {dimension_numbers = #tpu.dot_dimension_numbers<[1], [0], [0], [1], [0, 0, 1, 1], [], []>} : vector<64x16xbf16>, vector<16x32xbf16>, vector<64x32xf32> -> vector<64x32xf32>
    %159 = arith.addf %143, %158 : vector<64x32xf32>
    %c1_i32_45 = arith.constant 1 : i32
    %160 = tpu.dynamic_rotate %124 by %c1_i32_45 dim 0 : vector<64x16xf32>, i32 -> vector<64x16xf32>
    %161 = tpu.iota {dimensions = array<i32: 0>} : vector<64x16xi32>
    %c-1_i32_46 = arith.constant -1 : i32
    %162 = vector.broadcast %c-1_i32_46 : i32 to vector<64x16xi32>
    %163 = arith.addi %161, %162 : vector<64x16xi32>
    %c0_i32_47 = arith.constant 0 : i32
    %164 = vector.broadcast %c0_i32_47 : i32 to vector<64x16xi32>
    %165 = arith.cmpi sge, %163, %164 : vector<64x16xi32>
    %c64_i32_48 = arith.constant 64 : i32
    %166 = vector.broadcast %c64_i32_48 : i32 to vector<64x16xi32>
    %167 = arith.cmpi slt, %163, %166 : vector<64x16xi32>
    %168 = arith.andi %165, %167 : vector<64x16xi1>
    %cst_49 = arith.constant 0.000000e+00 : f32
    %169 = vector.broadcast %cst_49 : f32 to vector<64x16xf32>
    %170 = arith.select %168, %160, %169 : vector<64x16xi1>, vector<64x16xf32>
    %171 = arith.truncf %170 : vector<64x16xf32> to vector<64x16xbf16>
    %172 = vector.extract_strided_slice %125 {offsets = [2, 0, 0], sizes = [1, 16, 32], strides = [1, 1, 1]} : vector<7x16x32xbf16> to vector<1x16x32xbf16>
    %173 = vector.shape_cast %172 : vector<1x16x32xbf16> to vector<16x32xbf16>
    %cst_50 = arith.constant dense<0.000000e+00> : vector<64x32xf32>
    %174 = tpu.matmul %171, %173, %cst_50 {dimension_numbers = #tpu.dot_dimension_numbers<[1], [0], [0], [1], [0, 0, 1, 1], [], []>} : vector<64x16xbf16>, vector<16x32xbf16>, vector<64x32xf32> -> vector<64x32xf32>
    %175 = arith.addf %159, %174 : vector<64x32xf32>
    %176 = arith.truncf %124 : vector<64x16xf32> to vector<64x16xbf16>
    %177 = vector.extract_strided_slice %125 {offsets = [3, 0, 0], sizes = [1, 16, 32], strides = [1, 1, 1]} : vector<7x16x32xbf16> to vector<1x16x32xbf16>
    %178 = vector.shape_cast %177 : vector<1x16x32xbf16> to vector<16x32xbf16>
    %cst_51 = arith.constant dense<0.000000e+00> : vector<64x32xf32>
    %179 = tpu.matmul %176, %178, %cst_51 {dimension_numbers = #tpu.dot_dimension_numbers<[1], [0], [0], [1], [0, 0, 1, 1], [], []>} : vector<64x16xbf16>, vector<16x32xbf16>, vector<64x32xf32> -> vector<64x32xf32>
    %180 = arith.addf %175, %179 : vector<64x32xf32>
    %c63_i32_52 = arith.constant 63 : i32
    %181 = tpu.dynamic_rotate %124 by %c63_i32_52 dim 0 : vector<64x16xf32>, i32 -> vector<64x16xf32>
    %182 = tpu.iota {dimensions = array<i32: 0>} : vector<64x16xi32>
    %c1_i32_53 = arith.constant 1 : i32
    %183 = vector.broadcast %c1_i32_53 : i32 to vector<64x16xi32>
    %184 = arith.addi %182, %183 : vector<64x16xi32>
    %c0_i32_54 = arith.constant 0 : i32
    %185 = vector.broadcast %c0_i32_54 : i32 to vector<64x16xi32>
    %186 = arith.cmpi sge, %184, %185 : vector<64x16xi32>
    %c64_i32_55 = arith.constant 64 : i32
    %187 = vector.broadcast %c64_i32_55 : i32 to vector<64x16xi32>
    %188 = arith.cmpi slt, %184, %187 : vector<64x16xi32>
    %189 = arith.andi %186, %188 : vector<64x16xi1>
    %cst_56 = arith.constant 0.000000e+00 : f32
    %190 = vector.broadcast %cst_56 : f32 to vector<64x16xf32>
    %191 = arith.select %189, %181, %190 : vector<64x16xi1>, vector<64x16xf32>
    %192 = arith.truncf %191 : vector<64x16xf32> to vector<64x16xbf16>
    %193 = vector.extract_strided_slice %125 {offsets = [4, 0, 0], sizes = [1, 16, 32], strides = [1, 1, 1]} : vector<7x16x32xbf16> to vector<1x16x32xbf16>
    %194 = vector.shape_cast %193 : vector<1x16x32xbf16> to vector<16x32xbf16>
    %cst_57 = arith.constant dense<0.000000e+00> : vector<64x32xf32>
    %195 = tpu.matmul %192, %194, %cst_57 {dimension_numbers = #tpu.dot_dimension_numbers<[1], [0], [0], [1], [0, 0, 1, 1], [], []>} : vector<64x16xbf16>, vector<16x32xbf16>, vector<64x32xf32> -> vector<64x32xf32>
    %196 = arith.addf %180, %195 : vector<64x32xf32>
    %c62_i32_58 = arith.constant 62 : i32
    %197 = tpu.dynamic_rotate %124 by %c62_i32_58 dim 0 : vector<64x16xf32>, i32 -> vector<64x16xf32>
    %198 = tpu.iota {dimensions = array<i32: 0>} : vector<64x16xi32>
    %c2_i32_59 = arith.constant 2 : i32
    %199 = vector.broadcast %c2_i32_59 : i32 to vector<64x16xi32>
    %200 = arith.addi %198, %199 : vector<64x16xi32>
    %c0_i32_60 = arith.constant 0 : i32
    %201 = vector.broadcast %c0_i32_60 : i32 to vector<64x16xi32>
    %202 = arith.cmpi sge, %200, %201 : vector<64x16xi32>
    %c64_i32_61 = arith.constant 64 : i32
    %203 = vector.broadcast %c64_i32_61 : i32 to vector<64x16xi32>
    %204 = arith.cmpi slt, %200, %203 : vector<64x16xi32>
    %205 = arith.andi %202, %204 : vector<64x16xi1>
    %cst_62 = arith.constant 0.000000e+00 : f32
    %206 = vector.broadcast %cst_62 : f32 to vector<64x16xf32>
    %207 = arith.select %205, %197, %206 : vector<64x16xi1>, vector<64x16xf32>
    %208 = arith.truncf %207 : vector<64x16xf32> to vector<64x16xbf16>
    %209 = vector.extract_strided_slice %125 {offsets = [5, 0, 0], sizes = [1, 16, 32], strides = [1, 1, 1]} : vector<7x16x32xbf16> to vector<1x16x32xbf16>
    %210 = vector.shape_cast %209 : vector<1x16x32xbf16> to vector<16x32xbf16>
    %cst_63 = arith.constant dense<0.000000e+00> : vector<64x32xf32>
    %211 = tpu.matmul %208, %210, %cst_63 {dimension_numbers = #tpu.dot_dimension_numbers<[1], [0], [0], [1], [0, 0, 1, 1], [], []>} : vector<64x16xbf16>, vector<16x32xbf16>, vector<64x32xf32> -> vector<64x32xf32>
    %212 = arith.addf %196, %211 : vector<64x32xf32>
    %c61_i32_64 = arith.constant 61 : i32
    %213 = tpu.dynamic_rotate %124 by %c61_i32_64 dim 0 : vector<64x16xf32>, i32 -> vector<64x16xf32>
    %214 = tpu.iota {dimensions = array<i32: 0>} : vector<64x16xi32>
    %c3_i32_65 = arith.constant 3 : i32
    %215 = vector.broadcast %c3_i32_65 : i32 to vector<64x16xi32>
    %216 = arith.addi %214, %215 : vector<64x16xi32>
    %c0_i32_66 = arith.constant 0 : i32
    %217 = vector.broadcast %c0_i32_66 : i32 to vector<64x16xi32>
    %218 = arith.cmpi sge, %216, %217 : vector<64x16xi32>
    %c64_i32_67 = arith.constant 64 : i32
    %219 = vector.broadcast %c64_i32_67 : i32 to vector<64x16xi32>
    %220 = arith.cmpi slt, %216, %219 : vector<64x16xi32>
    %221 = arith.andi %218, %220 : vector<64x16xi1>
    %cst_68 = arith.constant 0.000000e+00 : f32
    %222 = vector.broadcast %cst_68 : f32 to vector<64x16xf32>
    %223 = arith.select %221, %213, %222 : vector<64x16xi1>, vector<64x16xf32>
    %224 = arith.truncf %223 : vector<64x16xf32> to vector<64x16xbf16>
    %225 = vector.extract_strided_slice %125 {offsets = [6, 0, 0], sizes = [1, 16, 32], strides = [1, 1, 1]} : vector<7x16x32xbf16> to vector<1x16x32xbf16>
    %226 = vector.shape_cast %225 : vector<1x16x32xbf16> to vector<16x32xbf16>
    %cst_69 = arith.constant dense<0.000000e+00> : vector<64x32xf32>
    %227 = tpu.matmul %224, %226, %cst_69 {dimension_numbers = #tpu.dot_dimension_numbers<[1], [0], [0], [1], [0, 0, 1, 1], [], []>} : vector<64x16xbf16>, vector<16x32xbf16>, vector<64x32xf32> -> vector<64x32xf32>
    %228 = arith.addf %212, %227 : vector<64x32xf32>
    %229 = vector.broadcast %126 : vector<1x32xf32> to vector<64x32xf32>
    %230 = arith.addf %228, %229 : vector<64x32xf32>
    %cst_70 = arith.constant 2.000000e-01 : f32
    %231 = vector.broadcast %cst_70 : f32 to vector<64x32xf32>
    %232 = arith.mulf %231, %230 : vector<64x32xf32>
    %233 = arith.maximumf %230, %232 : vector<64x32xf32>
    %c0_71 = arith.constant 0 : index
    %c0_72 = arith.constant 0 : index
    %c0_73 = arith.constant 0 : index
    %234 = vector.load %arg7[%c0_71, %c0_72, %c0_73] : memref<7x32x128xbf16, #tpu.memory_space<vmem>>, vector<7x32x128xbf16>
    %c0_74 = arith.constant 0 : index
    %c0_75 = arith.constant 0 : index
    %235 = vector.load %arg8[%c0_74, %c0_75] : memref<1x128xf32, #tpu.memory_space<vmem>>, vector<1x128xf32>
    %cst_76 = arith.constant 0.000000e+00 : f32
    %236 = vector.broadcast %cst_76 : f32 to vector<64x128xf32>
    %c3_i32_77 = arith.constant 3 : i32
    %237 = tpu.dynamic_rotate %233 by %c3_i32_77 dim 0 : vector<64x32xf32>, i32 -> vector<64x32xf32>
    %238 = tpu.iota {dimensions = array<i32: 0>} : vector<64x32xi32>
    %c-3_i32_78 = arith.constant -3 : i32
    %239 = vector.broadcast %c-3_i32_78 : i32 to vector<64x32xi32>
    %240 = arith.addi %238, %239 : vector<64x32xi32>
    %c0_i32_79 = arith.constant 0 : i32
    %241 = vector.broadcast %c0_i32_79 : i32 to vector<64x32xi32>
    %242 = arith.cmpi sge, %240, %241 : vector<64x32xi32>
    %c64_i32_80 = arith.constant 64 : i32
    %243 = vector.broadcast %c64_i32_80 : i32 to vector<64x32xi32>
    %244 = arith.cmpi slt, %240, %243 : vector<64x32xi32>
    %245 = arith.andi %242, %244 : vector<64x32xi1>
    %cst_81 = arith.constant 0.000000e+00 : f32
    %246 = vector.broadcast %cst_81 : f32 to vector<64x32xf32>
    %247 = arith.select %245, %237, %246 : vector<64x32xi1>, vector<64x32xf32>
    %248 = arith.truncf %247 : vector<64x32xf32> to vector<64x32xbf16>
    %249 = vector.extract_strided_slice %234 {offsets = [0, 0, 0], sizes = [1, 32, 128], strides = [1, 1, 1]} : vector<7x32x128xbf16> to vector<1x32x128xbf16>
    %250 = vector.shape_cast %249 : vector<1x32x128xbf16> to vector<32x128xbf16>
    %cst_82 = arith.constant dense<0.000000e+00> : vector<64x128xf32>
    %251 = tpu.matmul %248, %250, %cst_82 {dimension_numbers = #tpu.dot_dimension_numbers<[1], [0], [0], [1], [0, 0, 1, 1], [], []>} : vector<64x32xbf16>, vector<32x128xbf16>, vector<64x128xf32> -> vector<64x128xf32>
    %252 = arith.addf %236, %251 : vector<64x128xf32>
    %c2_i32_83 = arith.constant 2 : i32
    %253 = tpu.dynamic_rotate %233 by %c2_i32_83 dim 0 : vector<64x32xf32>, i32 -> vector<64x32xf32>
    %254 = tpu.iota {dimensions = array<i32: 0>} : vector<64x32xi32>
    %c-2_i32_84 = arith.constant -2 : i32
    %255 = vector.broadcast %c-2_i32_84 : i32 to vector<64x32xi32>
    %256 = arith.addi %254, %255 : vector<64x32xi32>
    %c0_i32_85 = arith.constant 0 : i32
    %257 = vector.broadcast %c0_i32_85 : i32 to vector<64x32xi32>
    %258 = arith.cmpi sge, %256, %257 : vector<64x32xi32>
    %c64_i32_86 = arith.constant 64 : i32
    %259 = vector.broadcast %c64_i32_86 : i32 to vector<64x32xi32>
    %260 = arith.cmpi slt, %256, %259 : vector<64x32xi32>
    %261 = arith.andi %258, %260 : vector<64x32xi1>
    %cst_87 = arith.constant 0.000000e+00 : f32
    %262 = vector.broadcast %cst_87 : f32 to vector<64x32xf32>
    %263 = arith.select %261, %253, %262 : vector<64x32xi1>, vector<64x32xf32>
    %264 = arith.truncf %263 : vector<64x32xf32> to vector<64x32xbf16>
    %265 = vector.extract_strided_slice %234 {offsets = [1, 0, 0], sizes = [1, 32, 128], strides = [1, 1, 1]} : vector<7x32x128xbf16> to vector<1x32x128xbf16>
    %266 = vector.shape_cast %265 : vector<1x32x128xbf16> to vector<32x128xbf16>
    %cst_88 = arith.constant dense<0.000000e+00> : vector<64x128xf32>
    %267 = tpu.matmul %264, %266, %cst_88 {dimension_numbers = #tpu.dot_dimension_numbers<[1], [0], [0], [1], [0, 0, 1, 1], [], []>} : vector<64x32xbf16>, vector<32x128xbf16>, vector<64x128xf32> -> vector<64x128xf32>
    %268 = arith.addf %252, %267 : vector<64x128xf32>
    %c1_i32_89 = arith.constant 1 : i32
    %269 = tpu.dynamic_rotate %233 by %c1_i32_89 dim 0 : vector<64x32xf32>, i32 -> vector<64x32xf32>
    %270 = tpu.iota {dimensions = array<i32: 0>} : vector<64x32xi32>
    %c-1_i32_90 = arith.constant -1 : i32
    %271 = vector.broadcast %c-1_i32_90 : i32 to vector<64x32xi32>
    %272 = arith.addi %270, %271 : vector<64x32xi32>
    %c0_i32_91 = arith.constant 0 : i32
    %273 = vector.broadcast %c0_i32_91 : i32 to vector<64x32xi32>
    %274 = arith.cmpi sge, %272, %273 : vector<64x32xi32>
    %c64_i32_92 = arith.constant 64 : i32
    %275 = vector.broadcast %c64_i32_92 : i32 to vector<64x32xi32>
    %276 = arith.cmpi slt, %272, %275 : vector<64x32xi32>
    %277 = arith.andi %274, %276 : vector<64x32xi1>
    %cst_93 = arith.constant 0.000000e+00 : f32
    %278 = vector.broadcast %cst_93 : f32 to vector<64x32xf32>
    %279 = arith.select %277, %269, %278 : vector<64x32xi1>, vector<64x32xf32>
    %280 = arith.truncf %279 : vector<64x32xf32> to vector<64x32xbf16>
    %281 = vector.extract_strided_slice %234 {offsets = [2, 0, 0], sizes = [1, 32, 128], strides = [1, 1, 1]} : vector<7x32x128xbf16> to vector<1x32x128xbf16>
    %282 = vector.shape_cast %281 : vector<1x32x128xbf16> to vector<32x128xbf16>
    %cst_94 = arith.constant dense<0.000000e+00> : vector<64x128xf32>
    %283 = tpu.matmul %280, %282, %cst_94 {dimension_numbers = #tpu.dot_dimension_numbers<[1], [0], [0], [1], [0, 0, 1, 1], [], []>} : vector<64x32xbf16>, vector<32x128xbf16>, vector<64x128xf32> -> vector<64x128xf32>
    %284 = arith.addf %268, %283 : vector<64x128xf32>
    %285 = arith.truncf %233 : vector<64x32xf32> to vector<64x32xbf16>
    %286 = vector.extract_strided_slice %234 {offsets = [3, 0, 0], sizes = [1, 32, 128], strides = [1, 1, 1]} : vector<7x32x128xbf16> to vector<1x32x128xbf16>
    %287 = vector.shape_cast %286 : vector<1x32x128xbf16> to vector<32x128xbf16>
    %cst_95 = arith.constant dense<0.000000e+00> : vector<64x128xf32>
    %288 = tpu.matmul %285, %287, %cst_95 {dimension_numbers = #tpu.dot_dimension_numbers<[1], [0], [0], [1], [0, 0, 1, 1], [], []>} : vector<64x32xbf16>, vector<32x128xbf16>, vector<64x128xf32> -> vector<64x128xf32>
    %289 = arith.addf %284, %288 : vector<64x128xf32>
    %c63_i32_96 = arith.constant 63 : i32
    %290 = tpu.dynamic_rotate %233 by %c63_i32_96 dim 0 : vector<64x32xf32>, i32 -> vector<64x32xf32>
    %291 = tpu.iota {dimensions = array<i32: 0>} : vector<64x32xi32>
    %c1_i32_97 = arith.constant 1 : i32
    %292 = vector.broadcast %c1_i32_97 : i32 to vector<64x32xi32>
    %293 = arith.addi %291, %292 : vector<64x32xi32>
    %c0_i32_98 = arith.constant 0 : i32
    %294 = vector.broadcast %c0_i32_98 : i32 to vector<64x32xi32>
    %295 = arith.cmpi sge, %293, %294 : vector<64x32xi32>
    %c64_i32_99 = arith.constant 64 : i32
    %296 = vector.broadcast %c64_i32_99 : i32 to vector<64x32xi32>
    %297 = arith.cmpi slt, %293, %296 : vector<64x32xi32>
    %298 = arith.andi %295, %297 : vector<64x32xi1>
    %cst_100 = arith.constant 0.000000e+00 : f32
    %299 = vector.broadcast %cst_100 : f32 to vector<64x32xf32>
    %300 = arith.select %298, %290, %299 : vector<64x32xi1>, vector<64x32xf32>
    %301 = arith.truncf %300 : vector<64x32xf32> to vector<64x32xbf16>
    %302 = vector.extract_strided_slice %234 {offsets = [4, 0, 0], sizes = [1, 32, 128], strides = [1, 1, 1]} : vector<7x32x128xbf16> to vector<1x32x128xbf16>
    %303 = vector.shape_cast %302 : vector<1x32x128xbf16> to vector<32x128xbf16>
    %cst_101 = arith.constant dense<0.000000e+00> : vector<64x128xf32>
    %304 = tpu.matmul %301, %303, %cst_101 {dimension_numbers = #tpu.dot_dimension_numbers<[1], [0], [0], [1], [0, 0, 1, 1], [], []>} : vector<64x32xbf16>, vector<32x128xbf16>, vector<64x128xf32> -> vector<64x128xf32>
    %305 = arith.addf %289, %304 : vector<64x128xf32>
    %c62_i32_102 = arith.constant 62 : i32
    %306 = tpu.dynamic_rotate %233 by %c62_i32_102 dim 0 : vector<64x32xf32>, i32 -> vector<64x32xf32>
    %307 = tpu.iota {dimensions = array<i32: 0>} : vector<64x32xi32>
    %c2_i32_103 = arith.constant 2 : i32
    %308 = vector.broadcast %c2_i32_103 : i32 to vector<64x32xi32>
    %309 = arith.addi %307, %308 : vector<64x32xi32>
    %c0_i32_104 = arith.constant 0 : i32
    %310 = vector.broadcast %c0_i32_104 : i32 to vector<64x32xi32>
    %311 = arith.cmpi sge, %309, %310 : vector<64x32xi32>
    %c64_i32_105 = arith.constant 64 : i32
    %312 = vector.broadcast %c64_i32_105 : i32 to vector<64x32xi32>
    %313 = arith.cmpi slt, %309, %312 : vector<64x32xi32>
    %314 = arith.andi %311, %313 : vector<64x32xi1>
    %cst_106 = arith.constant 0.000000e+00 : f32
    %315 = vector.broadcast %cst_106 : f32 to vector<64x32xf32>
    %316 = arith.select %314, %306, %315 : vector<64x32xi1>, vector<64x32xf32>
    %317 = arith.truncf %316 : vector<64x32xf32> to vector<64x32xbf16>
    %318 = vector.extract_strided_slice %234 {offsets = [5, 0, 0], sizes = [1, 32, 128], strides = [1, 1, 1]} : vector<7x32x128xbf16> to vector<1x32x128xbf16>
    %319 = vector.shape_cast %318 : vector<1x32x128xbf16> to vector<32x128xbf16>
    %cst_107 = arith.constant dense<0.000000e+00> : vector<64x128xf32>
    %320 = tpu.matmul %317, %319, %cst_107 {dimension_numbers = #tpu.dot_dimension_numbers<[1], [0], [0], [1], [0, 0, 1, 1], [], []>} : vector<64x32xbf16>, vector<32x128xbf16>, vector<64x128xf32> -> vector<64x128xf32>
    %321 = arith.addf %305, %320 : vector<64x128xf32>
    %c61_i32_108 = arith.constant 61 : i32
    %322 = tpu.dynamic_rotate %233 by %c61_i32_108 dim 0 : vector<64x32xf32>, i32 -> vector<64x32xf32>
    %323 = tpu.iota {dimensions = array<i32: 0>} : vector<64x32xi32>
    %c3_i32_109 = arith.constant 3 : i32
    %324 = vector.broadcast %c3_i32_109 : i32 to vector<64x32xi32>
    %325 = arith.addi %323, %324 : vector<64x32xi32>
    %c0_i32_110 = arith.constant 0 : i32
    %326 = vector.broadcast %c0_i32_110 : i32 to vector<64x32xi32>
    %327 = arith.cmpi sge, %325, %326 : vector<64x32xi32>
    %c64_i32_111 = arith.constant 64 : i32
    %328 = vector.broadcast %c64_i32_111 : i32 to vector<64x32xi32>
    %329 = arith.cmpi slt, %325, %328 : vector<64x32xi32>
    %330 = arith.andi %327, %329 : vector<64x32xi1>
    %cst_112 = arith.constant 0.000000e+00 : f32
    %331 = vector.broadcast %cst_112 : f32 to vector<64x32xf32>
    %332 = arith.select %330, %322, %331 : vector<64x32xi1>, vector<64x32xf32>
    %333 = arith.truncf %332 : vector<64x32xf32> to vector<64x32xbf16>
    %334 = vector.extract_strided_slice %234 {offsets = [6, 0, 0], sizes = [1, 32, 128], strides = [1, 1, 1]} : vector<7x32x128xbf16> to vector<1x32x128xbf16>
    %335 = vector.shape_cast %334 : vector<1x32x128xbf16> to vector<32x128xbf16>
    %cst_113 = arith.constant dense<0.000000e+00> : vector<64x128xf32>
    %336 = tpu.matmul %333, %335, %cst_113 {dimension_numbers = #tpu.dot_dimension_numbers<[1], [0], [0], [1], [0, 0, 1, 1], [], []>} : vector<64x32xbf16>, vector<32x128xbf16>, vector<64x128xf32> -> vector<64x128xf32>
    %337 = arith.addf %321, %336 : vector<64x128xf32>
    %338 = vector.broadcast %235 : vector<1x128xf32> to vector<64x128xf32>
    %339 = arith.addf %337, %338 : vector<64x128xf32>
    %c0_114 = arith.constant 0 : index
    %c0_115 = arith.constant 0 : index
    %c0_116 = arith.constant 0 : index
    %340 = vector.load %arg1[%c0_114, %c0_115, %c0_116] : memref<1x64x128xbf16, #tpu.memory_space<vmem>>, vector<1x64x128xbf16>
    %341 = vector.shape_cast %340 : vector<1x64x128xbf16> to vector<64x128xbf16>
    %c0_117 = arith.constant 0 : index
    %c0_118 = arith.constant 0 : index
    %c0_119 = arith.constant 0 : index
    %342 = vector.load %arg9[%c0_117, %c0_118, %c0_119] : memref<4x128x128xbf16, #tpu.memory_space<vmem>>, vector<1x128x128xbf16>
    %343 = vector.shape_cast %342 : vector<1x128x128xbf16> to vector<128x128xbf16>
    %cst_120 = arith.constant dense<0.000000e+00> : vector<64x128xf32>
    %344 = tpu.matmul %341, %343, %cst_120 {dimension_numbers = #tpu.dot_dimension_numbers<[1], [0], [0], [1], [0, 0, 1, 1], [], []>} : vector<64x128xbf16>, vector<128x128xbf16>, vector<64x128xf32> -> vector<64x128xf32>
    %345 = arith.truncf %339 : vector<64x128xf32> to vector<64x128xbf16>
    %c1 = arith.constant 1 : index
    %c0_121 = arith.constant 0 : index
    %c0_122 = arith.constant 0 : index
    %346 = vector.load %arg9[%c1, %c0_121, %c0_122] : memref<4x128x128xbf16, #tpu.memory_space<vmem>>, vector<1x128x128xbf16>
    %347 = vector.shape_cast %346 : vector<1x128x128xbf16> to vector<128x128xbf16>
    %cst_123 = arith.constant dense<0.000000e+00> : vector<64x128xf32>
    %348 = tpu.matmul %345, %347, %cst_123 {dimension_numbers = #tpu.dot_dimension_numbers<[1], [0], [0], [1], [0, 0, 1, 1], [], []>} : vector<64x128xbf16>, vector<128x128xbf16>, vector<64x128xf32> -> vector<64x128xf32>
    %349 = arith.addf %344, %348 : vector<64x128xf32>
    %c0_124 = arith.constant 0 : index
    %c0_125 = arith.constant 0 : index
    %c0_126 = arith.constant 0 : index
    %350 = vector.load %arg10[%c0_124, %c0_125, %c0_126] : memref<3x1x128xf32, #tpu.memory_space<vmem>>, vector<1x1x128xf32>
    %351 = vector.shape_cast %350 : vector<1x1x128xf32> to vector<1x128xf32>
    %352 = vector.broadcast %351 : vector<1x128xf32> to vector<64x128xf32>
    %353 = arith.addf %349, %352 : vector<64x128xf32>
    %cst_127 = arith.constant 2.000000e-01 : f32
    %354 = vector.broadcast %cst_127 : f32 to vector<64x128xf32>
    %355 = arith.mulf %354, %353 : vector<64x128xf32>
    %356 = arith.maximumf %353, %355 : vector<64x128xf32>
    %357 = arith.truncf %356 : vector<64x128xf32> to vector<64x128xbf16>
    %c2 = arith.constant 2 : index
    %c0_128 = arith.constant 0 : index
    %c0_129 = arith.constant 0 : index
    %358 = vector.load %arg9[%c2, %c0_128, %c0_129] : memref<4x128x128xbf16, #tpu.memory_space<vmem>>, vector<1x128x128xbf16>
    %359 = vector.shape_cast %358 : vector<1x128x128xbf16> to vector<128x128xbf16>
    %cst_130 = arith.constant dense<0.000000e+00> : vector<64x128xf32>
    %360 = tpu.matmul %357, %359, %cst_130 {dimension_numbers = #tpu.dot_dimension_numbers<[1], [0], [0], [1], [0, 0, 1, 1], [], []>} : vector<64x128xbf16>, vector<128x128xbf16>, vector<64x128xf32> -> vector<64x128xf32>
    %c1_131 = arith.constant 1 : index
    %c0_132 = arith.constant 0 : index
    %c0_133 = arith.constant 0 : index
    %361 = vector.load %arg10[%c1_131, %c0_132, %c0_133] : memref<3x1x128xf32, #tpu.memory_space<vmem>>, vector<1x1x128xf32>
    %362 = vector.shape_cast %361 : vector<1x1x128xf32> to vector<1x128xf32>
    %363 = vector.broadcast %362 : vector<1x128xf32> to vector<64x128xf32>
    %364 = arith.addf %360, %363 : vector<64x128xf32>
    %cst_134 = arith.constant 2.000000e-01 : f32
    %365 = vector.broadcast %cst_134 : f32 to vector<64x128xf32>
    %366 = arith.mulf %365, %364 : vector<64x128xf32>
    %367 = arith.maximumf %364, %366 : vector<64x128xf32>
    %368 = arith.truncf %367 : vector<64x128xf32> to vector<64x128xbf16>
    %c3 = arith.constant 3 : index
    %c0_135 = arith.constant 0 : index
    %c0_136 = arith.constant 0 : index
    %369 = vector.load %arg9[%c3, %c0_135, %c0_136] : memref<4x128x128xbf16, #tpu.memory_space<vmem>>, vector<1x128x128xbf16>
    %370 = vector.shape_cast %369 : vector<1x128x128xbf16> to vector<128x128xbf16>
    %cst_137 = arith.constant dense<0.000000e+00> : vector<64x128xf32>
    %371 = tpu.matmul %368, %370, %cst_137 {dimension_numbers = #tpu.dot_dimension_numbers<[1], [0], [0], [1], [0, 0, 1, 1], [], []>} : vector<64x128xbf16>, vector<128x128xbf16>, vector<64x128xf32> -> vector<64x128xf32>
    %c2_138 = arith.constant 2 : index
    %c0_139 = arith.constant 0 : index
    %c0_140 = arith.constant 0 : index
    %372 = vector.load %arg10[%c2_138, %c0_139, %c0_140] : memref<3x1x128xf32, #tpu.memory_space<vmem>>, vector<1x1x128xf32>
    %373 = vector.shape_cast %372 : vector<1x1x128xf32> to vector<1x128xf32>
    %374 = vector.broadcast %373 : vector<1x128xf32> to vector<64x128xf32>
    %375 = arith.addf %371, %374 : vector<64x128xf32>
    %c0_141 = arith.constant 0 : index
    %c0_142 = arith.constant 0 : index
    %c0_143 = arith.constant 0 : index
    %376 = vector.load %arg11[%c0_141, %c0_142, %c0_143] : memref<3x384x128xbf16, #tpu.memory_space<vmem>>, vector<1x384x128xbf16>
    %377 = vector.shape_cast %376 : vector<1x384x128xbf16> to vector<384x128xbf16>
    %c0_144 = arith.constant 0 : index
    %c0_145 = arith.constant 0 : index
    %c0_146 = arith.constant 0 : index
    %378 = vector.load %arg12[%c0_144, %c0_145, %c0_146] : memref<3x1x128xf32, #tpu.memory_space<vmem>>, vector<1x1x128xf32>
    %379 = vector.shape_cast %378 : vector<1x1x128xf32> to vector<1x128xf32>
    %c1_i32_147 = arith.constant 1 : i32
    %380 = tpu.dynamic_rotate %375 by %c1_i32_147 dim 0 : vector<64x128xf32>, i32 -> vector<64x128xf32>
    %381 = tpu.iota {dimensions = array<i32: 0>} : vector<64x128xi32>
    %c-1_i32_148 = arith.constant -1 : i32
    %382 = vector.broadcast %c-1_i32_148 : i32 to vector<64x128xi32>
    %383 = arith.addi %381, %382 : vector<64x128xi32>
    %c0_i32_149 = arith.constant 0 : i32
    %384 = vector.broadcast %c0_i32_149 : i32 to vector<64x128xi32>
    %385 = arith.cmpi sge, %383, %384 : vector<64x128xi32>
    %c64_i32_150 = arith.constant 64 : i32
    %386 = vector.broadcast %c64_i32_150 : i32 to vector<64x128xi32>
    %387 = arith.cmpi slt, %383, %386 : vector<64x128xi32>
    %388 = arith.andi %385, %387 : vector<64x128xi1>
    %cst_151 = arith.constant 0.000000e+00 : f32
    %389 = vector.broadcast %cst_151 : f32 to vector<64x128xf32>
    %390 = arith.select %388, %380, %389 : vector<64x128xi1>, vector<64x128xf32>
    %c63_i32_152 = arith.constant 63 : i32
    %391 = tpu.dynamic_rotate %375 by %c63_i32_152 dim 0 : vector<64x128xf32>, i32 -> vector<64x128xf32>
    %392 = tpu.iota {dimensions = array<i32: 0>} : vector<64x128xi32>
    %c1_i32_153 = arith.constant 1 : i32
    %393 = vector.broadcast %c1_i32_153 : i32 to vector<64x128xi32>
    %394 = arith.addi %392, %393 : vector<64x128xi32>
    %c0_i32_154 = arith.constant 0 : i32
    %395 = vector.broadcast %c0_i32_154 : i32 to vector<64x128xi32>
    %396 = arith.cmpi sge, %394, %395 : vector<64x128xi32>
    %c64_i32_155 = arith.constant 64 : i32
    %397 = vector.broadcast %c64_i32_155 : i32 to vector<64x128xi32>
    %398 = arith.cmpi slt, %394, %397 : vector<64x128xi32>
    %399 = arith.andi %396, %398 : vector<64x128xi1>
    %cst_156 = arith.constant 0.000000e+00 : f32
    %400 = vector.broadcast %cst_156 : f32 to vector<64x128xf32>
    %401 = arith.select %399, %391, %400 : vector<64x128xi1>, vector<64x128xf32>
    %402 = tpu.concatenate %390, %375, %401 in 1 : vector<64x128xf32>, vector<64x128xf32>, vector<64x128xf32> -> vector<64x384xf32>
    %403 = arith.truncf %402 : vector<64x384xf32> to vector<64x384xbf16>
    %cst_157 = arith.constant dense<0.000000e+00> : vector<64x128xf32>
    %404 = tpu.matmul %403, %377, %cst_157 {dimension_numbers = #tpu.dot_dimension_numbers<[1], [0], [0], [1], [0, 0, 1, 1], [], []>} : vector<64x384xbf16>, vector<384x128xbf16>, vector<64x128xf32> -> vector<64x128xf32>
    %405 = vector.broadcast %379 : vector<1x128xf32> to vector<64x128xf32>
    %406 = arith.addf %404, %405 : vector<64x128xf32>
    %407 = arith.addf %406, %375 : vector<64x128xf32>
    %cst_158 = arith.constant 2.000000e-01 : f32
    %408 = vector.broadcast %cst_158 : f32 to vector<64x128xf32>
    %409 = arith.mulf %408, %407 : vector<64x128xf32>
    %410 = arith.maximumf %407, %409 : vector<64x128xf32>
    %c1_159 = arith.constant 1 : index
    %c0_160 = arith.constant 0 : index
    %c0_161 = arith.constant 0 : index
    %411 = vector.load %arg11[%c1_159, %c0_160, %c0_161] : memref<3x384x128xbf16, #tpu.memory_space<vmem>>, vector<1x384x128xbf16>
    %412 = vector.shape_cast %411 : vector<1x384x128xbf16> to vector<384x128xbf16>
    %c1_162 = arith.constant 1 : index
    %c0_163 = arith.constant 0 : index
    %c0_164 = arith.constant 0 : index
    %413 = vector.load %arg12[%c1_162, %c0_163, %c0_164] : memref<3x1x128xf32, #tpu.memory_space<vmem>>, vector<1x1x128xf32>
    %414 = vector.shape_cast %413 : vector<1x1x128xf32> to vector<1x128xf32>
    %c3_i32_165 = arith.constant 3 : i32
    %415 = tpu.dynamic_rotate %410 by %c3_i32_165 dim 0 : vector<64x128xf32>, i32 -> vector<64x128xf32>
    %416 = tpu.iota {dimensions = array<i32: 0>} : vector<64x128xi32>
    %c-3_i32_166 = arith.constant -3 : i32
    %417 = vector.broadcast %c-3_i32_166 : i32 to vector<64x128xi32>
    %418 = arith.addi %416, %417 : vector<64x128xi32>
    %c0_i32_167 = arith.constant 0 : i32
    %419 = vector.broadcast %c0_i32_167 : i32 to vector<64x128xi32>
    %420 = arith.cmpi sge, %418, %419 : vector<64x128xi32>
    %c64_i32_168 = arith.constant 64 : i32
    %421 = vector.broadcast %c64_i32_168 : i32 to vector<64x128xi32>
    %422 = arith.cmpi slt, %418, %421 : vector<64x128xi32>
    %423 = arith.andi %420, %422 : vector<64x128xi1>
    %cst_169 = arith.constant 0.000000e+00 : f32
    %424 = vector.broadcast %cst_169 : f32 to vector<64x128xf32>
    %425 = arith.select %423, %415, %424 : vector<64x128xi1>, vector<64x128xf32>
    %c61_i32_170 = arith.constant 61 : i32
    %426 = tpu.dynamic_rotate %410 by %c61_i32_170 dim 0 : vector<64x128xf32>, i32 -> vector<64x128xf32>
    %427 = tpu.iota {dimensions = array<i32: 0>} : vector<64x128xi32>
    %c3_i32_171 = arith.constant 3 : i32
    %428 = vector.broadcast %c3_i32_171 : i32 to vector<64x128xi32>
    %429 = arith.addi %427, %428 : vector<64x128xi32>
    %c0_i32_172 = arith.constant 0 : i32
    %430 = vector.broadcast %c0_i32_172 : i32 to vector<64x128xi32>
    %431 = arith.cmpi sge, %429, %430 : vector<64x128xi32>
    %c64_i32_173 = arith.constant 64 : i32
    %432 = vector.broadcast %c64_i32_173 : i32 to vector<64x128xi32>
    %433 = arith.cmpi slt, %429, %432 : vector<64x128xi32>
    %434 = arith.andi %431, %433 : vector<64x128xi1>
    %cst_174 = arith.constant 0.000000e+00 : f32
    %435 = vector.broadcast %cst_174 : f32 to vector<64x128xf32>
    %436 = arith.select %434, %426, %435 : vector<64x128xi1>, vector<64x128xf32>
    %437 = tpu.concatenate %425, %410, %436 in 1 : vector<64x128xf32>, vector<64x128xf32>, vector<64x128xf32> -> vector<64x384xf32>
    %438 = arith.truncf %437 : vector<64x384xf32> to vector<64x384xbf16>
    %cst_175 = arith.constant dense<0.000000e+00> : vector<64x128xf32>
    %439 = tpu.matmul %438, %412, %cst_175 {dimension_numbers = #tpu.dot_dimension_numbers<[1], [0], [0], [1], [0, 0, 1, 1], [], []>} : vector<64x384xbf16>, vector<384x128xbf16>, vector<64x128xf32> -> vector<64x128xf32>
    %440 = vector.broadcast %414 : vector<1x128xf32> to vector<64x128xf32>
    %441 = arith.addf %439, %440 : vector<64x128xf32>
    %442 = arith.addf %441, %410 : vector<64x128xf32>
    %cst_176 = arith.constant 2.000000e-01 : f32
    %443 = vector.broadcast %cst_176 : f32 to vector<64x128xf32>
    %444 = arith.mulf %443, %442 : vector<64x128xf32>
    %445 = arith.maximumf %442, %444 : vector<64x128xf32>
    %c2_177 = arith.constant 2 : index
    %c0_178 = arith.constant 0 : index
    %c0_179 = arith.constant 0 : index
    %446 = vector.load %arg11[%c2_177, %c0_178, %c0_179] : memref<3x384x128xbf16, #tpu.memory_space<vmem>>, vector<1x384x128xbf16>
    %447 = vector.shape_cast %446 : vector<1x384x128xbf16> to vector<384x128xbf16>
    %c2_180 = arith.constant 2 : index
    %c0_181 = arith.constant 0 : index
    %c0_182 = arith.constant 0 : index
    %448 = vector.load %arg12[%c2_180, %c0_181, %c0_182] : memref<3x1x128xf32, #tpu.memory_space<vmem>>, vector<1x1x128xf32>
    %449 = vector.shape_cast %448 : vector<1x1x128xf32> to vector<1x128xf32>
    %c9_i32 = arith.constant 9 : i32
    %450 = tpu.dynamic_rotate %445 by %c9_i32 dim 0 : vector<64x128xf32>, i32 -> vector<64x128xf32>
    %451 = tpu.iota {dimensions = array<i32: 0>} : vector<64x128xi32>
    %c-9_i32 = arith.constant -9 : i32
    %452 = vector.broadcast %c-9_i32 : i32 to vector<64x128xi32>
    %453 = arith.addi %451, %452 : vector<64x128xi32>
    %c0_i32_183 = arith.constant 0 : i32
    %454 = vector.broadcast %c0_i32_183 : i32 to vector<64x128xi32>
    %455 = arith.cmpi sge, %453, %454 : vector<64x128xi32>
    %c64_i32_184 = arith.constant 64 : i32
    %456 = vector.broadcast %c64_i32_184 : i32 to vector<64x128xi32>
    %457 = arith.cmpi slt, %453, %456 : vector<64x128xi32>
    %458 = arith.andi %455, %457 : vector<64x128xi1>
    %cst_185 = arith.constant 0.000000e+00 : f32
    %459 = vector.broadcast %cst_185 : f32 to vector<64x128xf32>
    %460 = arith.select %458, %450, %459 : vector<64x128xi1>, vector<64x128xf32>
    %c55_i32 = arith.constant 55 : i32
    %461 = tpu.dynamic_rotate %445 by %c55_i32 dim 0 : vector<64x128xf32>, i32 -> vector<64x128xf32>
    %462 = tpu.iota {dimensions = array<i32: 0>} : vector<64x128xi32>
    %c9_i32_186 = arith.constant 9 : i32
    %463 = vector.broadcast %c9_i32_186 : i32 to vector<64x128xi32>
    %464 = arith.addi %462, %463 : vector<64x128xi32>
    %c0_i32_187 = arith.constant 0 : i32
    %465 = vector.broadcast %c0_i32_187 : i32 to vector<64x128xi32>
    %466 = arith.cmpi sge, %464, %465 : vector<64x128xi32>
    %c64_i32_188 = arith.constant 64 : i32
    %467 = vector.broadcast %c64_i32_188 : i32 to vector<64x128xi32>
    %468 = arith.cmpi slt, %464, %467 : vector<64x128xi32>
    %469 = arith.andi %466, %468 : vector<64x128xi1>
    %cst_189 = arith.constant 0.000000e+00 : f32
    %470 = vector.broadcast %cst_189 : f32 to vector<64x128xf32>
    %471 = arith.select %469, %461, %470 : vector<64x128xi1>, vector<64x128xf32>
    %472 = tpu.concatenate %460, %445, %471 in 1 : vector<64x128xf32>, vector<64x128xf32>, vector<64x128xf32> -> vector<64x384xf32>
    %473 = arith.truncf %472 : vector<64x384xf32> to vector<64x384xbf16>
    %cst_190 = arith.constant dense<0.000000e+00> : vector<64x128xf32>
    %474 = tpu.matmul %473, %447, %cst_190 {dimension_numbers = #tpu.dot_dimension_numbers<[1], [0], [0], [1], [0, 0, 1, 1], [], []>} : vector<64x384xbf16>, vector<384x128xbf16>, vector<64x128xf32> -> vector<64x128xf32>
    %475 = vector.broadcast %449 : vector<1x128xf32> to vector<64x128xf32>
    %476 = arith.addf %474, %475 : vector<64x128xf32>
    %477 = arith.addf %476, %445 : vector<64x128xf32>
    %cst_191 = arith.constant 2.000000e-01 : f32
    %478 = vector.broadcast %cst_191 : f32 to vector<64x128xf32>
    %479 = arith.mulf %478, %477 : vector<64x128xf32>
    %480 = arith.maximumf %477, %479 : vector<64x128xf32>
    %c0_192 = arith.constant 0 : index
    %c0_193 = arith.constant 0 : index
    %c0_194 = arith.constant 0 : index
    %481 = vector.load %arg13[%c0_192, %c0_193, %c0_194] : memref<4x384x128xbf16, #tpu.memory_space<vmem>>, vector<1x384x128xbf16>
    %482 = vector.shape_cast %481 : vector<1x384x128xbf16> to vector<384x128xbf16>
    %c0_195 = arith.constant 0 : index
    %c0_196 = arith.constant 0 : index
    %c0_197 = arith.constant 0 : index
    %483 = vector.load %arg14[%c0_195, %c0_196, %c0_197] : memref<4x1x128xf32, #tpu.memory_space<vmem>>, vector<1x1x128xf32>
    %484 = vector.shape_cast %483 : vector<1x1x128xf32> to vector<1x128xf32>
    %c1_i32_198 = arith.constant 1 : i32
    %485 = tpu.dynamic_rotate %480 by %c1_i32_198 dim 0 : vector<64x128xf32>, i32 -> vector<64x128xf32>
    %486 = tpu.iota {dimensions = array<i32: 0>} : vector<64x128xi32>
    %c-1_i32_199 = arith.constant -1 : i32
    %487 = vector.broadcast %c-1_i32_199 : i32 to vector<64x128xi32>
    %488 = arith.addi %486, %487 : vector<64x128xi32>
    %c0_i32_200 = arith.constant 0 : i32
    %489 = vector.broadcast %c0_i32_200 : i32 to vector<64x128xi32>
    %490 = arith.cmpi sge, %488, %489 : vector<64x128xi32>
    %c64_i32_201 = arith.constant 64 : i32
    %491 = vector.broadcast %c64_i32_201 : i32 to vector<64x128xi32>
    %492 = arith.cmpi slt, %488, %491 : vector<64x128xi32>
    %493 = arith.andi %490, %492 : vector<64x128xi1>
    %cst_202 = arith.constant 0.000000e+00 : f32
    %494 = vector.broadcast %cst_202 : f32 to vector<64x128xf32>
    %495 = arith.select %493, %485, %494 : vector<64x128xi1>, vector<64x128xf32>
    %c63_i32_203 = arith.constant 63 : i32
    %496 = tpu.dynamic_rotate %480 by %c63_i32_203 dim 0 : vector<64x128xf32>, i32 -> vector<64x128xf32>
    %497 = tpu.iota {dimensions = array<i32: 0>} : vector<64x128xi32>
    %c1_i32_204 = arith.constant 1 : i32
    %498 = vector.broadcast %c1_i32_204 : i32 to vector<64x128xi32>
    %499 = arith.addi %497, %498 : vector<64x128xi32>
    %c0_i32_205 = arith.constant 0 : i32
    %500 = vector.broadcast %c0_i32_205 : i32 to vector<64x128xi32>
    %501 = arith.cmpi sge, %499, %500 : vector<64x128xi32>
    %c64_i32_206 = arith.constant 64 : i32
    %502 = vector.broadcast %c64_i32_206 : i32 to vector<64x128xi32>
    %503 = arith.cmpi slt, %499, %502 : vector<64x128xi32>
    %504 = arith.andi %501, %503 : vector<64x128xi1>
    %cst_207 = arith.constant 0.000000e+00 : f32
    %505 = vector.broadcast %cst_207 : f32 to vector<64x128xf32>
    %506 = arith.select %504, %496, %505 : vector<64x128xi1>, vector<64x128xf32>
    %507 = tpu.concatenate %495, %480, %506 in 1 : vector<64x128xf32>, vector<64x128xf32>, vector<64x128xf32> -> vector<64x384xf32>
    %508 = arith.truncf %507 : vector<64x384xf32> to vector<64x384xbf16>
    %cst_208 = arith.constant dense<0.000000e+00> : vector<64x128xf32>
    %509 = tpu.matmul %508, %482, %cst_208 {dimension_numbers = #tpu.dot_dimension_numbers<[1], [0], [0], [1], [0, 0, 1, 1], [], []>} : vector<64x384xbf16>, vector<384x128xbf16>, vector<64x128xf32> -> vector<64x128xf32>
    %510 = vector.broadcast %484 : vector<1x128xf32> to vector<64x128xf32>
    %511 = arith.addf %509, %510 : vector<64x128xf32>
    %512 = arith.addf %511, %480 : vector<64x128xf32>
    %cst_209 = arith.constant 2.000000e-01 : f32
    %513 = vector.broadcast %cst_209 : f32 to vector<64x128xf32>
    %514 = arith.mulf %513, %512 : vector<64x128xf32>
    %515 = arith.maximumf %512, %514 : vector<64x128xf32>
    %c1_210 = arith.constant 1 : index
    %c0_211 = arith.constant 0 : index
    %c0_212 = arith.constant 0 : index
    %516 = vector.load %arg13[%c1_210, %c0_211, %c0_212] : memref<4x384x128xbf16, #tpu.memory_space<vmem>>, vector<1x384x128xbf16>
    %517 = vector.shape_cast %516 : vector<1x384x128xbf16> to vector<384x128xbf16>
    %c1_213 = arith.constant 1 : index
    %c0_214 = arith.constant 0 : index
    %c0_215 = arith.constant 0 : index
    %518 = vector.load %arg14[%c1_213, %c0_214, %c0_215] : memref<4x1x128xf32, #tpu.memory_space<vmem>>, vector<1x1x128xf32>
    %519 = vector.shape_cast %518 : vector<1x1x128xf32> to vector<1x128xf32>
    %c3_i32_216 = arith.constant 3 : i32
    %520 = tpu.dynamic_rotate %515 by %c3_i32_216 dim 0 : vector<64x128xf32>, i32 -> vector<64x128xf32>
    %521 = tpu.iota {dimensions = array<i32: 0>} : vector<64x128xi32>
    %c-3_i32_217 = arith.constant -3 : i32
    %522 = vector.broadcast %c-3_i32_217 : i32 to vector<64x128xi32>
    %523 = arith.addi %521, %522 : vector<64x128xi32>
    %c0_i32_218 = arith.constant 0 : i32
    %524 = vector.broadcast %c0_i32_218 : i32 to vector<64x128xi32>
    %525 = arith.cmpi sge, %523, %524 : vector<64x128xi32>
    %c64_i32_219 = arith.constant 64 : i32
    %526 = vector.broadcast %c64_i32_219 : i32 to vector<64x128xi32>
    %527 = arith.cmpi slt, %523, %526 : vector<64x128xi32>
    %528 = arith.andi %525, %527 : vector<64x128xi1>
    %cst_220 = arith.constant 0.000000e+00 : f32
    %529 = vector.broadcast %cst_220 : f32 to vector<64x128xf32>
    %530 = arith.select %528, %520, %529 : vector<64x128xi1>, vector<64x128xf32>
    %c61_i32_221 = arith.constant 61 : i32
    %531 = tpu.dynamic_rotate %515 by %c61_i32_221 dim 0 : vector<64x128xf32>, i32 -> vector<64x128xf32>
    %532 = tpu.iota {dimensions = array<i32: 0>} : vector<64x128xi32>
    %c3_i32_222 = arith.constant 3 : i32
    %533 = vector.broadcast %c3_i32_222 : i32 to vector<64x128xi32>
    %534 = arith.addi %532, %533 : vector<64x128xi32>
    %c0_i32_223 = arith.constant 0 : i32
    %535 = vector.broadcast %c0_i32_223 : i32 to vector<64x128xi32>
    %536 = arith.cmpi sge, %534, %535 : vector<64x128xi32>
    %c64_i32_224 = arith.constant 64 : i32
    %537 = vector.broadcast %c64_i32_224 : i32 to vector<64x128xi32>
    %538 = arith.cmpi slt, %534, %537 : vector<64x128xi32>
    %539 = arith.andi %536, %538 : vector<64x128xi1>
    %cst_225 = arith.constant 0.000000e+00 : f32
    %540 = vector.broadcast %cst_225 : f32 to vector<64x128xf32>
    %541 = arith.select %539, %531, %540 : vector<64x128xi1>, vector<64x128xf32>
    %542 = tpu.concatenate %530, %515, %541 in 1 : vector<64x128xf32>, vector<64x128xf32>, vector<64x128xf32> -> vector<64x384xf32>
    %543 = arith.truncf %542 : vector<64x384xf32> to vector<64x384xbf16>
    %cst_226 = arith.constant dense<0.000000e+00> : vector<64x128xf32>
    %544 = tpu.matmul %543, %517, %cst_226 {dimension_numbers = #tpu.dot_dimension_numbers<[1], [0], [0], [1], [0, 0, 1, 1], [], []>} : vector<64x384xbf16>, vector<384x128xbf16>, vector<64x128xf32> -> vector<64x128xf32>
    %545 = vector.broadcast %519 : vector<1x128xf32> to vector<64x128xf32>
    %546 = arith.addf %544, %545 : vector<64x128xf32>
    %547 = arith.addf %546, %515 : vector<64x128xf32>
    %cst_227 = arith.constant 2.000000e-01 : f32
    %548 = vector.broadcast %cst_227 : f32 to vector<64x128xf32>
    %549 = arith.mulf %548, %547 : vector<64x128xf32>
    %550 = arith.maximumf %547, %549 : vector<64x128xf32>
    %c2_228 = arith.constant 2 : index
    %c0_229 = arith.constant 0 : index
    %c0_230 = arith.constant 0 : index
    %551 = vector.load %arg13[%c2_228, %c0_229, %c0_230] : memref<4x384x128xbf16, #tpu.memory_space<vmem>>, vector<1x384x128xbf16>
    %552 = vector.shape_cast %551 : vector<1x384x128xbf16> to vector<384x128xbf16>
    %c2_231 = arith.constant 2 : index
    %c0_232 = arith.constant 0 : index
    %c0_233 = arith.constant 0 : index
    %553 = vector.load %arg14[%c2_231, %c0_232, %c0_233] : memref<4x1x128xf32, #tpu.memory_space<vmem>>, vector<1x1x128xf32>
    %554 = vector.shape_cast %553 : vector<1x1x128xf32> to vector<1x128xf32>
    %c9_i32_234 = arith.constant 9 : i32
    %555 = tpu.dynamic_rotate %550 by %c9_i32_234 dim 0 : vector<64x128xf32>, i32 -> vector<64x128xf32>
    %556 = tpu.iota {dimensions = array<i32: 0>} : vector<64x128xi32>
    %c-9_i32_235 = arith.constant -9 : i32
    %557 = vector.broadcast %c-9_i32_235 : i32 to vector<64x128xi32>
    %558 = arith.addi %556, %557 : vector<64x128xi32>
    %c0_i32_236 = arith.constant 0 : i32
    %559 = vector.broadcast %c0_i32_236 : i32 to vector<64x128xi32>
    %560 = arith.cmpi sge, %558, %559 : vector<64x128xi32>
    %c64_i32_237 = arith.constant 64 : i32
    %561 = vector.broadcast %c64_i32_237 : i32 to vector<64x128xi32>
    %562 = arith.cmpi slt, %558, %561 : vector<64x128xi32>
    %563 = arith.andi %560, %562 : vector<64x128xi1>
    %cst_238 = arith.constant 0.000000e+00 : f32
    %564 = vector.broadcast %cst_238 : f32 to vector<64x128xf32>
    %565 = arith.select %563, %555, %564 : vector<64x128xi1>, vector<64x128xf32>
    %c55_i32_239 = arith.constant 55 : i32
    %566 = tpu.dynamic_rotate %550 by %c55_i32_239 dim 0 : vector<64x128xf32>, i32 -> vector<64x128xf32>
    %567 = tpu.iota {dimensions = array<i32: 0>} : vector<64x128xi32>
    %c9_i32_240 = arith.constant 9 : i32
    %568 = vector.broadcast %c9_i32_240 : i32 to vector<64x128xi32>
    %569 = arith.addi %567, %568 : vector<64x128xi32>
    %c0_i32_241 = arith.constant 0 : i32
    %570 = vector.broadcast %c0_i32_241 : i32 to vector<64x128xi32>
    %571 = arith.cmpi sge, %569, %570 : vector<64x128xi32>
    %c64_i32_242 = arith.constant 64 : i32
    %572 = vector.broadcast %c64_i32_242 : i32 to vector<64x128xi32>
    %573 = arith.cmpi slt, %569, %572 : vector<64x128xi32>
    %574 = arith.andi %571, %573 : vector<64x128xi1>
    %cst_243 = arith.constant 0.000000e+00 : f32
    %575 = vector.broadcast %cst_243 : f32 to vector<64x128xf32>
    %576 = arith.select %574, %566, %575 : vector<64x128xi1>, vector<64x128xf32>
    %577 = tpu.concatenate %565, %550, %576 in 1 : vector<64x128xf32>, vector<64x128xf32>, vector<64x128xf32> -> vector<64x384xf32>
    %578 = arith.truncf %577 : vector<64x384xf32> to vector<64x384xbf16>
    %cst_244 = arith.constant dense<0.000000e+00> : vector<64x128xf32>
    %579 = tpu.matmul %578, %552, %cst_244 {dimension_numbers = #tpu.dot_dimension_numbers<[1], [0], [0], [1], [0, 0, 1, 1], [], []>} : vector<64x384xbf16>, vector<384x128xbf16>, vector<64x128xf32> -> vector<64x128xf32>
    %580 = vector.broadcast %554 : vector<1x128xf32> to vector<64x128xf32>
    %581 = arith.addf %579, %580 : vector<64x128xf32>
    %582 = arith.addf %581, %550 : vector<64x128xf32>
    %cst_245 = arith.constant 2.000000e-01 : f32
    %583 = vector.broadcast %cst_245 : f32 to vector<64x128xf32>
    %584 = arith.mulf %583, %582 : vector<64x128xf32>
    %585 = arith.maximumf %582, %584 : vector<64x128xf32>
    %c3_246 = arith.constant 3 : index
    %c0_247 = arith.constant 0 : index
    %c0_248 = arith.constant 0 : index
    %586 = vector.load %arg13[%c3_246, %c0_247, %c0_248] : memref<4x384x128xbf16, #tpu.memory_space<vmem>>, vector<1x384x128xbf16>
    %587 = vector.shape_cast %586 : vector<1x384x128xbf16> to vector<384x128xbf16>
    %c3_249 = arith.constant 3 : index
    %c0_250 = arith.constant 0 : index
    %c0_251 = arith.constant 0 : index
    %588 = vector.load %arg14[%c3_249, %c0_250, %c0_251] : memref<4x1x128xf32, #tpu.memory_space<vmem>>, vector<1x1x128xf32>
    %589 = vector.shape_cast %588 : vector<1x1x128xf32> to vector<1x128xf32>
    %c1_i32_252 = arith.constant 1 : i32
    %590 = tpu.dynamic_rotate %585 by %c1_i32_252 dim 0 : vector<64x128xf32>, i32 -> vector<64x128xf32>
    %591 = tpu.iota {dimensions = array<i32: 0>} : vector<64x128xi32>
    %c-1_i32_253 = arith.constant -1 : i32
    %592 = vector.broadcast %c-1_i32_253 : i32 to vector<64x128xi32>
    %593 = arith.addi %591, %592 : vector<64x128xi32>
    %c0_i32_254 = arith.constant 0 : i32
    %594 = vector.broadcast %c0_i32_254 : i32 to vector<64x128xi32>
    %595 = arith.cmpi sge, %593, %594 : vector<64x128xi32>
    %c64_i32_255 = arith.constant 64 : i32
    %596 = vector.broadcast %c64_i32_255 : i32 to vector<64x128xi32>
    %597 = arith.cmpi slt, %593, %596 : vector<64x128xi32>
    %598 = arith.andi %595, %597 : vector<64x128xi1>
    %cst_256 = arith.constant 0.000000e+00 : f32
    %599 = vector.broadcast %cst_256 : f32 to vector<64x128xf32>
    %600 = arith.select %598, %590, %599 : vector<64x128xi1>, vector<64x128xf32>
    %c63_i32_257 = arith.constant 63 : i32
    %601 = tpu.dynamic_rotate %585 by %c63_i32_257 dim 0 : vector<64x128xf32>, i32 -> vector<64x128xf32>
    %602 = tpu.iota {dimensions = array<i32: 0>} : vector<64x128xi32>
    %c1_i32_258 = arith.constant 1 : i32
    %603 = vector.broadcast %c1_i32_258 : i32 to vector<64x128xi32>
    %604 = arith.addi %602, %603 : vector<64x128xi32>
    %c0_i32_259 = arith.constant 0 : i32
    %605 = vector.broadcast %c0_i32_259 : i32 to vector<64x128xi32>
    %606 = arith.cmpi sge, %604, %605 : vector<64x128xi32>
    %c64_i32_260 = arith.constant 64 : i32
    %607 = vector.broadcast %c64_i32_260 : i32 to vector<64x128xi32>
    %608 = arith.cmpi slt, %604, %607 : vector<64x128xi32>
    %609 = arith.andi %606, %608 : vector<64x128xi1>
    %cst_261 = arith.constant 0.000000e+00 : f32
    %610 = vector.broadcast %cst_261 : f32 to vector<64x128xf32>
    %611 = arith.select %609, %601, %610 : vector<64x128xi1>, vector<64x128xf32>
    %612 = tpu.concatenate %600, %585, %611 in 1 : vector<64x128xf32>, vector<64x128xf32>, vector<64x128xf32> -> vector<64x384xf32>
    %613 = arith.truncf %612 : vector<64x384xf32> to vector<64x384xbf16>
    %cst_262 = arith.constant dense<0.000000e+00> : vector<64x128xf32>
    %614 = tpu.matmul %613, %587, %cst_262 {dimension_numbers = #tpu.dot_dimension_numbers<[1], [0], [0], [1], [0, 0, 1, 1], [], []>} : vector<64x384xbf16>, vector<384x128xbf16>, vector<64x128xf32> -> vector<64x128xf32>
    %615 = vector.broadcast %589 : vector<1x128xf32> to vector<64x128xf32>
    %616 = arith.addf %614, %615 : vector<64x128xf32>
    %617 = arith.addf %616, %585 : vector<64x128xf32>
    %cst_263 = arith.constant 2.000000e-01 : f32
    %618 = vector.broadcast %cst_263 : f32 to vector<64x128xf32>
    %619 = arith.mulf %618, %617 : vector<64x128xf32>
    %620 = arith.maximumf %617, %619 : vector<64x128xf32>
    %c0_264 = arith.constant 0 : index
    %c0_265 = arith.constant 0 : index
    %c0_266 = arith.constant 0 : index
    %621 = vector.load %arg19[%c0_264, %c0_265, %c0_266] : memref<1x64x128xf32, #tpu.memory_space<vmem>>, vector<1x64x128xf32>
    %622 = vector.shape_cast %621 : vector<1x64x128xf32> to vector<64x128xf32>
    %623 = vector.shape_cast %620 : vector<64x128xf32> to vector<1x64x128xf32>
    tpu.vector_store %arg19[%c0_264, %c0_265, %c0_266], %623 {strides = array<i32>} : memref<1x64x128xf32, #tpu.memory_space<vmem>>, vector<1x64x128xf32>,
    %624 = arith.truncf %620 : vector<64x128xf32> to vector<64x128xbf16>
    %c0_267 = arith.constant 0 : index
    %c0_268 = arith.constant 0 : index
    %625 = vector.load %arg15[%c0_267, %c0_268] : memref<128x384xbf16, #tpu.memory_space<vmem>>, vector<128x384xbf16>
    %cst_269 = arith.constant dense<0.000000e+00> : vector<64x384xf32>
    %626 = tpu.matmul %624, %625, %cst_269 {dimension_numbers = #tpu.dot_dimension_numbers<[1], [0], [0], [1], [0, 0, 1, 1], [], []>} : vector<64x128xbf16>, vector<128x384xbf16>, vector<64x384xf32> -> vector<64x384xf32>
    %c0_270 = arith.constant 0 : index
    %c0_271 = arith.constant 0 : index
    %627 = vector.load %arg16[%c0_270, %c0_271] : memref<1x384xf32, #tpu.memory_space<vmem>>, vector<1x384xf32>
    %628 = vector.broadcast %627 : vector<1x384xf32> to vector<64x384xf32>
    %629 = arith.addf %626, %628 : vector<64x384xf32>
    %630 = arith.truncf %629 : vector<64x384xf32> to vector<64x384xbf16>
    %c0_272 = arith.constant 0 : index
    %c0_273 = arith.constant 0 : index
    %c0_274 = arith.constant 0 : index
    %631 = vector.load %arg20[%c0_272, %c0_273, %c0_274] : memref<1x64x384xbf16, #tpu.memory_space<vmem>>, vector<1x64x384xbf16>
    %632 = vector.shape_cast %631 : vector<1x64x384xbf16> to vector<64x384xbf16>
    %633 = vector.shape_cast %630 : vector<64x384xbf16> to vector<1x64x384xbf16>
    tpu.vector_store %arg20[%c0_272, %c0_273, %c0_274], %633 {strides = array<i32>} : memref<1x64x384xbf16, #tpu.memory_space<vmem>>, vector<1x64x384xbf16>,
    %cst_275 = arith.constant dense<0.000000e+00> : vector<128xf32>
    %634 = vector.multi_reduction <add>, %620, %cst_275 [0] : vector<64x128xf32> to vector<128xf32>
    %635 = vector.shape_cast %634 : vector<128xf32> to vector<1x128xf32>
    %cst_276 = arith.constant 6.400000e+01 : f32
    %636 = vector.broadcast %cst_276 : f32 to vector<1x128xf32>
    %637 = arith.divf %635, %636 : vector<1x128xf32>
    %638 = tpu.concatenate %637, %637 in 1 : vector<1x128xf32>, vector<1x128xf32> -> vector<1x256xf32>
    %639 = arith.truncf %638 : vector<1x256xf32> to vector<1x256xbf16>
    %c0_277 = arith.constant 0 : index
    %c0_278 = arith.constant 0 : index
    %c0_279 = arith.constant 0 : index
    %640 = vector.load %arg17[%c0_277, %c0_278, %c0_279] : memref<4x256x256xbf16, #tpu.memory_space<vmem>>, vector<1x256x256xbf16>
    %641 = vector.shape_cast %640 : vector<1x256x256xbf16> to vector<256x256xbf16>
    %cst_280 = arith.constant dense<0.000000e+00> : vector<1x256xf32>
    %642 = tpu.matmul %639, %641, %cst_280 {dimension_numbers = #tpu.dot_dimension_numbers<[1], [0], [0], [1], [0, 0, 1, 1], [], []>} : vector<1x256xbf16>, vector<256x256xbf16>, vector<1x256xf32> -> vector<1x256xf32>
    %c0_281 = arith.constant 0 : index
    %c0_282 = arith.constant 0 : index
    %c0_283 = arith.constant 0 : index
    %643 = vector.load %arg18[%c0_281, %c0_282, %c0_283] : memref<4x1x256xf32, #tpu.memory_space<vmem>>, vector<1x1x256xf32>
    %644 = vector.shape_cast %643 : vector<1x1x256xf32> to vector<1x256xf32>
    %645 = arith.addf %642, %644 : vector<1x256xf32>
    %cst_284 = arith.constant 2.000000e-01 : f32
    %646 = vector.broadcast %cst_284 : f32 to vector<1x256xf32>
    %647 = arith.mulf %646, %645 : vector<1x256xf32>
    %648 = arith.maximumf %645, %647 : vector<1x256xf32>
    %649 = arith.truncf %648 : vector<1x256xf32> to vector<1x256xbf16>
    %c1_285 = arith.constant 1 : index
    %c0_286 = arith.constant 0 : index
    %c0_287 = arith.constant 0 : index
    %650 = vector.load %arg17[%c1_285, %c0_286, %c0_287] : memref<4x256x256xbf16, #tpu.memory_space<vmem>>, vector<1x256x256xbf16>
    %651 = vector.shape_cast %650 : vector<1x256x256xbf16> to vector<256x256xbf16>
    %cst_288 = arith.constant dense<0.000000e+00> : vector<1x256xf32>
    %652 = tpu.matmul %649, %651, %cst_288 {dimension_numbers = #tpu.dot_dimension_numbers<[1], [0], [0], [1], [0, 0, 1, 1], [], []>} : vector<1x256xbf16>, vector<256x256xbf16>, vector<1x256xf32> -> vector<1x256xf32>
    %c1_289 = arith.constant 1 : index
    %c0_290 = arith.constant 0 : index
    %c0_291 = arith.constant 0 : index
    %653 = vector.load %arg18[%c1_289, %c0_290, %c0_291] : memref<4x1x256xf32, #tpu.memory_space<vmem>>, vector<1x1x256xf32>
    %654 = vector.shape_cast %653 : vector<1x1x256xf32> to vector<1x256xf32>
    %655 = arith.addf %652, %654 : vector<1x256xf32>
    %cst_292 = arith.constant 2.000000e-01 : f32
    %656 = vector.broadcast %cst_292 : f32 to vector<1x256xf32>
    %657 = arith.mulf %656, %655 : vector<1x256xf32>
    %658 = arith.maximumf %655, %657 : vector<1x256xf32>
    %659 = arith.truncf %658 : vector<1x256xf32> to vector<1x256xbf16>
    %c2_293 = arith.constant 2 : index
    %c0_294 = arith.constant 0 : index
    %c0_295 = arith.constant 0 : index
    %660 = vector.load %arg17[%c2_293, %c0_294, %c0_295] : memref<4x256x256xbf16, #tpu.memory_space<vmem>>, vector<1x256x256xbf16>
    %661 = vector.shape_cast %660 : vector<1x256x256xbf16> to vector<256x256xbf16>
    %cst_296 = arith.constant dense<0.000000e+00> : vector<1x256xf32>
    %662 = tpu.matmul %659, %661, %cst_296 {dimension_numbers = #tpu.dot_dimension_numbers<[1], [0], [0], [1], [0, 0, 1, 1], [], []>} : vector<1x256xbf16>, vector<256x256xbf16>, vector<1x256xf32> -> vector<1x256xf32>
    %c2_297 = arith.constant 2 : index
    %c0_298 = arith.constant 0 : index
    %c0_299 = arith.constant 0 : index
    %663 = vector.load %arg18[%c2_297, %c0_298, %c0_299] : memref<4x1x256xf32, #tpu.memory_space<vmem>>, vector<1x1x256xf32>
    %664 = vector.shape_cast %663 : vector<1x1x256xf32> to vector<1x256xf32>
    %665 = arith.addf %662, %664 : vector<1x256xf32>
    %cst_300 = arith.constant 2.000000e-01 : f32
    %666 = vector.broadcast %cst_300 : f32 to vector<1x256xf32>
    %667 = arith.mulf %666, %665 : vector<1x256xf32>
    %668 = arith.maximumf %665, %667 : vector<1x256xf32>
    %669 = arith.truncf %668 : vector<1x256xf32> to vector<1x256xbf16>
    %c3_301 = arith.constant 3 : index
    %c0_302 = arith.constant 0 : index
    %c0_303 = arith.constant 0 : index
    %670 = vector.load %arg17[%c3_301, %c0_302, %c0_303] : memref<4x256x256xbf16, #tpu.memory_space<vmem>>, vector<1x256x256xbf16>
    %671 = vector.shape_cast %670 : vector<1x256x256xbf16> to vector<256x256xbf16>
    %cst_304 = arith.constant dense<0.000000e+00> : vector<1x256xf32>
    %672 = tpu.matmul %669, %671, %cst_304 {dimension_numbers = #tpu.dot_dimension_numbers<[1], [0], [0], [1], [0, 0, 1, 1], [], []>} : vector<1x256xbf16>, vector<256x256xbf16>, vector<1x256xf32> -> vector<1x256xf32>
    %c3_305 = arith.constant 3 : index
    %c0_306 = arith.constant 0 : index
    %c0_307 = arith.constant 0 : index
    %673 = vector.load %arg18[%c3_305, %c0_306, %c0_307] : memref<4x1x256xf32, #tpu.memory_space<vmem>>, vector<1x1x256xf32>
    %674 = vector.shape_cast %673 : vector<1x1x256xf32> to vector<1x256xf32>
    %675 = arith.addf %672, %674 : vector<1x256xf32>
    %676 = vector.extract_strided_slice %675 {offsets = [0, 0], sizes = [1, 128], strides = [1, 1]} : vector<1x256xf32> to vector<1x128xf32>
    %c0_308 = arith.constant 0 : index
    %c0_309 = arith.constant 0 : index
    %c0_310 = arith.constant 0 : index
    %677 = vector.load %arg21[%c0_308, %c0_309, %c0_310] : memref<1x1x128xf32, #tpu.memory_space<vmem>>, vector<1x1x128xf32>
    %678 = vector.shape_cast %677 : vector<1x1x128xf32> to vector<1x128xf32>
    %679 = vector.shape_cast %676 : vector<1x128xf32> to vector<1x1x128xf32>
    tpu.vector_store %arg21[%c0_308, %c0_309, %c0_310], %679 {strides = array<i32>} : memref<1x1x128xf32, #tpu.memory_space<vmem>>, vector<1x1x128xf32>,
    %680 = vector.extract_strided_slice %675 {offsets = [0, 128], sizes = [1, 128], strides = [1, 1]} : vector<1x256xf32> to vector<1x128xf32>
    %cst_311 = arith.constant 0.000000e+00 : f32
    %681 = vector.broadcast %cst_311 : f32 to vector<1x128xf32>
    %682 = arith.subf %681, %680 : vector<1x128xf32>
    %683 = math.exp %682 : vector<1x128xf32>
    %cst_312 = arith.constant 1.000000e+00 : f32
    %684 = vector.broadcast %cst_312 : f32 to vector<1x128xf32>
    %685 = arith.addf %684, %683 : vector<1x128xf32>
    %cst_313 = arith.constant 1.000000e+00 : f32
    %686 = vector.broadcast %cst_313 : f32 to vector<1x128xf32>
    %687 = arith.divf %686, %685 : vector<1x128xf32>
    %c0_314 = arith.constant 0 : index
    %c0_315 = arith.constant 0 : index
    %c0_316 = arith.constant 0 : index
    %688 = vector.load %arg22[%c0_314, %c0_315, %c0_316] : memref<1x1x128xf32, #tpu.memory_space<vmem>>, vector<1x1x128xf32>
    %689 = vector.shape_cast %688 : vector<1x1x128xf32> to vector<1x128xf32>
    %690 = vector.shape_cast %687 : vector<1x128xf32> to vector<1x1x128xf32>
    tpu.vector_store %arg22[%c0_314, %c0_315, %c0_316], %690 {strides = array<i32>} : memref<1x1x128xf32, #tpu.memory_space<vmem>>, vector<1x1x128xf32>,
    return
  }
  func.func @transform_0(%arg0: i32) -> (i32, i32, i32) {
    %c0_i32 = arith.constant 0 : i32
    %c0_i32_0 = arith.constant 0 : i32
    %c0_i32_1 = arith.constant 0 : i32
    return %arg0, %c0_i32, %c0_i32_0 : i32, i32, i32
  }
  func.func @transform_1(%arg0: i32) -> (i32, i32, i32) {
    %c0_i32 = arith.constant 0 : i32
    %c0_i32_0 = arith.constant 0 : i32
    %c0_i32_1 = arith.constant 0 : i32
    return %arg0, %c0_i32, %c0_i32_0 : i32, i32, i32
  }
  func.func @transform_2(%arg0: i32) -> (i32, i32, i32) {
    %c0_i32 = arith.constant 0 : i32
    %c0_i32_0 = arith.constant 0 : i32
    %c0_i32_1 = arith.constant 0 : i32
    %c0_i32_2 = arith.constant 0 : i32
    return %c0_i32, %c0_i32_0, %c0_i32_1 : i32, i32, i32
  }
  func.func @transform_3(%arg0: i32) -> (i32, i32) {
    %c0_i32 = arith.constant 0 : i32
    %c0_i32_0 = arith.constant 0 : i32
    %c0_i32_1 = arith.constant 0 : i32
    return %c0_i32, %c0_i32_0 : i32, i32
  }
  func.func @transform_4(%arg0: i32) -> (i32, i32, i32) {
    %c0_i32 = arith.constant 0 : i32
    %c0_i32_0 = arith.constant 0 : i32
    %c0_i32_1 = arith.constant 0 : i32
    %c0_i32_2 = arith.constant 0 : i32
    return %c0_i32, %c0_i32_0, %c0_i32_1 : i32, i32, i32
  }
  func.func @transform_5(%arg0: i32) -> (i32, i32) {
    %c0_i32 = arith.constant 0 : i32
    %c0_i32_0 = arith.constant 0 : i32
    %c0_i32_1 = arith.constant 0 : i32
    return %c0_i32, %c0_i32_0 : i32, i32
  }
  func.func @transform_6(%arg0: i32) -> (i32, i32, i32) {
    %c0_i32 = arith.constant 0 : i32
    %c0_i32_0 = arith.constant 0 : i32
    %c0_i32_1 = arith.constant 0 : i32
    %c0_i32_2 = arith.constant 0 : i32
    return %c0_i32, %c0_i32_0, %c0_i32_1 : i32, i32, i32
  }
  func.func @transform_7(%arg0: i32) -> (i32, i32) {
    %c0_i32 = arith.constant 0 : i32
    %c0_i32_0 = arith.constant 0 : i32
    %c0_i32_1 = arith.constant 0 : i32
    return %c0_i32, %c0_i32_0 : i32, i32
  }
  func.func @transform_8(%arg0: i32) -> (i32, i32, i32) {
    %c0_i32 = arith.constant 0 : i32
    %c0_i32_0 = arith.constant 0 : i32
    %c0_i32_1 = arith.constant 0 : i32
    %c0_i32_2 = arith.constant 0 : i32
    return %c0_i32, %c0_i32_0, %c0_i32_1 : i32, i32, i32
  }
  func.func @transform_9(%arg0: i32) -> (i32, i32, i32) {
    %c0_i32 = arith.constant 0 : i32
    %c0_i32_0 = arith.constant 0 : i32
    %c0_i32_1 = arith.constant 0 : i32
    %c0_i32_2 = arith.constant 0 : i32
    return %c0_i32, %c0_i32_0, %c0_i32_1 : i32, i32, i32
  }
  func.func @transform_10(%arg0: i32) -> (i32, i32, i32) {
    %c0_i32 = arith.constant 0 : i32
    %c0_i32_0 = arith.constant 0 : i32
    %c0_i32_1 = arith.constant 0 : i32
    %c0_i32_2 = arith.constant 0 : i32
    return %c0_i32, %c0_i32_0, %c0_i32_1 : i32, i32, i32
  }
  func.func @transform_11(%arg0: i32) -> (i32, i32, i32) {
    %c0_i32 = arith.constant 0 : i32
    %c0_i32_0 = arith.constant 0 : i32
    %c0_i32_1 = arith.constant 0 : i32
    %c0_i32_2 = arith.constant 0 : i32
    return %c0_i32, %c0_i32_0, %c0_i32_1 : i32, i32, i32
  }
  func.func @transform_12(%arg0: i32) -> (i32, i32, i32) {
    %c0_i32 = arith.constant 0 : i32
    %c0_i32_0 = arith.constant 0 : i32
    %c0_i32_1 = arith.constant 0 : i32
    %c0_i32_2 = arith.constant 0 : i32
    return %c0_i32, %c0_i32_0, %c0_i32_1 : i32, i32, i32
  }
  func.func @transform_13(%arg0: i32) -> (i32, i32, i32) {
    %c0_i32 = arith.constant 0 : i32
    %c0_i32_0 = arith.constant 0 : i32
    %c0_i32_1 = arith.constant 0 : i32
    %c0_i32_2 = arith.constant 0 : i32
    return %c0_i32, %c0_i32_0, %c0_i32_1 : i32, i32, i32
  }
  func.func @transform_14(%arg0: i32) -> (i32, i32) {
    %c0_i32 = arith.constant 0 : i32
    %c0_i32_0 = arith.constant 0 : i32
    %c0_i32_1 = arith.constant 0 : i32
    return %c0_i32, %c0_i32_0 : i32, i32
  }
  func.func @transform_15(%arg0: i32) -> (i32, i32) {
    %c0_i32 = arith.constant 0 : i32
    %c0_i32_0 = arith.constant 0 : i32
    %c0_i32_1 = arith.constant 0 : i32
    return %c0_i32, %c0_i32_0 : i32, i32
  }
  func.func @transform_16(%arg0: i32) -> (i32, i32, i32) {
    %c0_i32 = arith.constant 0 : i32
    %c0_i32_0 = arith.constant 0 : i32
    %c0_i32_1 = arith.constant 0 : i32
    %c0_i32_2 = arith.constant 0 : i32
    return %c0_i32, %c0_i32_0, %c0_i32_1 : i32, i32, i32
  }
  func.func @transform_17(%arg0: i32) -> (i32, i32, i32) {
    %c0_i32 = arith.constant 0 : i32
    %c0_i32_0 = arith.constant 0 : i32
    %c0_i32_1 = arith.constant 0 : i32
    %c0_i32_2 = arith.constant 0 : i32
    return %c0_i32, %c0_i32_0, %c0_i32_1 : i32, i32, i32
  }
  func.func @transform_18(%arg0: i32) -> (i32, i32, i32) {
    %c0_i32 = arith.constant 0 : i32
    %c0_i32_0 = arith.constant 0 : i32
    %c0_i32_1 = arith.constant 0 : i32
    return %arg0, %c0_i32, %c0_i32_0 : i32, i32, i32
  }
  func.func @transform_19(%arg0: i32) -> (i32, i32, i32) {
    %c0_i32 = arith.constant 0 : i32
    %c0_i32_0 = arith.constant 0 : i32
    %c0_i32_1 = arith.constant 0 : i32
    return %arg0, %c0_i32, %c0_i32_0 : i32, i32, i32
  }
  func.func @transform_20(%arg0: i32) -> (i32, i32, i32) {
    %c0_i32 = arith.constant 0 : i32
    %c0_i32_0 = arith.constant 0 : i32
    %c0_i32_1 = arith.constant 0 : i32
    return %arg0, %c0_i32, %c0_i32_0 : i32, i32, i32
  }
  func.func @transform_21(%arg0: i32) -> (i32, i32, i32) {
    %c0_i32 = arith.constant 0 : i32
    %c0_i32_0 = arith.constant 0 : i32
    %c0_i32_1 = arith.constant 0 : i32
    return %arg0, %c0_i32, %c0_i32_0 : i32, i32, i32
  }
}

</mosaic_0001>

<bundles_post_ra>
// kernel: generator_forward.1
= control target key start
LH: loop header
LB: loop body
LE: loop exit
PB: predicated region body
PF: predicated region fallthrough
CT: control target
= control target key end

     0   :  { %s13920_s0 = inlined_call_operand.vmem [shape: bf16[2,64,128], index: 0, kind: input, shape index: {}]   ;;  %s13921_s1 = inlined_call_operand.vmem [shape: f32[2,64,1], index: 1, kind: input, shape index: {}]   ;;  %s13922_s2 = inlined_call_operand.vmem [shape: bf16[7,1,16], index: 2, kind: input, shape index: {}]   ;;  %s13923_s3 = inlined_call_operand.vmem [shape: f32[1,16], index: 3, kind: input, shape index: {}]   ;;  %s13924_s4 = inlined_call_operand.hbm [shape: bf16[7,16,32], index: 4, kind: input, shape index: {}]   ;;  %s13925_s5 = inlined_call_operand.vmem [shape: f32[1,32], index: 5, kind: input, shape index: {}]   ;;  %s13926_s6 = inlined_call_operand.vmem [shape: bf16[7,32,128], index: 6, kind: input, shape index: {}]   ;;  %s13927_s7 = inlined_call_operand.vmem [shape: f32[1,128], index: 7, kind: input, shape index: {}]   ;;  %s13928_s8 = inlined_call_operand.hbm [shape: bf16[4,128,128], index: 8, kind: input, shape index: {}]   ;;  %s13929_s9 = inlined_call_operand.vmem [shape: f32[3,1,128], index: 9, kind: input, shape index: {}]   ;;  %s13930_s10 = inlined_call_operand.hbm [shape: bf16[3,384,128], index: 10, kind: input, shape index: {}]   ;;  %s13931_s11 = inlined_call_operand.hbm [shape: f32[3,1,128], index: 11, kind: input, shape index: {}]   ;;  %s13932_s12 = inlined_call_operand.vmem [shape: bf16[4,384,128], index: 12, kind: input, shape index: {}]   ;;  %s13933_s13 = inlined_call_operand.vmem [shape: f32[4,1,128], index: 13, kind: input, shape index: {}]   ;;  %s13934_s14 = inlined_call_operand.hbm [shape: bf16[128,384], index: 14, kind: input, shape index: {}]   ;;  %s13935_s15 = inlined_call_operand.hbm [shape: f32[1,384], index: 15, kind: input, shape index: {}]   ;;  %s13936_s16 = inlined_call_operand.hbm [shape: bf16[4,256,256], index: 16, kind: input, shape index: {}]   ;;  %s13937_s17 = inlined_call_operand.vmem [shape: f32[4,1,256], index: 17, kind: input, shape index: {}]   ;;  %s13938_s18 = inlined_call_operand.hbm [shape: f32[2,64,128], index: 18, kind: output, shape index: {0}]   ;;  %s13939_s19 = inlined_call_operand.vmem [shape: bf16[2,64,384], index: 19, kind: output, shape index: {1}]   ;;  %s13940_s20 = inlined_call_operand.hbm [shape: f32[2,1,128], index: 20, kind: output, shape index: {2}]   ;;  %s13941_s21 = inlined_call_operand.vmem [shape: f32[2,1,128], index: 21, kind: output, shape index: {3}]  }
   0x1   :  { %13983 = sst [smem:[#allocation41_spill]] %s13920_s0 }
   0x2   :  { %13984 = sst [smem:[#allocation42_spill]] %s13921_s1 }
   0x3   :  { %13985 = sst [smem:[#allocation43_spill]] %s13922_s2 }
   0x4   :  { %13986 = sst [smem:[#allocation44_spill]] %s13923_s3 }
   0x5   :  { %13987 = sst [smem:[#allocation45_spill]] %s13924_s4 }
   0x6   :  { %13988 = sst [smem:[#allocation46_spill]] %s13925_s5 }
   0x7   :  { %13989 = sst [smem:[#allocation47_spill]] %s13928_s8 }
   0x8   :  { %13990 = sst [smem:[#allocation48_spill]] %s13931_s11 }
   0x9   :  { %13991 = sst [smem:[#allocation49_spill]] %s13938_s18 }
   0xa   :  { %13992 = sst [smem:[#allocation50_spill]] %s13940_s20 }
   0xb   :  { %13993 = sst [smem:[#allocation51_spill]] %s13941_s21 }
   0xc   :  { %27 = vsyncpa [#allocation3], 0 }
   0xd   :  { %28 = vsyncpa [#allocation6], 0 }
   0xe   :  { %29 = vsyncpa [#allocation9], 0 }
   0xf   :  { %30 = vsyncpa [#allocation12], 0 }
  0x10   :  { %31 = vsyncpa [#allocation4], 0 }
  0x11   :  { %33 = vsyncpa [#allocation4 + $0x1], 0 }
  0x12   :  { %34 = vsyncpa [#allocation16], 0 }
  0x13   :  { %36 = vsyncpa [#allocation16 + $0x1], 0  ;;  %s11187_s2 = smov 0   ;;  %s11189_s25 = smov 0  }
  0x14   :  { %s11191_s26 = smov 0   ;;  %s11193_s27 = smov 0  }
  0x15 LB: > { %13994 = sst [smem:[#allocation23_spill]] %s11041_s2  ;;  %s11208_s3 = sadd.s32 4294967295, %s11053_s27   ;;  %s11053_s27 = sphi %s11193_s27, %s14137_s27   ;;  %s11049_s26 = sphi %s11191_s26, %s14139_s26   ;;  %s11045_s25 = sphi %s11189_s25, %s14141_s25   ;;  %s11041_s2 = sphi %s11187_s2, %s14140_s2  }
  0x16   : > { %13995 = sst [smem:[#allocation24_spill]] %s11049_s26  ;;  %s8410_s28 = sadd.s32 4294967294, %s11053_s27  }
  0x17   : > { %13996 = sst [smem:[#allocation25_spill]] %s11053_s27  ;;  %s11212_s29 = sadd.s32 1, %s11053_s27  }
  0x18   : > { %13997 = sst [smem:[#allocation26_spill]] %s11212_s29  ;;  %s437_s0 = sadd.s32 1, %s11049_s26 }
  0x19   : > { %s434_s4 = ssub.s32 %s11053_s27, %s11212_s29  ;;  %p447_p0 = scmp.ne.s32.totalorder %s11049_s26, %s11045_s25 }
  0x1a   : > { %p435_p1 = scmp.eq.s32.totalorder %s434_s4, 0  ;;  %p448_p2 = scmp.eq.s32.totalorder %s11208_s3, 1 }
  0x1b   : > { %p453_p3 = scmp.ne.s32.totalorder %s11045_s25, %s11041_s2  ;;  %p454_p4 = scmp.eq.s32.totalorder %s8410_s28, 1 }
  0x1c   : > { %s11223_s30 = scalar_select %p435_p1, %s11049_s26, %s437_s0  }
  0x1d   : > { %p11225_p5 = por %p448_p2, %p447_p0  ;;  %p11229_p6 = por %p454_p4, %p453_p3 }
  0x1e   : > { %13998 = sst [smem:[#allocation27_spill]] %s11223_s30  ;;  %p8411_p7 = scmp.ge.s32.totalorder %s11053_s27, 1 }
  0x1f   : > { %s13999_s5 = scalar_select %p11225_p5, 1, 0 }
  0x20   : > { %s14001_s22 = scalar_select %p11229_p6, 1, 0 }
  0x21   : > { %14000 = sst [smem:[#allocation28_spill]] %s13999_s5  ;;  %p539_p8 = scmp.lt.s32.totalorder %s11053_s27, 3 }
  0x22   : > { %14002 = sst [smem:[#allocation29_spill]] %s14001_s22  ;;  %p13950_p9 = scmp.eq.s32.totalorder %s11208_s3, 0 }
  0x23   : > { %p11236_p10 = pnand %p8411_p7, %p539_p8  ;;  %s11055_s1 = smov [#allocation5]  }
  0x24   : > { %s579_s24 = sshll.u32 %s11055_s1, 4  ;;  %s11056_s0 = smov [#allocation8]   ;;  %s580_s24 = int_to_ptr.vmem [resolvable:$true] %s579_s24 }
  0x25   : > { %s14003_s23 = scalar_select %p11236_p10, 1, 0 }
  0x26   : > { %p10195_p11 = pneg %p11236_p10  ;;  %s608_s4 = sshll.u32 %s11056_s0, 4  ;;  %s11248_s4 = int_to_ptr.vmem [resolvable:$true] %s608_s4 }
  0x27   : > { %s14005_s8 = sld [smem:[#allocation47_spill]] }
  0x28   : > { %p11244_p12 = pnand %p13950_p9, %p10195_p11 }
  0x2a   : > { %p11258_p0 = pneg %p11244_p12 }
  0x2d   : > { %s10747_s29 = scalar_lea.hbm %s14005_s8, 4096 }
  0x2e   : > { %p10748_p13 = scmp.ne.s32.totalorder %s14005_s8, %s10747_s29  ;;  %p10754_p3 = scmp.lt.u32.totalorder %s10747_s29, %s14005_s8 }
  0x30   : > { %p10750_p1 = pnand %p11258_p0, %p10748_p13 }
  0x32   : > { %p10751_p2 = pneg %p10750_p1 }
  0x34   : > { %p10756_p4 = pnand %p10754_p3, %p10751_p2 }
  0x36   : > { %10759 = shalt.err (!%p10756_p4)
}
  0x37   : > { %s10760_s26 = scalar_lea.vmem %s580_s24, 4096  ;;  %p10768_p9 = scmp.lt.s32.totalorder %s580_s24, %s580_s24 }
  0x38   : > { %p10761_p7 = scmp.ne.s32.totalorder %s580_s24, %s10760_s26  ;;  %p10769_p6 = scmp.lt.s32.totalorder %s10760_s26, %s10760_s26 }
  0x3a   : > { %p10763_p8 = pnand %p10761_p7, %p11258_p0  ;;  %p10770_p5 = por %p10769_p6, %p10768_p9 }
  0x3c   : > { %p10764_p11 = pneg %p10763_p8 }
  0x3e   : > { %p10771_p10 = pnand %p10770_p5, %p10764_p11 }
  0x40   : > { %10774 = shalt.err (!%p10771_p10)
}
  0x41   : > { %s13957_s2 = smov 64   ;;  %s13959_s30 = smov 4  }
  0x42   : > { %10201 = dma.hbm_to_vmem [thread:$0]  (!%p11244_p12), %s14005_s8, 4096, %s580_s24, [#allocation6], %s13957_s2, %s13957_s2, %s13959_s30  }
  0x43   : > { %s14007_s11 = sld [smem:[#allocation48_spill]] }
  0x49   : > { %s10775_s21 = scalar_lea.hbm %s14007_s11, 48 }
  0x4a   : > { %p10776_p5 = scmp.ne.s32.totalorder %s14007_s11, %s10775_s21  ;;  %p10782_p10 = scmp.lt.u32.totalorder %s10775_s21, %s14007_s11 }
  0x4c   : > { %p10778_p6 = pnand %p10776_p5, %p11258_p0 }
  0x4e   : > { %p10779_p9 = pneg %p10778_p6 }
  0x50   : > { %p10784_p13 = pnand %p10782_p10, %p10779_p9 }
  0x52   : > { %10787 = shalt.err (!%p10784_p13)
}
  0x53   : > { %s10788_s24 = scalar_lea.vmem %s11248_s4, 48  ;;  %s10795_s20 = scalar_lea.vmem %s11248_s4, 64 }
  0x54   : > { %p10789_p1 = scmp.ne.s32.totalorder %s11248_s4, %s10788_s24  ;;  %p10796_p4 = scmp.lt.s32.totalorder %s11248_s4, %s11248_s4 }
  0x55   : > { %p10797_p7 = scmp.lt.s32.totalorder %s10795_s20, %s10788_s24 }
  0x56   : > { %p10791_p2 = pnand %p10789_p1, %p11258_p0 }
  0x57   : > { %p10798_p8 = por %p10797_p7, %p10796_p4 }
  0x58   : > { %p10792_p3 = pneg %p10791_p2 }
  0x5a   : > { %p10799_p11 = pnand %p10798_p8, %p10792_p3 }
  0x5c   : > { %10802 = shalt.err (!%p10799_p11)
}
  0x5d   : > { %s11059_s18 = smov 16   ;;  %s11060_s21 = smov 1  }
  0x5e   : > { %10207 = dma.hbm_to_vmem [thread:$0]  (!%p11244_p12), %s14007_s11, 48, %s11248_s4, [#allocation9], %s11059_s18, %s11059_s18, %s11060_s21  }
  0x5f   : > { %s11061_s29 = smov [#allocation11]   ;;  %s11062_s0 = smov [#allocation2]  }
  0x60   : > { %s641_s22 = sshll.u32 %s11061_s29, 4  ;;  %s557_s26 = sshll.u32 %s11062_s0, 4  ;;  %s642_s22 = int_to_ptr.vmem [resolvable:$true] %s641_s22  ;;  %s11301_s26 = int_to_ptr.vmem [resolvable:$true] %s557_s26 }
  0x61   : > { %s10803_s2 = scalar_lea.hbm %s13935_s15, 48 }
  0x62   : > { %p10804_p5 = scmp.ne.s32.totalorder %s13935_s15, %s10803_s2  ;;  %p10810_p10 = scmp.lt.u32.totalorder %s10803_s2, %s13935_s15 }
  0x64   : > { %p10806_p6 = pnand %p10804_p5, %p11258_p0 }
  0x66   : > { %p10807_p9 = pneg %p10806_p6 }
  0x68   : > { %p10812_p13 = pnand %p10810_p10, %p10807_p9 }
  0x6a   : > { %10815 = shalt.err (!%p10812_p13)
}
  0x6b   : > { %s10816_s18 = scalar_lea.vmem %s642_s22, 48  ;;  %s10823_s21 = scalar_lea.vmem %s642_s22, 64 }
  0x6c   : > { %p10817_p1 = scmp.ne.s32.totalorder %s642_s22, %s10816_s18  ;;  %p10824_p4 = scmp.lt.s32.totalorder %s642_s22, %s642_s22 }
  0x6d   : > { %p10825_p7 = scmp.lt.s32.totalorder %s10823_s21, %s10816_s18 }
  0x6e   : > { %p10819_p2 = pnand %p10817_p1, %p11258_p0 }
  0x6f   : > { %p10826_p8 = por %p10825_p7, %p10824_p4 }
  0x70   : > { %p10820_p3 = pneg %p10819_p2 }
  0x72   : > { %p10827_p11 = pnand %p10826_p8, %p10820_p3 }
  0x74   : > { %10830 = shalt.err (!%p10827_p11)
}
  0x75   : > { %10213 = dma.hbm_to_vmem [thread:$0]  (!%p11244_p12), %s13935_s15, 48, %s642_s22, [#allocation12]  }
  0x76   : > { %s14008_s29 = sld [smem:[#allocation45_spill]] }
  0x7c   : > { %s10831_s0 = scalar_lea.hbm %s14008_s29, 896 }
  0x7d   : > { %p10832_p5 = scmp.ne.s32.totalorder %s14008_s29, %s10831_s0  ;;  %p10838_p10 = scmp.lt.u32.totalorder %s10831_s0, %s14008_s29 }
  0x7f   : > { %p10834_p6 = pnand %p10832_p5, %p11258_p0 }
  0x81   : > { %p10835_p9 = pneg %p10834_p6 }
  0x83   : > { %p10840_p13 = pnand %p10838_p10, %p10835_p9 }
  0x85   : > { %10843 = shalt.err (!%p10840_p13)
}
  0x86   : > { %s10844_s22 = scalar_lea.vmem %s11301_s26, 896  ;;  %p10852_p4 = scmp.lt.s32.totalorder %s11301_s26, %s11301_s26 }
  0x87   : > { %p10845_p1 = scmp.ne.s32.totalorder %s11301_s26, %s10844_s22  ;;  %p10853_p7 = scmp.lt.s32.totalorder %s10844_s22, %s10844_s22 }
  0x89   : > { %p10847_p2 = pnand %p10845_p1, %p11258_p0  ;;  %p10854_p8 = por %p10853_p7, %p10852_p4 }
  0x8b   : > { %p10848_p3 = pneg %p10847_p2 }
  0x8d   : > { %p10855_p11 = pnand %p10854_p8, %p10848_p3 }
  0x8f   : > { %10858 = shalt.err (!%p10855_p11)
}
  0x90   : > { %s14009_s18 = smov 4   ;;  %s14010_s21 = smov 64  }
  0x91   : > { %10198 = dma.hbm_to_vmem [thread:$0]  (!%p11244_p12), %s14008_s29, 896, %s11301_s26, [#allocation3], %s14010_s21, %s14010_s21, %s14009_s18  }
  0x92   : > { %s11063_s2 = smov [#allocation7]   ;;  %s11064_s0 = smov [#allocation10]  }
  0x93   : > { %s595_s27 = sshll.u32 %s11063_s2, 4  ;;  %s627_s24 = sshll.u32 %s11064_s0, 4  ;;  %s596_s27 = int_to_ptr.vmem [resolvable:$true] %s595_s27  ;;  %s11347_s24 = int_to_ptr.vmem [resolvable:$true] %s627_s24 }
  0x94   : > { %s10859_s4 = scalar_lea.hbm %s13930_s10, 9216 }
  0x95   : > { %p10860_p5 = scmp.ne.s32.totalorder %s13930_s10, %s10859_s4  ;;  %p10866_p10 = scmp.lt.u32.totalorder %s10859_s4, %s13930_s10 }
  0x97   : > { %p10862_p6 = pnand %p10860_p5, %p11258_p0 }
  0x99   : > { %p10863_p9 = pneg %p10862_p6 }
  0x9b   : > { %p10868_p13 = pnand %p10866_p10, %p10863_p9 }
  0x9d   : > { %10871 = shalt.err (!%p10868_p13)
}
  0x9e   : > { %s10872_s30 = scalar_lea.vmem %s596_s27, 9216  ;;  %p10880_p4 = scmp.lt.s32.totalorder %s596_s27, %s596_s27 }
  0x9f   : > { %p10873_p1 = scmp.ne.s32.totalorder %s596_s27, %s10872_s30  ;;  %p10881_p7 = scmp.lt.s32.totalorder %s10872_s30, %s10872_s30 }
  0xa1   : > { %p10875_p2 = pnand %p10873_p1, %p11258_p0  ;;  %p10882_p8 = por %p10881_p7, %p10880_p4 }
  0xa3   : > { %p10876_p3 = pneg %p10875_p2 }
  0xa5   : > { %p10883_p11 = pnand %p10882_p8, %p10876_p3 }
  0xa7   : > { %10886 = shalt.err (!%p10883_p11)
}
  0xa8   : > { %10204 = dma.hbm_to_vmem [thread:$0]  (!%p11244_p12), %s13930_s10, 9216, %s596_s27, [#allocation6], %s14010_s21, %s14010_s21, %s14009_s18  }
  0xa9   : > { %s10887_s5 = scalar_lea.hbm %s13934_s14, 3072 }
  0xaa   : > { %p10888_p5 = scmp.ne.s32.totalorder %s13934_s14, %s10887_s5  ;;  %p10894_p10 = scmp.lt.u32.totalorder %s10887_s5, %s13934_s14 }
  0xac   : > { %p10890_p6 = pnand %p10888_p5, %p11258_p0 }
  0xae   : > { %p10891_p9 = pneg %p10890_p6 }
  0xb0   : > { %p10896_p13 = pnand %p10894_p10, %p10891_p9 }
  0xb2   : > { %10899 = shalt.err (!%p10896_p13)
}
  0xb3   : > { %s10900_s18 = scalar_lea.vmem %s11347_s24, 3072  ;;  %p10908_p4 = scmp.lt.s32.totalorder %s11347_s24, %s11347_s24 }
  0xb4   : > { %p10901_p1 = scmp.ne.s32.totalorder %s11347_s24, %s10900_s18  ;;  %p10909_p7 = scmp.lt.s32.totalorder %s10900_s18, %s10900_s18 }
  0xb6   : > { %p10903_p2 = pnand %p10901_p1, %p11258_p0  ;;  %p10910_p8 = por %p10909_p7, %p10908_p4 }
  0xb8   : > { %p10904_p3 = pneg %p10903_p2 }
  0xba   : > { %p10911_p11 = pnand %p10910_p8, %p10904_p3 }
  0xbc   : > { %10914 = shalt.err (!%p10911_p11)
}
  0xbd   : > { %s11065_s21 = smov 192   ;;  %s11066_s27 = smov 12  }
  0xbe   : > { %10210 = dma.hbm_to_vmem [thread:$0]  (!%p11244_p12), %s13934_s14, 3072, %s11347_s24, [#allocation9], %s11065_s21, %s11065_s21, %s11066_s27  }
  0xbf   : > { %s11067_s2 = smov [#allocation13]   ;;  %s10915_s4 = scalar_lea.hbm %s13936_s16, 16384 }
  0xc0   : > { %s651_s0 = sshll.u32 %s11067_s2, 4  ;;  %p10916_p5 = scmp.ne.s32.totalorder %s13936_s16, %s10915_s4  ;;  %s652_s0 = int_to_ptr.vmem [resolvable:$true] %s651_s0 }
  0xc1   : > { %p10922_p10 = scmp.lt.u32.totalorder %s10915_s4, %s13936_s16 }
  0xc2   : > { %p10918_p6 = pnand %p10916_p5, %p11258_p0 }
  0xc4   : > { %p10919_p9 = pneg %p10918_p6 }
  0xc6   : > { %p10924_p13 = pnand %p10922_p10, %p10919_p9 }
  0xc8   : > { %10927 = shalt.err (!%p10924_p13)
}
  0xc9   : > { %s10928_s24 = scalar_lea.vmem %s652_s0, 16384  ;;  %p10936_p4 = scmp.lt.s32.totalorder %s652_s0, %s652_s0 }
  0xca   : > { %p10929_p1 = scmp.ne.s32.totalorder %s652_s0, %s10928_s24  ;;  %p10937_p7 = scmp.lt.s32.totalorder %s10928_s24, %s10928_s24 }
  0xcc   : > { %p10931_p2 = pnand %p10929_p1, %p11258_p0  ;;  %p10938_p8 = por %p10937_p7, %p10936_p4 }
  0xce   : > { %p10932_p3 = pneg %p10931_p2 }
  0xd0   : > { %p10939_p11 = pnand %p10938_p8, %p10932_p3 }
  0xd2   : > { %10942 = shalt.err (!%p10939_p11)
}
  0xd3   : > { %s11068_s21 = smov 128   ;;  %s11069_s27 = smov 8  }
  0xd4   : > { %10216 = dma.hbm_to_vmem [thread:$0]  (!%p11244_p12), %s13936_s16, 16384, %s652_s0, [#allocation12], %s11068_s21, %s11068_s21, %s11069_s27  }
  0xd5   : > { %p14011_p5 = scmp.ne.s32.totalorder %s14003_s23, 0 }
  0xd7   : > { %686 = sbr.rel (%p14011_p5) target bundleno = 4557 (0x11cd), region = 92 }
  0xde   : > { %p14012_p6 = scmp.eq.s32.totalorder %s11208_s3, 0 }
  0xe0   : > { %11016 = dma.done.wait (%p14012_p6), [#allocation3], 896   ;;  %p14013_p0 = pmov %p14012_p6 }
  0xe2   : > { %11018 = vsyncadd (%p14013_p0), [#allocation3], 4294966400  ;;  %p14014_p9 = pmov %p14013_p0 }
  0xe3   : > { %p14015_p10 = pmov %p14013_p0 }
  0xe4   : > { %11020 = dma.done.wait (%p14014_p9), [#allocation6], 13312  }
  0xe5   : > { %11022 = vsyncadd (%p14015_p10), [#allocation6], 4294953984  ;;  %p14016_p13 = pmov %p14013_p0 }
  0xe6   : > { %p14017_p12 = pmov %p14013_p0 }
  0xe7   : > { %11024 = dma.done.wait (%p14016_p13), [#allocation9], 3120  }
  0xe8   : > { %11026 = vsyncadd (%p14017_p12), [#allocation9], 4294964176  ;;  %p14018_p1 = pmov %p14013_p0 }
  0xe9   : > { %p14019_p2 = pmov %p14013_p0 }
  0xea   : > { %11028 = dma.done.wait (%p14018_p1), [#allocation12], 16432  }
  0xeb   : > { %11030 = vsyncadd (%p14019_p2), [#allocation12], 4294950864  ;;  %p787_p3 = scmp.lt.s32.totalorder %s11208_s3, 1  ;;  %v13961_v0 = vmov 0   ;;  %s14020_s0 = sld [smem:[#allocation42_spill]]  ;;  %v10293_v9 = vld [vmem:[#allocation2 + $0x8] sm:$0xff]   ;;  %v863_v10 = vlaneseq }
  0xec   : > { %10292 = vset.pattern.permute.xlu1 %v13961_v0  ;;  %10291 = vset.pattern.permute.xlu0 %v13961_v0  ;;  %v10294_v12 = vld [vmem:[#allocation2] sm:$0xff]   ;;  %s14023_s22 = sld [smem:[#allocation43_spill]]  ;;  %s14067_s4 = sld [smem:[#allocation44_spill]]  ;;  %vm1467_vm12 = vcmask 130048   ;;  %vm2326_vm13 = vcmask 261120   ;;  %vm11071_vm14 = vmmov 1  }
  0xed   : > { %s11433_s23 = scalar_select %p787_p3, %s11208_s3, 1  ;;  %9616 = vmatprep.subr.bf16.mxu0 %v10293_v9  ;;  %v11439_v11 = vshrl.u32 %v863_v10, 7 }
  0xee   : > { %9617 = vmatpush3.bf16.msra.mxu0 %v10293_v9  ;;  %s14113_s21 = sld [smem:[#allocation41_spill]]  ;;  %s11073_s5 = smov [#allocation14]  }
  0xef   : > { %s9097_s28 = sshll.u32 %s11433_s23, 6  ;;  %9626 = vmatprep.subr.bf16.mxu0 %v10294_v12  ;;  %v900_v13 = vadd.s32 56, %v11439_v11  ;;  %v11443_v14 = vsub.s32 0, %v11439_v11  ;;  %vm1147_vm0 = vcmp.lt.s32.totalorder %v11439_v11, 7  ;;  %v11525_v46 = vadd.s32 4294967293, %v11439_v11  ;;  %s9096_s26 = sshll.u32 %s11433_s23, 5 }
  0xf0   : > { %v11528_v47 = vadd.s32 4294967294, %v11439_v11  ;;  %v11537_v52 = vadd.s32 4294967295, %v11439_v11  ;;  %vm885_vm2 = vcmp.lt.s32.totalorder %v11439_v11, 3  ;;  %vm970_vm3 = vcmp.lt.s32.totalorder %v11439_v11, 2  ;;  %s10162_s11 = smul.u32 96, %s11433_s23  ;;  %s14128_s18 = sld [smem:[#allocation28_spill]] }
  0xf1   : > { %s796_s20 = scalar_lea.vmem %s14020_s0, %s9097_s28  ;;  %14021 = vst [vmem:[#allocation30_spill] sm:$0xff] %v11443_v14  ;;  %v11445_v15 = vadd.s32 1, %v900_v13  ;;  %v11465_v22 = vadd.s32 2, %v900_v13  ;;  %v11467_v23 = vadd.s32 3, %v900_v13  ;;  %vm1048_vm4 = vcmp.lt.s32.totalorder %v11439_v11, 1  ;;  %s14100_s28 = sld [smem:[#allocation46_spill]] }
  0xf2   : > { %v812_v1 = vld [vmem:[%s796_s20 + $0x30] sm:$0xff]  ;;  %v806_v2 = vld [vmem:[%s796_s20] sm:$0xff]  ;;  %v807_v3 = vld [vmem:[%s796_s20 + $0x8] sm:$0xff]  ;;  %vm1225_vm5 = vcmp.lt.s32.totalorder %v11439_v11, 6  ;;  %vm1303_vm6 = vcmp.lt.s32.totalorder %v11439_v11, 5  ;;  %vm909_vm7 = vcmp.ge.s32.totalorder %v11525_v46, 0  ;;  %s13783_s2 = scalar_lea.vmem %s13939_s19, %s10162_s11 }
  0xf3   : > { %855 = vperm.xlu1 %10292, %v812_v1   ;;  %825 = vperm.xlu0 %10291, %v806_v2   ;;  %v813_v4 = vld [vmem:[%s796_s20 + $0x38] sm:$0xff]  ;;  %v808_v6 = vld [vmem:[%s796_s20 + $0x10] sm:$0xff]  ;;  %v811_v7 = vld [vmem:[%s796_s20 + $0x28] sm:$0xff]  ;;  %14022 = vst [vmem:[#allocation31_spill] sm:$0xff] %v11445_v15  ;;  %vm1179_vm1 = vcmp.lt.s32.totalorder %v11445_v15, 64  ;;  %vm987_vm8 = vcmp.ge.s32.totalorder %v11528_v47, 0 }
  0xf4   : > { %v809_v5 = vld [vmem:[%s796_s20 + $0x18] sm:$0xff]  ;;  %v810_v8 = vld [vmem:[%s796_s20 + $0x20] sm:$0xff]  ;;  %vm1065_vm9 = vcmp.ge.s32.totalorder %v11537_v52, 0  ;;  %vm1257_vm10 = vcmp.lt.s32.totalorder %v11465_v22, 64  ;;  %vm1335_vm11 = vcmp.lt.s32.totalorder %v11467_v23, 64  ;;  %v10303_v47 = vld [vmem:[%s13926_s6 + $0x8] sm:$0xff]   ;;  %s12701_s27 = scalar_lea.vmem %s14113_s21, %s9096_s26 }
  0xf5   : > { %v814_v16 = vld [vmem:[%s14023_s22] sm:$0x1]  ;;  %v815_v17 = vld [vmem:[%s14023_s22 + $0x1] sm:$0x1]  ;;  %v816_v18 = vld [vmem:[%s14023_s22 + $0x2] sm:$0x1] }
  0xf6   : > { %v818_v19 = vld [vmem:[%s14023_s22 + $0x4] sm:$0x1]  ;;  %v819_v20 = vld [vmem:[%s14023_s22 + $0x5] sm:$0x1]  ;;  %v820_v21 = vld [vmem:[%s14023_s22 + $0x6] sm:$0x1]  ;;  %v822_v24 = vunpack.c.l.bf16 %v814_v16  ;;  %v949_v25 = vunpack.c.l.bf16 %v815_v17  ;;  %v1027_v26 = vunpack.c.l.bf16 %v816_v18 }
  0xf7   : > { %830 = vperm.xlu1 %10292, %v807_v3   ;;  %860 = vperm.xlu0 %10291, %v813_v4   ;;  %v1126_v27 = vunpack.c.l.bf16 %v818_v19  ;;  %v1204_v28 = vunpack.c.l.bf16 %v819_v20  ;;  %v1282_v29 = vunpack.c.l.bf16 %v820_v21  ;;  %v817_v20 = vld [vmem:[%s14023_s22 + $0x3] sm:$0x1]  ;;  %vm12762_vm15 = vmpackc.low %vm11071_vm14, %vm1065_vm9  ;;  %s13734_s21 = sand.u32 1, %s11045_s25   ;;  %s14129_s1 = sld [smem:[#allocation49_spill]] }
  0xf8   : > { %v11470_v30 = vrot.slane %v822_v24, %v11443_v14  ;;  %v11473_v31 = vrot.slane %v949_v25, %v11443_v14  ;;  %v11476_v32 = vrot.slane %v1027_v26, %v11443_v14  ;;  %v1105_v58 = vunpack.c.l.bf16 %v817_v20  ;;  %s8151_s0 = scalar_lea.sflag [#allocation4], %s13734_s21  ;;  %p14130_p7 = scmp.ne.s32.totalorder %s14128_s18, 0 }
  0xf9   : > { %v11479_v33 = vrot.slane %v1126_v27, %v11443_v14  ;;  %v11482_v34 = vrot.slane %v1204_v28, %v11443_v14  ;;  %v11485_v35 = vrot.slane %v1282_v29, %v11443_v14 }
  0xfb   : > { %840 = vperm.xlu1 %10292, %v809_v5   ;;  %835 = vperm.xlu0 %10291, %v808_v6  }
  0xff   : > { %850 = vperm.xlu1 %10292, %v811_v7   ;;  %845 = vperm.xlu0 %10291, %v810_v8  }
 0x172   : > { %v11487_v36 = vpop.permute.xlu1 %855  ;;  %v11489_v37 = vpop.permute.xlu0 %825 }
 0x173   : > { %v11493_v38 = vmul.f32 %v11470_v30, %v11487_v36  ;;  %v11497_v39 = vmul.f32 %v11473_v31, %v11487_v36  ;;  %v11501_v40 = vmul.f32 %v11476_v32, %v11487_v36  ;;  %v11505_v41 = vmul.f32 %v11479_v33, %v11487_v36 }
 0x174   : > { %v11509_v42 = vmul.f32 %v11482_v34, %v11487_v36  ;;  %v11513_v43 = vmul.f32 %v11485_v35, %v11487_v36  ;;  %v11518_v44 = vmul.f32 %v11476_v32, %v11489_v37  ;;  %v11522_v45 = vmul.f32 %v11479_v33, %v11489_v37 }
 0x175   : > { %v11542_v54 = vmul.f32 %v11482_v34, %v11489_v37  ;;  %v11546_v55 = vmul.f32 %v11485_v35, %v11489_v37 }
 0x176   : > { %14024 = vst [vmem:[#allocation32_spill] sm:$0xff] %v11522_v45  ;;  %v11533_v51 = vpop.permute.xlu1 %830  ;;  %v11562_v61 = vpop.permute.xlu0 %860  ;;  %v13963_v63 = vrot.slane %v11522_v45, 1 }
 0x177   : > { %14025 = vst [vmem:[#allocation33_spill] sm:$0xff] %v11546_v55  ;;  %v11550_v56 = vmul.f32 %v11470_v30, %v11533_v51  ;;  %v11556_v59 = vmul.f32 %v11473_v31, %v11533_v51  ;;  %v11560_v60 = vmul.f32 %v11476_v32, %v11533_v51  ;;  %v11569_v2 = vmul.f32 %v11479_v33, %v11533_v51 }
 0x178   : > { %v11575_v5 = vmul.f32 %v11482_v34, %v11533_v51  ;;  %v11579_v6 = vmul.f32 %v11485_v35, %v11533_v51  ;;  %v11586_v9 = vmul.f32 %v11476_v32, %v11562_v61  ;;  %v11590_v10 = vmul.f32 %v11479_v33, %v11562_v61 }
 0x179   : > { %14026 = vst [vmem:[#allocation34_spill] sm:$0xff] %v11569_v2  ;;  %v13969_v4 = vrot.slane %v11550_v56, 5  ;;  %v13970_v8 = vrot.slane %v11556_v59, 6  ;;  %v11595_v13 = vmul.f32 %v11482_v34, %v11562_v61  ;;  %v11601_v18 = vmul.f32 %v11485_v35, %v11562_v61 }
 0x17a   : > { %14027 = vst [vmem:[#allocation35_spill] sm:$0xff] %v11575_v5  ;;  %14028 = vst [vmem:[#allocation36_spill] sm:$0xff] %v11579_v6  ;;  %v11581_v7 = vpop.permute.xlu1 %840  ;;  %v13964_v17 = vrot.slane %v11590_v10, 1  ;;  %v836_v0 = vpop.permute.xlu0 %835  ;;  %v14036_v2 = vrot.slane %v11497_v39, 6 }
 0x17b   : > { %14029 = vst [vmem:[#allocation37_spill] sm:$0xff] %v11601_v18  ;;  %v11605_v19 = vmul.f32 %v11470_v30, %v11581_v7  ;;  %v11614_v25 = vmul.f32 %v11473_v31, %v11581_v7  ;;  %v11629_v29 = vmul.f32 %v11476_v32, %v11581_v7  ;;  %v11644_v1 = vmul.f32 %v11482_v34, %v11581_v7 }
 0x17c   : > { %v1155_v27 = vsel %vm1147_vm0, %v13964_v17, %v13963_v63  ;;  %v11640_v63 = vmul.f32 %v11479_v33, %v11581_v7  ;;  %v869_v57 = vmul.f32 %v11470_v30, %v836_v0  ;;  %v1034_v28 = vmul.f32 %v11476_v32, %v836_v0 }
 0x17d   : > { %v11633_v24 = vsel %vm1179_vm1, %v1155_v27, 0.0  ;;  %v956_v27 = vmul.f32 %v11473_v31, %v836_v0  ;;  %v11653_v26 = vmul.f32 %v11485_v35, %v11581_v7  ;;  %v11656_v62 = vmul.f32 %v11479_v33, %v836_v0 }
 0x17e   : > { %14030 = vst [vmem:[#allocation38_spill] sm:$0xff] %v11633_v24  ;;  %v851_v3 = vpop.permute.xlu1 %850  ;;  %v877_v50 = vrot.slane %v869_v57, 5  ;;  %v1042_v49 = vrot.slane %v1034_v28, 7  ;;  %v11659_v48 = vmul.f32 %v11482_v34, %v836_v0  ;;  %v11673_v28 = vrot.slane %v1105_v58, %v11443_v14  ;;  %v846_v55 = vpop.permute.xlu0 %845 }
 0x17f   : > { %v964_v20 = vrot.slane %v956_v27, 6  ;;  %v872_v12 = vmul.f32 %v11470_v30, %v851_v3  ;;  %v959_v53 = vmul.f32 %v11473_v31, %v851_v3  ;;  %v14031_v15 = vrot.slane %v11605_v19, 5 }
 0x180   : > { %v891_v17 = vsel %vm885_vm2, %v13969_v4, %v877_v50  ;;  %v14032_v4 = vrot.slane %v11560_v60, 7  ;;  %v11687_v58 = vmul.f32 %v11485_v35, %v836_v0  ;;  %v14033_v27 = vrot.slane %v11614_v25, 6 }
 0x181   : > { %v976_v57 = vsel %vm970_vm3, %v13970_v8, %v964_v20  ;;  %v890_v6 = vsel %vm885_vm2, %v877_v50, %v14031_v15  ;;  %v880_v21 = vrot.slane %v872_v12, 5  ;;  %v967_v14 = vrot.slane %v959_v53, 6 }
 0x182   : > { %v1021_v16 = vadd.f32 %v976_v57, %v891_v17  ;;  %v1054_v24 = vsel %vm1048_vm4, %v14032_v4, %v1042_v49  ;;  %v975_v17 = vsel %vm970_vm3, %v964_v20, %v14033_v27  ;;  %v1112_v15 = vmul.f32 %v11673_v28, %v836_v0 }
 0x183   : > { %v1037_v50 = vmul.f32 %v11476_v32, %v851_v3  ;;  %v1022_v45 = vadd.f32 %v975_v17, %v890_v6  ;;  %v11696_v4 = vmul.f32 %v11479_v33, %v851_v3  ;;  %v11699_v8 = vmul.f32 %v11482_v34, %v851_v3 }
 0x184   : > { %v1099_v57 = vadd.f32 %v1054_v24, %v1021_v16  ;;  %v14034_v5 = vrot.slane %v11629_v29, 7  ;;  %v871_v24 = vmul.f32 %v11470_v30, %v846_v55  ;;  %v958_v6 = vmul.f32 %v11473_v31, %v846_v55 }
 0x185   : > { %v1045_v12 = vrot.slane %v1037_v50, 7  ;;  %v1144_v0 = vrot.slane %v11696_v4, 1  ;;  %v14035_v27 = vrot.slane %v11493_v38, 5  ;;  %v11723_v50 = vmul.f32 %v11673_v28, %v11533_v51 }
 0x186   : > { %v1053_v20 = vsel %vm1048_vm4, %v1042_v49, %v14034_v5  ;;  %v1120_v16 = vadd.f32 %v1112_v15, %v1099_v57  ;;  %v972_v49 = vsel %vm970_vm3, %v967_v14, %v14036_v2  ;;  %v1036_v57 = vmul.f32 %v11476_v32, %v846_v55 }
 0x187   : > { %v887_v17 = vsel %vm885_vm2, %v880_v21, %v14035_v27  ;;  %v1116_v15 = vmul.f32 %v11673_v28, %v11487_v36  ;;  %14037 = vst [vmem:[#allocation39_spill] sm:$0xff] %v11723_v50  ;;  %v1100_v4 = vadd.f32 %v1053_v20, %v1022_v45  ;;  %v879_v53 = vrot.slane %v871_v24, 5 }
 0x188   : > { %v11728_v27 = vmul.f32 %v11673_v28, %v11562_v61  ;;  %v1113_v2 = vmul.f32 %v11673_v28, %v11581_v7  ;;  %v966_v5 = vrot.slane %v958_v6, 6  ;;  %v1044_v32 = vrot.slane %v1036_v57, 7 }
 0x189   : > { %v14039_v18 = vrot.slane %v11640_v63, 1  ;;  %v14040_v36 = vrot.slane %v11656_v62, 1  ;;  %v1025_v45 = vadd.f32 %v972_v49, %v887_v17  ;;  %v888_v20 = vsel %vm885_vm2, %v879_v53, %v880_v21 }
 0x18a   : > { %14038 = vst [vmem:[#allocation40_spill] sm:$0xff] %v11728_v27  ;;  %v14041_v24 = vrot.slane %v11605_v19, 5  ;;  %v1115_v7 = vmul.f32 %v11673_v28, %v851_v3  ;;  %v973_v6 = vsel %vm970_vm3, %v966_v5, %v967_v14  ;;  %v14042_v57 = vrot.slane %v11614_v25, 6 }
 0x18b   : > { %v1152_v51 = vsel %vm1147_vm0, %v14040_v36, %v14039_v18  ;;  %v11752_v17 = vmul.f32 %v11485_v35, %v851_v3  ;;  %v1121_v21 = vadd.f32 %v1113_v2, %v1100_v4  ;;  %v1024_v19 = vadd.f32 %v973_v6, %v888_v20 }
 0x18c   : > { %v889_v27 = vsel %vm885_vm2, %v14041_v24, %v879_v53  ;;  %v1198_v50 = vadd.f32 %v1152_v51, %v1120_v16  ;;  %v974_v18 = vsel %vm970_vm3, %v14042_v57, %v966_v5  ;;  %v1051_v16 = vsel %vm1048_vm4, %v1044_v32, %v1045_v12 }
 0x18d   : > { %v1023_v49 = vadd.f32 %v974_v18, %v889_v27  ;;  %v14043_v53 = vrot.slane %v11629_v29, 7  ;;  %v1135_v25 = vmul.f32 %v11479_v33, %v846_v55  ;;  %v1213_v5 = vmul.f32 %v11482_v34, %v846_v55 }
 0x18e   : > { %v14044_v3 = vrot.slane %v11501_v40, 7  ;;  %v1102_v2 = vadd.f32 %v1051_v16, %v1024_v19  ;;  %v1114_v36 = vmul.f32 %v11673_v28, %v846_v55  ;;  %v1291_v29 = vmul.f32 %v11485_v35, %v846_v55 }
 0x18f   : > { %v1052_v14 = vsel %vm1048_vm4, %v14043_v53, %v1044_v32  ;;  %v1143_v20 = vrot.slane %v1135_v25, 1  ;;  %v1221_v24 = vrot.slane %v1213_v5, 2  ;;  %v867_v34 = vmul.f32 %v11470_v30, %v11489_v37 }
 0x190   : > { %v1050_v4 = vsel %vm1048_vm4, %v1045_v12, %v14044_v3  ;;  %v1101_v27 = vadd.f32 %v1052_v14, %v1023_v49  ;;  %v1123_v33 = vadd.f32 %v1115_v7, %v1102_v2  ;;  %v874_v6 = vmul.f32 %v11470_v30, %v11562_v61 }
 0x191   : > { %v1103_v51 = vadd.f32 %v1050_v4, %v1025_v45  ;;  %v14045_v12 = vrot.slane %v11560_v60, 7  ;;  %v14046_v57 = vrot.slane %v11518_v44, 7  ;;  %v14047_v18 = vrot.slane %v11586_v9, 7 }
 0x192   : > { %v1122_v32 = vadd.f32 %v1114_v36, %v1101_v27  ;;  %v14048_v35 = vmov %v14044_v3  ;;  %v1150_v7 = vsel %vm1147_vm0, %v1143_v20, %v1144_v0  ;;  %v14049_v49 = vrot.slane %v11640_v63, 1 }
 0x193   : > { %v1055_v45 = vsel %vm1048_vm4, %v14046_v57, %v14045_v12  ;;  %v1049_v55 = vsel %vm1048_vm4, %v14048_v35, %v14047_v18  ;;  %v14050_v60 = vrot.slane %v11590_v10, 1  ;;  %v14051_v19 = vrot.slane %v11505_v41, 1 }
 0x194   : > { %v1151_v30 = vsel %vm1147_vm0, %v14049_v49, %v1143_v20  ;;  %v14052_v16 = vrot.slane %v11644_v1, 2  ;;  %v14053_v53 = vrot.slane %v11659_v48, 2  ;;  %v1200_v25 = vadd.f32 %v1150_v7, %v1122_v32 }
 0x195   : > { %v1148_v40 = vsel %vm1147_vm0, %v14051_v19, %v14050_v60  ;;  %v1199_v63 = vadd.f32 %v1151_v30, %v1121_v21  ;;  %v14054_v3 = vmov %v14051_v19  ;;  %v1300_v4 = vrot.slane %v11752_v17, 3 }
 0x196   : > { %v1230_v14 = vsel %vm1225_vm5, %v14053_v53, %v14052_v16  ;;  %v1149_v10 = vsel %vm1147_vm0, %v1144_v0, %v14054_v3  ;;  %v882_v27 = vrot.slane %v874_v6, 5  ;;  %v1124_v2 = vadd.f32 %v1116_v15, %v1103_v51 }
 0x197   : > { %v1276_v5 = vadd.f32 %v1230_v14, %v1198_v50  ;;  %v1201_v36 = vadd.f32 %v1149_v10, %v1123_v33  ;;  %v1299_v20 = vrot.slane %v1291_v29, 3  ;;  %v875_v12 = vrot.slane %v867_v34, 5 }
 0x198   : > { %v14055_v21 = vrot.slane %v11595_v13, 2  ;;  %v14056_v50 = vrot.slane %v11509_v42, 2  ;;  %v14057_v0 = vrot.slane %v11699_v8, 2  ;;  %v14058_v32 = vmov %v14052_v16 }
 0x199   : > { %v1229_v15 = vsel %vm1225_vm5, %v14058_v32, %v1221_v24  ;;  %v954_v51 = vmul.f32 %v11473_v31, %v11489_v37  ;;  %v14059_v29 = vrot.slane %v11653_v26, 3  ;;  %v14060_v33 = vrot.slane %v11687_v58, 3 }
 0x19a   : > { %v1226_v41 = vsel %vm1225_vm5, %v14056_v50, %v14055_v21  ;;  %v1228_v17 = vsel %vm1225_vm5, %v1221_v24, %v14057_v0  ;;  %v14061_v6 = vmov %v14056_v50  ;;  %v14062_v57 = vmov %v14057_v0 }
 0x19b   : > { %v1308_v34 = vsel %vm1303_vm6, %v14060_v33, %v14059_v29  ;;  %v1227_v1 = vsel %vm1225_vm5, %v14062_v57, %v14061_v6  ;;  %v1277_v18 = vadd.f32 %v1229_v15, %v1199_v63  ;;  %v1278_v35 = vadd.f32 %v1228_v17, %v1200_v25 }
 0x19c   : > { %v14063_v24 = vrot.slane %v11550_v56, 5  ;;  %v893_v49 = vsel %vm885_vm2, %v882_v27, %v875_v12  ;;  %v961_v30 = vmul.f32 %v11473_v31, %v11562_v61  ;;  %v962_v60 = vrot.slane %v954_v51, 6 }
 0x19d   : > { %v1354_v42 = vadd.f32 %v1308_v34, %v1276_v5  ;;  %v1202_v19 = vadd.f32 %v1148_v40, %v1124_v2  ;;  %v1279_v8 = vadd.f32 %v1227_v1, %v1201_v36  ;;  %v1306_v16 = vsel %vm1303_vm6, %v1299_v20, %v1300_v4  ;;  %v8434_v40 = vld [vmem:[%s14067_s4] ss:$0 sm:$0xff]  ;;  %s10947_s4 = sshll.u32 %s11073_s5, 4  ;;  %s10948_s4 = int_to_ptr.vmem [resolvable:$false] %s10947_s4 }
 0x19e   : > { %v892_v7 = vsel %vm885_vm2, %v875_v12, %v14063_v24  ;;  %v14064_v53 = vmov %v14059_v29  ;;  %v14065_v14 = vrot.slane %v11493_v38, 5  ;;  %v969_v25 = vrot.slane %v961_v30, 6  ;;  %v14077_v24 = vld [vmem:[#allocation39_spill] sm:$0xff] }
 0x19f   : > { %v1307_v56 = vsel %vm1303_vm6, %v14064_v53, %v1299_v20  ;;  %v14066_v31 = vrot.slane %v11556_v59, 6  ;;  %v1356_v26 = vadd.f32 %v1306_v16, %v1278_v35  ;;  %v933_v3 = vsel %vm909_vm7, %v893_v49, 0.0  ;;  %v14079_v49 = vld [vmem:[#allocation34_spill] sm:$0xff] }
 0x1a0   : > { %v886_v63 = vsel %vm885_vm2, %v14065_v14, %v882_v27  ;;  %v1355_v5 = vadd.f32 %v1307_v56, %v1277_v18  ;;  %v14068_v38 = vrot.slane %v11513_v43, 3  ;;  %v14069_v27 = vrot.slane %v11497_v39, 6 }
 0x1a1   : > { %v977_v61 = vsel %vm970_vm3, %v962_v60, %v14066_v31  ;;  %v978_v36 = vsel %vm970_vm3, %v969_v25, %v962_v60  ;;  %v14070_v20 = vrot.slane %v11518_v44, 7  ;;  %v14071_v12 = vrot.slane %v11586_v9, 7  ;;  %v14074_v9 = vld [vmem:[#allocation37_spill] sm:$0xff] }
 0x1a2   : > { %v1020_v10 = vadd.f32 %v977_v61, %v892_v7  ;;  %v1305_v59 = vsel %vm1303_vm6, %v1300_v4, %v14068_v38  ;;  %v971_v2 = vsel %vm970_vm3, %v14069_v27, %v969_v25  ;;  %v14072_v50 = vrot.slane %v11542_v54, 2  ;;  %v14086_v61 = vld [vmem:[#allocation32_spill] sm:$0xff]  ;;  %v14091_v27 = vld [vmem:[#allocation38_spill] sm:$0xff] }
 0x1a3   : > { %v1056_v21 = vsel %vm1048_vm4, %v14071_v12, %v14070_v20  ;;  %v14073_v0 = vrot.slane %v11595_v13, 2  ;;  %v1280_v4 = vadd.f32 %v1226_v41, %v1202_v19  ;;  %v1357_v17 = vadd.f32 %v1305_v59, %v1279_v8  ;;  %v14093_v12 = vld [vmem:[#allocation36_spill] sm:$0xff] }
 0x1a4   : > { %v1011_v32 = vsel %vm987_vm8, %v978_v36, 0.0  ;;  %v1368_v15 = vadd.f32 %v8434_v40, %v1354_v42  ;;  %v1026_v44 = vadd.f32 %v971_v2, %v886_v63  ;;  %v1098_v29 = vadd.f32 %v1055_v45, %v1020_v10 }
 0x1a5   : > { %v1233_v39 = vsel %vm1225_vm5, %v14073_v0, %v14072_v50  ;;  %v1019_v51 = vadd.f32 %v1011_v32, %v933_v3  ;;  %v14075_v33 = vrot.slane %v14074_v9, 3  ;;  %v14076_v34 = vmov %v14068_v38  ;;  %v14088_v3 = vld [vmem:[#allocation33_spill] sm:$0xff] }
 0x1a6   : > { %v1369_v13 = vadd.f32 %v8434_v40, %v1355_v5  ;;  %v1370_v57 = vadd.f32 %v8434_v40, %v1356_v26  ;;  %v1089_v41 = vsel %vm1065_vm9, %v1056_v21, 0.0  ;;  %v1104_v18 = vadd.f32 %v1049_v55, %v1026_v44  ;;  %v14081_v55 = vld [vmem:[#allocation40_spill] sm:$0xff] }
 0x1a7   : > { %v1304_v6 = vsel %vm1303_vm6, %v14076_v34, %v14075_v33  ;;  %v1097_v1 = vadd.f32 %v1089_v41, %v1019_v51  ;;  %v1110_v35 = vmul.f32 %v11673_v28, %v11489_v37  ;;  %v1119_v7 = vadd.f32 %v14077_v24, %v1098_v29  ;;  %v14083_v28 = vld [vmem:[#allocation35_spill] sm:$0xff] }
 0x1a8   : > { %v1273_v45 = vsel %vm1257_vm10, %v1233_v39, 0.0  ;;  %v14078_v43 = vrot.slane %v11656_v62, 1  ;;  %v14080_v30 = vrot.slane %v14079_v49, 1  ;;  %v1358_v42 = vadd.f32 %v1304_v6, %v1280_v4 }
 0x1a9   : > { %v1371_v19 = vadd.f32 %v8434_v40, %v1357_v17  ;;  %v1376_v8 = vmul.f32 0.2, %v1368_v15  ;;  %v1118_v16 = vadd.f32 %v1110_v35, %v1097_v1  ;;  %v1125_v53 = vadd.f32 %v14081_v55, %v1104_v18 }
 0x1aa   : > { %v1153_v60 = vsel %vm1147_vm0, %v14080_v30, %v14078_v43  ;;  %v14082_v37 = vrot.slane %v11659_v48, 2  ;;  %v14084_v14 = vrot.slane %v14083_v28, 2  ;;  %v1377_v62 = vmul.f32 0.2, %v1369_v13 }
 0x1ab   : > { %v1197_v56 = vadd.f32 %v1153_v60, %v1119_v7  ;;  %v1378_v25 = vmul.f32 0.2, %v1370_v57  ;;  %v14085_v31 = vmov %v14080_v30  ;;  %v14087_v5 = vrot.slane %v14086_v61, 1 }
 0x1ac   : > { %v1231_v63 = vsel %vm1225_vm5, %v14084_v14, %v14082_v37  ;;  %v14089_v10 = vrot.slane %v14088_v3, 3  ;;  %v14090_v38 = vmov %v14075_v33  ;;  %v1203_v2 = vadd.f32 %v14091_v27, %v1125_v53 }
 0x1ad   : > { %v1154_v26 = vsel %vm1147_vm0, %v14087_v5, %v14085_v31  ;;  %v1275_v36 = vadd.f32 %v1231_v63, %v1197_v56  ;;  %v14092_v20 = vrot.slane %v11687_v58, 3  ;;  %v14094_v21 = vrot.slane %v14093_v12, 3  ;;  %v12008_v12 = vld [vmem:[#allocation2 + $0x10] sm:$0xff]  }
 0x1ae   : > { %v1311_v48 = vsel %vm1303_vm6, %v14090_v38, %v14089_v10  ;;  %v1196_v59 = vadd.f32 %v1154_v26, %v1118_v16  ;;  %v1372_v0 = vadd.f32 %v8434_v40, %v1358_v42  ;;  %v1379_v39 = vmul.f32 0.2, %v1371_v19 }
 0x1af   : > { %v1309_v50 = vsel %vm1303_vm6, %v14094_v21, %v14092_v20  ;;  %v14095_v4 = vmov %v14084_v14  ;;  %v14096_v17 = vrot.slane %v11542_v54, 2  ;;  %v11943_v51 = vmax.f32 %v1368_v15, %v1376_v8 }
 0x1b0   : > { %v1281_v29 = vadd.f32 %v1273_v45, %v1203_v2  ;;  %v1353_v9 = vadd.f32 %v1309_v50, %v1275_v36  ;;  %v1351_v58 = vsel %vm1335_vm11, %v1311_v48, 0.0  ;;  %v11947_v33 = vmax.f32 %v1369_v13, %v1377_v62 }
 0x1b1   : > { %v1232_v32 = vsel %vm1225_vm5, %v14096_v17, %v14095_v4  ;;  %v11949_v34 = vmax.f32 %v1370_v57, %v1378_v25  ;;  %v14097_v6 = vmov %v14094_v21  ;;  %v14098_v41 = vmov %v14089_v10 }
 0x1b2   : > { %v1274_v44 = vadd.f32 %v1232_v32, %v1196_v59  ;;  %v1310_v54 = vsel %vm1303_vm6, %v14098_v41, %v14097_v6  ;;  %v1359_v15 = vadd.f32 %v1351_v58, %v1281_v29  ;;  %v1367_v18 = vadd.f32 %v8434_v40, %v1353_v9  ;;  %v10746_v6 = vld [vmem:[#allocation2] sm:$0xff]  }
 0x1b3   : > { %v1380_v35 = vmul.f32 0.2, %v1372_v0  ;;  %v11957_v24 = vmax.f32 %v1371_v19, %v1379_v39  ;;  %v1435_v13 = vrot.slane %v11943_v51, 6  ;;  %v1844_v57 = vrot.slane %v11943_v51, 1 }
 0x1b4   : > { %v1352_v1 = vadd.f32 %v1310_v54, %v1274_v44  ;;  %v1373_v45 = vadd.f32 %v8434_v40, %v1359_v15  ;;  %v1375_v43 = vmul.f32 0.2, %v1367_v18  ;;  %v1845_v49 = vrot.slane %v11947_v33, 1 }
 0x1b5   : > { %v1846_v30 = vrot.slane %v11949_v34, 1  ;;  %v1436_v16 = vrot.slane %v11947_v33, 6  ;;  %v11966_v55 = vmax.f32 %v1372_v0, %v1380_v35  ;;  %v1437_v19 = vrot.slane %v11949_v34, 6 }
 0x1b6   : > { %v1366_v7 = vadd.f32 %v8434_v40, %v1352_v1  ;;  %v1381_v42 = vmul.f32 0.2, %v1373_v45  ;;  %v11963_v8 = vmax.f32 %v1367_v18, %v1375_v43  ;;  %v1438_v40 = vrot.slane %v11957_v24, 6 }
 0x1b7   : > { %v11972_v53 = vsel %vm1147_vm0, %v1845_v49, %v1846_v30  ;;  %v11983_v14 = vsel %vm1147_vm0, %v1844_v57, %v1845_v49  ;;  %v1445_v31 = vsel %vm970_vm3, %v1435_v13, %v1436_v16  ;;  %v1444_v26 = vsel %vm970_vm3, %v1436_v16, %v1437_v19 }
 0x1b8   : > { %v1374_v60 = vmul.f32 0.2, %v1366_v7  ;;  %v11976_v37 = vmax.f32 %v1373_v45, %v1381_v42  ;;  %v1434_v28 = vrot.slane %v11963_v8, 6  ;;  %v1867_v63 = vpack.c.bf16 %v11972_v53, %v11983_v14 }
 0x1b9   : > { %v1443_v5 = vsel %vm970_vm3, %v1437_v19, %v1438_v40  ;;  %v1847_v3 = vrot.slane %v11957_v24, 1  ;;  %v1848_v10 = vrot.slane %v11966_v55, 1  ;;  %v1439_v20 = vrot.slane %v11966_v55, 6 }
 0x1ba   : > { %v11974_v56 = vmax.f32 %v1366_v7, %v1374_v60  ;;  %v1440_v25 = vrot.slane %v11976_v37, 6  ;;  %v1446_v61 = vsel %vm970_vm3, %v1434_v28, %v1435_v13  ;;  %v1412_v27 = vrot.slane %v11976_v37, 5 }
 0x1bb   : > { %v1458_v36 = vpack.c.bf16 %v1445_v31, %v1446_v61  ;;  %v1459_v50 = vpack.c.bf16 %v1443_v5, %v1444_v26  ;;  %v1406_v0 = vrot.slane %v11963_v8, 5  ;;  %v1407_v39 = vrot.slane %v11943_v51, 5 }
 0x1bc   : > { %v1433_v62 = vrot.slane %v11974_v56, 6  ;;  %v1405_v59 = vrot.slane %v11974_v56, 5  ;;  %v1408_v4 = vrot.slane %v11947_v33, 5  ;;  %v1409_v32 = vrot.slane %v11949_v34, 5 }
 0x1bd   : > { %v1410_v44 = vrot.slane %v11957_v24, 5  ;;  %v12024_v29 = vsel %vm1147_vm0, %v1847_v3, %v1848_v10  ;;  %v1442_v9 = vsel %vm970_vm3, %v1438_v40, %v1439_v20  ;;  %v1963_v58 = vrot.slane %v11943_v51, 2 }
 0x1be   : > { %v1447_v38 = vsel %vm970_vm3, %v1433_v62, %v1434_v28  ;;  %v1448_v48 = vsel %vm970_vm3, %v1440_v25, %v1433_v62  ;;  %v1420_v17 = vsel %vm885_vm2, %v1412_v27, %v1405_v59  ;;  %v1441_v41 = vsel %vm970_vm3, %v1439_v20, %v1440_v25 }
 0x1bf   : > { %v1449_v2 = vsel %vm987_vm8, %v1448_v48, 0.0  ;;  %v1419_v54 = vsel %vm885_vm2, %v1405_v59, %v1406_v0  ;;  %v12037_v1 = vsel %vm1147_vm0, %v1846_v30, %v1847_v3  ;;  %v1421_v15 = vsel %vm909_vm7, %v1420_v17, 0.0 }
 0x1c0   : > { %v1457_v21 = vpack.c.bf16 %v1447_v38, %v1449_v2  ;;  %v1868_v18 = vpack.c.bf16 %v12024_v29, %v12037_v1  ;;  %v1961_v35 = vrot.slane %v11974_v56, 2  ;;  %v1962_v7 = vrot.slane %v11963_v8, 2  ;;  %v8470_v29 = vld [vmem:[%s14100_s28] ss:$0 sm:$0xff] }
 0x1c1   : > { %v1417_v45 = vsel %vm885_vm2, %v1407_v39, %v1408_v4  ;;  %v1415_v43 = vsel %vm885_vm2, %v1409_v32, %v1410_v44  ;;  %v1964_v13 = vrot.slane %v11947_v33, 2  ;;  %v1460_v49 = vpack.c.bf16 %v1441_v41, %v1442_v9 }
 0x1c2   : > { %9618 = vmatprep.mubr.msk.bf16.mxu0 %vm1467_vm12, %v1457_v21  ;;  %v12055_v30 = vsel %vm1225_vm5, %v1962_v7, %v1963_v58  ;;  %v12059_v60 = vsel %vm1225_vm5, %v1961_v35, %v1962_v7  ;;  %v1965_v42 = vrot.slane %v11949_v34, 2  ;;  %v1429_v16 = vpack.c.bf16 %v1419_v54, %v1421_v15 }
 0x1c3   : > { %9619 = vmatmul.mubr.msk.bf16.vlgmr.msra.gmra.mrb[0].mxu0 %vm1467_vm12, %v1458_v36  ;;  %v12064_v19 = vsel %vm1225_vm5, %v1963_v58, %v1964_v13  ;;  %v1985_v40 = vpack.c.bf16 %v12055_v30, %v12059_v60  ;;  %v1966_v28 = vrot.slane %v11957_v24, 2  ;;  %v1967_v25 = vrot.slane %v11966_v55, 2  ;;  %v10315_v30 = vld [vmem:[#allocation5 + $0x48] sm:$0xff]  }
 0x1c4   : > { %9627 = vmatpush3.bf16.msra.mxu0 %v10746_v6  ;;  %9622 = vmatprep.mubr.msk.bf16.mxu0 %vm1467_vm12, %v1459_v50  ;;  %v12071_v62 = vsel %vm1225_vm5, %v1964_v13, %v1965_v42  ;;  %v1968_v31 = vrot.slane %v11976_v37, 2  ;;  %v2080_v61 = vrot.slane %v11974_v56, 3  ;;  %v2081_v3 = vrot.slane %v11963_v8, 3 }
 0x1c5   : > { %9636 = vmatprep.subr.bf16.mxu0 %v12008_v12  ;;  %v1986_v5 = vpack.c.bf16 %v12071_v62, %v12064_v19  ;;  %v12080_v26 = vsel %vm1225_vm5, %v1965_v42, %v1966_v28  ;;  %v2082_v38 = vrot.slane %v11943_v51, 3  ;;  %v12087_v48 = vsel %vm1225_vm5, %v1966_v28, %v1967_v25 }
 0x1c6   : > { %v12091_v59 = vsel %vm1225_vm5, %v1967_v25, %v1968_v31  ;;  %v1976_v2 = vsel %vm1225_vm5, %v1968_v31, %v1961_v35  ;;  %v2083_v36 = vrot.slane %v11947_v33, 3  ;;  %v1987_v20 = vpack.c.bf16 %v12087_v48, %v12080_v26 }
 0x1c7   : > { %v12101_v21 = vsel %vm1257_vm10, %v1976_v2, 0.0  ;;  %v12105_v50 = vsel %vm1303_vm6, %v2081_v3, %v2082_v38  ;;  %v12109_v17 = vsel %vm1303_vm6, %v2080_v61, %v2081_v3  ;;  %v2084_v41 = vrot.slane %v11949_v34, 3 }
 0x1c8   : > { %v1988_v9 = vpack.c.bf16 %v12101_v21, %v12091_v59  ;;  %v12115_v58 = vsel %vm1303_vm6, %v2082_v38, %v2083_v36  ;;  %v2104_v6 = vpack.c.bf16 %v12105_v50, %v12109_v17  ;;  %v1418_v54 = vsel %vm885_vm2, %v1406_v0, %v1407_v39  ;;  %v10316_v21 = vld [vmem:[#allocation5 + $0x50] sm:$0xff]  }
 0x1c9   : > { %v2085_v15 = vrot.slane %v11957_v24, 3  ;;  %v2086_v35 = vrot.slane %v11966_v55, 3  ;;  %v2087_v7 = vrot.slane %v11976_v37, 3  ;;  %v1416_v13 = vsel %vm885_vm2, %v1408_v4, %v1409_v32 }
 0x1ca   : > { %v1635_v42 = vrot.slane %v11976_v37, 7  ;;  %v12131_v28 = vsel %vm1303_vm6, %v2083_v36, %v2084_v41  ;;  %v1430_v32 = vpack.c.bf16 %v1417_v45, %v1418_v54  ;;  %v1431_v38 = vpack.c.bf16 %v1415_v43, %v1416_v13 }
 0x1cb   : > { %9623 = vmatmul.mubr.msk.bf16.gmra.mrb[4].mxu0 %vm1467_vm12, %v1460_v49  ;;  %v1628_v49 = vrot.slane %v11974_v56, 7  ;;  %v2105_v0 = vpack.c.bf16 %v12131_v28, %v12115_v58  ;;  %v12137_v39 = vsel %vm1303_vm6, %v2085_v15, %v2086_v35  ;;  %v12141_v25 = vsel %vm1303_vm6, %v2084_v41, %v2085_v15 }
 0x1cc   : > { %9628 = vmatprep.mubr.msk.bf16.mxu0 %vm1467_vm12, %v1429_v16  ;;  %v10296_v16 = vld [vmem:[#allocation2 + $0x18] sm:$0xff]   ;;  %v12145_v4 = vsel %vm1303_vm6, %v2086_v35, %v2087_v7  ;;  %v2106_v31 = vpack.c.bf16 %v12137_v39, %v12141_v25  ;;  %v2095_v3 = vsel %vm1303_vm6, %v2087_v7, %v2080_v61  ;;  %v1411_v2 = vrot.slane %v11966_v55, 5 }
 0x1cd   : > { %v12154_v36 = vsel %vm1335_vm11, %v2095_v3, 0.0  ;;  %v1629_v41 = vrot.slane %v11963_v8, 7  ;;  %v1643_v43 = vsel %vm1048_vm4, %v1635_v42, %v1628_v49  ;;  %v1630_v7 = vrot.slane %v11943_v51, 7 }
 0x1ce   : > { %v2107_v45 = vpack.c.bf16 %v12154_v36, %v12145_v4  ;;  %v1413_v61 = vsel %vm885_vm2, %v1411_v2, %v1412_v27  ;;  %v1414_v54 = vsel %vm885_vm2, %v1410_v44, %v1411_v2  ;;  %v1632_v27 = vrot.slane %v11949_v34, 7 }
 0x1cf   : > { %v1642_v15 = vsel %vm1048_vm4, %v1628_v49, %v1629_v41  ;;  %v1432_v35 = vpack.c.bf16 %v1413_v61, %v1414_v54  ;;  %v1633_v3 = vrot.slane %v11957_v24, 7  ;;  %v1641_v44 = vsel %vm1048_vm4, %v1629_v41, %v1630_v7  ;;  %v10297_v61 = vld [vmem:[#allocation2 + $0x20] sm:$0xff]  }
 0x1d3   : > { %9629 = vmatmul.mubr.msk.bf16.vlgmr.msra.gmra.mrb[0].mxu0 %vm1467_vm12, %v1430_v32  ;;  %v1631_v32 = vrot.slane %v11947_v33, 7 }
 0x1d4   : > { %9637 = vmatpush3.bf16.msra.mxu0 %v12008_v12  ;;  %9632 = vmatprep.mubr.msk.bf16.mxu0 %vm1467_vm12, %v1431_v38  ;;  %v1644_v12 = vsel %vm1065_vm9, %v1643_v43, 0.0  ;;  %v1638_v38 = vsel %vm1048_vm4, %v1632_v27, %v1633_v3 }
 0x1d5   : > { %9646 = vmatprep.subr.bf16.mxu0 %v10296_v16  ;;  %v1652_v13 = vpack.c.bf16 %v1642_v15, %v1644_v12  ;;  %v1640_v49 = vsel %vm1048_vm4, %v1630_v7, %v1631_v32  ;;  %v1639_v2 = vsel %vm1048_vm4, %v1631_v32, %v1632_v27  ;;  %v1634_v15 = vrot.slane %v11966_v55, 7 }
 0x1d6   : > { %v1653_v43 = vpack.c.bf16 %v1640_v49, %v1641_v44  ;;  %v1654_v54 = vpack.c.bf16 %v1638_v38, %v1639_v2  ;;  %v1747_v7 = vpack.c.bf16 %v11963_v8, %v11974_v56  ;;  %v1749_v32 = vpack.c.bf16 %v11957_v24, %v11949_v34  ;;  %v10317_v44 = vld [vmem:[#allocation5 + $0x58] sm:$0xff]  }
 0x1d7   : > { %v1636_v41 = vsel %vm1048_vm4, %v1634_v15, %v1635_v42  ;;  %v1637_v12 = vsel %vm1048_vm4, %v1633_v3, %v1634_v15  ;;  %v1842_v42 = vrot.slane %v11974_v56, 1  ;;  %v1843_v27 = vrot.slane %v11963_v8, 1  ;;  %v10299_v8 = vld [vmem:[#allocation2 + $0x30] sm:$0xff]  }
 0x1d8   : > { %v1849_v56 = vrot.slane %v11976_v37, 1 }
 0x1d9   : > { %v1855_v3 = vsel %vm1147_vm0, %v1843_v27, %v1844_v57  ;;  %v1856_v34 = vsel %vm1147_vm0, %v1842_v42, %v1843_v27 }
 0x1da   : > { %v1866_v24 = vpack.c.bf16 %v1855_v3, %v1856_v34  ;;  %v1850_v57 = vsel %vm1147_vm0, %v1848_v10, %v1849_v56  ;;  %v12278_v10 = vld [vmem:[%s13926_s6] sm:$0xff]  }
 0x1db   : > { %9633 = vmatmul.mubr.msk.bf16.gmra.mrb[4].mxu0 %vm1467_vm12, %v1432_v35  ;;  %v1655_v35 = vpack.c.bf16 %v1636_v41, %v1637_v12 }
 0x1dc   : > { %9638 = vmatprep.mubr.msk.bf16.mxu0 %vm1467_vm12, %v1652_v13  ;;  %v10298_v13 = vld [vmem:[#allocation2 + $0x28] sm:$0xff]  }
 0x1e3   : > { %9639 = vmatmul.mubr.msk.bf16.vlgmr.msra.gmra.mrb[0].mxu0 %vm1467_vm12, %v1653_v43 }
 0x1e4   : > { %9647 = vmatpush3.bf16.msra.mxu0 %v10296_v16  ;;  %9642 = vmatprep.mubr.msk.bf16.mxu0 %vm1467_vm12, %v1654_v54  ;;  %v1748_v16 = vpack.c.bf16 %v11947_v33, %v11943_v51  ;;  %v1750_v33 = vpack.c.bf16 %v11976_v37, %v11966_v55  ;;  %v1857_v51 = vsel %vm1147_vm0, %v1849_v56, %v1842_v42  ;;  %v10300_v55 = vld [vmem:[%s13926_s6 + $0x10] sm:$0xff]  }
 0x1e5   : > { %9656 = vmatprep.subr.bf16.mxu0 %v10297_v61  ;;  %v1865_v53 = vsel %vm1179_vm1, %v1857_v51, 0.0  ;;  %9686 = vmatprep.subr.bf16.mxu1 %v10300_v55 }
 0x1e6   : > { %v1869_v14 = vpack.c.bf16 %v1865_v53, %v1850_v57  ;;  %9687 = vmatpush3.bf16.msra.mxu1 %v10300_v55 }
 0x1eb   : > { %9643 = vmatmul.mubr.msk.bf16.gmra.mrb[4].mxu0 %vm1467_vm12, %v1655_v35 }
 0x1ec   : > { %9648 = vmatprep.mubr.msk.bf16.mxu0 %vm1467_vm12, %v1747_v7 }
 0x1f3   : > { %9649 = vmatmul.mubr.msk.bf16.vlgmr.msra.gmra.mrb[0].mxu0 %vm1467_vm12, %v1748_v16 }
 0x1f4   : > { %9657 = vmatpush3.bf16.msra.mxu0 %v10297_v61  ;;  %9652 = vmatprep.mubr.msk.bf16.mxu0 %vm1467_vm12, %v1749_v32 }
 0x1f5   : > { %9666 = vmatprep.subr.bf16.mxu0 %v10298_v13 }
 0x1fb   : > { %9653 = vmatmul.mubr.msk.bf16.gmra.mrb[4].mxu0 %vm1467_vm12, %v1750_v33 }
 0x1fc   : > { %9658 = vmatprep.mubr.msk.bf16.mxu0 %vm1467_vm12, %v1866_v24  ;;  %v10318_v24 = vld [vmem:[#allocation5 + $0x60] sm:$0xff]  }
 0x203   : > { %9659 = vmatmul.mubr.msk.bf16.vlgmr.msra.gmra.mrb[0].mxu0 %vm1467_vm12, %v1867_v63  ;;  %v10301_v63 = vld [vmem:[%s13926_s6 + $0x18] sm:$0xff]  }
 0x204   : > { %9667 = vmatpush3.bf16.msra.mxu0 %v10298_v13  ;;  %9662 = vmatprep.mubr.msk.bf16.mxu0 %vm1467_vm12, %v1868_v18  ;;  %v10314_v18 = vld [vmem:[#allocation5 + $0x40] sm:$0xff]  }
 0x205   : > { %9676 = vmatprep.subr.bf16.mxu0 %v10299_v8  ;;  %9688 = vmatprep.subr.bf16.mxu1 %v10301_v63 }
 0x206   : > { %9689 = vmatpush3.bf16.msra.mxu1 %v10301_v63 }
 0x207   : > { %9698 = vmatprep.subr.bf16.mxu1 %v12278_v10 }
 0x20b   : > { %9663 = vmatmul.mubr.msk.bf16.gmra.mrb[4].mxu0 %vm1467_vm12, %v1869_v14 }
 0x20c   : > { %9668 = vmatprep.mubr.msk.bf16.mxu0 %vm1467_vm12, %v1985_v40 }
 0x213   : > { %9669 = vmatmul.mubr.msk.bf16.vlgmr.msra.gmra.mrb[0].mxu0 %vm1467_vm12, %v1986_v5 }
 0x214   : > { %9677 = vmatpush3.bf16.msra.mxu0 %v10299_v8  ;;  %9672 = vmatprep.mubr.msk.bf16.mxu0 %vm1467_vm12, %v1987_v20 }
 0x215   : > { %9770 = vmatprep.subr.bf16.mxu0 %v10314_v18 }
 0x21b   : > { %9673 = vmatmul.mubr.msk.bf16.gmra.mrb[4].mxu0 %vm1467_vm12, %v1988_v9 }
 0x21c   : > { %9678 = vmatprep.mubr.msk.bf16.mxu0 %vm1467_vm12, %v2104_v6 }
 0x223   : > { %9679 = vmatmul.mubr.msk.bf16.vlgmr.msra.gmra.mrb[0].mxu0 %vm1467_vm12, %v2105_v0 }
 0x224   : > { %9682 = vmatprep.mubr.msk.bf16.mxu0 %vm1467_vm12, %v2106_v31  ;;  %9771 = vmatpush3.bf16.msra.mxu0 %v10314_v18 }
 0x225   : > { %9772 = vmatprep.subr.bf16.mxu0 %v10315_v30 }
 0x228   : > { %9773 = vmatpush3.bf16.msra.mxu0 %v10315_v30 }
 0x229   : > { %9774 = vmatprep.subr.bf16.mxu0 %v10316_v21 }
 0x22b   : > { %9683 = vmatmul.mubr.msk.bf16.gmra.mrb[4].mxu0 %vm1467_vm12, %v2107_v45 }
 0x22c   : > { %9775 = vmatpush3.bf16.msra.mxu0 %v10316_v21 }
 0x22d   : > { %9776 = vmatprep.subr.bf16.mxu0 %v10317_v44 }
 0x230   : > { %9777 = vmatpush3.bf16.msra.mxu0 %v10317_v44 }
 0x231   : > { %9778 = vmatprep.subr.bf16.mxu0 %v10318_v24 }
 0x234   : > { %9779 = vmatpush3.bf16.msra.mxu0 %v10318_v24 }
 0x2f6   : > { %v9680_v1 = vpop.f32.mrb[0].mxu0 }
 0x2f7   : > { %v2207_v60 = vadd.f32 %v9680_v1, %v8470_v29  ;;  %v2160_v19 = vpop.f32.mrb[1].mxu0 }
 0x2f8   : > { %v2205_v40 = vadd.f32 %v8470_v29, %v2160_v19  ;;  %v9681_v62 = vpop.f32.mrb[2].mxu0 }
 0x2f9   : > { %v2215_v5 = vmul.f32 0.2, %v2207_v60  ;;  %v2208_v26 = vadd.f32 %v9681_v62, %v8470_v29  ;;  %v2163_v48 = vpop.f32.mrb[3].mxu0 }
 0x2fa   : > { %v2213_v59 = vmul.f32 0.2, %v2205_v40  ;;  %v2206_v20 = vadd.f32 %v8470_v29, %v2163_v48 }
 0x2fb   : > { %v12284_v50 = vmax.f32 %v2207_v60, %v2215_v5  ;;  %v2216_v17 = vmul.f32 0.2, %v2208_v26  ;;  %v10319_v5 = vld [vmem:[#allocation5 + $0x68] sm:$0xff]  }
 0x2fc   : > { %v12286_v9 = vmax.f32 %v2205_v40, %v2213_v59  ;;  %v2214_v58 = vmul.f32 0.2, %v2206_v20  ;;  %9780 = vmatprep.subr.bf16.mxu0 %v10319_v5 }
 0x2fd   : > { %v12288_v6 = vmax.f32 %v2208_v26, %v2216_v17  ;;  %v2288_v28 = vrot.slane %v12284_v50, 6  ;;  %v2260_v0 = vrot.slane %v12284_v50, 5  ;;  %v2495_v39 = vrot.slane %v12284_v50, 7  ;;  %9781 = vmatpush3.bf16.msra.mxu0 %v10319_v5 }
 0x2fe   : > { %v12293_v25 = vmax.f32 %v2206_v20, %v2214_v58  ;;  %v9684_v4 = vpop.f32.mrb[4].mxu0  ;;  %v2286_v31 = vrot.slane %v12286_v9, 6  ;;  %v2258_v36 = vrot.slane %v12286_v9, 5  ;;  %v2493_v45 = vrot.slane %v12286_v9, 7 }
 0x2ff   : > { %v2211_v49 = vadd.f32 %v9684_v4, %v8470_v29  ;;  %v2176_v38 = vpop.f32.mrb[5].mxu0  ;;  %v2289_v2 = vrot.slane %v12288_v6, 6  ;;  %v2261_v43 = vrot.slane %v12288_v6, 5  ;;  %v2496_v61 = vrot.slane %v12288_v6, 7 }
 0x300   : > { %v2209_v54 = vadd.f32 %v8470_v29, %v2176_v38  ;;  %v9685_v15 = vpop.f32.mrb[6].mxu0  ;;  %v2287_v41 = vrot.slane %v12293_v25, 6  ;;  %v2259_v12 = vrot.slane %v12293_v25, 5  ;;  %v2494_v35 = vrot.slane %v12293_v25, 7 }
 0x301   : > { %v2219_v7 = vmul.f32 0.2, %v2211_v49  ;;  %v2212_v16 = vadd.f32 %v9685_v15, %v8470_v29  ;;  %v2179_v13 = vpop.f32.mrb[7].mxu0  ;;  %v12306_v32 = vsel %vm970_vm3, %v2288_v28, %v2289_v2  ;;  %v12310_v42 = vsel %vm885_vm2, %v2260_v0, %v2261_v43 }
 0x302   : > { %v2217_v27 = vmul.f32 0.2, %v2209_v54  ;;  %v2210_v3 = vadd.f32 %v8470_v29, %v2179_v13  ;;  %v2300_v33 = vsel %vm970_vm3, %v2286_v31, %v2287_v41  ;;  %v2299_v34 = vsel %vm970_vm3, %v2287_v41, %v2288_v28 }
 0x303   : > { %v12316_v56 = vmax.f32 %v2211_v49, %v2219_v7  ;;  %v2220_v8 = vmul.f32 0.2, %v2212_v16  ;;  %v2311_v51 = vpack.c.bf16 %v12306_v32, %v2299_v34  ;;  %v12321_v57 = vsel %vm885_vm2, %v2259_v12, %v2260_v0 }
 0x304   : > { %v12323_v53 = vmax.f32 %v2209_v54, %v2217_v27  ;;  %v2218_v14 = vmul.f32 0.2, %v2210_v3  ;;  %v12327_v55 = vsel %vm885_vm2, %v2258_v36, %v2259_v12  ;;  %v2283_v63 = vpack.c.bf16 %v12310_v42, %v12321_v57 }
 0x305   : > { %v12331_v29 = vmax.f32 %v2212_v16, %v2220_v8  ;;  %v2292_v1 = vrot.slane %v12316_v56, 6  ;;  %v2264_v18 = vrot.slane %v12316_v56, 5  ;;  %v12337_v30 = vsel %vm1048_vm4, %v2494_v35, %v2495_v39 }
 0x306   : > { %v12339_v60 = vmax.f32 %v2210_v3, %v2218_v14  ;;  %v2290_v19 = vrot.slane %v12323_v53, 6  ;;  %v2262_v40 = vrot.slane %v12323_v53, 5  ;;  %v12347_v62 = vsel %vm1048_vm4, %v2493_v45, %v2494_v35 }
 0x307   : > { %v2293_v26 = vrot.slane %v12331_v29, 6  ;;  %v2265_v48 = vrot.slane %v12331_v29, 5  ;;  %v2500_v59 = vrot.slane %v12331_v29, 7  ;;  %v12356_v20 = vsel %vm1048_vm4, %v2495_v39, %v2496_v61 }
 0x308   : > { %v2291_v21 = vrot.slane %v12339_v60, 6  ;;  %v2297_v17 = vsel %vm970_vm3, %v2289_v2, %v2290_v19  ;;  %v2263_v58 = vrot.slane %v12339_v60, 5  ;;  %v12364_v28 = vsel %vm885_vm2, %v2261_v43, %v2262_v40 }
 0x309   : > { %v2301_v0 = vsel %vm970_vm3, %v2293_v26, %v2286_v31  ;;  %v12370_v4 = vsel %vm970_vm3, %v2292_v1, %v2293_v26  ;;  %v2273_v39 = vsel %vm885_vm2, %v2265_v48, %v2258_v36  ;;  %v12376_v44 = vsel %vm885_vm2, %v2264_v18, %v2265_v48 }
 0x30a   : > { %v2302_v49 = vsel %vm987_vm8, %v2301_v0, 0.0  ;;  %v2296_v38 = vsel %vm970_vm3, %v2290_v19, %v2291_v21  ;;  %v2295_v31 = vsel %vm970_vm3, %v2291_v21, %v2292_v1  ;;  %v2274_v2 = vsel %vm909_vm7, %v2273_v39, 0.0  ;;  %vm12788_vm3 = vmpackc.low %vm1179_vm1, %vm11071_vm14 }
 0x30b   : > { %v2310_v43 = vpack.c.bf16 %v2300_v33, %v2302_v49  ;;  %v2312_v36 = vpack.c.bf16 %v2296_v38, %v2297_v17  ;;  %v2313_v54 = vpack.c.bf16 %v12370_v4, %v2295_v31  ;;  %v2282_v15 = vpack.c.bf16 %v12327_v55, %v2274_v2 }
 0x30c   : > { %v12393_v41 = vsel %vm885_vm2, %v2262_v40, %v2263_v58  ;;  %v12397_v12 = vsel %vm885_vm2, %v2263_v58, %v2264_v18  ;;  %v2508_v35 = vsel %vm1048_vm4, %v2500_v59, %v2493_v45  ;;  %v2518_v7 = vpack.c.bf16 %v12356_v20, %v12337_v30  ;;  %v10309_v20 = vld [vmem:[%s13926_s6 + $0x48] sm:$0xff]  }
 0x30d   : > { %9690 = vmatprep.mubr.msk.bf16.mxu1 %vm2326_vm13, %v2310_v43  ;;  %v2284_v16 = vpack.c.bf16 %v12393_v41, %v12364_v28  ;;  %v2285_v13 = vpack.c.bf16 %v12376_v44, %v12397_v12  ;;  %v12412_v32 = vsel %vm1065_vm9, %v2508_v35, 0.0  ;;  %v2497_v27 = vrot.slane %v12323_v53, 7 }
 0x30e   : > { %9691 = vmatmul.mubr.msk.bf16.vlgmr.msra.gmra.mrb[0].mxu1 %vm2326_vm13, %v2311_v51  ;;  %v2517_v45 = vpack.c.bf16 %v12347_v62, %v12412_v32  ;;  %v2498_v3 = vrot.slane %v12339_v60, 7  ;;  %v2499_v33 = vrot.slane %v12316_v56, 7  ;;  %v2719_v14 = vrot.slane %v12286_v9, 1  ;;  %v10308_v62 = vld [vmem:[%s13926_s6 + $0x40] sm:$0xff]  }
 0x30f   : > { %9699 = vmatpush3.bf16.msra.mxu1 %v12278_v10  ;;  %9694 = vmatprep.mubr.msk.bf16.mxu1 %vm2326_vm13, %v2312_v36  ;;  %v12428_v24 = vsel %vm1048_vm4, %v2496_v61, %v2497_v27  ;;  %v12438_v10 = vld [vmem:[%s13926_s6 + $0x20] sm:$0xff]   ;;  %v2720_v5 = vrot.slane %v12293_v25, 1  ;;  %v2721_v26 = vrot.slane %v12284_v50, 1  ;;  %v2722_v48 = vrot.slane %v12288_v6, 1 }
 0x310   : > { %9700 = vmatprep.subr.bf16.mxu1 %v10303_v47  ;;  %v12442_v55 = vsel %vm1048_vm4, %v2497_v27, %v2498_v3  ;;  %v12446_v61 = vsel %vm1048_vm4, %v2499_v33, %v2500_v59  ;;  %v12450_v1 = vsel %vm1048_vm4, %v2498_v3, %v2499_v33  ;;  %v2723_v59 = vrot.slane %v12323_v53, 1 }
 0x311   : > { %v2519_v19 = vpack.c.bf16 %v12442_v55, %v12428_v24  ;;  %v2520_v40 = vpack.c.bf16 %v12446_v61, %v12450_v1  ;;  %v2724_v21 = vrot.slane %v12339_v60, 1  ;;  %v2725_v17 = vrot.slane %v12316_v56, 1  ;;  %v10321_v55 = vld [vmem:[#allocation5 + $0x78] sm:$0xff]   ;;  %v10322_v61 = vld [vmem:[#allocation5] sm:$0xff]  }
 0x312   : > { %v12466_v58 = vsel %vm1147_vm0, %v2720_v5, %v2721_v26  ;;  %v12470_v0 = vsel %vm1147_vm0, %v2719_v14, %v2720_v5  ;;  %v2726_v4 = vrot.slane %v12331_v29, 1  ;;  %v2844_v39 = vrot.slane %v12286_v9, 2  ;;  %v10334_v1 = vld [vmem:[#allocation5 + $0x80] sm:$0xff]  }
 0x313   : > { %9701 = vmatpush3.bf16.msra.mxu1 %v10303_v47  ;;  %v12477_v49 = vsel %vm1147_vm0, %v2721_v26, %v2722_v48  ;;  %v12483_v31 = vsel %vm1147_vm0, %v2722_v48, %v2723_v59  ;;  %v12487_v2 = vsel %vm1147_vm0, %v2724_v21, %v2725_v17  ;;  %v12493_v36 = vsel %vm1147_vm0, %v2723_v59, %v2724_v21 }
 0x314   : > { %9710 = vmatprep.subr.bf16.mxu1 %v12438_v10  ;;  %v12497_v47 = vsel %vm1147_vm0, %v2725_v17, %v2726_v4  ;;  %v2734_v35 = vsel %vm1147_vm0, %v2726_v4, %v2719_v14  ;;  %v2845_v33 = vrot.slane %v12293_v25, 2  ;;  %v2846_v5 = vrot.slane %v12284_v50, 2 }
 0x315   : > { %v12506_v3 = vsel %vm1179_vm1, %v2734_v35, 0.0  ;;  %v2847_v14 = vrot.slane %v12288_v6, 2  ;;  %v2849_v48 = vrot.slane %v12339_v60, 2  ;;  %v2850_v17 = vrot.slane %v12316_v56, 2  ;;  %vm12871_vm1 = vmpackc.low %vm11071_vm14, %vm909_vm7 }
 0x316   : > { %9695 = vmatmul.mubr.msk.bf16.gmra.mrb[4].mxu1 %vm2326_vm13, %v2313_v54  ;;  %v2848_v54 = vrot.slane %v12323_v53, 2  ;;  %v12518_v59 = vsel %vm1225_vm5, %v2845_v33, %v2846_v5  ;;  %v12522_v21 = vsel %vm1225_vm5, %v2844_v39, %v2845_v33  ;;  %v2969_v33 = vrot.slane %v12286_v9, 3 }
 0x317   : > { %9702 = vmatprep.mubr.msk.bf16.mxu1 %vm2326_vm13, %v2282_v15  ;;  %v2851_v15 = vrot.slane %v12331_v29, 2  ;;  %v12528_v4 = vsel %vm1225_vm5, %v2846_v5, %v2847_v14  ;;  %v12544_v43 = vsel %vm1225_vm5, %v2849_v48, %v2850_v17  ;;  %v2970_v38 = vrot.slane %v12293_v25, 3 }
 0x318   : > { %v12534_v26 = vsel %vm1225_vm5, %v2847_v14, %v2848_v54  ;;  %v12538_v27 = vsel %vm1225_vm5, %v2848_v54, %v2849_v48  ;;  %v10305_v48 = vld [vmem:[%s13926_s6 + $0x28] sm:$0xff]   ;;  %v2973_v14 = vrot.slane %v12323_v53, 3  ;;  %v2975_v18 = vrot.slane %v12316_v56, 3 }
 0x319   : > { %v12548_v5 = vsel %vm1225_vm5, %v2850_v17, %v2851_v15  ;;  %v2859_v35 = vsel %vm1225_vm5, %v2851_v15, %v2844_v39  ;;  %v2971_v39 = vrot.slane %v12284_v50, 3  ;;  %v2972_v15 = vrot.slane %v12288_v6, 3  ;;  %vm12886_vm5 = vmpackc.low %vm1335_vm11, %vm11071_vm14 }
 0x31a   : > { %v12556_v54 = vsel %vm1257_vm10, %v2859_v35, 0.0  ;;  %v12570_v22 = vsel %vm1303_vm6, %v2969_v33, %v2970_v38  ;;  %v2974_v35 = vrot.slane %v12339_v60, 3  ;;  %v2976_v51 = vrot.slane %v12331_v29, 3 }
 0x31b   : > { %v2981_v17 = vsel %vm1303_vm6, %v2971_v39, %v2972_v15  ;;  %v2982_v8 = vsel %vm1303_vm6, %v2970_v38, %v2971_v39  ;;  %v2980_v34 = vsel %vm1303_vm6, %v2972_v15, %v2973_v14  ;;  %v10306_v38 = vld [vmem:[%s13926_s6 + $0x30] sm:$0xff]   ;;  %v14101_v30 = vpack.c.bf16 %v12293_v25, %v12286_v9 }
 0x31c   : > { %v2993_v42 = vpack.c.bf16 %v2982_v8, %v12570_v22  ;;  %v2994_v57 = vpack.c.bf16 %v2980_v34, %v2981_v17  ;;  %v2979_v39 = vsel %vm1303_vm6, %v2973_v14, %v2974_v35  ;;  %v2984_v28 = vsel %vm1303_vm6, %v2976_v51, %v2969_v33  ;;  %v10307_v8 = vld [vmem:[%s13926_s6 + $0x38] sm:$0xff]   ;;  %v10310_v9 = vld [vmem:[%s13926_s6 + $0x50] sm:$0xff]   ;;  %v10324_v17 = vld [vmem:[#allocation5 + $0x10] sm:$0xff]  }
 0x31d   : > { %v14102_v44 = vpack.c.bf16 %v12288_v6, %v12284_v50  ;;  %v14103_v12 = vpack.c.bf16 %v12339_v60, %v12323_v53  ;;  %v14104_v25 = vpack.c.bf16 %v12331_v29, %v12316_v56  ;;  %v14105_v50 = vpack.c.bf16 %v12466_v58, %v12470_v0  ;;  %v10311_v6 = vld [vmem:[%s13926_s6 + $0x58] sm:$0xff]   ;;  %v10312_v29 = vld [vmem:[%s13926_s6 + $0x60] sm:$0xff]  }
 0x31e   : > { %9703 = vmatmul.mubr.msk.bf16.vlgmr.msra.gmra.mrb[0].mxu1 %vm2326_vm13, %v2283_v63  ;;  %v2978_v63 = vsel %vm1303_vm6, %v2974_v35, %v2975_v18  ;;  %v14106_v53 = vpack.c.bf16 %v12483_v31, %v12477_v49  ;;  %v14107_v56 = vpack.c.bf16 %v12487_v2, %v12493_v36  ;;  %v14108_v60 = vpack.c.bf16 %v12506_v3, %v12497_v47  ;;  %v10338_v58 = vld [vmem:[#allocation5 + $0xa0] sm:$0xff]   ;;  %v8513_v0 = vld [vmem:[%s13927_s7] ss:$0 sm:$0xff] }
 0x31f   : > { %9711 = vmatpush3.bf16.msra.mxu1 %v12438_v10  ;;  %9706 = vmatprep.mubr.msk.bf16.mxu1 %vm2326_vm13, %v2284_v16  ;;  %v2977_v10 = vsel %vm1303_vm6, %v2975_v18, %v2976_v51  ;;  %v2995_v41 = vpack.c.bf16 %v2978_v63, %v2979_v39  ;;  %v2992_v16 = vsel %vm1335_vm11, %v2984_v28, 0.0  ;;  %v14110_v32 = vpack.c.bf16 %v12534_v26, %v12528_v4  ;;  %v10320_v51 = vld [vmem:[#allocation5 + $0x70] sm:$0xff]   ;;  %v10335_v18 = vld [vmem:[#allocation5 + $0x88] sm:$0xff]   ;;  %v10325_v63 = vld [vmem:[#allocation5 + $0x18] sm:$0xff]  }
 0x320   : > { %9712 = vmatprep.subr.bf16.mxu1 %v10305_v48  ;;  %v2996_v34 = vpack.c.bf16 %v2992_v16, %v2977_v10  ;;  %v14112_v24 = vpack.c.bf16 %v12556_v54, %v12548_v5  ;;  %9782 = vmatprep.subr.bf16.mxu0 %v10320_v51  ;;  %v10327_v39 = vld [vmem:[#allocation5 + $0x28] sm:$0xff]   ;;  %v10328_v10 = vld [vmem:[#allocation5 + $0x30] sm:$0xff]   ;;  %v10329_v28 = vld [vmem:[#allocation5 + $0x38] sm:$0xff]  }
 0x321   : > { %9783 = vmatpush3.bf16.msra.mxu0 %v10320_v51  ;;  %v10332_v16 = vld [vmem:[%s12701_s27 + $0x10] sm:$0xff]  }
 0x322   : > { %9784 = vmatprep.subr.bf16.mxu0 %v10321_v55 }
 0x323   : > { %9713 = vmatpush3.bf16.msra.mxu1 %v10305_v48 }
 0x324   : > { %9722 = vmatprep.subr.bf16.mxu1 %v10306_v38 }
 0x325   : > { %9785 = vmatpush3.bf16.msra.mxu0 %v10321_v55 }
 0x326   : > { %9707 = vmatmul.mubr.msk.bf16.gmra.mrb[4].mxu1 %vm2326_vm13, %v2285_v13  ;;  %v10313_v13 = vld [vmem:[%s13926_s6 + $0x68] sm:$0xff]   ;;  %9794 = vmatprep.subr.bf16.mxu0 %v10322_v61 }
 0x327   : > { %9714 = vmatprep.mubr.msk.bf16.mxu1 %vm2326_vm13, %v2517_v45  ;;  %v14111_v45 = vpack.c.bf16 %v12544_v43, %v12538_v27 }
 0x32e   : > { %9715 = vmatmul.mubr.msk.bf16.vlgmr.msra.gmra.mrb[0].mxu1 %vm2326_vm13, %v2518_v7  ;;  %v14109_v7 = vpack.c.bf16 %v12518_v59, %v12522_v21  ;;  %v10323_v21 = vld [vmem:[#allocation5 + $0x8] sm:$0xff]  }
 0x32f   : > { %9723 = vmatpush3.bf16.msra.mxu1 %v10306_v38  ;;  %9718 = vmatprep.mubr.msk.bf16.mxu1 %vm2326_vm13, %v2519_v19  ;;  %v10336_v19 = vld [vmem:[#allocation5 + $0x90] sm:$0xff]   ;;  %v10326_v38 = vld [vmem:[#allocation5 + $0x20] sm:$0xff]  }
 0x330   : > { %9724 = vmatprep.subr.bf16.mxu1 %v10307_v8 }
 0x333   : > { %9725 = vmatpush3.bf16.msra.mxu1 %v10307_v8  ;;  %v10339_v8 = vld [vmem:[#allocation5 + $0xa8] sm:$0xff]  }
 0x334   : > { %9734 = vmatprep.subr.bf16.mxu1 %v10308_v62 }
 0x336   : > { %9719 = vmatmul.mubr.msk.bf16.gmra.mrb[4].mxu1 %vm2326_vm13, %v2520_v40  ;;  %v10337_v40 = vld [vmem:[#allocation5 + $0x98] sm:$0xff]  }
 0x337   : > { %9726 = vmatprep.mubr.msk.bf16.mxu1 %vm2326_vm13, %v14101_v30  ;;  %v10341_v30 = vld [vmem:[#allocation5 + $0xb8] sm:$0xff]  }
 0x33e   : > { %9727 = vmatmul.mubr.msk.bf16.vlgmr.msra.gmra.mrb[0].mxu1 %vm2326_vm13, %v14102_v44  ;;  %v8534_v44 = vld [vmem:[%s13929_s9] ss:$0 sm:$0xff] }
 0x33f   : > { %9735 = vmatpush3.bf16.msra.mxu1 %v10308_v62  ;;  %9730 = vmatprep.mubr.msk.bf16.mxu1 %vm2326_vm13, %v14103_v12  ;;  %v10340_v62 = vld [vmem:[#allocation5 + $0xb0] sm:$0xff]  }
 0x340   : > { %9736 = vmatprep.subr.bf16.mxu1 %v10309_v20 }
 0x343   : > { %9737 = vmatpush3.bf16.msra.mxu1 %v10309_v20  ;;  %v10342_v20 = vld [vmem:[#allocation5 + $0xc0] sm:$0xff]  }
 0x344   : > { %9746 = vmatprep.subr.bf16.mxu1 %v10310_v9 }
 0x346   : > { %9731 = vmatmul.mubr.msk.bf16.gmra.mrb[4].mxu1 %vm2326_vm13, %v14104_v25 }
 0x347   : > { %9738 = vmatprep.mubr.msk.bf16.mxu1 %vm2326_vm13, %v14105_v50 }
 0x34e   : > { %9739 = vmatmul.mubr.msk.bf16.vlgmr.msra.gmra.mrb[0].mxu1 %vm2326_vm13, %v14106_v53 }
 0x34f   : > { %9747 = vmatpush3.bf16.msra.mxu1 %v10310_v9  ;;  %9742 = vmatprep.mubr.msk.bf16.mxu1 %vm2326_vm13, %v14107_v56 }
 0x350   : > { %9748 = vmatprep.subr.bf16.mxu1 %v10311_v6 }
 0x353   : > { %9749 = vmatpush3.bf16.msra.mxu1 %v10311_v6 }
 0x354   : > { %9758 = vmatprep.subr.bf16.mxu1 %v10312_v29 }
 0x356   : > { %9743 = vmatmul.mubr.msk.bf16.gmra.mrb[4].mxu1 %vm2326_vm13, %v14108_v60 }
 0x357   : > { %9750 = vmatprep.mubr.msk.bf16.mxu1 %vm2326_vm13, %v14109_v7 }
 0x35e   : > { %9751 = vmatmul.mubr.msk.bf16.vlgmr.msra.gmra.mrb[0].mxu1 %vm2326_vm13, %v14110_v32 }
 0x35f   : > { %9759 = vmatpush3.bf16.msra.mxu1 %v10312_v29  ;;  %9754 = vmatprep.mubr.msk.bf16.mxu1 %vm2326_vm13, %v14111_v45 }
 0x360   : > { %9760 = vmatprep.subr.bf16.mxu1 %v10313_v13 }
 0x363   : > { %9761 = vmatpush3.bf16.msra.mxu1 %v10313_v13 }
 0x364   : > { %9818 = vmatprep.subr.bf16.mxu1 %v10334_v1 }
 0x366   : > { %9755 = vmatmul.mubr.msk.bf16.gmra.mrb[4].mxu1 %vm2326_vm13, %v14112_v24 }
 0x367   : > { %9762 = vmatprep.mubr.msk.bf16.mxu1 %vm2326_vm13, %v2993_v42 }
 0x36e   : > { %9763 = vmatmul.mubr.msk.bf16.vlgmr.msra.gmra.mrb[0].mxu1 %vm2326_vm13, %v2994_v57  ;;  %v10330_v57 = vld [vmem:[%s12701_s27] sm:$0xff]  }
 0x36f   : > { %9766 = vmatprep.mubr.msk.bf16.mxu1 %vm2326_vm13, %v2995_v41  ;;  %9819 = vmatpush3.bf16.msra.mxu1 %v10334_v1  ;;  %v10331_v41 = vld [vmem:[%s12701_s27 + $0x8] sm:$0xff]  }
 0x370   : > { %9820 = vmatprep.subr.bf16.mxu1 %v10335_v18 }
 0x373   : > { %9821 = vmatpush3.bf16.msra.mxu1 %v10335_v18 }
 0x374   : > { %9822 = vmatprep.subr.bf16.mxu1 %v10336_v19 }
 0x376   : > { %9767 = vmatmul.mubr.msk.bf16.gmra.mrb[4].mxu1 %vm2326_vm13, %v2996_v34  ;;  %v10333_v34 = vld [vmem:[%s12701_s27 + $0x18] sm:$0xff]   ;;  %s8428_s27 = sshll.u32 %s13734_s21, 6 }
 0x377   : > { %9823 = vmatpush3.bf16.msra.mxu1 %v10336_v19  ;;  %s13742_s30 = scalar_lea.vmem [#allocation14], %s8428_s27  ;;  %s9114_s27 = sshll.u32 %s11208_s3, 10 }
 0x378   : > { %9824 = vmatprep.subr.bf16.mxu1 %v10337_v40  ;;  %s8176_s24 = sshll.u32 %s13742_s30, 4  ;;  %s13831_s24 = int_to_ptr.vmem [resolvable:$true] %s8176_s24 }
 0x379   : > { %s10943_s20 = scalar_lea.vmem %s13831_s24, 1024  ;;  %p10950_p5 = scmp.lt.s32.totalorder %s13831_s24, %s10948_s4 }
 0x37a   : > { %p10944_p4 = scmp.ne.s32.totalorder %s13831_s24, %s10943_s20 }
 0x37b   : > { %9825 = vmatpush3.bf16.msra.mxu1 %v10337_v40 }
 0x37c   : > { %9826 = vmatprep.subr.bf16.mxu1 %v10338_v58  ;;  %p10945_p8 = pnand %p10944_p4, %p14130_p7 }
 0x37e   : > { %p10946_p11 = pneg %p10945_p8 }
 0x37f   : > { %9827 = vmatpush3.bf16.msra.mxu1 %v10338_v58 }
 0x380   : > { %9828 = vmatprep.subr.bf16.mxu1 %v10339_v8 }
 0x383   : > { %9829 = vmatpush3.bf16.msra.mxu1 %v10339_v8 }
 0x384   : > { %9830 = vmatprep.subr.bf16.mxu1 %v10340_v62 }
 0x387   : > { %9831 = vmatpush3.bf16.msra.mxu1 %v10340_v62 }
 0x388   : > { %9832 = vmatprep.subr.bf16.mxu1 %v10341_v30 }
 0x38b   : > { %9833 = vmatpush3.bf16.msra.mxu1 %v10341_v30 }
 0x38c   : > { %9842 = vmatprep.subr.bf16.mxu1 %v10342_v20 }
 0x441   : > { %v9764_v49 = vpop.f32.mrb[0].mxu1 }
 0x442   : > { %v3055_v31 = vpop.f32.mrb[1].mxu1  ;;  %v3102_v43 = vadd.f32 %v9764_v49, %v8513_v0 }
 0x443   : > { %v9765_v2 = vpop.f32.mrb[2].mxu1  ;;  %v3100_v27 = vadd.f32 %v8513_v0, %v3055_v31 }
 0x444   : > { %v3103_v36 = vadd.f32 %v9765_v2, %v8513_v0  ;;  %v3058_v47 = vpop.f32.mrb[3].mxu1 }
 0x445   : > { %v3101_v3 = vadd.f32 %v8513_v0, %v3058_v47 }
 0x446   : > { %v3133_v26 = vpack.c.bf16 %v3103_v36, %v3102_v43  ;;  %v10343_v43 = vld [vmem:[#allocation5 + $0xc8] sm:$0xff]  }
 0x447   : > { %v3132_v59 = vpack.c.bf16 %v3101_v3, %v3100_v27 }
 0x449   : > { %v9768_v4 = vpop.f32.mrb[4].mxu1  ;;  %9786 = vmatprep.mubr.bf16.mxu0 %v3132_v59 }
 0x44a   : > { %v3071_v33 = vpop.f32.mrb[5].mxu1  ;;  %9787 = vmatmul.mubr.bf16.vlgmr.msra.gmra.mrb[8].mxu0 %v3133_v26  ;;  %v3106_v14 = vadd.f32 %v9768_v4, %v8513_v0 }
 0x44b   : > { %9795 = vmatpush3.bf16.msra.mxu0 %v10322_v61  ;;  %v9769_v5 = vpop.f32.mrb[6].mxu1  ;;  %v3104_v15 = vadd.f32 %v8513_v0, %v3071_v33 }
 0x44c   : > { %v3107_v54 = vadd.f32 %v9769_v5, %v8513_v0  ;;  %v3074_v48 = vpop.f32.mrb[7].mxu1  ;;  %9796 = vmatprep.subr.bf16.mxu0 %v10323_v21 }
 0x44d   : > { %v3105_v22 = vadd.f32 %v8513_v0, %v3074_v48  ;;  %v10346_v48 = vld [vmem:[#allocation5 + $0xe0] sm:$0xff]  }
 0x44e   : > { %v3135_v35 = vpack.c.bf16 %v3107_v54, %v3106_v14  ;;  %v10345_v54 = vld [vmem:[#allocation5 + $0xd8] sm:$0xff]  }
 0x44f   : > { %v3134_v42 = vpack.c.bf16 %v3105_v22, %v3104_v15  ;;  %9797 = vmatpush3.bf16.msra.mxu0 %v10323_v21  ;;  %v10344_v21 = vld [vmem:[#allocation5 + $0xd0] sm:$0xff]   ;;  %v10349_v22 = vld [vmem:[#allocation5 + $0xf8] sm:$0xff]  }
 0x450   : > { %9798 = vmatprep.subr.bf16.mxu0 %v10324_v17  ;;  %v10348_v15 = vld [vmem:[#allocation5 + $0xf0] sm:$0xff]  }
 0x451   : > { %9790 = vmatprep.mubr.bf16.mxu0 %v3134_v42  ;;  %v10351_v42 = vld [vmem:[#allocation7 + $0x40] sm:$0xff]  }
 0x452   : > { %9791 = vmatmul.mubr.bf16.gmra.mrb[12].mxu0 %v3135_v35  ;;  %v10350_v35 = vld [vmem:[#allocation7 + $0x80] sm:$0xff]  }
 0x453   : > { %9799 = vmatpush3.bf16.msra.mxu0 %v10324_v17  ;;  %9810 = vmatprep.mubr.bf16.mxu0 %v10330_v57  ;;  %v10347_v17 = vld [vmem:[#allocation5 + $0xe8] sm:$0xff]   ;;  %v10352_v57 = vld [vmem:[#allocation7] sm:$0xff]  }
 0x454   : > { %9800 = vmatprep.subr.bf16.mxu0 %v10325_v63 }
 0x457   : > { %9801 = vmatpush3.bf16.msra.mxu0 %v10325_v63  ;;  %v10354_v63 = vld [vmem:[#allocation7 + $0x48] sm:$0xff]  }
 0x458   : > { %9802 = vmatprep.subr.bf16.mxu0 %v10326_v38 }
 0x45b   : > { %9803 = vmatpush3.bf16.msra.mxu0 %v10326_v38  ;;  %v10355_v38 = vld [vmem:[#allocation7 + $0x8] sm:$0xff]  }
 0x45c   : > { %9804 = vmatprep.subr.bf16.mxu0 %v10327_v39 }
 0x45f   : > { %9805 = vmatpush3.bf16.msra.mxu0 %v10327_v39  ;;  %v10357_v39 = vld [vmem:[#allocation7 + $0x50] sm:$0xff]  }
 0x460   : > { %9806 = vmatprep.subr.bf16.mxu0 %v10328_v10 }
 0x463   : > { %9807 = vmatpush3.bf16.msra.mxu0 %v10328_v10  ;;  %v10358_v10 = vld [vmem:[#allocation7 + $0x10] sm:$0xff]  }
 0x464   : > { %9808 = vmatprep.subr.bf16.mxu0 %v10329_v28 }
 0x467   : > { %9809 = vmatpush3.bf16.msra.mxu0 %v10329_v28  ;;  %v10360_v28 = vld [vmem:[#allocation7 + $0x58] sm:$0xff]  }
 0x468   : > { %9240 = vmatprep.subr.bf16.mxu0 %v10351_v42  ;;  %v10373_v42 = vld [vmem:[#allocation7 + $0x38] sm:$0xff]  }
 0x46a   : > { %9811 = vmatmul.mubr.bf16.vlgmr.msra.gmra.mrb[8].mxu0 %v10331_v41  ;;  %v10361_v41 = vld [vmem:[#allocation7 + $0x18] sm:$0xff]  }
 0x46b   : > { %9814 = vmatprep.mubr.bf16.mxu0 %v10332_v16  ;;  %9241 = vmatpush3.bf16.msra.mxu0 %v10352_v57  ;;  %v8536_v16 = vld [vmem:[%s13929_s9 + $0x1] ss:$0 sm:$0xff]  ;;  %v8546_v57 = vld [vmem:[%s13929_s9 + $0x2] ss:$0 sm:$0xff] }
 0x46c   : > { %9242 = vmatprep.subr.bf16.mxu0 %v10354_v63 }
 0x46f   : > { %9243 = vmatpush3.bf16.msra.mxu0 %v10355_v38 }
 0x470   : > { %9244 = vmatprep.subr.bf16.mxu0 %v10357_v39 }
 0x472   : > { %9815 = vmatmul.mubr.bf16.gmra.mrb[12].mxu0 %v10333_v34 }
 0x473   : > { %9245 = vmatpush3.bf16.msra.mxu0 %v10358_v10 }
 0x474   : > { %9246 = vmatprep.subr.bf16.mxu0 %v10360_v28 }
 0x477   : > { %9247 = vmatpush3.bf16.msra.mxu0 %v10361_v41 }
 0x53d   : > { %v9812_v12 = vpop.f32.mrb[8].mxu0 }
 0x53e   : > { %v3412_v9 = vadd.f32 %v9812_v12, %v8534_v44  ;;  %v3372_v25 = vpop.f32.mrb[9].mxu0 }
 0x53f   : > { %v3410_v50 = vadd.f32 %v8534_v44, %v3372_v25  ;;  %v9813_v6 = vpop.f32.mrb[10].mxu0 }
 0x540   : > { %v3420_v53 = vmul.f32 0.2, %v3412_v9  ;;  %v3413_v56 = vadd.f32 %v9813_v6, %v8534_v44  ;;  %v3375_v29 = vpop.f32.mrb[11].mxu0 }
 0x541   : > { %v3418_v60 = vmul.f32 0.2, %v3410_v50  ;;  %v3411_v7 = vadd.f32 %v8534_v44, %v3375_v29 }
 0x542   : > { %v3421_v13 = vmul.f32 0.2, %v3413_v56  ;;  %v3428_v45 = vmax.f32 %v3412_v9, %v3420_v53 }
 0x543   : > { %v3419_v32 = vmul.f32 0.2, %v3411_v7  ;;  %v3426_v51 = vmax.f32 %v3410_v50, %v3418_v60 }
 0x544   : > { %v3429_v24 = vmax.f32 %v3413_v56, %v3421_v13 }
 0x545   : > { %v3427_v55 = vmax.f32 %v3411_v7, %v3419_v32  ;;  %v9816_v61 = vpop.f32.mrb[12].mxu0 }
 0x546   : > { %v3435_v1 = vpack.c.bf16 %v3429_v24, %v3428_v45  ;;  %v3416_v18 = vadd.f32 %v9816_v61, %v8534_v44  ;;  %v3388_v19 = vpop.f32.mrb[13].mxu0 }
 0x547   : > { %v3414_v40 = vadd.f32 %v8534_v44, %v3388_v19  ;;  %v9817_v58 = vpop.f32.mrb[14].mxu0  ;;  %v3434_v0 = vpack.c.bf16 %v3427_v55, %v3426_v51 }
 0x548   : > { %v3424_v49 = vmul.f32 0.2, %v3416_v18  ;;  %v3417_v31 = vadd.f32 %v9817_v58, %v8534_v44  ;;  %v3391_v2 = vpop.f32.mrb[15].mxu0 }
 0x549   : > { %v3422_v36 = vmul.f32 0.2, %v3414_v40  ;;  %v3415_v47 = vadd.f32 %v8534_v44, %v3391_v2  ;;  %9834 = vmatprep.mubr.bf16.mxu1 %v3434_v0 }
 0x54a   : > { %v3425_v27 = vmul.f32 0.2, %v3417_v31  ;;  %9835 = vmatmul.mubr.bf16.vlgmr.msra.gmra.mrb[8].mxu1 %v3435_v1  ;;  %v3432_v26 = vmax.f32 %v3416_v18, %v3424_v49 }
 0x54b   : > { %v3423_v3 = vmul.f32 0.2, %v3415_v47  ;;  %9843 = vmatpush3.bf16.msra.mxu1 %v10342_v20  ;;  %v3430_v4 = vmax.f32 %v3414_v40, %v3422_v36  ;;  %v10353_v40 = vld [vmem:[#allocation7 + $0x88] sm:$0xff]   ;;  %v10356_v36 = vld [vmem:[#allocation7 + $0x90] sm:$0xff]  }
 0x54c   : > { %v3433_v59 = vmax.f32 %v3417_v31, %v3425_v27  ;;  %9844 = vmatprep.subr.bf16.mxu1 %v10343_v43 }
 0x54d   : > { %v3431_v33 = vmax.f32 %v3415_v47, %v3423_v3 }
 0x54e   : > { %v3437_v5 = vpack.c.bf16 %v3433_v59, %v3432_v26  ;;  %v10359_v59 = vld [vmem:[#allocation7 + $0x98] sm:$0xff]  }
 0x54f   : > { %v3436_v14 = vpack.c.bf16 %v3431_v33, %v3430_v4  ;;  %9845 = vmatpush3.bf16.msra.mxu1 %v10343_v43  ;;  %v10363_v4 = vld [vmem:[#allocation7 + $0x60] sm:$0xff]  }
 0x550   : > { %9846 = vmatprep.subr.bf16.mxu1 %v10344_v21  ;;  %9248 = vmatprep.subr.bf16.mxu0 %v10363_v4  ;;  %v10364_v33 = vld [vmem:[#allocation7 + $0x20] sm:$0xff]  }
 0x551   : > { %9838 = vmatprep.mubr.bf16.mxu1 %v3436_v14  ;;  %v10366_v14 = vld [vmem:[#allocation7 + $0x68] sm:$0xff]   ;;  %9249 = vmatpush3.bf16.msra.mxu0 %v10364_v33 }
 0x552   : > { %9839 = vmatmul.mubr.bf16.gmra.mrb[12].mxu1 %v3437_v5  ;;  %v10365_v5 = vld [vmem:[#allocation7 + $0xa8] sm:$0xff]   ;;  %9250 = vmatprep.subr.bf16.mxu0 %v10366_v14 }
 0x553   : > { %9847 = vmatpush3.bf16.msra.mxu1 %v10344_v21  ;;  %v10362_v21 = vld [vmem:[#allocation7 + $0xa0] sm:$0xff]  }
 0x554   : > { %9848 = vmatprep.subr.bf16.mxu1 %v10345_v54 }
 0x557   : > { %9849 = vmatpush3.bf16.msra.mxu1 %v10345_v54  ;;  %v10367_v54 = vld [vmem:[#allocation7 + $0x28] sm:$0xff]  }
 0x558   : > { %9850 = vmatprep.subr.bf16.mxu1 %v10346_v48  ;;  %9251 = vmatpush3.bf16.msra.mxu0 %v10367_v54 }
 0x55b   : > { %9851 = vmatpush3.bf16.msra.mxu1 %v10346_v48  ;;  %v10368_v48 = vld [vmem:[#allocation7 + $0xb0] sm:$0xff]  }
 0x55c   : > { %9852 = vmatprep.subr.bf16.mxu1 %v10347_v17 }
 0x55f   : > { %9853 = vmatpush3.bf16.msra.mxu1 %v10347_v17  ;;  %v10369_v17 = vld [vmem:[#allocation7 + $0x70] sm:$0xff]  }
 0x560   : > { %9854 = vmatprep.subr.bf16.mxu1 %v10348_v15  ;;  %9252 = vmatprep.subr.bf16.mxu0 %v10369_v17 }
 0x563   : > { %9855 = vmatpush3.bf16.msra.mxu1 %v10348_v15  ;;  %v10370_v15 = vld [vmem:[#allocation7 + $0x30] sm:$0xff]  }
 0x564   : > { %9856 = vmatprep.subr.bf16.mxu1 %v10349_v22  ;;  %9253 = vmatpush3.bf16.msra.mxu0 %v10370_v15 }
 0x567   : > { %9857 = vmatpush3.bf16.msra.mxu1 %v10349_v22  ;;  %v10371_v22 = vld [vmem:[#allocation7 + $0xb8] sm:$0xff]  }
 0x568   : > { %9866 = vmatprep.subr.bf16.mxu1 %v10350_v35 }
 0x61d   : > { %v9836_v34 = vpop.f32.mrb[8].mxu1 }
 0x61e   : > { %v3554_v8 = vadd.f32 %v9836_v34, %v8536_v16  ;;  %v3545_v62 = vpop.f32.mrb[9].mxu1 }
 0x61f   : > { %v3546_v30 = vadd.f32 %v8536_v16, %v3545_v62  ;;  %v9837_v20 = vpop.f32.mrb[10].mxu1 }
 0x620   : > { %v3578_v44 = vmul.f32 0.2, %v3554_v8  ;;  %v3557_v12 = vadd.f32 %v9837_v20, %v8536_v16  ;;  %v3548_v9 = vpop.f32.mrb[11].mxu1 }
 0x621   : > { %v3576_v25 = vmul.f32 0.2, %v3546_v30  ;;  %v3549_v50 = vadd.f32 %v8536_v16, %v3548_v9 }
 0x622   : > { %v3579_v6 = vmul.f32 0.2, %v3557_v12  ;;  %v3586_v56 = vmax.f32 %v3554_v8, %v3578_v44 }
 0x623   : > { %v3577_v53 = vmul.f32 0.2, %v3549_v50  ;;  %v3584_v60 = vmax.f32 %v3546_v30, %v3576_v25 }
 0x624   : > { %v3587_v29 = vmax.f32 %v3557_v12, %v3579_v6 }
 0x625   : > { %v3585_v7 = vmax.f32 %v3549_v50, %v3577_v53  ;;  %v9840_v13 = vpop.f32.mrb[12].mxu1 }
 0x626   : > { %v3593_v32 = vpack.c.bf16 %v3587_v29, %v3586_v56  ;;  %v3570_v45 = vadd.f32 %v9840_v13, %v8536_v16  ;;  %v3561_v24 = vpop.f32.mrb[13].mxu1 }
 0x627   : > { %v3562_v51 = vadd.f32 %v8536_v16, %v3561_v24  ;;  %v9841_v55 = vpop.f32.mrb[14].mxu1  ;;  %v3592_v61 = vpack.c.bf16 %v3585_v7, %v3584_v60 }
 0x628   : > { %v3582_v1 = vmul.f32 0.2, %v3570_v45  ;;  %v3573_v18 = vadd.f32 %v9841_v55, %v8536_v16  ;;  %v3564_v19 = vpop.f32.mrb[15].mxu1 }
 0x629   : > { %v3580_v58 = vmul.f32 0.2, %v3562_v51  ;;  %v3565_v0 = vadd.f32 %v8536_v16, %v3564_v19  ;;  %9858 = vmatprep.mubr.bf16.mxu1 %v3592_v61 }
 0x62a   : > { %v3583_v49 = vmul.f32 0.2, %v3573_v18  ;;  %9859 = vmatmul.mubr.bf16.vlgmr.msra.gmra.mrb[16].mxu1 %v3593_v32  ;;  %v3590_v2 = vmax.f32 %v3570_v45, %v3582_v1 }
 0x62b   : > { %v3581_v31 = vmul.f32 0.2, %v3565_v0  ;;  %9867 = vmatpush3.bf16.msra.mxu1 %v10350_v35  ;;  %v3588_v47 = vmax.f32 %v3562_v51, %v3580_v58  ;;  %v10372_v35 = vld [vmem:[#allocation7 + $0x78] sm:$0xff]  }
 0x62c   : > { %v3591_v43 = vmax.f32 %v3573_v18, %v3583_v49  ;;  %9868 = vmatprep.subr.bf16.mxu1 %v10353_v40  ;;  %9254 = vmatprep.subr.bf16.mxu0 %v10372_v35 }
 0x62d   : > { %v3589_v27 = vmax.f32 %v3565_v0, %v3581_v31  ;;  %9255 = vmatpush3.bf16.msra.mxu0 %v10373_v42 }
 0x62e   : > { %v3595_v3 = vpack.c.bf16 %v3591_v43, %v3590_v2 }
 0x62f   : > { %v3594_v26 = vpack.c.bf16 %v3589_v27, %v3588_v47  ;;  %9869 = vmatpush3.bf16.msra.mxu1 %v10353_v40 }
 0x630   : > { %9870 = vmatprep.subr.bf16.mxu1 %v10356_v36 }
 0x631   : > { %9862 = vmatprep.mubr.bf16.mxu1 %v3594_v26 }
 0x632   : > { %9863 = vmatmul.mubr.bf16.gmra.mrb[20].mxu1 %v3595_v3 }
 0x633   : > { %9871 = vmatpush3.bf16.msra.mxu1 %v10356_v36 }
 0x634   : > { %9872 = vmatprep.subr.bf16.mxu1 %v10359_v59 }
 0x637   : > { %9873 = vmatpush3.bf16.msra.mxu1 %v10359_v59 }
 0x638   : > { %9874 = vmatprep.subr.bf16.mxu1 %v10362_v21 }
 0x63b   : > { %9875 = vmatpush3.bf16.msra.mxu1 %v10362_v21 }
 0x63c   : > { %9876 = vmatprep.subr.bf16.mxu1 %v10365_v5 }
 0x63f   : > { %9877 = vmatpush3.bf16.msra.mxu1 %v10365_v5 }
 0x640   : > { %9878 = vmatprep.subr.bf16.mxu1 %v10368_v48 }
 0x643   : > { %9879 = vmatpush3.bf16.msra.mxu1 %v10368_v48 }
 0x644   : > { %9880 = vmatprep.subr.bf16.mxu1 %v10371_v22 }
 0x647   : > { %9881 = vmatpush3.bf16.msra.mxu1 %v10371_v22 }
 0x6fd   : > { %v9860_v63 = vpop.f32.mrb[16].mxu1 }
 0x6fe   : > { %v12719_v38 = vadd.f32 %v9860_v63, %v8546_v57  ;;  %v3703_v39 = vpop.f32.mrb[17].mxu1 }
 0x6ff   : > { %v12721_v10 = vadd.f32 %v8546_v57, %v3703_v39  ;;  %v9861_v28 = vpop.f32.mrb[18].mxu1  ;;  %v10374_v39 = vld [vmem:[#allocation7 + $0x140] sm:$0xff]  }
 0x700   : > { %v3706_v41 = vpop.f32.mrb[19].mxu1  ;;  %v3809_v34 = vrot.slane %v12719_v38, 1  ;;  %v12727_v62 = vadd.f32 %v9861_v28, %v8546_v57  ;;  %v3785_v27 = vrot.slane %v12719_v38, 7  ;;  %v10375_v28 = vld [vmem:[#allocation7 + $0x148] sm:$0xff]   ;;  %9890 = vmatprep.subr.bf16.mxu1 %v10374_v39 }
 0x701   : > { %v12723_v16 = vadd.f32 %v8546_v57, %v3706_v41  ;;  %v3807_v8 = vrot.slane %v12721_v10, 1  ;;  %v3783_v24 = vrot.slane %v12721_v10, 7  ;;  %v10376_v41 = vld [vmem:[#allocation7 + $0x150] sm:$0xff]  }
 0x702   : > { %v3810_v6 = vrot.slane %v12727_v62, 1  ;;  %v3786_v36 = vrot.slane %v12727_v62, 7  ;;  %v3835_v52 = vpack.c.bf16 %v12727_v62, %v12719_v38 }
 0x703   : > { %v3808_v30 = vrot.slane %v12723_v16, 1  ;;  %v3832_v20 = vpack.c.bf16 %v12723_v16, %v12721_v10  ;;  %v3784_v60 = vrot.slane %v12723_v16, 7 }
 0x704   : > { %v3819_v18 = vsel %vm1147_vm0, %v3809_v34, %v3810_v6  ;;  %v3795_v59 = vsel %vm1048_vm4, %v3785_v27, %v3786_v36 }
 0x705   : > { %v9864_v44 = vpop.f32.mrb[20].mxu1  ;;  %4025 = vmatprep.mubr.bf16.mxu0 %v3832_v20  ;;  %v3820_v12 = vsel %vm1147_vm0, %v3808_v30, %v3809_v34  ;;  %v3821_v9 = vsel %vm1147_vm0, %v3807_v8, %v3808_v30  ;;  %v3797_v19 = vsel %vm1048_vm4, %v3783_v24, %v3784_v60  ;;  %v3796_v21 = vsel %vm1048_vm4, %v3784_v60, %v3785_v27  ;;  %v10377_v34 = vld [vmem:[#allocation7 + $0x100] sm:$0xff]   ;;  %v10379_v30 = vld [vmem:[#allocation7 + $0x158] sm:$0xff]   ;;  %v10380_v20 = vld [vmem:[#allocation7 + $0x108] sm:$0xff]  }
 0x706   : > { %v3719_v25 = vpop.f32.mrb[21].mxu1  ;;  %v3833_v50 = vpack.c.bf16 %v3820_v12, %v3821_v9  ;;  %v12737_v53 = vadd.f32 %v9864_v44, %v8546_v57  ;;  %v3834_v5 = vpack.c.bf16 %v3795_v59, %v3796_v21  ;;  %9292 = vmatprep.subr.bf16.mxu0 %v10377_v34  ;;  %v10381_v44 = vld [vmem:[#allocation7 + $0xc8] sm:$0xff]   ;;  %v10382_v12 = vld [vmem:[#allocation7 + $0x160] sm:$0xff]   ;;  %v10383_v9 = vld [vmem:[#allocation7 + $0x110] sm:$0xff]  }
 0x707   : > { %v12739_v56 = vadd.f32 %v8546_v57, %v3719_v25  ;;  %v9865_v29 = vpop.f32.mrb[22].mxu1  ;;  %v10384_v25 = vld [vmem:[#allocation7 + $0xd0] sm:$0xff]  }
 0x708   : > { %v12742_v7 = vadd.f32 %v9865_v29, %v8546_v57  ;;  %v3722_v13 = vpop.f32.mrb[23].mxu1  ;;  %9882 = vmatprep.mubr.bf16.mxu1 %v3833_v50  ;;  %v3813_v55 = vrot.slane %v12737_v53, 1  ;;  %v3789_v35 = vrot.slane %v12737_v53, 7  ;;  %v10385_v50 = vld [vmem:[#allocation7 + $0x168] sm:$0xff]   ;;  %v10387_v29 = vld [vmem:[#allocation7 + $0xd8] sm:$0xff]   ;;  %v10388_v60 = vld [vmem:[#allocation7 + $0x170] sm:$0xff]  }
 0x709   : > { %v3811_v32 = vrot.slane %v12739_v56, 1  ;;  %v12745_v45 = vadd.f32 %v8546_v57, %v3722_v13  ;;  %v3787_v48 = vrot.slane %v12739_v56, 7  ;;  %v10389_v13 = vld [vmem:[#allocation7 + $0x120] sm:$0xff]  }
 0x70a   : > { %v3790_v51 = vrot.slane %v12742_v7, 7  ;;  %v3814_v49 = vrot.slane %v12742_v7, 1  ;;  %v3841_v22 = vpack.c.bf16 %v12742_v7, %v12737_v53 }
 0x70b   : > { %v3812_v61 = vrot.slane %v12745_v45, 1  ;;  %v3818_v1 = vsel %vm1147_vm0, %v3810_v6, %v3811_v32  ;;  %v3788_v14 = vrot.slane %v12745_v45, 7  ;;  %v3838_v54 = vpack.c.bf16 %v12745_v45, %v12739_v56  ;;  %v10386_v6 = vld [vmem:[#allocation7 + $0x118] sm:$0xff]  }
 0x70c   : > { %v3798_v40 = vsel %vm1048_vm4, %v3790_v51, %v3783_v24  ;;  %v3836_v58 = vpack.c.bf16 %v3818_v1, %v3819_v18  ;;  %v3815_v3 = vsel %vm1147_vm0, %v3813_v55, %v3814_v49  ;;  %v3822_v26 = vsel %vm1147_vm0, %v3814_v49, %v3807_v8  ;;  %v10378_v8 = vld [vmem:[#allocation7 + $0xc0] sm:$0xff]   ;;  %v10391_v24 = vld [vmem:[#allocation7 + $0x178] sm:$0xff]   ;;  %v10395_v1 = vld [vmem:[#allocation7 + $0xf0] sm:$0xff]  }
 0x70d   : > { %v8581_v31 = vpack.c.bf16 %v3797_v19, %v3798_v40  ;;  %v3816_v2 = vsel %vm1147_vm0, %v3812_v61, %v3813_v55  ;;  %v3817_v43 = vsel %vm1147_vm0, %v3811_v32, %v3812_v61  ;;  %v8584_v33 = vpack.c.bf16 %v3822_v26, %v3815_v3  ;;  %v10390_v32 = vld [vmem:[#allocation7 + $0xe0] sm:$0xff]   ;;  %v10393_v55 = vld [vmem:[#allocation7 + $0xe8] sm:$0xff]   ;;  %v10394_v61 = vld [vmem:[#allocation7 + $0x130] sm:$0xff]  }
 0x70e   : > { %9883 = vmatmul.mubr.bf16.vlgmr.msra.gmra.mrb[24].mxu1 %v3836_v58  ;;  %v3839_v47 = vpack.c.bf16 %v3816_v2, %v3817_v43  ;;  %v3793_v37 = vsel %vm1048_vm4, %v3787_v48, %v3788_v14  ;;  %v3794_v17 = vsel %vm1048_vm4, %v3786_v36, %v3787_v48  ;;  %v3791_v42 = vsel %vm1048_vm4, %v3789_v35, %v3790_v51  ;;  %v10392_v51 = vld [vmem:[#allocation7 + $0x128] sm:$0xff]   ;;  %v10396_v18 = vld [vmem:[#allocation7 + $0x138] sm:$0xff]  }
 0x70f   : > { %8582 = vmatmul.mubr.msk.bf16.vlgmr.msra.gmra.mrb[16].mxu0 %vm12762_vm15, %v8581_v31  ;;  %v3837_v15 = vpack.c.bf16 %v3793_v37, %v3794_v17  ;;  %v3792_v57 = vsel %vm1048_vm4, %v3788_v14, %v3789_v35  ;;  %9891 = vmatpush3.bf16.msra.mxu1 %v10374_v39  ;;  %v10397_v19 = vld [vmem:[#allocation7 + $0xf8] sm:$0xff]   ;;  %v12809_v31 = vld [vmem:[#allocation8] ss:$0 sm:$0xff] }
 0x710   : > { %4033 = vmatprep.mubr.bf16.mxu0 %v3835_v52  ;;  %9886 = vmatprep.mubr.bf16.mxu1 %v3839_v47  ;;  %v3840_v63 = vpack.c.bf16 %v3791_v42, %v3792_v57 }
 0x711   : > { %9892 = vmatprep.subr.bf16.mxu1 %v10375_v28  ;;  %9293 = vmatpush3.bf16.msra.mxu0 %v10378_v8 }
 0x712   : > { %9294 = vmatprep.subr.bf16.mxu0 %v10380_v20 }
 0x713   : > { %9893 = vmatpush3.bf16.msra.mxu1 %v10375_v28 }
 0x714   : > { %9894 = vmatprep.subr.bf16.mxu1 %v10376_v41 }
 0x715   : > { %9295 = vmatpush3.bf16.msra.mxu0 %v10381_v44 }
 0x716   : > { %9887 = vmatmul.mubr.msk.bf16.gmra.mrb[28].mxu1 %vm12788_vm3, %v8584_v33  ;;  %9296 = vmatprep.subr.bf16.mxu0 %v10383_v9 }
 0x717   : > { %4034 = vmatmul.mubr.bf16.gmra.mrb[20].mxu0 %v3834_v5  ;;  %9895 = vmatpush3.bf16.msra.mxu1 %v10376_v41 }
 0x718   : > { %4041 = vmatprep.mubr.bf16.mxu0 %v3838_v54  ;;  %9896 = vmatprep.subr.bf16.mxu1 %v10379_v30 }
 0x719   : > { %9297 = vmatpush3.bf16.msra.mxu0 %v10384_v25 }
 0x71a   : > { %9298 = vmatprep.subr.bf16.mxu0 %v10386_v6 }
 0x71b   : > { %9897 = vmatpush3.bf16.msra.mxu1 %v10379_v30 }
 0x71c   : > { %9898 = vmatprep.subr.bf16.mxu1 %v10382_v12 }
 0x71d   : > { %9299 = vmatpush3.bf16.msra.mxu0 %v10387_v29 }
 0x71e   : > { %9300 = vmatprep.subr.bf16.mxu0 %v10389_v13 }
 0x71f   : > { %4042 = vmatmul.mubr.bf16.gmra.mrb[24].mxu0 %v3837_v15  ;;  %9899 = vmatpush3.bf16.msra.mxu1 %v10382_v12 }
 0x720   : > { %4049 = vmatprep.mubr.bf16.mxu0 %v3841_v22  ;;  %9900 = vmatprep.subr.bf16.mxu1 %v10385_v50 }
 0x721   : > { %9301 = vmatpush3.bf16.msra.mxu0 %v10390_v32 }
 0x722   : > { %9302 = vmatprep.subr.bf16.mxu0 %v10392_v51 }
 0x723   : > { %9901 = vmatpush3.bf16.msra.mxu1 %v10385_v50 }
 0x724   : > { %9902 = vmatprep.subr.bf16.mxu1 %v10388_v60 }
 0x725   : > { %9303 = vmatpush3.bf16.msra.mxu0 %v10393_v55 }
 0x726   : > { %9304 = vmatprep.subr.bf16.mxu0 %v10394_v61 }
 0x727   : > { %4050 = vmatmul.mubr.bf16.gmra.mrb[28].mxu0 %v3840_v63  ;;  %9903 = vmatpush3.bf16.msra.mxu1 %v10388_v60 }
 0x728   : > { %9904 = vmatprep.subr.bf16.mxu1 %v10391_v24 }
 0x729   : > { %9305 = vmatpush3.bf16.msra.mxu0 %v10395_v1 }
 0x72a   : > { %9306 = vmatprep.subr.bf16.mxu0 %v10396_v18 }
 0x72b   : > { %9905 = vmatpush3.bf16.msra.mxu1 %v10391_v24 }
 0x72d   : > { %9307 = vmatpush3.bf16.msra.mxu0 %v10397_v19 }
 0x7e1   : > { %v9884_v40 = vpop.f32.mrb[24].mxu1 }
 0x7e2   : > { %v9256_v58 = vpop.f32.mrb[16].mxu0  ;;  %v4092_v49 = vpop.f32.mrb[25].mxu1 }
 0x7e3   : > { %v9257_v2 = vpop.f32.mrb[17].mxu0  ;;  %v9885_v43 = vpop.f32.mrb[26].mxu1 }
 0x7e4   : > { %v9258_v36 = vadd.f32 %v9257_v2, %v9256_v58  ;;  %v9259_v52 = vpop.f32.mrb[18].mxu0  ;;  %v4095_v47 = vpop.f32.mrb[27].mxu1 }
 0x7e5   : > { %v9260_v27 = vpop.f32.mrb[19].mxu0 }
 0x7e6   : > { %v4028_v3 = vadd.f32 %v9258_v36, %v12809_v31  ;;  %v9261_v26 = vadd.f32 %v9260_v27, %v9259_v52 }
 0x7e8   : > { %v4093_v59 = vadd.f32 %v4092_v49, %v4028_v3  ;;  %v4031_v21 = vadd.f32 %v9261_v26, %v12809_v31 }
 0x7e9   : > { %v9888_v33 = vpop.f32.mrb[28].mxu1 }
 0x7ea   : > { %v4123_v5 = vadd.f32 %v4093_v59, %v12721_v10  ;;  %v4096_v14 = vadd.f32 %v4095_v47, %v4031_v21  ;;  %v9262_v54 = vpop.f32.mrb[20].mxu0  ;;  %v4108_v48 = vpop.f32.mrb[29].mxu1 }
 0x7eb   : > { %v9263_v37 = vpop.f32.mrb[21].mxu0  ;;  %v9889_v17 = vpop.f32.mrb[30].mxu1 }
 0x7ec   : > { %v4131_v15 = vmul.f32 0.2, %v4123_v5  ;;  %v4124_v22 = vadd.f32 %v4096_v14, %v12723_v16  ;;  %v9264_v35 = vadd.f32 %v9263_v37, %v9262_v54  ;;  %v9265_v42 = vpop.f32.mrb[22].mxu0  ;;  %v4111_v57 = vpop.f32.mrb[31].mxu1 }
 0x7ed   : > { %v9266_v63 = vpop.f32.mrb[23].mxu0 }
 0x7ee   : > { %v4132_v39 = vmul.f32 0.2, %v4124_v22  ;;  %v4036_v28 = vadd.f32 %v9264_v35, %v12809_v31  ;;  %v9267_v41 = vadd.f32 %v9266_v63, %v9265_v42  ;;  %v12816_v34 = vmax.f32 %v4123_v5, %v4131_v15 }
 0x7f0   : > { %v12818_v8 = vmax.f32 %v4124_v22, %v4132_v39  ;;  %v4101_v10 = vadd.f32 %v9884_v40, %v4036_v28  ;;  %v4039_v30 = vadd.f32 %v9267_v41, %v12809_v31  ;;  %v4222_v1 = vrot.slane %v12816_v34, 3 }
 0x7f2   : > { %v4125_v20 = vadd.f32 %v4101_v10, %v12719_v38  ;;  %v4104_v44 = vadd.f32 %v9885_v43, %v4039_v30  ;;  %v9268_v12 = vpop.f32.mrb[24].mxu0  ;;  %v4247_v16 = vpack.c.bf16 %v12818_v8, %v12816_v34  ;;  %v4223_v13 = vrot.slane %v12818_v8, 3 }
 0x7f3   : > { %v9269_v9 = vpop.f32.mrb[25].mxu0  ;;  %v4199_v41 = vrot.slane %v12818_v8, 5 }
 0x7f4   : > { %v4133_v25 = vmul.f32 0.2, %v4125_v20  ;;  %v4126_v50 = vadd.f32 %v4104_v44, %v12727_v62  ;;  %v9270_v6 = vadd.f32 %v9269_v9, %v9268_v12  ;;  %v9271_v29 = vpop.f32.mrb[26].mxu0  ;;  %4440 = vmatprep.mubr.bf16.mxu0 %v4247_v16  ;;  %v4236_v2 = vsel %vm1303_vm6, %v4222_v1, %v4223_v13 }
 0x7f5   : > { %v9272_v60 = vpop.f32.mrb[27].mxu0 }
 0x7f6   : > { %v12826_v32 = vmax.f32 %v4125_v20, %v4133_v25  ;;  %v4134_v24 = vmul.f32 0.2, %v4126_v50  ;;  %v4044_v38 = vadd.f32 %v9270_v6, %v12809_v31  ;;  %v9273_v51 = vadd.f32 %v9272_v60, %v9271_v29 }
 0x7f8   : > { %v4109_v55 = vadd.f32 %v4108_v48, %v4044_v38  ;;  %v4047_v61 = vadd.f32 %v9273_v51, %v12809_v31  ;;  %v4224_v18 = vrot.slane %v12826_v32, 3  ;;  %v12832_v62 = vmax.f32 %v4126_v50, %v4134_v24 }
 0x7f9   : > { %v4200_v23 = vrot.slane %v12826_v32, 5 }
 0x7fa   : > { %v4127_v19 = vadd.f32 %v4109_v55, %v12739_v56  ;;  %v4112_v40 = vadd.f32 %v4111_v57, %v4047_v61  ;;  %v9274_v58 = vpop.f32.mrb[28].mxu0  ;;  %v4235_v49 = vsel %vm1303_vm6, %v4223_v13, %v4224_v18  ;;  %v4225_v26 = vrot.slane %v12832_v62, 3 }
 0x7fb   : > { %v9275_v43 = vpop.f32.mrb[29].mxu0  ;;  %v4248_v36 = vpack.c.bf16 %v4235_v49, %v4236_v2  ;;  %v4250_v13 = vpack.c.bf16 %v12832_v62, %v12826_v32  ;;  %v4201_v24 = vrot.slane %v12832_v62, 5  ;;  %v4211_v51 = vsel %vm885_vm2, %v4199_v41, %v4200_v23 }
 0x7fc   : > { %v4135_v52 = vmul.f32 0.2, %v4127_v19  ;;  %v4128_v47 = vadd.f32 %v4112_v40, %v12745_v45  ;;  %v9276_v27 = vadd.f32 %v9275_v43, %v9274_v58  ;;  %v9277_v3 = vpop.f32.mrb[30].mxu0  ;;  %v4234_v45 = vsel %vm1303_vm6, %v4224_v18, %v4225_v26 }
 0x7fd   : > { %v9278_v59 = vpop.f32.mrb[31].mxu0  ;;  %9906 = vmatprep.mubr.bf16.mxu1 %v4248_v36  ;;  %v4210_v38 = vsel %vm885_vm2, %v4200_v23, %v4201_v24 }
 0x7fe   : > { %v12841_v56 = vmax.f32 %v4127_v19, %v4135_v52  ;;  %v4136_v21 = vmul.f32 0.2, %v4128_v47  ;;  %v4052_v5 = vadd.f32 %v9276_v27, %v12809_v31  ;;  %v9279_v14 = vadd.f32 %v9278_v59, %v9277_v3  ;;  %v10399_v27 = vld [vmem:[#allocation7 + $0x208] sm:$0xff]   ;;  %v10400_v3 = vld [vmem:[#allocation7 + $0x1c0] sm:$0xff]   ;;  %v10402_v59 = vld [vmem:[#allocation7 + $0x210] sm:$0xff]  }
 0x7ff   : > { %v4249_v55 = vpack.c.bf16 %v4210_v38, %v4211_v51  ;;  %9344 = vmatprep.subr.bf16.mxu0 %v10400_v3 }
 0x800   : > { %v4226_v54 = vrot.slane %v12841_v56, 3  ;;  %v4117_v48 = vadd.f32 %v9888_v33, %v4052_v5  ;;  %v4055_v37 = vadd.f32 %v9279_v14, %v12809_v31  ;;  %v12848_v15 = vmax.f32 %v4128_v47, %v4136_v21  ;;  %v10398_v47 = vld [vmem:[#allocation7 + $0x200] sm:$0xff]   ;;  %v10403_v21 = vld [vmem:[#allocation7 + $0x1c8] sm:$0xff]   ;;  %v10405_v14 = vld [vmem:[#allocation7 + $0x218] sm:$0xff]  }
 0x801   : > { %v4202_v18 = vrot.slane %v12841_v56, 5  ;;  %9914 = vmatprep.subr.bf16.mxu1 %v10398_v47  ;;  %v10404_v5 = vld [vmem:[#allocation7 + $0x188] sm:$0xff]  }
 0x802   : > { %v4129_v22 = vadd.f32 %v4117_v48, %v12737_v53  ;;  %v4120_v35 = vadd.f32 %v9889_v17, %v4055_v37  ;;  %v4233_v42 = vsel %vm1303_vm6, %v4225_v26, %v4226_v54  ;;  %v4227_v31 = vrot.slane %v12848_v15, 3  ;;  %v10401_v26 = vld [vmem:[#allocation7 + $0x180] sm:$0xff]   ;;  %v10407_v48 = vld [vmem:[#allocation7 + $0x190] sm:$0xff]  }
 0x803   : > { %v4251_v57 = vpack.c.bf16 %v4233_v42, %v4234_v45  ;;  %v4198_v17 = vrot.slane %v12816_v34, 5  ;;  %v4253_v61 = vpack.c.bf16 %v12848_v15, %v12841_v56  ;;  %v4209_v40 = vsel %vm885_vm2, %v4201_v24, %v4202_v18  ;;  %v10408_v37 = vld [vmem:[#allocation7 + $0x220] sm:$0xff]   ;;  %v10409_v45 = vld [vmem:[#allocation7 + $0x1d8] sm:$0xff]  }
 0x804   : > { %v4137_v63 = vmul.f32 0.2, %v4129_v22  ;;  %v4130_v39 = vadd.f32 %v4120_v35, %v12742_v7  ;;  %v4232_v7 = vsel %vm1303_vm6, %v4226_v54, %v4227_v31  ;;  %v10406_v54 = vld [vmem:[#allocation7 + $0x1d0] sm:$0xff]   ;;  %v10411_v35 = vld [vmem:[#allocation7 + $0x228] sm:$0xff]   ;;  %v10412_v42 = vld [vmem:[#allocation7 + $0x1e0] sm:$0xff]  }
 0x805   : > { %9907 = vmatmul.mubr.bf16.vlgmr.msra.gmra.mrb[32].mxu1 %v4251_v57  ;;  %v4212_v9 = vsel %vm885_vm2, %v4198_v17, %v4199_v41  ;;  %v10413_v57 = vld [vmem:[#allocation7 + $0x1a0] sm:$0xff]   ;;  %v10418_v41 = vld [vmem:[#allocation7 + $0x1f0] sm:$0xff]  }
 0x806   : > { %v12854_v28 = vmax.f32 %v4129_v22, %v4137_v63  ;;  %v4138_v33 = vmul.f32 0.2, %v4130_v39  ;;  %9915 = vmatpush3.bf16.msra.mxu1 %v10398_v47  ;;  %v10410_v22 = vld [vmem:[#allocation7 + $0x198] sm:$0xff]   ;;  %v10414_v63 = vld [vmem:[#allocation7 + $0x230] sm:$0xff]  }
 0x807   : > { %9916 = vmatprep.subr.bf16.mxu1 %v10399_v27 }
 0x808   : > { %v12858_v10 = vmax.f32 %v4130_v39, %v4138_v33  ;;  %v4228_v53 = vrot.slane %v12854_v28, 3  ;;  %v4204_v2 = vrot.slane %v12854_v28, 5  ;;  %v10415_v39 = vld [vmem:[#allocation7 + $0x1e8] sm:$0xff]   ;;  %v10417_v33 = vld [vmem:[#allocation7 + $0x238] sm:$0xff]  }
 0x80a   : > { %v4205_v30 = vrot.slane %v12858_v10, 5  ;;  %v4231_v20 = vsel %vm1303_vm6, %v4227_v31, %v4228_v53  ;;  %v4229_v44 = vrot.slane %v12858_v10, 3  ;;  %v4256_v49 = vpack.c.bf16 %v12858_v10, %v12854_v28  ;;  %9917 = vmatpush3.bf16.msra.mxu1 %v10399_v27  ;;  %v10416_v31 = vld [vmem:[#allocation7 + $0x1a8] sm:$0xff]  }
 0x80b   : > { %v4254_v12 = vpack.c.bf16 %v4231_v20, %v4232_v7  ;;  %9918 = vmatprep.subr.bf16.mxu1 %v10402_v59 }
 0x80c   : > { %v4213_v25 = vsel %vm885_vm2, %v4205_v30, %v4198_v17  ;;  %v4230_v50 = vsel %vm1303_vm6, %v4228_v53, %v4229_v44  ;;  %v4237_v6 = vsel %vm1303_vm6, %v4229_v44, %v4222_v1  ;;  %v4203_v1 = vrot.slane %v12848_v15, 5  ;;  %v10419_v53 = vld [vmem:[#allocation7 + $0x1b0] sm:$0xff]   ;;  %v10420_v17 = vld [vmem:[#allocation7 + $0x1f8] sm:$0xff]  }
 0x80d   : > { %9910 = vmatprep.mubr.bf16.mxu1 %v4254_v12  ;;  %v8612_v29 = vpack.c.bf16 %v4212_v9, %v4213_v25  ;;  %v8615_v60 = vpack.c.bf16 %v4237_v6, %v4230_v50  ;;  %v4206_v43 = vsel %vm885_vm2, %v4204_v2, %v4205_v30  ;;  %v10421_v30 = vld [vmem:[#allocation7 + $0x1b8] sm:$0xff]   ;;  %v12919_v50 = vld [vmem:[#allocation8 + $0x1] ss:$0 sm:$0xff] }
 0x80e   : > { %v4208_v19 = vsel %vm885_vm2, %v4202_v18, %v4203_v1  ;;  %v4207_v36 = vsel %vm885_vm2, %v4203_v1, %v4204_v2  ;;  %9919 = vmatpush3.bf16.msra.mxu1 %v10402_v59 }
 0x80f   : > { %8613 = vmatmul.mubr.msk.bf16.vlgmr.msra.gmra.mrb[32].mxu0 %vm12871_vm1, %v8612_v29  ;;  %9911 = vmatmul.mubr.msk.bf16.gmra.mrb[36].mxu1 %vm12886_vm5, %v8615_v60  ;;  %v4252_v58 = vpack.c.bf16 %v4208_v19, %v4209_v40  ;;  %v4255_v52 = vpack.c.bf16 %v4206_v43, %v4207_v36 }
 0x810   : > { %4448 = vmatprep.mubr.bf16.mxu0 %v4250_v13  ;;  %9345 = vmatpush3.bf16.msra.mxu0 %v10401_v26 }
 0x811   : > { %9346 = vmatprep.subr.bf16.mxu0 %v10403_v21  ;;  %9920 = vmatprep.subr.bf16.mxu1 %v10405_v14 }
 0x812   : > { %9921 = vmatpush3.bf16.msra.mxu1 %v10405_v14 }
 0x813   : > { %9922 = vmatprep.subr.bf16.mxu1 %v10408_v37 }
 0x814   : > { %9347 = vmatpush3.bf16.msra.mxu0 %v10404_v5 }
 0x815   : > { %9348 = vmatprep.subr.bf16.mxu0 %v10406_v54 }
 0x816   : > { %9923 = vmatpush3.bf16.msra.mxu1 %v10408_v37 }
 0x817   : > { %4449 = vmatmul.mubr.bf16.gmra.mrb[36].mxu0 %v4249_v55  ;;  %9924 = vmatprep.subr.bf16.mxu1 %v10411_v35 }
 0x818   : > { %4456 = vmatprep.mubr.bf16.mxu0 %v4253_v61  ;;  %9349 = vmatpush3.bf16.msra.mxu0 %v10407_v48 }
 0x819   : > { %9350 = vmatprep.subr.bf16.mxu0 %v10409_v45 }
 0x81a   : > { %9925 = vmatpush3.bf16.msra.mxu1 %v10411_v35 }
 0x81b   : > { %9926 = vmatprep.subr.bf16.mxu1 %v10414_v63 }
 0x81c   : > { %9351 = vmatpush3.bf16.msra.mxu0 %v10410_v22 }
 0x81d   : > { %9352 = vmatprep.subr.bf16.mxu0 %v10412_v42 }
 0x81e   : > { %9927 = vmatpush3.bf16.msra.mxu1 %v10414_v63 }
 0x81f   : > { %4457 = vmatmul.mubr.bf16.gmra.mrb[40].mxu0 %v4252_v58  ;;  %9928 = vmatprep.subr.bf16.mxu1 %v10417_v33 }
 0x820   : > { %4464 = vmatprep.mubr.bf16.mxu0 %v4256_v49  ;;  %9353 = vmatpush3.bf16.msra.mxu0 %v10413_v57 }
 0x821   : > { %9354 = vmatprep.subr.bf16.mxu0 %v10415_v39 }
 0x822   : > { %9929 = vmatpush3.bf16.msra.mxu1 %v10417_v33 }
 0x824   : > { %9355 = vmatpush3.bf16.msra.mxu0 %v10416_v31 }
 0x825   : > { %9356 = vmatprep.subr.bf16.mxu0 %v10418_v41 }
 0x827   : > { %4465 = vmatmul.mubr.bf16.gmra.mrb[44].mxu0 %v4255_v52 }
 0x828   : > { %9357 = vmatpush3.bf16.msra.mxu0 %v10419_v53 }
 0x829   : > { %9358 = vmatprep.subr.bf16.mxu0 %v10420_v17 }
 0x82c   : > { %9359 = vmatpush3.bf16.msra.mxu0 %v10421_v30 }
 0x8d8   : > { %v9908_v20 = vpop.f32.mrb[32].mxu1 }
 0x8d9   : > { %v4507_v7 = vpop.f32.mrb[33].mxu1 }
 0x8da   : > { %v9909_v44 = vpop.f32.mrb[34].mxu1 }
 0x8db   : > { %v4510_v12 = vpop.f32.mrb[35].mxu1 }
 0x8e2   : > { %v9308_v9 = vpop.f32.mrb[32].mxu0  ;;  %v12917_v25 = vpop.f32.mrb[36].mxu1 }
 0x8e3   : > { %v9309_v6 = vpop.f32.mrb[33].mxu0  ;;  %v4523_v29 = vpop.f32.mrb[37].mxu1 }
 0x8e4   : > { %v9310_v60 = vadd.f32 %v9309_v6, %v9308_v9  ;;  %v9311_v13 = vpop.f32.mrb[34].mxu0  ;;  %v12921_v24 = vpop.f32.mrb[38].mxu1 }
 0x8e5   : > { %v9312_v23 = vpop.f32.mrb[35].mxu0  ;;  %v4526_v38 = vpop.f32.mrb[39].mxu1 }
 0x8e6   : > { %v4443_v51 = vadd.f32 %v9310_v60, %v12919_v50  ;;  %v9313_v55 = vadd.f32 %v9312_v23, %v9311_v13 }
 0x8e8   : > { %v4508_v61 = vadd.f32 %v4507_v7, %v4443_v51  ;;  %v4446_v1 = vadd.f32 %v9313_v55, %v12919_v50 }
 0x8ea   : > { %v4538_v18 = vadd.f32 %v4508_v61, %v12816_v34  ;;  %v4511_v19 = vadd.f32 %v4510_v12, %v4446_v1  ;;  %v9314_v40 = vpop.f32.mrb[36].mxu0 }
 0x8eb   : > { %v9315_v58 = vpop.f32.mrb[37].mxu0 }
 0x8ec   : > { %v4546_v49 = vmul.f32 0.2, %v4538_v18  ;;  %v4539_v2 = vadd.f32 %v4511_v19, %v12818_v8  ;;  %v9316_v43 = vadd.f32 %v9315_v58, %v9314_v40  ;;  %v9317_v36 = vpop.f32.mrb[38].mxu0  ;;  %v894_v40 = vadd.s32 8, %v11439_v11 }
 0x8ed   : > { %v9318_v52 = vpop.f32.mrb[39].mxu0  ;;  %v899_v58 = vadd.s32 48, %v11439_v11 }
 0x8ee   : > { %v4547_v47 = vmul.f32 0.2, %v4539_v2  ;;  %v4451_v27 = vadd.f32 %v9316_v43, %v12919_v50  ;;  %v9319_v3 = vadd.f32 %v9318_v52, %v9317_v36  ;;  %v12928_v26 = vmax.f32 %v4538_v18, %v4546_v49 }
 0x8f0   : > { %v12930_v59 = vmax.f32 %v4539_v2, %v4547_v47  ;;  %v4516_v21 = vadd.f32 %v9908_v20, %v4451_v27  ;;  %v4454_v34 = vadd.f32 %v9319_v3, %v12919_v50  ;;  %v4630_v27 = vadd.s32 4294967287, %v894_v40  ;;  %v10427_v40 = vld [vmem:[%s13932_s12 + $0x98] sm:$0xff]  }
 0x8f1   : > { %v4691_v3 = vadd.s32 9, %v899_v58  ;;  %v10428_v58 = vld [vmem:[%s13932_s12 + $0x48] sm:$0xff]  }
 0x8f2   : > { %v4540_v5 = vadd.f32 %v4516_v21, %v12826_v32  ;;  %v4519_v14 = vadd.f32 %v9909_v44, %v4454_v34  ;;  %v9320_v54 = vpop.f32.mrb[40].mxu0  ;;  %v4726_v8 = vpack.c.bf16 %v12930_v59, %v12928_v26  ;;  %v4670_v17 = vrot.slane %v12930_v59, 1 }
 0x8f3   : > { %v9321_v48 = vpop.f32.mrb[41].mxu0  ;;  %vm4638_vm7 = vcmp.ge.s32.totalorder %v4630_v27, 0  ;;  %vm4707_vm8 = vcmp.lt.s32.totalorder %v4691_v3, 64  ;;  %v10437_v27 = vld [vmem:[%s13932_s12 + $0x60] sm:$0xff]  }
 0x8f4   : > { %v4548_v37 = vmul.f32 0.2, %v4540_v5  ;;  %v4541_v45 = vadd.f32 %v4519_v14, %v12832_v62  ;;  %v9322_v22 = vadd.f32 %v9321_v48, %v9320_v54  ;;  %v9323_v35 = vpop.f32.mrb[42].mxu0  ;;  %4919 = vmatprep.mubr.bf16.mxu0 %v4726_v8  ;;  %v4669_v54 = vrot.slane %v12928_v26, 1  ;;  %vm12982_vm9 = vmpackc.low %vm4638_vm7, %vm11071_vm14  ;;  %v10438_v3 = vld [vmem:[%s13932_s12 + $0x20] sm:$0xff]  }
 0x8f5   : > { %v9324_v42 = vpop.f32.mrb[43].mxu0  ;;  %vm12994_vm10 = vmpackc.low %vm11071_vm14, %vm4707_vm8 }
 0x8f6   : > { %v12937_v57 = vmax.f32 %v4540_v5, %v4548_v37  ;;  %v4549_v63 = vmul.f32 0.2, %v4541_v45  ;;  %v4459_v39 = vadd.f32 %v9322_v22, %v12919_v50  ;;  %v9325_v33 = vadd.f32 %v9324_v42, %v9323_v35 }
 0x8f7   : > { %v11072_v35 = vmov 0.0  }
 0x8f8   : > { %v12940_v32 = vmax.f32 %v4541_v45, %v4549_v63  ;;  %v4524_v31 = vadd.f32 %v4523_v29, %v4459_v39  ;;  %v4462_v41 = vadd.f32 %v9325_v33, %v12919_v50  ;;  %v4671_v53 = vrot.slane %v12937_v57, 1 }
 0x8fa   : > { %v4542_v62 = vadd.f32 %v4524_v31, %v12841_v56  ;;  %v4527_v30 = vadd.f32 %v4526_v38, %v4462_v41  ;;  %v9326_v20 = vpop.f32.mrb[44].mxu0  ;;  %v4672_v7 = vrot.slane %v12940_v32, 1  ;;  %v4682_v12 = vsel %vm1147_vm0, %v4670_v17, %v4671_v53 }
 0x8fb   : > { %v9327_v44 = vpop.f32.mrb[45].mxu0  ;;  %v4729_v31 = vpack.c.bf16 %v12940_v32, %v12937_v57  ;;  %v4615_v41 = vrot.slane %v12937_v57, 7 }
 0x8fc   : > { %v4550_v9 = vmul.f32 0.2, %v4542_v62  ;;  %v4543_v6 = vadd.f32 %v4527_v30, %v12848_v15  ;;  %v9328_v29 = vadd.f32 %v9327_v44, %v9326_v20  ;;  %v9329_v60 = vpop.f32.mrb[46].mxu0  ;;  %v4681_v13 = vsel %vm1147_vm0, %v4671_v53, %v4672_v7 }
 0x8fd   : > { %v9330_v23 = vpop.f32.mrb[47].mxu0  ;;  %v4727_v51 = vpack.c.bf16 %v4681_v13, %v4682_v12  ;;  %v4614_v53 = vrot.slane %v12930_v59, 7  ;;  %v4616_v44 = vrot.slane %v12940_v32, 7 }
 0x8fe   : > { %v12952_v55 = vmax.f32 %v4542_v62, %v4550_v9  ;;  %v4551_v56 = vmul.f32 0.2, %v4543_v6  ;;  %v4467_v38 = vadd.f32 %v9328_v29, %v12919_v50  ;;  %v9331_v61 = vadd.f32 %v9330_v23, %v9329_v60 }
 0x8ff   : > { %9930 = vmatprep.mubr.bf16.mxu1 %v4727_v51  ;;  %v4626_v17 = vsel %vm1048_vm4, %v4614_v53, %v4615_v41  ;;  %v4625_v9 = vsel %vm1048_vm4, %v4615_v41, %v4616_v44 }
 0x900   : > { %v4673_v1 = vrot.slane %v12952_v55, 1  ;;  %v12956_v18 = vmax.f32 %v4543_v6, %v4551_v56  ;;  %v4532_v15 = vadd.f32 %v12917_v25, %v4467_v38  ;;  %v4470_v19 = vadd.f32 %v9331_v61, %v12919_v50  ;;  %v10422_v38 = vld [vmem:[%s13932_s12 + $0x80] sm:$0xff]   ;;  %v10423_v61 = vld [vmem:[%s13932_s12 + $0x88] sm:$0xff]  }
 0x901   : > { %9938 = vmatprep.subr.bf16.mxu1 %v10422_v38 }
 0x902   : > { %v4674_v49 = vrot.slane %v12956_v18, 1  ;;  %v4544_v2 = vadd.f32 %v4532_v15, %v12854_v28  ;;  %v4535_v43 = vadd.f32 %v12921_v24, %v4470_v19  ;;  %v4680_v25 = vsel %vm1147_vm0, %v4672_v7, %v4673_v1  ;;  %v10425_v15 = vld [vmem:[%s13932_s12 + $0x40] sm:$0xff]  }
 0x903   : > { %v4732_v20 = vpack.c.bf16 %v12956_v18, %v12952_v55  ;;  %v4617_v7 = vrot.slane %v12952_v55, 7  ;;  %v4618_v13 = vrot.slane %v12956_v18, 7  ;;  %v10426_v19 = vld [vmem:[%s13932_s12] sm:$0xff]   ;;  %9396 = vmatprep.subr.bf16.mxu0 %v10425_v15 }
 0x904   : > { %v4552_v36 = vmul.f32 0.2, %v4544_v2  ;;  %v4545_v52 = vadd.f32 %v4535_v43, %v12858_v10  ;;  %v4679_v47 = vsel %vm1147_vm0, %v4673_v1, %v4674_v49  ;;  %v4613_v10 = vrot.slane %v12928_v26, 7  ;;  %v10424_v1 = vld [vmem:[%s13932_s12 + $0x90] sm:$0xff]  }
 0x905   : > { %v4730_v50 = vpack.c.bf16 %v4679_v47, %v4680_v25  ;;  %v4624_v12 = vsel %vm1048_vm4, %v4616_v44, %v4617_v7  ;;  %v4623_v51 = vsel %vm1048_vm4, %v4617_v7, %v4618_v13  ;;  %v10431_v43 = vld [vmem:[%s13932_s12 + $0x50] sm:$0xff]   ;;  %v10434_v47 = vld [vmem:[%s13932_s12 + $0x58] sm:$0xff]  }
 0x906   : > { %v12970_v21 = vmax.f32 %v4544_v2, %v4552_v36  ;;  %v4553_v34 = vmul.f32 0.2, %v4545_v52  ;;  %v4627_v62 = vsel %vm1048_vm4, %v4613_v10, %v4614_v53  ;;  %v4731_v6 = vpack.c.bf16 %v4624_v12, %v4625_v9  ;;  %v10430_v2 = vld [vmem:[%s13932_s12 + $0xa0] sm:$0xff]   ;;  %v10432_v36 = vld [vmem:[%s13932_s12 + $0x10] sm:$0xff]   ;;  %v10435_v25 = vld [vmem:[%s13932_s12 + $0x18] sm:$0xff]  }
 0x907   : > { %9931 = vmatmul.mubr.bf16.vlgmr.msra.gmra.mrb[40].mxu1 %v4730_v50  ;;  %v4728_v30 = vpack.c.bf16 %v4626_v17, %v4627_v62  ;;  %v10436_v50 = vld [vmem:[%s13932_s12 + $0xb0] sm:$0xff]  }
 0x908   : > { %v12972_v5 = vmax.f32 %v4545_v52, %v4553_v34  ;;  %v4675_v28 = vrot.slane %v12970_v21, 1  ;;  %v4619_v60 = vrot.slane %v12970_v21, 7  ;;  %9939 = vmatpush3.bf16.msra.mxu1 %v10422_v38  ;;  %v10433_v52 = vld [vmem:[%s13932_s12 + $0xa8] sm:$0xff]   ;;  %v10439_v34 = vld [vmem:[%s13932_s12 + $0xb8] sm:$0xff]  }
 0x909   : > { %9940 = vmatprep.subr.bf16.mxu1 %v10423_v61 }
 0x90a   : > { %v4620_v24 = vrot.slane %v12972_v5, 7  ;;  %v4676_v14 = vrot.slane %v12972_v5, 1  ;;  %v4678_v45 = vsel %vm1147_vm0, %v4674_v49, %v4675_v28  ;;  %v4735_v29 = vpack.c.bf16 %v12972_v5, %v12970_v21  ;;  %v10429_v49 = vld [vmem:[%s13932_s12 + $0x8] sm:$0xff]  }
 0x90b   : > { %v4622_v23 = vsel %vm1048_vm4, %v4618_v13, %v4619_v60 }
 0x90c   : > { %v4628_v8 = vsel %vm1048_vm4, %v4620_v24, %v4613_v10  ;;  %v4677_v37 = vsel %vm1147_vm0, %v4675_v28, %v4676_v14  ;;  %v4684_v22 = vsel %vm1147_vm0, %v4676_v14, %v4669_v54  ;;  %v4734_v56 = vpack.c.bf16 %v4622_v23, %v4623_v51  ;;  %9941 = vmatpush3.bf16.msra.mxu1 %v10423_v61  ;;  %v10440_v28 = vld [vmem:[%s13932_s12 + $0x68] sm:$0xff]   ;;  %v10442_v24 = vld [vmem:[%s13932_s12 + $0x70] sm:$0xff]   ;;  %v10444_v54 = vld [vmem:[%s13932_s12 + $0x78] sm:$0xff]  }
 0x90d   : > { %v8643_v42 = vpack.c.bf16 %v4628_v8, %v11072_v35  ;;  %v4733_v63 = vpack.c.bf16 %v4677_v37, %v4678_v45  ;;  %v8646_v33 = vpack.c.bf16 %v11072_v35, %v4684_v22  ;;  %9942 = vmatprep.subr.bf16.mxu1 %v10424_v1  ;;  %v10441_v10 = vld [vmem:[%s13932_s12 + $0x28] sm:$0xff]   ;;  %v10443_v14 = vld [vmem:[%s13932_s12 + $0x30] sm:$0xff]   ;;  %v10445_v8 = vld [vmem:[%s13932_s12 + $0x38] sm:$0xff]  }
 0x90f   : > { %8644 = vmatmul.mubr.msk.bf16.vlgmr.msra.gmra.mrb[48].mxu0 %vm12982_vm9, %v8643_v42  ;;  %9934 = vmatprep.mubr.bf16.mxu1 %v4733_v63 }
 0x910   : > { %4927 = vmatprep.mubr.bf16.mxu0 %v4729_v31  ;;  %9935 = vmatmul.mubr.msk.bf16.gmra.mrb[44].mxu1 %vm12994_vm10, %v8646_v33  ;;  %v13099_v33 = vld [vmem:[#allocation8 + $0x2] ss:$0 sm:$0xff] }
 0x911   : > { %9943 = vmatpush3.bf16.msra.mxu1 %v10424_v1  ;;  %9397 = vmatpush3.bf16.msra.mxu0 %v10426_v19 }
 0x912   : > { %9944 = vmatprep.subr.bf16.mxu1 %v10427_v40  ;;  %9398 = vmatprep.subr.bf16.mxu0 %v10428_v58 }
 0x915   : > { %9945 = vmatpush3.bf16.msra.mxu1 %v10427_v40  ;;  %9399 = vmatpush3.bf16.msra.mxu0 %v10429_v49 }
 0x916   : > { %9946 = vmatprep.subr.bf16.mxu1 %v10430_v2  ;;  %9400 = vmatprep.subr.bf16.mxu0 %v10431_v43 }
 0x917   : > { %4928 = vmatmul.mubr.bf16.gmra.mrb[52].mxu0 %v4728_v30 }
 0x918   : > { %4935 = vmatprep.mubr.bf16.mxu0 %v4732_v20 }
 0x919   : > { %9947 = vmatpush3.bf16.msra.mxu1 %v10430_v2  ;;  %9401 = vmatpush3.bf16.msra.mxu0 %v10432_v36 }
 0x91a   : > { %9948 = vmatprep.subr.bf16.mxu1 %v10433_v52  ;;  %9402 = vmatprep.subr.bf16.mxu0 %v10434_v47 }
 0x91d   : > { %9949 = vmatpush3.bf16.msra.mxu1 %v10433_v52  ;;  %9403 = vmatpush3.bf16.msra.mxu0 %v10435_v25 }
 0x91e   : > { %9950 = vmatprep.subr.bf16.mxu1 %v10436_v50  ;;  %9404 = vmatprep.subr.bf16.mxu0 %v10437_v27 }
 0x91f   : > { %4936 = vmatmul.mubr.bf16.gmra.mrb[56].mxu0 %v4731_v6 }
 0x920   : > { %4943 = vmatprep.mubr.bf16.mxu0 %v4735_v29 }
 0x921   : > { %9951 = vmatpush3.bf16.msra.mxu1 %v10436_v50  ;;  %9405 = vmatpush3.bf16.msra.mxu0 %v10438_v3 }
 0x922   : > { %9952 = vmatprep.subr.bf16.mxu1 %v10439_v34  ;;  %9406 = vmatprep.subr.bf16.mxu0 %v10440_v28 }
 0x925   : > { %9953 = vmatpush3.bf16.msra.mxu1 %v10439_v34  ;;  %9407 = vmatpush3.bf16.msra.mxu0 %v10441_v10 }
 0x926   : > { %9408 = vmatprep.subr.bf16.mxu0 %v10442_v24 }
 0x927   : > { %4944 = vmatmul.mubr.bf16.gmra.mrb[60].mxu0 %v4734_v56 }
 0x929   : > { %9409 = vmatpush3.bf16.msra.mxu0 %v10443_v14 }
 0x92a   : > { %9410 = vmatprep.subr.bf16.mxu0 %v10444_v54 }
 0x92d   : > { %9411 = vmatpush3.bf16.msra.mxu0 %v10445_v8 }
 0x9da   : > { %v9932_v37 = vpop.f32.mrb[40].mxu1 }
 0x9db   : > { %v4986_v45 = vpop.f32.mrb[41].mxu1 }
 0x9dc   : > { %v9933_v22 = vpop.f32.mrb[42].mxu1 }
 0x9dd   : > { %v4989_v42 = vpop.f32.mrb[43].mxu1 }
 0x9e2   : > { %v9360_v63 = vpop.f32.mrb[48].mxu0 }
 0x9e3   : > { %v9361_v31 = vpop.f32.mrb[49].mxu0  ;;  %v13101_v41 = vpop.f32.mrb[44].mxu1 }
 0x9e4   : > { %v9362_v53 = vadd.f32 %v9361_v31, %v9360_v63  ;;  %v9363_v17 = vpop.f32.mrb[50].mxu0  ;;  %v5002_v62 = vpop.f32.mrb[45].mxu1 }
 0x9e5   : > { %v9364_v30 = vpop.f32.mrb[51].mxu0  ;;  %v13103_v20 = vpop.f32.mrb[46].mxu1 }
 0x9e6   : > { %v4922_v7 = vadd.f32 %v9362_v53, %v13099_v33  ;;  %v9365_v44 = vadd.f32 %v9364_v30, %v9363_v17  ;;  %v5005_v12 = vpop.f32.mrb[47].mxu1 }
 0x9e8   : > { %v4987_v9 = vadd.f32 %v4986_v45, %v4922_v7  ;;  %v4925_v6 = vadd.f32 %v9365_v44, %v13099_v33 }
 0x9ea   : > { %v5017_v29 = vadd.f32 %v4987_v9, %v12928_v26  ;;  %v4990_v60 = vadd.f32 %v4989_v42, %v4925_v6  ;;  %v9366_v13 = vpop.f32.mrb[52].mxu0 }
 0x9eb   : > { %v9367_v23 = vpop.f32.mrb[53].mxu0 }
 0x9ec   : > { %v5025_v51 = vmul.f32 0.2, %v5017_v29  ;;  %v5018_v56 = vadd.f32 %v4990_v60, %v12930_v59  ;;  %v9368_v38 = vadd.f32 %v9367_v23, %v9366_v13  ;;  %v9369_v61 = vpop.f32.mrb[54].mxu0 }
 0x9ed   : > { %v9370_v1 = vpop.f32.mrb[55].mxu0 }
 0x9ee   : > { %v5026_v15 = vmul.f32 0.2, %v5018_v56  ;;  %v4930_v19 = vadd.f32 %v9368_v38, %v13099_v33  ;;  %v9371_v40 = vadd.f32 %v9370_v1, %v9369_v61  ;;  %v13110_v58 = vmax.f32 %v5017_v29, %v5025_v51 }
 0x9f0   : > { %v13112_v49 = vmax.f32 %v5018_v56, %v5026_v15  ;;  %v4995_v2 = vadd.f32 %v9932_v37, %v4930_v19  ;;  %v4933_v26 = vadd.f32 %v9371_v40, %v13099_v33  ;;  %v5114_v37 = vrot.slane %v13110_v58, 1 }
 0x9f2   : > { %v5019_v43 = vadd.f32 %v4995_v2, %v12937_v57  ;;  %v4998_v36 = vadd.f32 %v9933_v22, %v4933_v26  ;;  %v9372_v52 = vpop.f32.mrb[56].mxu0  ;;  %v5139_v59 = vpack.c.bf16 %v13112_v49, %v13110_v58  ;;  %v5115_v28 = vrot.slane %v13112_v49, 1 }
 0x9f3   : > { %v9373_v47 = vpop.f32.mrb[57].mxu0 }
 0x9f4   : > { %v5027_v25 = vmul.f32 0.2, %v5019_v43  ;;  %v5020_v50 = vadd.f32 %v4998_v36, %v12940_v32  ;;  %v9374_v27 = vadd.f32 %v9373_v47, %v9372_v52  ;;  %v9375_v3 = vpop.f32.mrb[58].mxu0  ;;  %5332 = vmatprep.mubr.bf16.mxu0 %v5139_v59  ;;  %v5128_v53 = vsel %vm1147_vm0, %v5114_v37, %v5115_v28 }
 0x9f5   : > { %v9376_v34 = vpop.f32.mrb[59].mxu0 }
 0x9f6   : > { %v13120_v10 = vmax.f32 %v5019_v43, %v5027_v25  ;;  %v5028_v24 = vmul.f32 0.2, %v5020_v50  ;;  %v4938_v57 = vadd.f32 %v9374_v27, %v13099_v33  ;;  %v9377_v14 = vadd.f32 %v9376_v34, %v9375_v3 }
 0x9f7   : > { %v5091_v43 = vrot.slane %v13112_v49, 7 }
 0x9f8   : > { %v5003_v54 = vadd.f32 %v5002_v62, %v4938_v57  ;;  %v4941_v8 = vadd.f32 %v9377_v14, %v13099_v33  ;;  %v5116_v45 = vrot.slane %v13120_v10, 1  ;;  %v13126_v32 = vmax.f32 %v5020_v50, %v5028_v24 }
 0x9fa   : > { %v5021_v22 = vadd.f32 %v5003_v54, %v12952_v55  ;;  %v5006_v42 = vadd.f32 %v5005_v12, %v4941_v8  ;;  %v9378_v63 = vpop.f32.mrb[60].mxu0  ;;  %v5127_v31 = vsel %vm1147_vm0, %v5115_v28, %v5116_v45  ;;  %v5117_v6 = vrot.slane %v13126_v32, 1 }
 0x9fb   : > { %v9379_v17 = vpop.f32.mrb[61].mxu0  ;;  %v5140_v62 = vpack.c.bf16 %v5127_v31, %v5128_v53  ;;  %v5142_v57 = vpack.c.bf16 %v13126_v32, %v13120_v10  ;;  %v5093_v14 = vrot.slane %v13126_v32, 7  ;;  %v5092_v54 = vrot.slane %v13120_v10, 7 }
 0x9fc   : > { %v5029_v30 = vmul.f32 0.2, %v5021_v22  ;;  %v5022_v7 = vadd.f32 %v5006_v42, %v12956_v18  ;;  %v9380_v44 = vadd.f32 %v9379_v17, %v9378_v63  ;;  %v9381_v9 = vpop.f32.mrb[62].mxu0  ;;  %v5126_v18 = vsel %vm1147_vm0, %v5116_v45, %v5117_v6 }
 0x9fd   : > { %v9382_v29 = vpop.f32.mrb[63].mxu0  ;;  %9954 = vmatprep.mubr.bf16.mxu1 %v5140_v62  ;;  %v5102_v8 = vsel %vm1048_vm4, %v5092_v54, %v5093_v14 }
 0x9fe   : > { %v13135_v55 = vmax.f32 %v5021_v22, %v5029_v30  ;;  %v5030_v12 = vmul.f32 0.2, %v5022_v7  ;;  %v4946_v60 = vadd.f32 %v9380_v44, %v13099_v33  ;;  %v9383_v13 = vadd.f32 %v9382_v29, %v9381_v9  ;;  %v10447_v29 = vld [vmem:[%s13932_s12 + $0x148] sm:$0xff]  }
 0xa00   : > { %v5118_v23 = vrot.slane %v13135_v55, 1  ;;  %v5011_v51 = vadd.f32 %v13101_v41, %v4946_v60  ;;  %v4949_v56 = vadd.f32 %v9383_v13, %v13099_v33  ;;  %v13143_v38 = vmax.f32 %v5022_v7, %v5030_v12  ;;  %v10448_v12 = vld [vmem:[%s13932_s12 + $0x150] sm:$0xff]   ;;  %v10449_v60 = vld [vmem:[%s13932_s12 + $0x100] sm:$0xff]  }
 0xa01   : > { %v5094_v63 = vrot.slane %v13135_v55, 7  ;;  %v10450_v13 = vld [vmem:[%s13932_s12 + $0xc0] sm:$0xff]   ;;  %9448 = vmatprep.subr.bf16.mxu0 %v10449_v60 }
 0xa02   : > { %v5023_v61 = vadd.f32 %v5011_v51, %v12970_v21  ;;  %v5014_v1 = vadd.f32 %v13103_v20, %v4949_v56  ;;  %v5125_v15 = vsel %vm1147_vm0, %v5117_v6, %v5118_v23  ;;  %v5119_v26 = vrot.slane %v13143_v38, 1  ;;  %v10446_v6 = vld [vmem:[%s13932_s12 + $0x140] sm:$0xff]   ;;  %v10452_v51 = vld [vmem:[%s13932_s12 + $0x108] sm:$0xff]  }
 0xa03   : > { %v5143_v19 = vpack.c.bf16 %v5125_v15, %v5126_v18  ;;  %v5090_v20 = vrot.slane %v13110_v58, 7  ;;  %v5145_v22 = vpack.c.bf16 %v13143_v38, %v13135_v55  ;;  %v5095_v42 = vrot.slane %v13143_v38, 7  ;;  %9962 = vmatprep.subr.bf16.mxu1 %v10446_v6  ;;  %v10453_v56 = vld [vmem:[%s13932_s12 + $0xc8] sm:$0xff]   ;;  %v10454_v18 = vld [vmem:[%s13932_s12 + $0x160] sm:$0xff]  }
 0xa04   : > { %v5031_v40 = vmul.f32 0.2, %v5023_v61  ;;  %v5024_v2 = vadd.f32 %v5014_v1, %v12972_v5  ;;  %v5124_v5 = vsel %vm1147_vm0, %v5118_v23, %v5119_v26  ;;  %v5101_v53 = vsel %vm1048_vm4, %v5093_v14, %v5094_v63  ;;  %v10451_v23 = vld [vmem:[%s13932_s12 + $0x158] sm:$0xff]   ;;  %v10456_v1 = vld [vmem:[%s13932_s12 + $0xd0] sm:$0xff]   ;;  %v10457_v15 = vld [vmem:[%s13932_s12 + $0x168] sm:$0xff]  }
 0xa05   : > { %9955 = vmatmul.mubr.bf16.vlgmr.msra.gmra.mrb[48].mxu1 %v5143_v19  ;;  %v5104_v50 = vsel %vm1048_vm4, %v5090_v20, %v5091_v43  ;;  %v5100_v31 = vsel %vm1048_vm4, %v5094_v63, %v5095_v42  ;;  %v10458_v19 = vld [vmem:[%s13932_s12 + $0x118] sm:$0xff]  }
 0xa06   : > { %v13150_v41 = vmax.f32 %v5023_v61, %v5031_v40  ;;  %v5032_v33 = vmul.f32 0.2, %v5024_v2  ;;  %v5144_v17 = vpack.c.bf16 %v5100_v31, %v5101_v53  ;;  %9963 = vmatpush3.bf16.msra.mxu1 %v10446_v6  ;;  %v10455_v61 = vld [vmem:[%s13932_s12 + $0x110] sm:$0xff]   ;;  %v10459_v40 = vld [vmem:[%s13932_s12 + $0xd8] sm:$0xff]  }
 0xa07   : > { %9964 = vmatprep.subr.bf16.mxu1 %v10447_v29 }
 0xa08   : > { %v13154_v36 = vmax.f32 %v5024_v2, %v5032_v33  ;;  %v5120_v21 = vrot.slane %v13150_v41, 1  ;;  %v5096_v30 = vrot.slane %v13150_v41, 7  ;;  %v10460_v2 = vld [vmem:[%s13932_s12 + $0x170] sm:$0xff]   ;;  %v10461_v33 = vld [vmem:[%s13932_s12 + $0x120] sm:$0xff]  }
 0xa0a   : > { %v5097_v52 = vrot.slane %v13154_v36, 7  ;;  %v5123_v59 = vsel %vm1147_vm0, %v5119_v26, %v5120_v21  ;;  %v5121_v47 = vrot.slane %v13154_v36, 1  ;;  %v5148_v62 = vpack.c.bf16 %v13154_v36, %v13150_v41  ;;  %9965 = vmatpush3.bf16.msra.mxu1 %v10447_v29  ;;  %v10462_v26 = vld [vmem:[%s13932_s12 + $0xe0] sm:$0xff]  }
 0xa0b   : > { %v5146_v25 = vpack.c.bf16 %v5123_v59, %v5124_v5  ;;  %v5099_v44 = vsel %vm1048_vm4, %v5095_v42, %v5096_v30  ;;  %9966 = vmatprep.subr.bf16.mxu1 %v10448_v12  ;;  %v10467_v59 = vld [vmem:[%s13932_s12 + $0xf0] sm:$0xff]   ;;  %v10468_v5 = vld [vmem:[%s13932_s12 + $0x138] sm:$0xff]  }
 0xa0c   : > { %v5105_v27 = vsel %vm1048_vm4, %v5097_v52, %v5090_v20  ;;  %v5122_v3 = vsel %vm1147_vm0, %v5120_v21, %v5121_v47  ;;  %v5129_v34 = vsel %vm1147_vm0, %v5121_v47, %v5114_v37  ;;  %v5103_v37 = vsel %vm1048_vm4, %v5091_v43, %v5092_v54  ;;  %v10463_v43 = vld [vmem:[%s13932_s12 + $0x178] sm:$0xff]   ;;  %v10464_v21 = vld [vmem:[%s13932_s12 + $0x128] sm:$0xff]  }
 0xa0d   : > { %9958 = vmatprep.mubr.bf16.mxu1 %v5146_v25  ;;  %v8674_v28 = vpack.c.bf16 %v5104_v50, %v5105_v27  ;;  %v8677_v24 = vpack.c.bf16 %v5129_v34, %v5122_v3  ;;  %v5141_v45 = vpack.c.bf16 %v5102_v8, %v5103_v37  ;;  %v5098_v7 = vsel %vm1048_vm4, %v5096_v30, %v5097_v52  ;;  %v10465_v20 = vld [vmem:[%s13932_s12 + $0xe8] sm:$0xff]   ;;  %v10466_v52 = vld [vmem:[%s13932_s12 + $0x130] sm:$0xff]   ;;  %v10469_v47 = vld [vmem:[%s13932_s12 + $0xf8] sm:$0xff]  }
 0xa0e   : > { %v5147_v9 = vpack.c.bf16 %v5098_v7, %v5099_v44  ;;  %9967 = vmatpush3.bf16.msra.mxu1 %v10448_v12 }
 0xa0f   : > { %8675 = vmatmul.mubr.msk.bf16.vlgmr.msra.gmra.mrb[64].mxu0 %vm12762_vm15, %v8674_v28  ;;  %9959 = vmatmul.mubr.msk.bf16.gmra.mrb[52].mxu1 %vm12788_vm3, %v8677_v24  ;;  %v13276_v24 = vld [vmem:[%s13933_s13] ss:$0 sm:$0xff] }
 0xa10   : > { %5340 = vmatprep.mubr.bf16.mxu0 %v5142_v57  ;;  %9449 = vmatpush3.bf16.msra.mxu0 %v10450_v13 }
 0xa11   : > { %9968 = vmatprep.subr.bf16.mxu1 %v10451_v23  ;;  %9450 = vmatprep.subr.bf16.mxu0 %v10452_v51 }
 0xa12   : > { %9969 = vmatpush3.bf16.msra.mxu1 %v10451_v23 }
 0xa13   : > { %9970 = vmatprep.subr.bf16.mxu1 %v10454_v18 }
 0xa14   : > { %9451 = vmatpush3.bf16.msra.mxu0 %v10453_v56 }
 0xa15   : > { %9452 = vmatprep.subr.bf16.mxu0 %v10455_v61 }
 0xa16   : > { %9971 = vmatpush3.bf16.msra.mxu1 %v10454_v18 }
 0xa17   : > { %5341 = vmatmul.mubr.bf16.gmra.mrb[68].mxu0 %v5141_v45  ;;  %9972 = vmatprep.subr.bf16.mxu1 %v10457_v15 }
 0xa18   : > { %5348 = vmatprep.mubr.bf16.mxu0 %v5145_v22  ;;  %9453 = vmatpush3.bf16.msra.mxu0 %v10456_v1 }
 0xa19   : > { %9454 = vmatprep.subr.bf16.mxu0 %v10458_v19 }
 0xa1a   : > { %9973 = vmatpush3.bf16.msra.mxu1 %v10457_v15 }
 0xa1b   : > { %9974 = vmatprep.subr.bf16.mxu1 %v10460_v2 }
 0xa1c   : > { %9455 = vmatpush3.bf16.msra.mxu0 %v10459_v40 }
 0xa1d   : > { %9456 = vmatprep.subr.bf16.mxu0 %v10461_v33 }
 0xa1e   : > { %9975 = vmatpush3.bf16.msra.mxu1 %v10460_v2 }
 0xa1f   : > { %5349 = vmatmul.mubr.bf16.gmra.mrb[72].mxu0 %v5144_v17  ;;  %9976 = vmatprep.subr.bf16.mxu1 %v10463_v43 }
 0xa20   : > { %5356 = vmatprep.mubr.bf16.mxu0 %v5148_v62  ;;  %9457 = vmatpush3.bf16.msra.mxu0 %v10462_v26 }
 0xa21   : > { %9458 = vmatprep.subr.bf16.mxu0 %v10464_v21 }
 0xa22   : > { %9977 = vmatpush3.bf16.msra.mxu1 %v10463_v43 }
 0xa24   : > { %9459 = vmatpush3.bf16.msra.mxu0 %v10465_v20 }
 0xa25   : > { %9460 = vmatprep.subr.bf16.mxu0 %v10466_v52 }
 0xa27   : > { %5357 = vmatmul.mubr.bf16.gmra.mrb[76].mxu0 %v5147_v9 }
 0xa28   : > { %9461 = vmatpush3.bf16.msra.mxu0 %v10467_v59 }
 0xa29   : > { %9462 = vmatprep.subr.bf16.mxu0 %v10468_v5 }
 0xa2c   : > { %9463 = vmatpush3.bf16.msra.mxu0 %v10469_v47 }
 0xad8   : > { %v9956_v25 = vpop.f32.mrb[48].mxu1 }
 0xad9   : > { %v5399_v50 = vpop.f32.mrb[49].mxu1 }
 0xada   : > { %v9957_v27 = vpop.f32.mrb[50].mxu1 }
 0xadb   : > { %v5402_v3 = vpop.f32.mrb[51].mxu1 }
 0xae2   : > { %v9412_v34 = vpop.f32.mrb[64].mxu0  ;;  %v13271_v28 = vpop.f32.mrb[52].mxu1 }
 0xae3   : > { %v9413_v57 = vpop.f32.mrb[65].mxu0  ;;  %v5415_v14 = vpop.f32.mrb[53].mxu1 }
 0xae4   : > { %v9414_v54 = vadd.f32 %v9413_v57, %v9412_v34  ;;  %v9415_v8 = vpop.f32.mrb[66].mxu0  ;;  %v13278_v37 = vpop.f32.mrb[54].mxu1 }
 0xae5   : > { %v9416_v45 = vpop.f32.mrb[67].mxu0  ;;  %v5418_v22 = vpop.f32.mrb[55].mxu1 }
 0xae6   : > { %v5335_v42 = vadd.f32 %v9414_v54, %v13276_v24  ;;  %v9417_v63 = vadd.f32 %v9416_v45, %v9415_v8 }
 0xae8   : > { %v5400_v31 = vadd.f32 %v5399_v50, %v5335_v42  ;;  %v5338_v53 = vadd.f32 %v9417_v63, %v13276_v24 }
 0xaea   : > { %v5430_v17 = vadd.f32 %v5400_v31, %v13110_v58  ;;  %v5403_v62 = vadd.f32 %v5402_v3, %v5338_v53  ;;  %v9418_v30 = vpop.f32.mrb[68].mxu0 }
 0xaeb   : > { %v9419_v7 = vpop.f32.mrb[69].mxu0 }
 0xaec   : > { %v5438_v44 = vmul.f32 0.2, %v5430_v17  ;;  %v5431_v9 = vadd.f32 %v5403_v62, %v13112_v49  ;;  %v9420_v6 = vadd.f32 %v9419_v7, %v9418_v30  ;;  %v9421_v29 = vpop.f32.mrb[70].mxu0 }
 0xaed   : > { %v9422_v12 = vpop.f32.mrb[71].mxu0 }
 0xaee   : > { %v5439_v60 = vmul.f32 0.2, %v5431_v9  ;;  %v5343_v13 = vadd.f32 %v9420_v6, %v13276_v24  ;;  %v9423_v23 = vadd.f32 %v9422_v12, %v9421_v29  ;;  %v13285_v51 = vmax.f32 %v5430_v17, %v5438_v44 }
 0xaf0   : > { %v13287_v56 = vmax.f32 %v5431_v9, %v5439_v60  ;;  %v5408_v18 = vadd.f32 %v9956_v25, %v5343_v13  ;;  %v5346_v58 = vadd.f32 %v9423_v23, %v13276_v24  ;;  %v5529_v25 = vrot.slane %v13285_v51, 3 }
 0xaf2   : > { %v5432_v61 = vadd.f32 %v5408_v18, %v13120_v10  ;;  %v5411_v1 = vadd.f32 %v9957_v27, %v5346_v58  ;;  %v9424_v15 = vpop.f32.mrb[72].mxu0  ;;  %v5554_v49 = vpack.c.bf16 %v13287_v56, %v13285_v51  ;;  %v5530_v21 = vrot.slane %v13287_v56, 3 }
 0xaf3   : > { %v9425_v19 = vpop.f32.mrb[73].mxu0 }
 0xaf4   : > { %v5440_v40 = vmul.f32 0.2, %v5432_v61  ;;  %v5433_v2 = vadd.f32 %v5411_v1, %v13126_v32  ;;  %v9426_v33 = vadd.f32 %v9425_v19, %v9424_v15  ;;  %v9427_v26 = vpop.f32.mrb[74].mxu0  ;;  %5747 = vmatprep.mubr.bf16.mxu0 %v5554_v49  ;;  %v5543_v54 = vsel %vm1303_vm6, %v5529_v25, %v5530_v21 }
 0xaf5   : > { %v9428_v43 = vpop.f32.mrb[75].mxu0 }
 0xaf6   : > { %v13295_v20 = vmax.f32 %v5432_v61, %v5440_v40  ;;  %v5441_v52 = vmul.f32 0.2, %v5433_v2  ;;  %v5351_v10 = vadd.f32 %v9426_v33, %v13276_v24  ;;  %v9429_v59 = vadd.f32 %v9428_v43, %v9427_v26 }
 0xaf7   : > { %v5506_v61 = vrot.slane %v13287_v56, 5 }
 0xaf8   : > { %v5416_v5 = vadd.f32 %v5415_v14, %v5351_v10  ;;  %v5354_v47 = vadd.f32 %v9429_v59, %v13276_v24  ;;  %v5531_v50 = vrot.slane %v13295_v20, 3  ;;  %v13301_v32 = vmax.f32 %v5433_v2, %v5441_v52 }
 0xafa   : > { %v5434_v27 = vadd.f32 %v5416_v5, %v13135_v55  ;;  %v5419_v3 = vadd.f32 %v5418_v22, %v5354_v47  ;;  %v9430_v34 = vpop.f32.mrb[76].mxu0  ;;  %v5542_v57 = vsel %vm1303_vm6, %v5530_v21, %v5531_v50  ;;  %v5532_v53 = vrot.slane %v13301_v32, 3 }
 0xafb   : > { %v9431_v8 = vpop.f32.mrb[77].mxu0  ;;  %v5555_v14 = vpack.c.bf16 %v5542_v57, %v5543_v54  ;;  %v5557_v10 = vpack.c.bf16 %v13301_v32, %v13295_v20  ;;  %v5508_v59 = vrot.slane %v13301_v32, 5  ;;  %v5507_v5 = vrot.slane %v13295_v20, 5 }
 0xafc   : > { %v5442_v45 = vmul.f32 0.2, %v5434_v27  ;;  %v5435_v42 = vadd.f32 %v5419_v3, %v13143_v38  ;;  %v9432_v63 = vadd.f32 %v9431_v8, %v9430_v34  ;;  %v9433_v31 = vpop.f32.mrb[78].mxu0  ;;  %v5541_v38 = vsel %vm1303_vm6, %v5531_v50, %v5532_v53 }
 0xafd   : > { %v9434_v17 = vpop.f32.mrb[79].mxu0  ;;  %9978 = vmatprep.mubr.bf16.mxu1 %v5555_v14  ;;  %v5517_v47 = vsel %vm885_vm2, %v5507_v5, %v5508_v59 }
 0xafe   : > { %v13310_v55 = vmax.f32 %v5434_v27, %v5442_v45  ;;  %v5443_v22 = vmul.f32 0.2, %v5435_v42  ;;  %v5359_v62 = vadd.f32 %v9432_v63, %v13276_v24  ;;  %v9435_v30 = vadd.f32 %v9434_v17, %v9433_v31  ;;  %v10470_v63 = vld [vmem:[%s13932_s12 + $0x200] sm:$0xff]   ;;  %v10471_v31 = vld [vmem:[%s13932_s12 + $0x208] sm:$0xff]  }
 0xaff   : > { %9986 = vmatprep.subr.bf16.mxu1 %v10470_v63  ;;  %v10473_v17 = vld [vmem:[%s13932_s12 + $0x180] sm:$0xff]  }
 0xb00   : > { %v5533_v7 = vrot.slane %v13310_v55, 3  ;;  %v5424_v44 = vadd.f32 %v13271_v28, %v5359_v62  ;;  %v5362_v9 = vadd.f32 %v9435_v30, %v13276_v24  ;;  %v13318_v6 = vmax.f32 %v5435_v42, %v5443_v22  ;;  %v10474_v22 = vld [vmem:[%s13932_s12 + $0x210] sm:$0xff]   ;;  %v10475_v62 = vld [vmem:[%s13932_s12 + $0x1c8] sm:$0xff]  }
 0xb01   : > { %v5509_v16 = vrot.slane %v13310_v55, 5  ;;  %v10476_v30 = vld [vmem:[%s13932_s12 + $0x188] sm:$0xff]  }
 0xb02   : > { %v5436_v29 = vadd.f32 %v5424_v44, %v13150_v41  ;;  %v5427_v12 = vadd.f32 %v13278_v37, %v5362_v9  ;;  %v5540_v60 = vsel %vm1303_vm6, %v5532_v53, %v5533_v7  ;;  %v5534_v58 = vrot.slane %v13318_v6, 3  ;;  %v10472_v53 = vld [vmem:[%s13932_s12 + $0x1c0] sm:$0xff]   ;;  %v10478_v44 = vld [vmem:[%s13932_s12 + $0x1d0] sm:$0xff]  }
 0xb03   : > { %v5558_v13 = vpack.c.bf16 %v5540_v60, %v5541_v38  ;;  %v5505_v37 = vrot.slane %v13285_v51, 5  ;;  %v5560_v27 = vpack.c.bf16 %v13318_v6, %v13310_v55  ;;  %v5510_v3 = vrot.slane %v13318_v6, 5  ;;  %9500 = vmatprep.subr.bf16.mxu0 %v10472_v53  ;;  %v10479_v9 = vld [vmem:[%s13932_s12 + $0x190] sm:$0xff]   ;;  %v10480_v38 = vld [vmem:[%s13932_s12 + $0x220] sm:$0xff]   ;;  %v10483_v60 = vld [vmem:[%s13932_s12 + $0x228] sm:$0xff]  }
 0xb04   : > { %v5444_v23 = vmul.f32 0.2, %v5436_v29  ;;  %v5437_v18 = vadd.f32 %v5427_v12, %v13154_v36  ;;  %v5539_v36 = vsel %vm1303_vm6, %v5533_v7, %v5534_v58  ;;  %v5516_v34 = vsel %vm885_vm2, %v5508_v59, %v5509_v16  ;;  %v10477_v7 = vld [vmem:[%s13932_s12 + $0x218] sm:$0xff]  }
 0xb05   : > { %9979 = vmatmul.mubr.bf16.vlgmr.msra.gmra.mrb[56].mxu1 %v5558_v13  ;;  %v5519_v2 = vsel %vm885_vm2, %v5505_v37, %v5506_v61  ;;  %v5515_v46 = vsel %vm885_vm2, %v5509_v16, %v5510_v3  ;;  %v10482_v12 = vld [vmem:[%s13932_s12 + $0x198] sm:$0xff]   ;;  %v10484_v13 = vld [vmem:[%s13932_s12 + $0x1e0] sm:$0xff]  }
 0xb06   : > { %v13325_v28 = vmax.f32 %v5436_v29, %v5444_v23  ;;  %v5445_v24 = vmul.f32 0.2, %v5437_v18  ;;  %v5559_v57 = vpack.c.bf16 %v5515_v46, %v5516_v34  ;;  %9987 = vmatpush3.bf16.msra.mxu1 %v10470_v63  ;;  %v10481_v29 = vld [vmem:[%s13932_s12 + $0x1d8] sm:$0xff]   ;;  %v10485_v23 = vld [vmem:[%s13932_s12 + $0x1a0] sm:$0xff]  }
 0xb07   : > { %9988 = vmatprep.subr.bf16.mxu1 %v10471_v31 }
 0xb08   : > { %v13329_v1 = vmax.f32 %v5437_v18, %v5445_v24  ;;  %v5535_v41 = vrot.slane %v13325_v28, 3  ;;  %v5511_v8 = vrot.slane %v13325_v28, 5  ;;  %v10486_v18 = vld [vmem:[%s13932_s12 + $0x230] sm:$0xff]   ;;  %v10487_v24 = vld [vmem:[%s13932_s12 + $0x1e8] sm:$0xff]  }
 0xb0a   : > { %v5512_v15 = vrot.slane %v13329_v1, 5  ;;  %v5538_v49 = vsel %vm1303_vm6, %v5534_v58, %v5535_v41  ;;  %v5536_v19 = vrot.slane %v13329_v1, 3  ;;  %v5563_v54 = vpack.c.bf16 %v13329_v1, %v13325_v28  ;;  %9989 = vmatpush3.bf16.msra.mxu1 %v10471_v31  ;;  %v10489_v58 = vld [vmem:[%s13932_s12 + $0x238] sm:$0xff]  }
 0xb0b   : > { %v5561_v40 = vpack.c.bf16 %v5538_v49, %v5539_v36  ;;  %v5514_v45 = vsel %vm885_vm2, %v5510_v3, %v5511_v8  ;;  %9990 = vmatprep.subr.bf16.mxu1 %v10474_v22  ;;  %v10493_v49 = vld [vmem:[%s13932_s12 + $0x1b8] sm:$0xff]  }
 0xb0c   : > { %v5520_v33 = vsel %vm885_vm2, %v5512_v15, %v5505_v37  ;;  %v5537_v26 = vsel %vm1303_vm6, %v5535_v41, %v5536_v19  ;;  %v5544_v43 = vsel %vm1303_vm6, %v5536_v19, %v5529_v25  ;;  %v5518_v25 = vsel %vm885_vm2, %v5506_v61, %v5507_v5  ;;  %v10488_v61 = vld [vmem:[%s13932_s12 + $0x1a8] sm:$0xff]   ;;  %v10490_v41 = vld [vmem:[%s13932_s12 + $0x1f0] sm:$0xff]  }
 0xb0d   : > { %9982 = vmatprep.mubr.bf16.mxu1 %v5561_v40  ;;  %v8754_v21 = vpack.c.bf16 %v5519_v2, %v5520_v33  ;;  %v8757_v52 = vpack.c.bf16 %v5544_v43, %v5537_v26  ;;  %v5556_v50 = vpack.c.bf16 %v5517_v47, %v5518_v25  ;;  %v5513_v14 = vsel %vm885_vm2, %v5511_v8, %v5512_v15  ;;  %v10491_v37 = vld [vmem:[%s13932_s12 + $0x1b0] sm:$0xff]   ;;  %v10492_v15 = vld [vmem:[%s13932_s12 + $0x1f8] sm:$0xff]   ;;  %v13451_v43 = vld [vmem:[%s13933_s13 + $0x1] ss:$0 sm:$0xff] }
 0xb0e   : > { %v5562_v42 = vpack.c.bf16 %v5513_v14, %v5514_v45  ;;  %9991 = vmatpush3.bf16.msra.mxu1 %v10474_v22 }
 0xb0f   : > { %8755 = vmatmul.mubr.msk.bf16.vlgmr.msra.gmra.mrb[80].mxu0 %vm12871_vm1, %v8754_v21  ;;  %9983 = vmatmul.mubr.msk.bf16.gmra.mrb[60].mxu1 %vm12886_vm5, %v8757_v52 }
 0xb10   : > { %5755 = vmatprep.mubr.bf16.mxu0 %v5557_v10  ;;  %9501 = vmatpush3.bf16.msra.mxu0 %v10473_v17 }
 0xb11   : > { %9502 = vmatprep.subr.bf16.mxu0 %v10475_v62  ;;  %9992 = vmatprep.subr.bf16.mxu1 %v10477_v7 }
 0xb12   : > { %9993 = vmatpush3.bf16.msra.mxu1 %v10477_v7 }
 0xb13   : > { %9994 = vmatprep.subr.bf16.mxu1 %v10480_v38 }
 0xb14   : > { %9503 = vmatpush3.bf16.msra.mxu0 %v10476_v30 }
 0xb15   : > { %9504 = vmatprep.subr.bf16.mxu0 %v10478_v44 }
 0xb16   : > { %9995 = vmatpush3.bf16.msra.mxu1 %v10480_v38 }
 0xb17   : > { %5756 = vmatmul.mubr.bf16.gmra.mrb[84].mxu0 %v5556_v50  ;;  %9996 = vmatprep.subr.bf16.mxu1 %v10483_v60 }
 0xb18   : > { %5763 = vmatprep.mubr.bf16.mxu0 %v5560_v27  ;;  %9505 = vmatpush3.bf16.msra.mxu0 %v10479_v9 }
 0xb19   : > { %9506 = vmatprep.subr.bf16.mxu0 %v10481_v29 }
 0xb1a   : > { %9997 = vmatpush3.bf16.msra.mxu1 %v10483_v60 }
 0xb1b   : > { %9998 = vmatprep.subr.bf16.mxu1 %v10486_v18 }
 0xb1c   : > { %9507 = vmatpush3.bf16.msra.mxu0 %v10482_v12 }
 0xb1d   : > { %9508 = vmatprep.subr.bf16.mxu0 %v10484_v13 }
 0xb1e   : > { %9999 = vmatpush3.bf16.msra.mxu1 %v10486_v18 }
 0xb1f   : > { %5764 = vmatmul.mubr.bf16.gmra.mrb[88].mxu0 %v5559_v57  ;;  %10000 = vmatprep.subr.bf16.mxu1 %v10489_v58 }
 0xb20   : > { %5771 = vmatprep.mubr.bf16.mxu0 %v5563_v54  ;;  %9509 = vmatpush3.bf16.msra.mxu0 %v10485_v23 }
 0xb21   : > { %9510 = vmatprep.subr.bf16.mxu0 %v10487_v24 }
 0xb22   : > { %10001 = vmatpush3.bf16.msra.mxu1 %v10489_v58 }
 0xb24   : > { %9511 = vmatpush3.bf16.msra.mxu0 %v10488_v61 }
 0xb25   : > { %9512 = vmatprep.subr.bf16.mxu0 %v10490_v41 }
 0xb27   : > { %5772 = vmatmul.mubr.bf16.gmra.mrb[92].mxu0 %v5562_v42 }
 0xb28   : > { %9513 = vmatpush3.bf16.msra.mxu0 %v10491_v37 }
 0xb29   : > { %9514 = vmatprep.subr.bf16.mxu0 %v10492_v15 }
 0xb2c   : > { %9515 = vmatpush3.bf16.msra.mxu0 %v10493_v49 }
 0xbd8   : > { %v9980_v36 = vpop.f32.mrb[56].mxu1 }
 0xbd9   : > { %v5814_v19 = vpop.f32.mrb[57].mxu1 }
 0xbda   : > { %v9981_v40 = vpop.f32.mrb[58].mxu1 }
 0xbdb   : > { %v5817_v2 = vpop.f32.mrb[59].mxu1 }
 0xbe2   : > { %v9464_v33 = vpop.f32.mrb[80].mxu0  ;;  %v13446_v26 = vpop.f32.mrb[60].mxu1 }
 0xbe3   : > { %v9465_v21 = vpop.f32.mrb[81].mxu0  ;;  %v5830_v52 = vpop.f32.mrb[61].mxu1 }
 0xbe4   : > { %v9466_v10 = vadd.f32 %v9465_v21, %v9464_v33  ;;  %v9467_v59 = vpop.f32.mrb[82].mxu0  ;;  %v13453_v5 = vpop.f32.mrb[62].mxu1 }
 0xbe5   : > { %v9468_v47 = vpop.f32.mrb[83].mxu0  ;;  %v5833_v25 = vpop.f32.mrb[63].mxu1 }
 0xbe6   : > { %v5750_v50 = vadd.f32 %v9466_v10, %v13451_v43  ;;  %v9469_v27 = vadd.f32 %v9468_v47, %v9467_v59 }
 0xbe8   : > { %v5815_v3 = vadd.f32 %v5814_v19, %v5750_v50  ;;  %v5753_v16 = vadd.f32 %v9469_v27, %v13451_v43 }
 0xbea   : > { %v5845_v46 = vadd.f32 %v5815_v3, %v13285_v51  ;;  %v5818_v34 = vadd.f32 %v5817_v2, %v5753_v16  ;;  %v9470_v57 = vpop.f32.mrb[84].mxu0 }
 0xbeb   : > { %v9471_v54 = vpop.f32.mrb[85].mxu0 }
 0xbec   : > { %v5853_v8 = vmul.f32 0.2, %v5845_v46  ;;  %v5846_v14 = vadd.f32 %v5818_v34, %v13287_v56  ;;  %v9472_v45 = vadd.f32 %v9471_v54, %v9470_v57  ;;  %v9473_v42 = vpop.f32.mrb[86].mxu0 }
 0xbed   : > { %v9474_v63 = vpop.f32.mrb[87].mxu0 }
 0xbee   : > { %v5854_v31 = vmul.f32 0.2, %v5846_v14  ;;  %v5758_v53 = vadd.f32 %v9472_v45, %v13451_v43  ;;  %v9475_v17 = vadd.f32 %v9474_v63, %v9473_v42  ;;  %v13460_v22 = vmax.f32 %v5845_v46, %v5853_v8 }
 0xbf0   : > { %v13462_v62 = vmax.f32 %v5846_v14, %v5854_v31  ;;  %v5823_v30 = vadd.f32 %v9980_v36, %v5758_v53  ;;  %v5761_v51 = vadd.f32 %v9475_v17, %v13451_v43 }
 0xbf2   : > { %v5847_v7 = vadd.f32 %v5823_v30, %v13295_v20  ;;  %v5826_v44 = vadd.f32 %v9981_v40, %v5761_v51  ;;  %v9476_v9 = vpop.f32.mrb[88].mxu0  ;;  %v5969_v56 = vpack.c.bf16 %v13462_v62, %v13460_v22  ;;  %v5945_v49 = vrot.slane %v13462_v62, 1 }
 0xbf3   : > { %v9477_v38 = vpop.f32.mrb[89].mxu0  ;;  %v5944_v51 = vrot.slane %v13460_v22, 1 }
 0xbf4   : > { %v5855_v29 = vmul.f32 0.2, %v5847_v7  ;;  %v5848_v12 = vadd.f32 %v5826_v44, %v13301_v32  ;;  %v9478_v60 = vadd.f32 %v9477_v38, %v9476_v9  ;;  %v9479_v13 = vpop.f32.mrb[90].mxu0  ;;  %6162 = vmatprep.mubr.bf16.mxu0 %v5969_v56 }
 0xbf5   : > { %v9480_v23 = vpop.f32.mrb[91].mxu0 }
 0xbf6   : > { %v13469_v18 = vmax.f32 %v5847_v7, %v5855_v29  ;;  %v5856_v24 = vmul.f32 0.2, %v5848_v12  ;;  %v5766_v58 = vadd.f32 %v9478_v60, %v13451_v43  ;;  %v9481_v61 = vadd.f32 %v9480_v23, %v9479_v13 }
 0xbf7   : > { %v5921_v23 = vrot.slane %v13462_v62, 7 }
 0xbf8   : > { %v13472_v20 = vmax.f32 %v5848_v12, %v5856_v24  ;;  %v5831_v41 = vadd.f32 %v5830_v52, %v5766_v58  ;;  %v5769_v37 = vadd.f32 %v9481_v61, %v13451_v43  ;;  %v5946_v15 = vrot.slane %v13469_v18, 1 }
 0xbf9   : > { %v5922_v13 = vrot.slane %v13469_v18, 7 }
 0xbfa   : > { %v5849_v32 = vadd.f32 %v5831_v41, %v13310_v55  ;;  %v5834_v36 = vadd.f32 %v5833_v25, %v5769_v37  ;;  %v9482_v19 = vpop.f32.mrb[92].mxu0  ;;  %v5947_v40 = vrot.slane %v13472_v20, 1  ;;  %v5957_v33 = vsel %vm1147_vm0, %v5945_v49, %v5946_v15 }
 0xbfb   : > { %v9483_v2 = vpop.f32.mrb[93].mxu0  ;;  %v5972_v60 = vpack.c.bf16 %v13472_v20, %v13469_v18  ;;  %v5933_v24 = vsel %vm1048_vm4, %v5921_v23, %v5922_v13  ;;  %v5923_v41 = vrot.slane %v13472_v20, 7 }
 0xbfc   : > { %v5857_v21 = vmul.f32 0.2, %v5849_v32  ;;  %v5850_v10 = vadd.f32 %v5834_v36, %v13318_v6  ;;  %v9484_v52 = vadd.f32 %v9483_v2, %v9482_v19  ;;  %v9485_v59 = vpop.f32.mrb[94].mxu0  ;;  %v5956_v47 = vsel %vm1147_vm0, %v5946_v15, %v5947_v40 }
 0xbfd   : > { %v9486_v50 = vpop.f32.mrb[95].mxu0  ;;  %v5970_v27 = vpack.c.bf16 %v5956_v47, %v5957_v33  ;;  %v5932_v37 = vsel %vm1048_vm4, %v5922_v13, %v5923_v41  ;;  %v10494_v33 = vld [vmem:[%s13932_s12 + $0x2c0] sm:$0xff]   ;;  %v10499_v47 = vld [vmem:[%s13932_s12 + $0x2d8] sm:$0xff]  }
 0xbfe   : > { %v13484_v3 = vmax.f32 %v5849_v32, %v5857_v21  ;;  %v5858_v55 = vmul.f32 0.2, %v5850_v10  ;;  %v5774_v25 = vadd.f32 %v9484_v52, %v13451_v43  ;;  %v9487_v16 = vadd.f32 %v9486_v50, %v9485_v59  ;;  %v10495_v21 = vld [vmem:[%s13932_s12 + $0x2c8] sm:$0xff]   ;;  %10010 = vmatprep.subr.bf16.mxu1 %v10494_v33  ;;  %v10497_v52 = vld [vmem:[%s13932_s12 + $0x280] sm:$0xff]  }
 0xbff   : > { %10002 = vmatprep.mubr.bf16.mxu1 %v5970_v27  ;;  %v10498_v59 = vld [vmem:[%s13932_s12 + $0x240] sm:$0xff]   ;;  %v10500_v50 = vld [vmem:[%s13932_s12 + $0x288] sm:$0xff]   ;;  %9552 = vmatprep.subr.bf16.mxu0 %v10497_v52 }
 0xc00   : > { %v5948_v46 = vrot.slane %v13484_v3, 1  ;;  %v13488_v34 = vmax.f32 %v5850_v10, %v5858_v55  ;;  %v5839_v6 = vadd.f32 %v13446_v26, %v5774_v25  ;;  %v5777_v57 = vadd.f32 %v9487_v16, %v13451_v43  ;;  %v10496_v10 = vld [vmem:[%s13932_s12 + $0x2d0] sm:$0xff]   ;;  %v10501_v27 = vld [vmem:[%s13932_s12 + $0x248] sm:$0xff]   ;;  %v10502_v55 = vld [vmem:[%s13932_s12 + $0x2e0] sm:$0xff]  }
 0xc01   : > { %v5924_v48 = vrot.slane %v13484_v3, 7  ;;  %v10503_v25 = vld [vmem:[%s13932_s12 + $0x290] sm:$0xff]  }
 0xc02   : > { %v5949_v54 = vrot.slane %v13488_v34, 1  ;;  %v5851_v8 = vadd.f32 %v5839_v6, %v13325_v28  ;;  %v5842_v14 = vadd.f32 %v13453_v5, %v5777_v57  ;;  %v5955_v31 = vsel %vm1147_vm0, %v5947_v40, %v5948_v46  ;;  %v10504_v16 = vld [vmem:[%s13932_s12 + $0x250] sm:$0xff]   ;;  %v10506_v6 = vld [vmem:[%s13932_s12 + $0x298] sm:$0xff]  }
 0xc03   : > { %v5920_v5 = vrot.slane %v13460_v22, 7  ;;  %v5975_v61 = vpack.c.bf16 %v13488_v34, %v13484_v3  ;;  %v5931_v39 = vsel %vm1048_vm4, %v5923_v41, %v5924_v48  ;;  %v5925_v36 = vrot.slane %v13488_v34, 7  ;;  %v10507_v57 = vld [vmem:[%s13932_s12 + $0x258] sm:$0xff]  }
 0xc04   : > { %v5859_v45 = vmul.f32 0.2, %v5851_v8  ;;  %v5852_v42 = vadd.f32 %v5842_v14, %v13329_v1  ;;  %v5954_v63 = vsel %vm1147_vm0, %v5948_v46, %v5949_v54  ;;  %v5974_v15 = vpack.c.bf16 %v5931_v39, %v5932_v37  ;;  %v10505_v46 = vld [vmem:[%s13932_s12 + $0x2e8] sm:$0xff]   ;;  %v10510_v14 = vld [vmem:[%s13932_s12 + $0x260] sm:$0xff]  }
 0xc05   : > { %v5973_v53 = vpack.c.bf16 %v5954_v63, %v5955_v31  ;;  %v5930_v40 = vsel %vm1048_vm4, %v5924_v48, %v5925_v36  ;;  %v10513_v63 = vld [vmem:[%s13932_s12 + $0x268] sm:$0xff]   ;;  %v10514_v31 = vld [vmem:[%s13932_s12 + $0x2b0] sm:$0xff]  }
 0xc06   : > { %v13500_v17 = vmax.f32 %v5851_v8, %v5859_v45  ;;  %v5860_v26 = vmul.f32 0.2, %v5852_v42  ;;  %v10509_v8 = vld [vmem:[%s13932_s12 + $0x2a0] sm:$0xff]   ;;  %v10511_v45 = vld [vmem:[%s13932_s12 + $0x2f8] sm:$0xff]  }
 0xc07   : > { %10003 = vmatmul.mubr.bf16.vlgmr.msra.gmra.mrb[64].mxu1 %v5973_v53  ;;  %v10515_v53 = vld [vmem:[%s13932_s12 + $0x270] sm:$0xff]  }
 0xc08   : > { %v13502_v43 = vmax.f32 %v5852_v42, %v5860_v26  ;;  %v5950_v28 = vrot.slane %v13500_v17, 1  ;;  %v5926_v32 = vrot.slane %v13500_v17, 7  ;;  %10011 = vmatpush3.bf16.msra.mxu1 %v10494_v33  ;;  %v10512_v42 = vld [vmem:[%s13932_s12 + $0x2a8] sm:$0xff]   ;;  %v10516_v26 = vld [vmem:[%s13932_s12 + $0x2b8] sm:$0xff]  }
 0xc09   : > { %10012 = vmatprep.subr.bf16.mxu1 %v10495_v21 }
 0xc0a   : > { %v5927_v30 = vrot.slane %v13502_v43, 7  ;;  %v5951_v1 = vrot.slane %v13502_v43, 1  ;;  %v5953_v9 = vsel %vm1147_vm0, %v5949_v54, %v5950_v28  ;;  %v5978_v49 = vpack.c.bf16 %v13502_v43, %v13500_v17  ;;  %v10508_v54 = vld [vmem:[%s13932_s12 + $0x2f0] sm:$0xff]  }
 0xc0b   : > { %v5929_v19 = vsel %vm1048_vm4, %v5925_v36, %v5926_v32 }
 0xc0c   : > { %v5935_v7 = vsel %vm1048_vm4, %v5927_v30, %v5920_v5  ;;  %v5952_v44 = vsel %vm1147_vm0, %v5950_v28, %v5951_v1  ;;  %v5959_v56 = vsel %vm1147_vm0, %v5951_v1, %v5944_v51  ;;  %v5977_v2 = vpack.c.bf16 %v5929_v19, %v5930_v40  ;;  %10013 = vmatpush3.bf16.msra.mxu1 %v10495_v21  ;;  %v10517_v28 = vld [vmem:[%s13932_s12 + $0x278] sm:$0xff]  }
 0xc0d   : > { %v8834_v38 = vpack.c.bf16 %v5935_v7, %v11072_v35  ;;  %v5976_v29 = vpack.c.bf16 %v5952_v44, %v5953_v9  ;;  %v8837_v12 = vpack.c.bf16 %v11072_v35, %v5959_v56  ;;  %v5934_v35 = vsel %vm1048_vm4, %v5920_v5, %v5921_v23  ;;  %10014 = vmatprep.subr.bf16.mxu1 %v10496_v10  ;;  %v10520_v5 = vld [vmem:[#allocation10 + $0x4] ss:$12 sps:$4 sm:$0xff]  }
 0xc0e   : > { %v5971_v58 = vpack.c.bf16 %v5933_v24, %v5934_v35  ;;  %v13622_v9 = vld [vmem:[%s13933_s13 + $0x2] ss:$0 sm:$0xff] }
 0xc0f   : > { %8835 = vmatmul.mubr.msk.bf16.vlgmr.msra.gmra.mrb[96].mxu0 %vm12982_vm9, %v8834_v38  ;;  %10006 = vmatprep.mubr.bf16.mxu1 %v5976_v29 }
 0xc10   : > { %6170 = vmatprep.mubr.bf16.mxu0 %v5972_v60  ;;  %10007 = vmatmul.mubr.msk.bf16.gmra.mrb[68].mxu1 %vm12994_vm10, %v8837_v12 }
 0xc11   : > { %10015 = vmatpush3.bf16.msra.mxu1 %v10496_v10  ;;  %9553 = vmatpush3.bf16.msra.mxu0 %v10498_v59 }
 0xc12   : > { %10016 = vmatprep.subr.bf16.mxu1 %v10499_v47  ;;  %9554 = vmatprep.subr.bf16.mxu0 %v10500_v50 }
 0xc15   : > { %10017 = vmatpush3.bf16.msra.mxu1 %v10499_v47  ;;  %9555 = vmatpush3.bf16.msra.mxu0 %v10501_v27 }
 0xc16   : > { %10018 = vmatprep.subr.bf16.mxu1 %v10502_v55  ;;  %9556 = vmatprep.subr.bf16.mxu0 %v10503_v25 }
 0xc17   : > { %6171 = vmatmul.mubr.bf16.gmra.mrb[100].mxu0 %v5971_v58 }
 0xc18   : > { %6178 = vmatprep.mubr.bf16.mxu0 %v5975_v61 }
 0xc19   : > { %10019 = vmatpush3.bf16.msra.mxu1 %v10502_v55  ;;  %9557 = vmatpush3.bf16.msra.mxu0 %v10504_v16 }
 0xc1a   : > { %10020 = vmatprep.subr.bf16.mxu1 %v10505_v46  ;;  %9558 = vmatprep.subr.bf16.mxu0 %v10506_v6 }
 0xc1d   : > { %10021 = vmatpush3.bf16.msra.mxu1 %v10505_v46  ;;  %9559 = vmatpush3.bf16.msra.mxu0 %v10507_v57 }
 0xc1e   : > { %10022 = vmatprep.subr.bf16.mxu1 %v10508_v54  ;;  %9560 = vmatprep.subr.bf16.mxu0 %v10509_v8 }
 0xc1f   : > { %6179 = vmatmul.mubr.bf16.gmra.mrb[104].mxu0 %v5974_v15 }
 0xc20   : > { %6186 = vmatprep.mubr.bf16.mxu0 %v5978_v49 }
 0xc21   : > { %10023 = vmatpush3.bf16.msra.mxu1 %v10508_v54  ;;  %9561 = vmatpush3.bf16.msra.mxu0 %v10510_v14 }
 0xc22   : > { %10024 = vmatprep.subr.bf16.mxu1 %v10511_v45  ;;  %9562 = vmatprep.subr.bf16.mxu0 %v10512_v42 }
 0xc25   : > { %10025 = vmatpush3.bf16.msra.mxu1 %v10511_v45  ;;  %9563 = vmatpush3.bf16.msra.mxu0 %v10513_v63 }
 0xc26   : > { %9564 = vmatprep.subr.bf16.mxu0 %v10514_v31 }
 0xc27   : > { %6187 = vmatmul.mubr.bf16.gmra.mrb[108].mxu0 %v5977_v2 }
 0xc29   : > { %9565 = vmatpush3.bf16.msra.mxu0 %v10515_v53 }
 0xc2a   : > { %9566 = vmatprep.subr.bf16.mxu0 %v10516_v26 }
 0xc2d   : > { %9567 = vmatpush3.bf16.msra.mxu0 %v10517_v28 }
 0xc2e   : > { %6888 = vmatprep.subr.bf16.mxu0 %v10520_v5 }
 0xcda   : > { %v10004_v30 = vpop.f32.mrb[64].mxu1 }
 0xcdb   : > { %v6229_v1 = vpop.f32.mrb[65].mxu1 }
 0xcdc   : > { %v10005_v51 = vpop.f32.mrb[66].mxu1 }
 0xcdd   : > { %v6232_v7 = vpop.f32.mrb[67].mxu1 }
 0xce2   : > { %v9516_v44 = vpop.f32.mrb[96].mxu0 }
 0xce3   : > { %v9517_v56 = vpop.f32.mrb[97].mxu0  ;;  %v13624_v38 = vpop.f32.mrb[68].mxu1 }
 0xce4   : > { %v9518_v29 = vadd.f32 %v9517_v56, %v9516_v44  ;;  %v9519_v12 = vpop.f32.mrb[98].mxu0  ;;  %v6245_v60 = vpop.f32.mrb[69].mxu1 }
 0xce5   : > { %v9520_v13 = vpop.f32.mrb[99].mxu0  ;;  %v13626_v23 = vpop.f32.mrb[70].mxu1 }
 0xce6   : > { %v6165_v24 = vadd.f32 %v9518_v29, %v13622_v9  ;;  %v9521_v35 = vadd.f32 %v9520_v13, %v9519_v12  ;;  %v6248_v58 = vpop.f32.mrb[71].mxu1 }
 0xce8   : > { %v6230_v61 = vadd.f32 %v6229_v1, %v6165_v24  ;;  %v6168_v48 = vadd.f32 %v9521_v35, %v13622_v9 }
 0xcea   : > { %v6260_v41 = vadd.f32 %v6230_v61, %v13460_v22  ;;  %v6233_v39 = vadd.f32 %v6232_v7, %v6168_v48  ;;  %v9522_v37 = vpop.f32.mrb[100].mxu0 }
 0xceb   : > { %v9523_v15 = vpop.f32.mrb[101].mxu0 }
 0xcec   : > { %v6268_v49 = vmul.f32 0.2, %v6260_v41  ;;  %v6261_v32 = vadd.f32 %v6233_v39, %v13462_v62  ;;  %v9524_v36 = vadd.f32 %v9523_v15, %v9522_v37  ;;  %v9525_v19 = vpop.f32.mrb[102].mxu0 }
 0xced   : > { %v9526_v40 = vpop.f32.mrb[103].mxu0 }
 0xcee   : > { %v6269_v2 = vmul.f32 0.2, %v6261_v32  ;;  %v6173_v33 = vadd.f32 %v9524_v36, %v13622_v9  ;;  %v9527_v21 = vadd.f32 %v9526_v40, %v9525_v19  ;;  %v13633_v10 = vmax.f32 %v6260_v41, %v6268_v49 }
 0xcf0   : > { %v13635_v52 = vmax.f32 %v6261_v32, %v6269_v2  ;;  %v6238_v59 = vadd.f32 %v10004_v30, %v6173_v33  ;;  %v6176_v22 = vadd.f32 %v9527_v21, %v13622_v9  ;;  %v6359_v31 = vrot.slane %v13633_v10, 1 }
 0xcf2   : > { %v6262_v47 = vadd.f32 %v6238_v59, %v13469_v18  ;;  %v6241_v50 = vadd.f32 %v10005_v51, %v6176_v22  ;;  %v9528_v27 = vpop.f32.mrb[104].mxu0  ;;  %v6384_v62 = vpack.c.bf16 %v13635_v52, %v13633_v10  ;;  %v6360_v54 = vrot.slane %v13635_v52, 1 }
 0xcf3   : > { %v9529_v55 = vpop.f32.mrb[105].mxu0  ;;  %v6336_v2 = vrot.slane %v13635_v52, 7 }
 0xcf4   : > { %v6270_v25 = vmul.f32 0.2, %v6262_v47  ;;  %v6263_v16 = vadd.f32 %v6241_v50, %v13472_v20  ;;  %v9530_v46 = vadd.f32 %v9529_v55, %v9528_v27  ;;  %v9531_v6 = vpop.f32.mrb[106].mxu0  ;;  %6577 = vmatprep.mubr.bf16.mxu0 %v6384_v62  ;;  %v6373_v1 = vsel %vm1147_vm0, %v6359_v31, %v6360_v54 }
 0xcf5   : > { %v9532_v57 = vpop.f32.mrb[107].mxu0 }
 0xcf6   : > { %v13643_v8 = vmax.f32 %v6262_v47, %v6270_v25  ;;  %v6271_v14 = vmul.f32 0.2, %v6263_v16  ;;  %v6181_v18 = vadd.f32 %v9530_v46, %v13622_v9  ;;  %v9533_v45 = vadd.f32 %v9532_v57, %v9531_v6  ;;  %v10518_v25 = vld [vmem:[#allocation10] ss:$12 sps:$4 sm:$0xff]   ;;  %v10523_v6 = vld [vmem:[#allocation10 + $0x1c] ss:$12 sps:$4 sm:$0xff]  }
 0xcf8   : > { %v6246_v42 = vadd.f32 %v6245_v60, %v6181_v18  ;;  %v6184_v63 = vadd.f32 %v9533_v45, %v13622_v9  ;;  %v6361_v53 = vrot.slane %v13643_v8, 1  ;;  %v13649_v20 = vmax.f32 %v6263_v16, %v6271_v14  ;;  %v10521_v18 = vld [vmem:[#allocation10 + $0x18] ss:$12 sps:$4 sm:$0xff]  }
 0xcf9   : > { %v6337_v14 = vrot.slane %v13643_v8, 7 }
 0xcfa   : > { %v6264_v26 = vadd.f32 %v6246_v42, %v13484_v3  ;;  %v6249_v28 = vadd.f32 %v6248_v58, %v6184_v63  ;;  %v9534_v5 = vpop.f32.mrb[108].mxu0  ;;  %v6372_v30 = vsel %vm1147_vm0, %v6360_v54, %v6361_v53  ;;  %v6362_v60 = vrot.slane %v13649_v20, 1 }
 0xcfb   : > { %v9535_v51 = vpop.f32.mrb[109].mxu0  ;;  %v6385_v7 = vpack.c.bf16 %v6372_v30, %v6373_v1  ;;  %v6387_v57 = vpack.c.bf16 %v13649_v20, %v13643_v8  ;;  %v6338_v54 = vrot.slane %v13649_v20, 7  ;;  %v6348_v42 = vsel %vm1048_vm4, %v6336_v2, %v6337_v14 }
 0xcfc   : > { %v6272_v44 = vmul.f32 0.2, %v6264_v26  ;;  %v6265_v56 = vadd.f32 %v6249_v28, %v13488_v34  ;;  %v9536_v29 = vadd.f32 %v9535_v51, %v9534_v5  ;;  %v9537_v12 = vpop.f32.mrb[110].mxu0  ;;  %v6371_v34 = vsel %vm1147_vm0, %v6361_v53, %v6362_v60 }
 0xcfd   : > { %v9538_v13 = vpop.f32.mrb[111].mxu0  ;;  %10026 = vmatprep.mubr.bf16.mxu1 %v6385_v7  ;;  %v6347_v45 = vsel %vm1048_vm4, %v6337_v14, %v6338_v54 }
 0xcfe   : > { %v13658_v3 = vmax.f32 %v6264_v26, %v6272_v44  ;;  %v6273_v24 = vmul.f32 0.2, %v6265_v56  ;;  %v6189_v35 = vadd.f32 %v9536_v29, %v13622_v9  ;;  %v9539_v58 = vadd.f32 %v9538_v13, %v9537_v12  ;;  %v10526_v29 = vld [vmem:[#allocation10 + $0x34] ss:$12 sps:$4 sm:$0xff]  }
 0xcff   : > { %v6386_v63 = vpack.c.bf16 %v6347_v45, %v6348_v42  ;;  %v14126_v44 = vmov 0   ;;  %v10527_v12 = vld [vmem:[#allocation10 + $0x8] ss:$12 sps:$4 sm:$0xff]   ;;  %v10531_v13 = vld [vmem:[#allocation10 + $0x20] ss:$12 sps:$4 sm:$0xff]  }
 0xd00   : > { %v6363_v61 = vrot.slane %v13658_v3, 1  ;;  %v6254_v48 = vadd.f32 %v13624_v38, %v6189_v35  ;;  %v6192_v41 = vadd.f32 %v9539_v58, %v13622_v9  ;;  %v13666_v39 = vmax.f32 %v6265_v56, %v6273_v24  ;;  %v10524_v56 = vld [vmem:[#allocation10 + $0x30] ss:$12 sps:$4 sm:$0xff]   ;;  %10034 = vmatprep.subr.bf16.mxu1 %v10527_v12  ;;  %v10528_v24 = vld [vmem:[#allocation10 + $0x48] ss:$12 sps:$4 sm:$0xff]  }
 0xd01   : > { %v10532_v35 = vld [vmem:[#allocation10 + $0x60] ss:$12 sps:$4 sm:$0xff]   ;;  %v10534_v58 = vld [vmem:[#allocation10 + $0x64] ss:$12 sps:$4 sm:$0xff]  }
 0xd02   : > { %v6266_v37 = vadd.f32 %v6254_v48, %v13500_v17  ;;  %v6257_v15 = vadd.f32 %v13626_v23, %v6192_v41  ;;  %v6370_v49 = vsel %vm1147_vm0, %v6362_v60, %v6363_v61  ;;  %v6364_v40 = vrot.slane %v13666_v39, 1  ;;  %v10530_v60 = vld [vmem:[#allocation10 + $0x4c] ss:$12 sps:$4 sm:$0xff]   ;;  %v10538_v41 = vld [vmem:[#allocation10 + $0x7c] ss:$12 sps:$4 sm:$0xff]  }
 0xd03   : > { %v6388_v32 = vpack.c.bf16 %v6370_v49, %v6371_v34  ;;  %v6335_v23 = vrot.slane %v13633_v10, 7  ;;  %v6390_v0 = vpack.c.bf16 %v13666_v39, %v13658_v3  ;;  %v6340_v4 = vrot.slane %v13666_v39, 7  ;;  %v10536_v48 = vld [vmem:[#allocation10 + $0x78] ss:$12 sps:$4 sm:$0xff]   ;;  %v10539_v34 = vld [vmem:[#allocation10 + $0x50] ss:$12 sps:$4 sm:$0xff]  }
 0xd04   : > { %v6274_v36 = vmul.f32 0.2, %v6266_v37  ;;  %v6267_v19 = vadd.f32 %v6257_v15, %v13502_v43  ;;  %v6369_v43 = vsel %vm1147_vm0, %v6363_v61, %v6364_v40  ;;  %v10535_v61 = vld [vmem:[#allocation10 + $0x38] ss:$12 sps:$4 sm:$0xff]   ;;  %v10543_v15 = vld [vmem:[#allocation10 + $0x68] ss:$12 sps:$4 sm:$0xff]  }
 0xd05   : > { %10027 = vmatmul.mubr.bf16.vlgmr.msra.gmra.mrb[72].mxu1 %v6388_v32  ;;  %v6349_v50 = vsel %vm1048_vm4, %v6335_v23, %v6336_v2  ;;  %v10540_v49 = vld [vmem:[#allocation10 + $0x90] ss:$12 sps:$4 sm:$0xff]   ;;  %v10546_v32 = vld [vmem:[#allocation10 + $0xac] ss:$12 sps:$4 sm:$0xff]  }
 0xd06   : > { %v13673_v38 = vmax.f32 %v6266_v37, %v6274_v36  ;;  %v6275_v9 = vmul.f32 0.2, %v6267_v19  ;;  %10035 = vmatpush3.bf16.msra.mxu1 %v10527_v12  ;;  %v10542_v37 = vld [vmem:[#allocation10 + $0x94] ss:$12 sps:$4 sm:$0xff]   ;;  %v10555_v2 = vld [vmem:[#allocation10 + $0xb0] ss:$12 sps:$4 sm:$0xff]  }
 0xd07   : > { %10036 = vmatprep.subr.bf16.mxu1 %v10531_v13  ;;  %v10547_v36 = vld [vmem:[#allocation10 + $0x80] ss:$12 sps:$4 sm:$0xff]  }
 0xd08   : > { %v13677_v33 = vmax.f32 %v6267_v19, %v6275_v9  ;;  %v6365_v17 = vrot.slane %v13673_v38, 1  ;;  %v6341_v30 = vrot.slane %v13673_v38, 7  ;;  %v10544_v19 = vld [vmem:[#allocation10 + $0xa8] ss:$12 sps:$4 sm:$0xff]  }
 0xd09   : > { %v10550_v9 = vld [vmem:[#allocation13 + $0x4] ss:$8 sps:$4 sm:$0xff]  }
 0xd0a   : > { %v6342_v21 = vrot.slane %v13677_v33, 7  ;;  %v6368_v59 = vsel %vm1147_vm0, %v6364_v40, %v6365_v17  ;;  %v6366_v22 = vrot.slane %v13677_v33, 1  ;;  %v6393_v5 = vpack.c.bf16 %v13677_v33, %v13673_v38  ;;  %10037 = vmatpush3.bf16.msra.mxu1 %v10531_v13  ;;  %v10551_v40 = vld [vmem:[#allocation10 + $0x98] ss:$12 sps:$4 sm:$0xff]  }
 0xd0b   : > { %v6391_v47 = vpack.c.bf16 %v6368_v59, %v6369_v43  ;;  %v6344_v51 = vsel %vm1048_vm4, %v6340_v4, %v6341_v30  ;;  %10038 = vmatprep.subr.bf16.mxu1 %v10535_v61 }
 0xd0c   : > { %v6350_v27 = vsel %vm1048_vm4, %v6342_v21, %v6335_v23  ;;  %v6367_v62 = vsel %vm1147_vm0, %v6365_v17, %v6366_v22  ;;  %v6374_v55 = vsel %vm1147_vm0, %v6366_v22, %v6359_v31  ;;  %v6339_v31 = vrot.slane %v13658_v3, 7 }
 0xd0d   : > { %10030 = vmatprep.mubr.bf16.mxu1 %v6391_v47  ;;  %v8914_v16 = vpack.c.bf16 %v6349_v50, %v6350_v27  ;;  %v8917_v46 = vpack.c.bf16 %v6374_v55, %v6367_v62  ;;  %v6343_v1 = vsel %vm1048_vm4, %v6341_v30, %v6342_v21  ;;  %v13728_v47 = vld [vmem:[%s13933_s13 + $0x3] ss:$0 sm:$0xff] }
 0xd0e   : > { %v6345_v53 = vsel %vm1048_vm4, %v6339_v31, %v6340_v4  ;;  %v6346_v26 = vsel %vm1048_vm4, %v6338_v54, %v6339_v31  ;;  %v6392_v7 = vpack.c.bf16 %v6343_v1, %v6344_v51  ;;  %10039 = vmatpush3.bf16.msra.mxu1 %v10535_v61 }
 0xd0f   : > { %8915 = vmatmul.mubr.msk.bf16.vlgmr.msra.gmra.mrb[112].mxu0 %vm12762_vm15, %v8914_v16  ;;  %10031 = vmatmul.mubr.msk.bf16.gmra.mrb[76].mxu1 %vm12788_vm3, %v8917_v46  ;;  %v6389_v28 = vpack.c.bf16 %v6345_v53, %v6346_v26 }
 0xd10   : > { %6585 = vmatprep.mubr.bf16.mxu0 %v6387_v57  ;;  %6889 = vmatpush1.bf16.msra.mxu0 %v10518_v25 }
 0xd11   : > { %6890 = vmatprep.subr.bf16.mxu0 %v10523_v6  ;;  %10040 = vmatprep.subr.bf16.mxu1 %v10539_v34 }
 0xd12   : > { %10041 = vmatpush3.bf16.msra.mxu1 %v10539_v34 }
 0xd13   : > { %10042 = vmatprep.subr.bf16.mxu1 %v10543_v15 }
 0xd14   : > { %6891 = vmatpush1.bf16.msra.mxu0 %v10521_v18 }
 0xd15   : > { %6892 = vmatprep.subr.bf16.mxu0 %v10526_v29 }
 0xd16   : > { %10043 = vmatpush3.bf16.msra.mxu1 %v10543_v15 }
 0xd17   : > { %6586 = vmatmul.mubr.bf16.gmra.mrb[116].mxu0 %v6386_v63  ;;  %10044 = vmatprep.subr.bf16.mxu1 %v10547_v36 }
 0xd18   : > { %6593 = vmatprep.mubr.bf16.mxu0 %v6390_v0  ;;  %6893 = vmatpush1.bf16.msra.mxu0 %v10524_v56 }
 0xd19   : > { %6894 = vmatprep.subr.bf16.mxu0 %v10530_v60 }
 0xd1a   : > { %10045 = vmatpush3.bf16.msra.mxu1 %v10547_v36 }
 0xd1b   : > { %10046 = vmatprep.subr.bf16.mxu1 %v10551_v40 }
 0xd1c   : > { %6895 = vmatpush1.bf16.msra.mxu0 %v10528_v24  ;;  %v10554_v24 = vld [vmem:[#allocation13 + $0x14] ss:$8 sps:$4 sm:$0xff]  }
 0xd1d   : > { %6896 = vmatprep.subr.bf16.mxu0 %v10534_v58 }
 0xd1e   : > { %10047 = vmatpush3.bf16.msra.mxu1 %v10551_v40 }
 0xd1f   : > { %6594 = vmatmul.mubr.bf16.gmra.mrb[120].mxu0 %v6389_v28  ;;  %10048 = vmatprep.subr.bf16.mxu1 %v10555_v2 }
 0xd20   : > { %6601 = vmatprep.mubr.bf16.mxu0 %v6393_v5  ;;  %6897 = vmatpush1.bf16.msra.mxu0 %v10532_v35 }
 0xd21   : > { %6898 = vmatprep.subr.bf16.mxu0 %v10538_v41 }
 0xd22   : > { %10049 = vmatpush3.bf16.msra.mxu1 %v10555_v2  ;;  %v10556_v2 = vld [vmem:[#allocation13 + $0x20] ss:$8 sps:$4 sm:$0xff]  }
 0xd24   : > { %6899 = vmatpush1.bf16.msra.mxu0 %v10536_v48 }
 0xd25   : > { %6900 = vmatprep.subr.bf16.mxu0 %v10542_v37  ;;  %v10552_v37 = vld [vmem:[#allocation13 + $0x10] ss:$8 sps:$4 sm:$0xff]  }
 0xd27   : > { %6602 = vmatmul.mubr.bf16.gmra.mrb[124].mxu0 %v6392_v7 }
 0xd28   : > { %6920 = vmatprep.mubr.bf16.mxu0 %v14126_v44  ;;  %6901 = vmatpush1.bf16.msra.mxu0 %v10540_v49 }
 0xd29   : > { %6902 = vmatprep.subr.bf16.mxu0 %v10546_v32  ;;  %v10558_v32 = vld [vmem:[#allocation13 + $0x24] ss:$8 sps:$4 sm:$0xff]  }
 0xd2c   : > { %6903 = vmatpush1.bf16.msra.mxu0 %v10544_v19 }
 0xd2d   : > { %7342 = vmatprep.subr.bf16.mxu0 %v10550_v9 }
 0xdd8   : > { %v10028_v17 = vpop.f32.mrb[72].mxu1 }
 0xdd9   : > { %v6644_v23 = vpop.f32.mrb[73].mxu1 }
 0xdda   : > { %v10029_v21 = vpop.f32.mrb[74].mxu1 }
 0xddb   : > { %v6647_v59 = vpop.f32.mrb[75].mxu1 }
 0xde2   : > { %v9568_v43 = vpop.f32.mrb[112].mxu0  ;;  %v13723_v22 = vpop.f32.mrb[76].mxu1 }
 0xde3   : > { %v9569_v50 = vpop.f32.mrb[113].mxu0  ;;  %v6660_v27 = vpop.f32.mrb[77].mxu1 }
 0xde4   : > { %v9570_v62 = vadd.f32 %v9569_v50, %v9568_v43  ;;  %v9571_v55 = vpop.f32.mrb[114].mxu0  ;;  %v13730_v25 = vpop.f32.mrb[78].mxu1  ;;  %v10561_v50 = vld [vmem:[#allocation13 + $0x34] ss:$8 sps:$4 sm:$0xff]  }
 0xde5   : > { %v9572_v16 = vpop.f32.mrb[115].mxu0  ;;  %v6663_v46 = vpop.f32.mrb[79].mxu1 }
 0xde6   : > { %v6580_v6 = vadd.f32 %v9570_v62, %v13728_v47  ;;  %v9573_v57 = vadd.f32 %v9572_v16, %v9571_v55 }
 0xde8   : > { %v6645_v54 = vadd.f32 %v6644_v23, %v6580_v6  ;;  %v6583_v14 = vadd.f32 %v9573_v57, %v13728_v47 }
 0xdea   : > { %v6675_v18 = vadd.f32 %v6645_v54, %v13633_v10  ;;  %v6648_v45 = vadd.f32 %v6647_v59, %v6583_v14  ;;  %v9574_v42 = vpop.f32.mrb[116].mxu0  ;;  %v10548_v10 = vld [vmem:[#allocation13] ss:$8 sps:$4 sm:$0xff]   ;;  %v10559_v54 = vld [vmem:[#allocation13 + $0x30] ss:$8 sps:$4 sm:$0xff]  }
 0xdeb   : > { %v9575_v63 = vpop.f32.mrb[117].mxu0 }
 0xdec   : > { %v6683_v0 = vmul.f32 0.2, %v6675_v18  ;;  %v6676_v4 = vadd.f32 %v6648_v45, %v13635_v52  ;;  %v9576_v31 = vadd.f32 %v9575_v63, %v9574_v42  ;;  %v9577_v53 = vpop.f32.mrb[118].mxu0 }
 0xded   : > { %v9578_v26 = vpop.f32.mrb[119].mxu0 }
 0xdee   : > { %v6691_v28 = vmax.f32 %v6675_v18, %v6683_v0  ;;  %v6684_v5 = vmul.f32 0.2, %v6676_v4  ;;  %v6588_v30 = vadd.f32 %v9576_v31, %v13728_v47  ;;  %v9579_v1 = vadd.f32 %v9578_v26, %v9577_v53  ;;  %v10564_v18 = vld [vmem:[#allocation13 + $0x44] ss:$8 sps:$4 sm:$0xff]  }
 0xdf0   : > { %v6692_v51 = vmax.f32 %v6676_v4, %v6684_v5  ;;  %v6653_v7 = vadd.f32 %v10028_v17, %v6588_v30  ;;  %v6591_v56 = vadd.f32 %v9579_v1, %v13728_v47  ;;  %6699 = vst [vmem:[%s13742_s30] sm:$0xff] %v6691_v28  ;;  %v10562_v4 = vld [vmem:[#allocation13 + $0x40] ss:$8 sps:$4 sm:$0xff]   ;;  %v10567_v5 = vld [vmem:[#allocation13 + $0x54] ss:$8 sps:$4 sm:$0xff]  }
 0xdf2   : > { %v7122_v29 = vadd.f32 %v6692_v51, %v6691_v28  ;;  %v6677_v52 = vadd.f32 %v6653_v7, %v13643_v8  ;;  %v6656_v12 = vadd.f32 %v10029_v21, %v6591_v56  ;;  %v9580_v60 = vpop.f32.mrb[120].mxu0  ;;  %v6707_v13 = vpack.c.bf16 %v6692_v51, %v6691_v28  ;;  %6700 = vst [vmem:[%s13742_s30 + $0x8] sm:$0xff] %v6692_v51  ;;  %v10568_v56 = vld [vmem:[#allocation13 + $0x60] ss:$8 sps:$4 sm:$0xff]  }
 0xdf3   : > { %v9581_v35 = vpop.f32.mrb[121].mxu0 }
 0xdf4   : > { %v6685_v58 = vmul.f32 0.2, %v6677_v52  ;;  %v6678_v61 = vadd.f32 %v6656_v12, %v13649_v20  ;;  %v9582_v48 = vadd.f32 %v9581_v35, %v9580_v60  ;;  %v9583_v41 = vpop.f32.mrb[122].mxu0  ;;  %6921 = vmatmul.mubr.bf16.vlgmr.msra.gmra.mrb[128].mxu0 %v6707_v13  ;;  %10050 = vmatprep.mubr.bf16.mxu1 %v6707_v13  ;;  %v10571_v12 = vld [vmem:[#allocation13 + $0x70] ss:$8 sps:$4 sm:$0xff]  }
 0xdf5   : > { %7343 = vmatpush1.bf16.msra.mxu0 %v10548_v10  ;;  %v9584_v34 = vpop.f32.mrb[123].mxu0  ;;  %6930 = vmatprep.mubr.bf16.mxu0 %v14126_v44  ;;  %v10579_v35 = vld [vmem:[#allocation13 + $0x94] ss:$8 sps:$4 sm:$0xff]  }
 0xdf6   : > { %v6686_v8 = vmul.f32 0.2, %v6678_v61  ;;  %v6596_v15 = vadd.f32 %v9582_v48, %v13728_v47  ;;  %v9585_v49 = vadd.f32 %v9584_v34, %v9583_v41  ;;  %7344 = vmatprep.subr.bf16.mxu0 %v10554_v24  ;;  %v6693_v36 = vmax.f32 %v6677_v52, %v6685_v58  ;;  %v10574_v24 = vld [vmem:[#allocation13 + $0x80] ss:$8 sps:$4 sm:$0xff]   ;;  %v10577_v48 = vld [vmem:[#allocation13 + $0x90] ss:$8 sps:$4 sm:$0xff]  }
 0xdf7   : > { %v10582_v41 = vld [vmem:[#allocation13 + $0xa4] ss:$8 sps:$4 sm:$0xff]  }
 0xdf8   : > { %v6661_v19 = vadd.f32 %v6660_v27, %v6596_v15  ;;  %v6599_v20 = vadd.f32 %v9585_v49, %v13728_v47  ;;  %v6694_v9 = vmax.f32 %v6678_v61, %v6686_v8  ;;  %v7123_v40 = vadd.f32 %v7122_v29, %v6693_v36  ;;  %6701 = vst [vmem:[%s13742_s30 + $0x10] sm:$0xff] %v6693_v36  ;;  %v10573_v29 = vld [vmem:[#allocation13 + $0x74] ss:$8 sps:$4 sm:$0xff]   ;;  %v10580_v8 = vld [vmem:[#allocation13 + $0xa0] ss:$8 sps:$4 sm:$0xff]  }
 0xdf9   : > { %7345 = vmatpush1.bf16.msra.mxu0 %v10552_v37  ;;  %v10585_v49 = vld [vmem:[#allocation13 + $0xb4] ss:$8 sps:$4 sm:$0xff]  }
 0xdfa   : > { %v6679_v17 = vadd.f32 %v6661_v19, %v13658_v3  ;;  %v6664_v23 = vadd.f32 %v6663_v46, %v6599_v20  ;;  %v9586_v21 = vpop.f32.mrb[124].mxu0  ;;  %7346 = vmatprep.subr.bf16.mxu0 %v10558_v32  ;;  %v6708_v59 = vpack.c.bf16 %v6694_v9, %v6693_v36  ;;  %v7124_v43 = vadd.f32 %v7123_v40, %v6694_v9  ;;  %v10583_v32 = vld [vmem:[#allocation13 + $0xb0] ss:$8 sps:$4 sm:$0xff]   ;;  %v10588_v36 = vld [vmem:[#allocation13 + $0xc4] ss:$8 sps:$4 sm:$0xff]  }
 0xdfb   : > { %6702 = vst [vmem:[%s13742_s30 + $0x18] sm:$0xff] %v6694_v9  ;;  %v9587_v62 = vpop.f32.mrb[125].mxu0  ;;  %v10586_v19 = vld [vmem:[#allocation13 + $0xc0] ss:$8 sps:$4 sm:$0xff]   ;;  %v10591_v20 = vld [vmem:[#allocation13 + $0xd4] ss:$8 sps:$4 sm:$0xff]  }
 0xdfc   : > { %v6687_v55 = vmul.f32 0.2, %v6679_v17  ;;  %v6680_v27 = vadd.f32 %v6664_v23, %v13666_v39  ;;  %v9588_v16 = vadd.f32 %v9587_v62, %v9586_v21  ;;  %v9589_v6 = vpop.f32.mrb[126].mxu0  ;;  %6931 = vmatmul.mubr.bf16.gmra.mrb[132].mxu0 %v6708_v59  ;;  %10051 = vmatmul.mubr.bf16.vlgmr.msra.gmra.mrb[80].mxu1 %v6708_v59  ;;  %v10589_v9 = vld [vmem:[#allocation13 + $0xd0] ss:$8 sps:$4 sm:$0xff]  }
 0xdfd   : > { %7347 = vmatpush1.bf16.msra.mxu0 %v10556_v2  ;;  %v9590_v57 = vpop.f32.mrb[127].mxu0  ;;  %6940 = vmatprep.mubr.bf16.mxu0 %v14126_v44  ;;  %v10594_v40 = vld [vmem:[#allocation13 + $0xe4] ss:$8 sps:$4 sm:$0xff]   ;;  %v10592_v2 = vld [vmem:[#allocation13 + $0xe0] ss:$8 sps:$4 sm:$0xff]  }
 0xdfe   : > { %v6688_v3 = vmul.f32 0.2, %v6680_v27  ;;  %v6604_v46 = vadd.f32 %v9588_v16, %v13728_v47  ;;  %v9591_v14 = vadd.f32 %v9590_v57, %v9589_v6  ;;  %7348 = vmatprep.subr.bf16.mxu0 %v10561_v50  ;;  %v6695_v45 = vmax.f32 %v6679_v17, %v6687_v55  ;;  %v10597_v17 = vld [vmem:[#allocation13 + $0xf4] ss:$8 sps:$4 sm:$0xff]   ;;  %v10595_v23 = vld [vmem:[#allocation13 + $0xf0] ss:$8 sps:$4 sm:$0xff]  }
 0xdff   : > { %v10598_v21 = vld [vmem:[#allocation13 + $0x100] ss:$8 sps:$4 sm:$0xff]   ;;  %v10600_v59 = vld [vmem:[#allocation13 + $0x104] ss:$8 sps:$4 sm:$0xff]   ;;  %v10601_v50 = vld [vmem:[#allocation13 + $0x110] ss:$8 sps:$4 sm:$0xff]  }
 0xe00   : > { %v6669_v39 = vadd.f32 %v13723_v22, %v6604_v46  ;;  %v6607_v42 = vadd.f32 %v9591_v14, %v13728_v47  ;;  %v6696_v63 = vmax.f32 %v6680_v27, %v6688_v3  ;;  %v7125_v0 = vadd.f32 %v7124_v43, %v6695_v45  ;;  %6703 = vst [vmem:[%s13742_s30 + $0x20] sm:$0xff] %v6695_v45  ;;  %v10565_v47 = vld [vmem:[#allocation13 + $0x50] ss:$8 sps:$4 sm:$0xff]   ;;  %v10603_v43 = vld [vmem:[#allocation13 + $0x114] ss:$8 sps:$4 sm:$0xff]  }
 0xe01   : > { %7349 = vmatpush1.bf16.msra.mxu0 %v10559_v54  ;;  %7595 = vmatprep.subr.bf16.mxu1 %v10600_v59  ;;  %v10604_v62 = vld [vmem:[#allocation13 + $0x120] ss:$8 sps:$4 sm:$0xff]   ;;  %v10606_v55 = vld [vmem:[#allocation13 + $0x124] ss:$8 sps:$4 sm:$0xff]   ;;  %v10609_v27 = vld [vmem:[#allocation13 + $0x134] ss:$8 sps:$4 sm:$0xff]  }
 0xe02   : > { %v6681_v31 = vadd.f32 %v6669_v39, %v13673_v38  ;;  %v6672_v53 = vadd.f32 %v13730_v25, %v6607_v42  ;;  %7350 = vmatprep.subr.bf16.mxu0 %v10564_v18  ;;  %v6709_v26 = vpack.c.bf16 %v6696_v63, %v6695_v45  ;;  %v7126_v28 = vadd.f32 %v7125_v0, %v6696_v63  ;;  %v10570_v38 = vld [vmem:[#allocation13 + $0x64] ss:$8 sps:$4 sm:$0xff]   ;;  %v10607_v16 = vld [vmem:[#allocation13 + $0x130] ss:$8 sps:$4 sm:$0xff]   ;;  %v10610_v6 = vld [vmem:[#allocation13 + $0x140] ss:$8 sps:$4 sm:$0xff]  }
 0xe03   : > { %6704 = vst [vmem:[%s13742_s30 + $0x28] sm:$0xff] %v6696_v63  ;;  %7596 = vmatpush1.bf16.msra.mxu1 %v10598_v21  ;;  %v10612_v57 = vld [vmem:[#allocation13 + $0x144] ss:$8 sps:$4 sm:$0xff]   ;;  %v10615_v54 = vld [vmem:[#allocation13 + $0x154] ss:$8 sps:$4 sm:$0xff]  }
 0xe04   : > { %v6689_v30 = vmul.f32 0.2, %v6681_v31  ;;  %v6682_v22 = vadd.f32 %v6672_v53, %v13677_v33  ;;  %6941 = vmatmul.mubr.bf16.gmra.mrb[136].mxu0 %v6709_v26  ;;  %10054 = vmatprep.mubr.bf16.mxu1 %v6709_v26  ;;  %v10613_v3 = vld [vmem:[#allocation13 + $0x150] ss:$8 sps:$4 sm:$0xff]   ;;  %v10618_v46 = vld [vmem:[#allocation13 + $0x164] ss:$8 sps:$4 sm:$0xff]  }
 0xe05   : > { %7351 = vmatpush1.bf16.msra.mxu0 %v10562_v4  ;;  %6950 = vmatprep.mubr.bf16.mxu0 %v14126_v44  ;;  %v10576_v44 = vld [vmem:[#allocation13 + $0x84] ss:$8 sps:$4 sm:$0xff]   ;;  %v10616_v14 = vld [vmem:[#allocation13 + $0x160] ss:$8 sps:$4 sm:$0xff]   ;;  %v10621_v18 = vld [vmem:[#allocation13 + $0x174] ss:$8 sps:$4 sm:$0xff]  }
 0xe06   : > { %v6690_v1 = vmul.f32 0.2, %v6682_v22  ;;  %7352 = vmatprep.subr.bf16.mxu0 %v10567_v5  ;;  %v6697_v25 = vmax.f32 %v6681_v31, %v6689_v30  ;;  %7597 = vmatprep.subr.bf16.mxu1 %v10603_v43  ;;  %v10619_v45 = vld [vmem:[#allocation13 + $0x170] ss:$8 sps:$4 sm:$0xff]   ;;  %v10624_v39 = vld [vmem:[#allocation13 + $0x184] ss:$8 sps:$4 sm:$0xff]  }
 0xe07   : > { %7598 = vmatpush1.bf16.msra.mxu1 %v10601_v50  ;;  %v10622_v42 = vld [vmem:[#allocation13 + $0x180] ss:$8 sps:$4 sm:$0xff]   ;;  %v10627_v63 = vld [vmem:[#allocation13 + $0x194] ss:$8 sps:$4 sm:$0xff]   ;;  %v10625_v0 = vld [vmem:[#allocation13 + $0x190] ss:$8 sps:$4 sm:$0xff]  }
 0xe08   : > { %v6698_v51 = vmax.f32 %v6682_v22, %v6690_v1  ;;  %v7127_v7 = vadd.f32 %v7126_v28, %v6697_v25  ;;  %6705 = vst [vmem:[%s13742_s30 + $0x30] sm:$0xff] %v6697_v25  ;;  %7599 = vmatprep.subr.bf16.mxu1 %v10606_v55  ;;  %v10630_v4 = vld [vmem:[#allocation13 + $0x1a4] ss:$8 sps:$4 sm:$0xff]   ;;  %v10628_v31 = vld [vmem:[#allocation13 + $0x1a0] ss:$8 sps:$4 sm:$0xff]   ;;  %v6755_v55 = vsub.s32 2, %v11439_v11 }
 0xe09   : > { %7353 = vmatpush1.bf16.msra.mxu0 %v10565_v47  ;;  %v10633_v53 = vld [vmem:[#allocation13 + $0x1b4] ss:$8 sps:$4 sm:$0xff]   ;;  %v10631_v26 = vld [vmem:[#allocation13 + $0x1b0] ss:$8 sps:$4 sm:$0xff]   ;;  %v10636_v28 = vld [vmem:[#allocation13 + $0x1c4] ss:$8 sps:$4 sm:$0xff]  }
 0xe0a   : > { %7354 = vmatprep.subr.bf16.mxu0 %v10570_v38  ;;  %v6710_v10 = vpack.c.bf16 %v6698_v51, %v6697_v25  ;;  %v7128_v33 = vadd.f32 %v7127_v7, %v6698_v51  ;;  %6706 = vst [vmem:[%s13742_s30 + $0x38] sm:$0xff] %v6698_v51  ;;  %v10634_v5 = vld [vmem:[#allocation13 + $0x1c0] ss:$8 sps:$4 sm:$0xff]   ;;  %v10639_v30 = vld [vmem:[#allocation13 + $0x1d4] ss:$8 sps:$4 sm:$0xff]   ;;  %s10949_s30 = scalar_lea.vmem %s10948_s4, 2048 }
 0xe0b   : > { %7600 = vmatpush1.bf16.msra.mxu1 %v10604_v62  ;;  %v10637_v22 = vld [vmem:[#allocation13 + $0x1d0] ss:$8 sps:$4 sm:$0xff]   ;;  %v10640_v47 = vld [vmem:[#allocation13 + $0x1e0] ss:$8 sps:$4 sm:$0xff]   ;;  %v10642_v1 = vld [vmem:[#allocation13 + $0x1e4] ss:$8 sps:$4 sm:$0xff]   ;;  %p10951_p6 = scmp.lt.s32.totalorder %s10949_s30, %s10943_s20 }
 0xe0c   : > { %6951 = vmatmul.mubr.bf16.gmra.mrb[140].mxu0 %v6710_v10  ;;  %10055 = vmatmul.mubr.bf16.gmra.mrb[84].mxu1 %v6710_v10  ;;  %v7129_v52 = vrot.slane %v7128_v33, 4  ;;  %v10645_v38 = vld [vmem:[#allocation13 + $0x1f4] ss:$8 sps:$4 sm:$0xff]   ;;  %v10643_v25 = vld [vmem:[#allocation13 + $0x1f0] ss:$8 sps:$4 sm:$0xff]  }
 0xe0d   : > { %7355 = vmatpush1.bf16.msra.mxu0 %v10568_v56  ;;  %7601 = vmatprep.subr.bf16.mxu1 %v10609_v27  ;;  %v10646_v51 = vld [vmem:[#allocation13 + $0x200] ss:$8 sps:$4 sm:$0xff]   ;;  %v10648_v7 = vld [vmem:[#allocation13 + $0x204] ss:$8 sps:$4 sm:$0xff]   ;;  %v10651_v56 = vld [vmem:[#allocation13 + $0x214] ss:$8 sps:$4 sm:$0xff]   ;;  %p10952_p0 = por %p10951_p6, %p10950_p5 }
 0xe0e   : > { %7356 = vmatprep.subr.bf16.mxu0 %v10573_v29  ;;  %v7130_v60 = vadd.f32 %v7129_v52, %v7128_v33  ;;  %v10649_v10 = vld [vmem:[#allocation13 + $0x210] ss:$8 sps:$4 sm:$0xff]   ;;  %v10654_v29 = vld [vmem:[#allocation13 + $0x224] ss:$8 sps:$4 sm:$0xff]   ;;  %v10652_v33 = vld [vmem:[#allocation13 + $0x220] ss:$8 sps:$4 sm:$0xff]  }
 0xe0f   : > { %7602 = vmatpush1.bf16.msra.mxu1 %v10607_v16  ;;  %v10657_v52 = vld [vmem:[#allocation13 + $0x234] ss:$8 sps:$4 sm:$0xff]   ;;  %v10685_v59 = vld [vmem:[#allocation13 + $0x2d0] ss:$8 sps:$4 sm:$0xff]   ;;  %p10953_p9 = pnand %p10952_p0, %p10946_p11 }
 0xe10   : > { %v7131_v13 = vrot.slane %v7130_v60, 2  ;;  %7603 = vmatprep.subr.bf16.mxu1 %v10612_v57 }
 0xe11   : > { %7357 = vmatpush1.bf16.msra.mxu0 %v10571_v12  ;;  %v10655_v12 = vld [vmem:[#allocation13 + $0x230] ss:$8 sps:$4 sm:$0xff]  }
 0xe12   : > { %7358 = vmatprep.subr.bf16.mxu0 %v10576_v44  ;;  %v7132_v58 = vadd.f32 %v7131_v13, %v7130_v60  ;;  %v10660_v44 = vld [vmem:[#allocation13 + $0x244] ss:$8 sps:$4 sm:$0xff]   ;;  %v10658_v60 = vld [vmem:[#allocation13 + $0x240] ss:$8 sps:$4 sm:$0xff]   ;;  %v10663_v13 = vld [vmem:[#allocation13 + $0x254] ss:$8 sps:$4 sm:$0xff]  }
 0xe13   : > { %7604 = vmatpush1.bf16.msra.mxu1 %v10610_v6 }
 0xe14   : > { %v7133_v61 = vrot.slane %v7132_v58, 1  ;;  %7605 = vmatprep.subr.bf16.mxu1 %v10615_v54 }
 0xe15   : > { %7359 = vmatpush1.bf16.msra.mxu0 %v10574_v24  ;;  %v10661_v24 = vld [vmem:[#allocation13 + $0x250] ss:$8 sps:$4 sm:$0xff]  }
 0xe16   : > { %7360 = vmatprep.subr.bf16.mxu0 %v10579_v35  ;;  %v7134_v34 = vadd.f32 %v7133_v61, %v7132_v58  ;;  %v10666_v35 = vld [vmem:[#allocation13 + $0x264] ss:$8 sps:$4 sm:$0xff]   ;;  %v10664_v58 = vld [vmem:[#allocation13 + $0x260] ss:$8 sps:$4 sm:$0xff]   ;;  %v10669_v61 = vld [vmem:[#allocation13 + $0x274] ss:$8 sps:$4 sm:$0xff]  }
 0xe17   : > { %7606 = vmatpush1.bf16.msra.mxu1 %v10613_v3 }
 0xe18   : > { %v7136_v37 = vmul.f32 0.015625, %v7134_v34  ;;  %7607 = vmatprep.subr.bf16.mxu1 %v10618_v46  ;;  %v10670_v34 = vld [vmem:[#allocation13 + $0x280] ss:$8 sps:$4 sm:$0xff]  }
 0xe19   : > { %7361 = vmatpush1.bf16.msra.mxu0 %v10577_v48  ;;  %v10667_v48 = vld [vmem:[#allocation13 + $0x270] ss:$8 sps:$4 sm:$0xff]  }
 0xe1a   : > { %7362 = vmatprep.subr.bf16.mxu0 %v10582_v41  ;;  %v7137_v15 = vpack.c.bf16 %v7136_v37, %v7136_v37  ;;  %v10672_v41 = vld [vmem:[#allocation13 + $0x284] ss:$8 sps:$4 sm:$0xff]   ;;  %v10675_v37 = vld [vmem:[#allocation13 + $0x294] ss:$8 sps:$4 sm:$0xff]  }
 0xe1b   : > { %7608 = vmatpush1.bf16.msra.mxu1 %v10616_v14 }
 0xe1c   : > { %7374 = vmatprep.mubr.bf16.mxu0 %v7137_v15  ;;  %7609 = vmatprep.subr.bf16.mxu1 %v10621_v18 }
 0xe1d   : > { %7363 = vmatpush1.bf16.msra.mxu0 %v10580_v8  ;;  %v10673_v8 = vld [vmem:[#allocation13 + $0x290] ss:$8 sps:$4 sm:$0xff]  }
 0xe1e   : > { %7364 = vmatprep.subr.bf16.mxu0 %v10585_v49  ;;  %v10676_v49 = vld [vmem:[#allocation13 + $0x2a0] ss:$8 sps:$4 sm:$0xff]  }
 0xe1f   : > { %7610 = vmatpush1.bf16.msra.mxu1 %v10619_v45 }
 0xe20   : > { %7611 = vmatprep.subr.bf16.mxu1 %v10624_v39 }
 0xe21   : > { %7365 = vmatpush1.bf16.msra.mxu0 %v10583_v32  ;;  %v10681_v32 = vld [vmem:[#allocation13 + $0x2b4] ss:$8 sps:$4 sm:$0xff]  }
 0xe22   : > { %7366 = vmatprep.subr.bf16.mxu0 %v10588_v36  ;;  %v10679_v36 = vld [vmem:[#allocation13 + $0x2b0] ss:$8 sps:$4 sm:$0xff]  }
 0xe23   : > { %7612 = vmatpush1.bf16.msra.mxu1 %v10622_v42 }
 0xe24   : > { %7613 = vmatprep.subr.bf16.mxu1 %v10627_v63 }
 0xe25   : > { %7367 = vmatpush1.bf16.msra.mxu0 %v10586_v19  ;;  %v10684_v19 = vld [vmem:[#allocation13 + $0x2c4] ss:$8 sps:$4 sm:$0xff]  }
 0xe26   : > { %7368 = vmatprep.subr.bf16.mxu0 %v10591_v20  ;;  %v6743_v20 = vld [vmem:[#allocation11] sm:$0x7] }
 0xe27   : > { %7614 = vmatpush1.bf16.msra.mxu1 %v10625_v0  ;;  %v6756_v46 = vrot.slane %v6743_v20, %v6755_v55 }
 0xe28   : > { %7615 = vmatprep.subr.bf16.mxu1 %v10630_v4 }
 0xe29   : > { %7369 = vmatpush1.bf16.msra.mxu0 %v10589_v9  ;;  %v13768_v9 = vsub.s32 1, %v11439_v11 }
 0xe2a   : > { %7370 = vmatprep.subr.bf16.mxu0 %v10594_v40  ;;  %v10682_v40 = vld [vmem:[#allocation13 + $0x2c0] ss:$8 sps:$4 sm:$0xff]  }
 0xe2b   : > { %7616 = vmatpush1.bf16.msra.mxu1 %v10628_v31  ;;  %v13774_v21 = vrot.slane %v6743_v20, %v13768_v9 }
 0xe2c   : > { %7617 = vmatprep.subr.bf16.mxu1 %v10633_v53 }
 0xe2d   : > { %7371 = vmatpush1.bf16.msra.mxu0 %v10592_v2  ;;  %v10687_v2 = vld [vmem:[#allocation13 + $0x2d4] ss:$8 sps:$4 sm:$0xff]  }
 0xe2e   : > { %7372 = vmatprep.subr.bf16.mxu0 %v10597_v17  ;;  %v14127_v17 = vld [vmem:[#allocation30_spill] sm:$0xff] }
 0xe2f   : > { %7618 = vmatpush1.bf16.msra.mxu1 %v10631_v26 }
 0xe30   : > { %7619 = vmatprep.subr.bf16.mxu1 %v10636_v28 }
 0xe31   : > { %7373 = vmatpush1.bf16.msra.mxu0 %v10595_v23  ;;  %v13771_v23 = vrot.slane %v6743_v20, %v14127_v17 }
 0xe32   : > { %7848 = vmatprep.subr.bf16.mxu0 %v10648_v7 }
 0xe33   : > { %7620 = vmatpush1.bf16.msra.mxu1 %v10634_v5 }
 0xe34   : > { %7375 = vmatmul.mubr.bf16.vlgmr.msra.gmra.mrb[144].mxu0 %v7137_v15  ;;  %7621 = vmatprep.subr.bf16.mxu1 %v10639_v30  ;;  %v10678_v15 = vld [vmem:[#allocation13 + $0x2a4] ss:$8 sps:$4 sm:$0xff]  }
 0xe35   : > { %7849 = vmatpush1.bf16.msra.mxu0 %v10646_v51 }
 0xe36   : > { %7850 = vmatprep.subr.bf16.mxu0 %v10651_v56 }
 0xe37   : > { %7622 = vmatpush1.bf16.msra.mxu1 %v10637_v22 }
 0xe38   : > { %7623 = vmatprep.subr.bf16.mxu1 %v10642_v1 }
 0xe39   : > { %7851 = vmatpush1.bf16.msra.mxu0 %v10649_v10 }
 0xe3a   : > { %7852 = vmatprep.subr.bf16.mxu0 %v10654_v29 }
 0xe3b   : > { %7624 = vmatpush1.bf16.msra.mxu1 %v10640_v47 }
 0xe3c   : > { %7625 = vmatprep.subr.bf16.mxu1 %v10645_v38 }
 0xe3d   : > { %7853 = vmatpush1.bf16.msra.mxu0 %v10652_v33 }
 0xe3e   : > { %7854 = vmatprep.subr.bf16.mxu0 %v10657_v52 }
 0xe3f   : > { %7626 = vmatpush1.bf16.msra.mxu1 %v10643_v25 }
 0xe41   : > { %7855 = vmatpush1.bf16.msra.mxu0 %v10655_v12 }
 0xe42   : > { %7856 = vmatprep.subr.bf16.mxu0 %v10660_v44 }
 0xe45   : > { %7857 = vmatpush1.bf16.msra.mxu0 %v10658_v60 }
 0xe46   : > { %7858 = vmatprep.subr.bf16.mxu0 %v10663_v13 }
 0xe49   : > { %7859 = vmatpush1.bf16.msra.mxu0 %v10661_v24 }
 0xe4a   : > { %7860 = vmatprep.subr.bf16.mxu0 %v10666_v35 }
 0xe4d   : > { %7861 = vmatpush1.bf16.msra.mxu0 %v10664_v58 }
 0xe4e   : > { %7862 = vmatprep.subr.bf16.mxu0 %v10669_v61 }
 0xe51   : > { %7863 = vmatpush1.bf16.msra.mxu0 %v10667_v48 }
 0xe52   : > { %7864 = vmatprep.subr.bf16.mxu0 %v10672_v41 }
 0xe55   : > { %7865 = vmatpush1.bf16.msra.mxu0 %v10670_v34 }
 0xe56   : > { %7866 = vmatprep.subr.bf16.mxu0 %v10675_v37 }
 0xe59   : > { %7867 = vmatpush1.bf16.msra.mxu0 %v10673_v8 }
 0xe5a   : > { %7868 = vmatprep.subr.bf16.mxu0 %v10678_v15 }
 0xe5d   : > { %7869 = vmatpush1.bf16.msra.mxu0 %v10676_v49 }
 0xe5e   : > { %7870 = vmatprep.subr.bf16.mxu0 %v10681_v32 }
 0xe61   : > { %7871 = vmatpush1.bf16.msra.mxu0 %v10679_v36 }
 0xe62   : > { %7872 = vmatprep.subr.bf16.mxu0 %v10684_v19 }
 0xe65   : > { %7873 = vmatpush1.bf16.msra.mxu0 %v10682_v40 }
 0xe66   : > { %7874 = vmatprep.subr.bf16.mxu0 %v10687_v2 }
 0xe69   : > { %7875 = vmatpush1.bf16.msra.mxu0 %v10685_v59 }
 0xec7   : > { %v6922_v43 = vpop.f32.mrb[128].mxu0 }
 0xec8   : > { %v6923_v50 = vadd.f32 %v6922_v43, %v13771_v23  ;;  %v6924_v62 = vpop.f32.mrb[129].mxu0 }
 0xec9   : > { %v6925_v27 = vadd.f32 %v6924_v62, %v13774_v21  ;;  %v6926_v16 = vpop.f32.mrb[130].mxu0 }
 0xeca   : > { %v6927_v6 = vadd.f32 %v6926_v16, %v13771_v23  ;;  %v6928_v57 = vpop.f32.mrb[131].mxu0 }
 0xecb   : > { %v9098_v54 = vpack.c.bf16 %v6925_v27, %v6923_v50  ;;  %v6929_v3 = vadd.f32 %v6928_v57, %v13774_v21 }
 0xecd   : > { %7106 = vst [vmem:[%s13783_s2] sm:$0xff] %v9098_v54  ;;  %v9100_v11 = vpack.c.bf16 %v6929_v3, %v6927_v6 }
 0xecf   : > { %7108 = vst [vmem:[%s13783_s2 + $0xc] sm:$0xff] %v9100_v11  ;;  %v6932_v14 = vpop.f32.mrb[132].mxu0  ;;  %v10052_v18 = vpop.f32.mrb[80].mxu1 }
 0xed0   : > { %v6933_v45 = vadd.f32 %v6932_v14, %v13771_v23  ;;  %v7004_v39 = vadd.f32 %v10052_v18, %v6756_v46  ;;  %v6934_v42 = vpop.f32.mrb[133].mxu0  ;;  %v6995_v63 = vpop.f32.mrb[81].mxu1 }
 0xed1   : > { %v6935_v0 = vadd.f32 %v6934_v42, %v13774_v21  ;;  %v6996_v4 = vadd.f32 %v6995_v63, %v6756_v46  ;;  %v6936_v31 = vpop.f32.mrb[134].mxu0  ;;  %v10053_v53 = vpop.f32.mrb[82].mxu1 }
 0xed2   : > { %v9103_v26 = vpack.c.bf16 %v7004_v39, %v7004_v39  ;;  %v6937_v28 = vadd.f32 %v6936_v31, %v13771_v23  ;;  %v7007_v5 = vadd.f32 %v10053_v53, %v6756_v46  ;;  %v6938_v30 = vpop.f32.mrb[135].mxu0  ;;  %v6998_v22 = vpop.f32.mrb[83].mxu1  ;;  %v10690_v31 = vld [vmem:[#allocation13 + $0x2e4] ss:$8 sps:$4 sm:$0xff]   ;;  %v10693_v53 = vld [vmem:[#allocation13 + $0x2f4] ss:$8 sps:$4 sm:$0xff]  }
 0xed3   : > { %v9102_v47 = vpack.c.bf16 %v6935_v0, %v6933_v45  ;;  %v9099_v1 = vpack.c.bf16 %v6996_v4, %v6996_v4  ;;  %v6939_v38 = vadd.f32 %v6938_v30, %v13774_v21  ;;  %v6999_v25 = vadd.f32 %v6998_v22, %v6756_v46  ;;  %v10688_v4 = vld [vmem:[#allocation13 + $0x2e0] ss:$8 sps:$4 sm:$0xff]   ;;  %7876 = vmatprep.subr.bf16.mxu0 %v10690_v31  ;;  %v10699_v30 = vld [vmem:[#allocation13 + $0x314] ss:$8 sps:$4 sm:$0xff]   ;;  %v10697_v22 = vld [vmem:[#allocation13 + $0x310] ss:$8 sps:$4 sm:$0xff]  }
 0xed4   : > { %7111 = vst [vmem:[%s13783_s2 + $0x20] sm:$0xf] %v9103_v26  ;;  %v9105_v51 = vpack.c.bf16 %v7007_v5, %v7007_v5  ;;  %7877 = vmatpush1.bf16.msra.mxu0 %v10688_v4  ;;  %v10691_v26 = vld [vmem:[#allocation13 + $0x2f0] ss:$8 sps:$4 sm:$0xff]   ;;  %v10696_v5 = vld [vmem:[#allocation13 + $0x304] ss:$8 sps:$4 sm:$0xff]  }
 0xed5   : > { %7110 = vst [vmem:[%s13783_s2 + $0x18] sm:$0xff] %v9102_v47  ;;  %7107 = vst [vmem:[%s13783_s2 + $0x8] sm:$0xf] %v9099_v1  ;;  %v9104_v7 = vpack.c.bf16 %v6939_v38, %v6937_v28  ;;  %v9101_v56 = vpack.c.bf16 %v6999_v25, %v6999_v25  ;;  %v10694_v28 = vld [vmem:[#allocation13 + $0x300] ss:$8 sps:$4 sm:$0xff]   ;;  %7878 = vmatprep.subr.bf16.mxu0 %v10693_v53  ;;  %8101 = vmatprep.subr.bf16.mxu1 %v10696_v5 }
 0xed6   : > { %7113 = vst [vmem:[%s13783_s2 + $0x2c] sm:$0xf] %v9105_v51  ;;  %v10702_v47 = vld [vmem:[#allocation13 + $0x324] ss:$8 sps:$4 sm:$0xff]   ;;  %v10700_v1 = vld [vmem:[#allocation13 + $0x320] ss:$8 sps:$4 sm:$0xff]  }
 0xed7   : > { %7112 = vst [vmem:[%s13783_s2 + $0x24] sm:$0xff] %v9104_v7  ;;  %7109 = vst [vmem:[%s13783_s2 + $0x14] sm:$0xf] %v9101_v56  ;;  %v6942_v10 = vpop.f32.mrb[136].mxu0  ;;  %v10705_v38 = vld [vmem:[#allocation13 + $0x334] ss:$8 sps:$4 sm:$0xff]  }
 0xed8   : > { %v6943_v29 = vadd.f32 %v6942_v10, %v13771_v23  ;;  %v6944_v33 = vpop.f32.mrb[137].mxu0  ;;  %7879 = vmatpush1.bf16.msra.mxu0 %v10691_v26  ;;  %v10703_v25 = vld [vmem:[#allocation13 + $0x330] ss:$8 sps:$4 sm:$0xff]   ;;  %v10708_v51 = vld [vmem:[#allocation13 + $0x344] ss:$8 sps:$4 sm:$0xff]  }
 0xed9   : > { %v6945_v52 = vadd.f32 %v6944_v33, %v13774_v21  ;;  %v6946_v12 = vpop.f32.mrb[138].mxu0  ;;  %v10706_v7 = vld [vmem:[#allocation13 + $0x340] ss:$8 sps:$4 sm:$0xff]   ;;  %v10711_v56 = vld [vmem:[#allocation13 + $0x354] ss:$8 sps:$4 sm:$0xff]  }
 0xeda   : > { %v6947_v44 = vadd.f32 %v6946_v12, %v13771_v23  ;;  %v6948_v60 = vpop.f32.mrb[139].mxu0  ;;  %v10709_v10 = vld [vmem:[#allocation13 + $0x350] ss:$8 sps:$4 sm:$0xff]   ;;  %v10712_v33 = vld [vmem:[#allocation13 + $0x360] ss:$8 sps:$4 sm:$0xff]  }
 0xedb   : > { %v9106_v13 = vpack.c.bf16 %v6945_v52, %v6943_v29  ;;  %v6949_v24 = vadd.f32 %v6948_v60, %v13774_v21  ;;  %v10714_v29 = vld [vmem:[#allocation13 + $0x364] ss:$8 sps:$4 sm:$0xff]   ;;  %v10717_v52 = vld [vmem:[#allocation13 + $0x374] ss:$8 sps:$4 sm:$0xff]   ;;  %v10715_v12 = vld [vmem:[#allocation13 + $0x370] ss:$8 sps:$4 sm:$0xff]  }
 0xedc   : > { %v10718_v60 = vld [vmem:[#allocation13 + $0x380] ss:$8 sps:$4 sm:$0xff]  }
 0xedd   : > { %7114 = vst [vmem:[%s13783_s2 + $0x30] sm:$0xff] %v9106_v13  ;;  %v9108_v35 = vpack.c.bf16 %v6949_v24, %v6947_v44  ;;  %v10720_v44 = vld [vmem:[#allocation13 + $0x384] ss:$8 sps:$4 sm:$0xff]   ;;  %v10723_v13 = vld [vmem:[#allocation13 + $0x394] ss:$8 sps:$4 sm:$0xff]  }
 0xede   : > { %v10721_v24 = vld [vmem:[#allocation13 + $0x390] ss:$8 sps:$4 sm:$0xff]  }
 0xedf   : > { %7116 = vst [vmem:[%s13783_s2 + $0x3c] sm:$0xff] %v9108_v35  ;;  %v6952_v58 = vpop.f32.mrb[140].mxu0  ;;  %v10056_v61 = vpop.f32.mrb[84].mxu1  ;;  %v10726_v35 = vld [vmem:[#allocation13 + $0x3a4] ss:$8 sps:$4 sm:$0xff]  }
 0xee0   : > { %v6953_v48 = vadd.f32 %v6952_v58, %v13771_v23  ;;  %v7020_v41 = vadd.f32 %v10056_v61, %v6756_v46  ;;  %v6954_v34 = vpop.f32.mrb[141].mxu0  ;;  %v7011_v37 = vpop.f32.mrb[85].mxu1  ;;  %v10724_v58 = vld [vmem:[#allocation13 + $0x3a0] ss:$8 sps:$4 sm:$0xff]   ;;  %v10729_v61 = vld [vmem:[#allocation13 + $0x3b4] ss:$8 sps:$4 sm:$0xff]  }
 0xee1   : > { %v6955_v8 = vadd.f32 %v6954_v34, %v13774_v21  ;;  %v7012_v15 = vadd.f32 %v7011_v37, %v6756_v46  ;;  %v6956_v49 = vpop.f32.mrb[142].mxu0  ;;  %v10057_v32 = vpop.f32.mrb[86].mxu1  ;;  %v10730_v34 = vld [vmem:[#allocation13 + $0x3c0] ss:$8 sps:$4 sm:$0xff]   ;;  %v10735_v37 = vld [vmem:[#allocation13 + $0x3d4] ss:$8 sps:$4 sm:$0xff]  }
 0xee2   : > { %v9111_v36 = vpack.c.bf16 %v7020_v41, %v7020_v41  ;;  %v6957_v19 = vadd.f32 %v6956_v49, %v13771_v23  ;;  %v7023_v20 = vadd.f32 %v10057_v32, %v6756_v46  ;;  %v6958_v40 = vpop.f32.mrb[143].mxu0  ;;  %v7014_v2 = vpop.f32.mrb[87].mxu1  ;;  %v7170_v23 = vld [vmem:[%s13937_s17] sm:$0x3]  ;;  %v10732_v41 = vld [vmem:[#allocation13 + $0x3c4] ss:$8 sps:$4 sm:$0xff]  }
 0xee3   : > { %v9110_v59 = vpack.c.bf16 %v6955_v8, %v6953_v48  ;;  %v9107_v43 = vpack.c.bf16 %v7012_v15, %v7012_v15  ;;  %v6959_v50 = vadd.f32 %v6958_v40, %v13774_v21  ;;  %v7015_v62 = vadd.f32 %v7014_v2, %v6756_v46  ;;  %v10727_v48 = vld [vmem:[#allocation13 + $0x3b0] ss:$8 sps:$4 sm:$0xff]   ;;  %v8991_v15 = vld [vmem:[%s13937_s17 + $0x2] sm:$0x3] }
 0xee4   : > { %7119 = vst [vmem:[%s13783_s2 + $0x50] sm:$0xf] %v9111_v36  ;;  %v9113_v55 = vpack.c.bf16 %v7023_v20, %v7023_v20  ;;  %v7335_v6 = vrot.slane %v7170_v23, %v14127_v17  ;;  %v7339_v57 = vrot.slane %v7170_v23, %v13768_v9  ;;  %v10733_v8 = vld [vmem:[#allocation13 + $0x3d0] ss:$8 sps:$4 sm:$0xff]   ;;  %v7588_v49 = vrot.slane %v8991_v15, %v14127_v17  ;;  %v10736_v23 = vld [vmem:[#allocation13 + $0x3e0] ss:$8 sps:$4 sm:$0xff]  }
 0xee5   : > { %7118 = vst [vmem:[%s13783_s2 + $0x48] sm:$0xff] %v9110_v59  ;;  %7115 = vst [vmem:[%s13783_s2 + $0x38] sm:$0xf] %v9107_v43  ;;  %v9112_v27 = vpack.c.bf16 %v6959_v50, %v6957_v19  ;;  %v9109_v16 = vpack.c.bf16 %v7015_v62, %v7015_v62  ;;  %v7592_v32 = vrot.slane %v8991_v15, %v13768_v9 }
 0xee6   : > { %7121 = vst [vmem:[%s13783_s2 + $0x5c] sm:$0xf] %v9113_v55 }
 0xee7   : > { %7120 = vst [vmem:[%s13783_s2 + $0x54] sm:$0xff] %v9112_v27  ;;  %7117 = vst [vmem:[%s13783_s2 + $0x44] sm:$0xf] %v9109_v16  ;;  %s13837_s2 = scalar_lea.hbm %s14129_s1, %s9114_s27 }
 0xf07   : > { %v7376_v54 = vpop.f32.mrb[144].mxu0 }
 0xf08   : > { %v7377_v21 = vadd.f32 %v7376_v54, %v7335_v6  ;;  %v7378_v3 = vpop.f32.mrb[145].mxu0  ;;  %v10738_v6 = vld [vmem:[#allocation13 + $0x3e4] ss:$8 sps:$4 sm:$0xff]   ;;  %v10739_v54 = vld [vmem:[#allocation13 + $0x3f0] ss:$8 sps:$4 sm:$0xff]  }
 0xf09   : > { %v7379_v46 = vadd.f32 %v7378_v3, %v7339_v57  ;;  %v7380_v11 = vpop.f32.mrb[146].mxu0  ;;  %v10741_v57 = vld [vmem:[#allocation13 + $0x3f4] ss:$8 sps:$4 sm:$0xff]  }
 0xf0a   : > { %v7383_v14 = vmul.f32 0.2, %v7377_v21  ;;  %v7381_v18 = vpop.f32.mrb[147].mxu0 }
 0xf0b   : > { %v7384_v45 = vmul.f32 0.2, %v7379_v46 }
 0xf0c   : > { %v7385_v39 = vmax.f32 %v7377_v21, %v7383_v14  ;;  %v9024_v21 = vld [vmem:[%s13937_s17 + $0x4] sm:$0x3] }
 0xf0d   : > { %v7386_v42 = vmax.f32 %v7379_v46, %v7384_v45  ;;  %v7841_v3 = vrot.slane %v9024_v21, %v14127_v17  ;;  %v7845_v46 = vrot.slane %v9024_v21, %v13768_v9 }
 0xf0e   : > { %v7387_v0 = vpack.c.bf16 %v7385_v39, %v7385_v39 }
 0xf0f   : > { %v7388_v63 = vpack.c.bf16 %v7386_v42, %v7386_v42 }
 0xf11   : > { %7627 = vmatprep.mubr.bf16.mxu1 %v7388_v63 }
 0xf12   : > { %7628 = vmatmul.mubr.bf16.vlgmr.msra.gmra.mrb[88].mxu1 %v7387_v0 }
 0xf13   : > { %8102 = vmatpush1.bf16.msra.mxu1 %v10694_v28 }
 0xf14   : > { %8103 = vmatprep.subr.bf16.mxu1 %v10699_v30 }
 0xf17   : > { %8104 = vmatpush1.bf16.msra.mxu1 %v10697_v22 }
 0xf18   : > { %8105 = vmatprep.subr.bf16.mxu1 %v10702_v47 }
 0xf1b   : > { %8106 = vmatpush1.bf16.msra.mxu1 %v10700_v1 }
 0xf1c   : > { %8107 = vmatprep.subr.bf16.mxu1 %v10705_v38 }
 0xf1f   : > { %8108 = vmatpush1.bf16.msra.mxu1 %v10703_v25 }
 0xf20   : > { %8109 = vmatprep.subr.bf16.mxu1 %v10708_v51 }
 0xf23   : > { %8110 = vmatpush1.bf16.msra.mxu1 %v10706_v7 }
 0xf24   : > { %8111 = vmatprep.subr.bf16.mxu1 %v10711_v56 }
 0xf27   : > { %8112 = vmatpush1.bf16.msra.mxu1 %v10709_v10 }
 0xf28   : > { %8113 = vmatprep.subr.bf16.mxu1 %v10714_v29 }
 0xf2b   : > { %8114 = vmatpush1.bf16.msra.mxu1 %v10712_v33 }
 0xf2c   : > { %8115 = vmatprep.subr.bf16.mxu1 %v10717_v52 }
 0xf2f   : > { %8116 = vmatpush1.bf16.msra.mxu1 %v10715_v12 }
 0xf30   : > { %8117 = vmatprep.subr.bf16.mxu1 %v10720_v44 }
 0xf33   : > { %8118 = vmatpush1.bf16.msra.mxu1 %v10718_v60 }
 0xf34   : > { %8119 = vmatprep.subr.bf16.mxu1 %v10723_v13 }
 0xf37   : > { %8120 = vmatpush1.bf16.msra.mxu1 %v10721_v24 }
 0xf38   : > { %8121 = vmatprep.subr.bf16.mxu1 %v10726_v35 }
 0xf3b   : > { %8122 = vmatpush1.bf16.msra.mxu1 %v10724_v58 }
 0xf3c   : > { %8123 = vmatprep.subr.bf16.mxu1 %v10729_v61 }
 0xf3f   : > { %8124 = vmatpush1.bf16.msra.mxu1 %v10727_v48 }
 0xf40   : > { %8125 = vmatprep.subr.bf16.mxu1 %v10732_v41 }
 0xf43   : > { %8126 = vmatpush1.bf16.msra.mxu1 %v10730_v34 }
 0xf44   : > { %8127 = vmatprep.subr.bf16.mxu1 %v10735_v37 }
 0xf47   : > { %8128 = vmatpush1.bf16.msra.mxu1 %v10733_v8 }
 0xf48   : > { %8129 = vmatprep.subr.bf16.mxu1 %v10738_v6 }
 0xf4b   : > { %8130 = vmatpush1.bf16.msra.mxu1 %v10736_v23 }
 0xf4c   : > { %8131 = vmatprep.subr.bf16.mxu1 %v10741_v57 }
 0xf4f   : > { %8132 = vmatpush1.bf16.msra.mxu1 %v10739_v54 }
 0xfe5   : > { %v7629_v36 = vpop.f32.mrb[88].mxu1 }
 0xfe6   : > { %v7630_v19 = vadd.f32 %v7629_v36, %v7588_v49  ;;  %v7631_v20 = vpop.f32.mrb[89].mxu1 }
 0xfe7   : > { %v7632_v40 = vadd.f32 %v7631_v20, %v7592_v32  ;;  %v7633_v2 = vpop.f32.mrb[90].mxu1 }
 0xfe8   : > { %v7636_v59 = vmul.f32 0.2, %v7630_v19  ;;  %v7634_v43 = vpop.f32.mrb[91].mxu1 }
 0xfe9   : > { %v7637_v50 = vmul.f32 0.2, %v7632_v40 }
 0xfea   : > { %v7638_v62 = vmax.f32 %v7630_v19, %v7636_v59 }
 0xfeb   : > { %v7639_v55 = vmax.f32 %v7632_v40, %v7637_v50 }
 0xfec   : > { %v7640_v16 = vpack.c.bf16 %v7638_v62, %v7638_v62 }
 0xfed   : > { %v7641_v27 = vpack.c.bf16 %v7639_v55, %v7639_v55 }
 0xfef   : > { %7880 = vmatprep.mubr.bf16.mxu0 %v7641_v27 }
 0xff0   : > { %7881 = vmatmul.mubr.bf16.vlgmr.msra.gmra.mrb[148].mxu0 %v7640_v16 }
0x10c3   : > { %v7882_v11 = vpop.f32.mrb[148].mxu0 }
0x10c4   : > { %v7883_v14 = vadd.f32 %v7882_v11, %v7841_v3  ;;  %v7884_v18 = vpop.f32.mrb[149].mxu0 }
0x10c5   : > { %v7885_v45 = vadd.f32 %v7884_v18, %v7845_v46  ;;  %v7886_v39 = vpop.f32.mrb[150].mxu0 }
0x10c6   : > { %v7889_v42 = vmul.f32 0.2, %v7883_v14  ;;  %v7887_v63 = vpop.f32.mrb[151].mxu0 }
0x10c7   : > { %v7890_v0 = vmul.f32 0.2, %v7885_v45 }
0x10c8   : > { %v7891_v4 = vmax.f32 %v7883_v14, %v7889_v42 }
0x10c9   : > { %v7892_v31 = vmax.f32 %v7885_v45, %v7890_v0 }
0x10ca   : > { %v7893_v26 = vpack.c.bf16 %v7891_v4, %v7891_v4 }
0x10cb   : > { %v7894_v53 = vpack.c.bf16 %v7892_v31, %v7892_v31 }
0x10cd   : > { %8133 = vmatprep.mubr.bf16.mxu1 %v7894_v53 }
0x10ce   : > { %8134 = vmatmul.mubr.bf16.vlgmr.msra.gmra.mrb[92].mxu1 %v7893_v26 }
0x10cf   : > { %10956 = shalt.err (!%p10953_p9)
}
0x10d0   : > { %s10957_s8 = scalar_lea.hbm %s13837_s2, 1024  ;;  %s10961_s11 = scalar_lea.hbm %s14129_s1, 2048 }
0x10d1   : > { %p10958_p10 = scmp.ne.s32.totalorder %s13837_s2, %s10957_s8  ;;  %p10962_p1 = scmp.lt.u32.totalorder %s13837_s2, %s14129_s1 }
0x10d2   : > { %p10963_p2 = scmp.lt.u32.totalorder %s10961_s11, %s10957_s8  ;;  %p10965_p4 = scmp.lt.u32.totalorder %s10957_s8, %s13837_s2 }
0x10d3   : > { %p10959_p13 = pnand %p10958_p10, %p14130_p7 }
0x10d4   : > { %p10964_p3 = por %p10963_p2, %p10962_p1 }
0x10d5   : > { %p10960_p12 = pneg %p10959_p13 }
0x10d6   : > { %p10966_p8 = por %p10965_p4, %p10964_p3 }
0x10d8   : > { %p10967_p11 = pnand %p10966_p8, %p10960_p12 }
0x10da   : > { %10970 = shalt.err (!%p10967_p11)
}
0x10db   : > { %s11074_s20 = smov 128   ;;  %s11075_s4 = smov 8   ;;  %v9057_v28 = vld [vmem:[%s13937_s17 + $0x6] sm:$0x3] }
0x10dc   : > { %10191 = dma.vmem_to_hbm [thread:$0]  (%p14130_p7), %s13831_s24, 1024, %s13837_s2, %s8151_s0, %s11074_s20, %s11074_s20, %s11075_s4   ;;  %v8094_v5 = vrot.slane %v9057_v28, %v14127_v17  ;;  %v8098_v30 = vrot.slane %v9057_v28, %v13768_v9 }
0x10dd   : > { %s9093_s8 = sshll.u32 %s11208_s3, 4  ;;  %s781_s27 = scalar_lea.vmem [#allocation15], %s13734_s21 }
0x10de   : > { %s8195_s11 = sshll.u32 %s781_s27, 4  ;;  %s14131_s1 = sld [smem:[#allocation50_spill]]  ;;  %s13875_s11 = int_to_ptr.vmem [resolvable:$true] %s8195_s11 }
0x10df   : > { %s8161_s3 = scalar_lea.sflag [#allocation16], %s13734_s21  ;;  %s10971_s2 = scalar_lea.vmem %s13875_s11, 16 }
0x10e0   : > { %p10972_p5 = scmp.ne.s32.totalorder %s13875_s11, %s10971_s2  ;;  %s11076_s0 = smov [#allocation15]  }
0x10e1   : > { %s10975_s20 = sshll.u32 %s11076_s0, 4  ;;  %s10976_s20 = int_to_ptr.vmem [resolvable:$false] %s10975_s20 }
0x10e2   : > { %p10973_p6 = pnand %p10972_p5, %p14130_p7  ;;  %s10977_s4 = scalar_lea.vmem %s10976_s20, 32 }
0x10e3   : > { %p10978_p9 = scmp.lt.s32.totalorder %s13875_s11, %s10976_s20  ;;  %p10979_p10 = scmp.lt.s32.totalorder %s10977_s4, %s10971_s2 }
0x10e4   : > { %s13873_s24 = scalar_lea.hbm %s14131_s1, %s9093_s8  ;;  %p10974_p0 = pneg %p10973_p6 }
0x10e5   : > { %p10980_p13 = por %p10979_p10, %p10978_p9 }
0x10e7   : > { %p10981_p12 = pnand %p10980_p13, %p10974_p0 }
0x11a1   : > { %v8135_v22 = vpop.f32.mrb[92].mxu1 }
0x11a2   : > { %v8136_v47 = vadd.f32 %v8135_v22, %v8094_v5  ;;  %v8137_v1 = vpop.f32.mrb[93].mxu1 }
0x11a3   : > { %v8138_v17 = vadd.f32 %v8137_v1, %v8098_v30  ;;  %v8139_v38 = vpop.f32.mrb[94].mxu1 }
0x11a4   : > { %8142 = vst [vmem:[%s781_s27] sm:$0x1] %v8136_v47  ;;  %v8140_v9 = vpop.f32.mrb[95].mxu1 }
0x11a5   : > { %v8143_v25 = vsub.f32 0.0, %v8138_v17 }
0x11a6   : > { %10984 = shalt.err (!%p10981_p12)
}
0x11a7   : > { %s10985_s21 = scalar_lea.hbm %s13873_s24, 16  ;;  %s10989_s8 = scalar_lea.hbm %s14131_s1, 32 }
0x11a8   : > { %p10986_p1 = scmp.ne.s32.totalorder %s13873_s24, %s10985_s21  ;;  %p10990_p4 = scmp.lt.u32.totalorder %s13873_s24, %s14131_s1 }
0x11a9   : > { %p10991_p8 = scmp.lt.u32.totalorder %s10989_s8, %s10985_s21  ;;  %p10993_p5 = scmp.lt.u32.totalorder %s10985_s21, %s13873_s24 }
0x11aa   : > { %p10987_p2 = pnand %p10986_p1, %p14130_p7 }
0x11ab   : > { %p10992_p11 = por %p10991_p8, %p10990_p4 }
0x11ac   : > { %p10988_p3 = pneg %p10987_p2 }
0x11ad   : > { %p10994_p6 = por %p10993_p5, %p10992_p11 }
0x11af   : > { %p10995_p0 = pnand %p10994_p6, %p10988_p3 }
0x11b1   : > { %10998 = shalt.err (!%p10995_p0)
}
0x11b2   : > { %10192 = dma.vmem_to_hbm [thread:$0]  (%p14130_p7), %s13875_s11, 16, %s13873_s24, %s8161_s3   ;;  %v8144_v51 = vmul.f32 1.442695, %v8143_v25 }
0x11b3   : > { %s14132_s0 = sld [smem:[#allocation51_spill]] }
0x11b4   : > { %10742 = vpow2.f32 %v8144_v51 }
0x11b9   : > { %s804_s20 = scalar_lea.vmem %s14132_s0, %s11433_s23 }
0x11be   : > { %v10743_v7 = vpop.eup %10742 }
0x11bf   : > { %v8146_v56 = vadd.f32 1.0, %v10743_v7 }
0x11c1   : > { %10744 = vrcp.f32 %v8146_v56 }
0x11cb   : > { %v10745_v10 = vpop.eup %10744 }
0x11cc   : > { %8149 = vst [vmem:[%s804_s20] sm:$0x1] %v10745_v10 }
0x11cd PF: > { %s14133_s4 = sld [smem:[#allocation25_spill]]  ;;  %s14134_s21 = sld [smem:[#allocation23_spill]] }
0x11ce   : > { %s14135_s30 = sld [smem:[#allocation29_spill]] }
0x11d3   : > { %p10238_p9 = scmp.ge.s32.totalorder %s14133_s4, 2  ;;  %s8210_s18 = sand.u32 1, %s14134_s21  }
0x11d4   : > { %p14136_p10 = scmp.ne.s32.totalorder %s14135_s30, 0  ;;  %s8211_s11 = scalar_lea.sflag [#allocation4], %s8210_s18 }
0x11d6   : > { %p10218_p13 = pnand %p10238_p9, %p14136_p10 }
0x11d8   : > { %11032 = dma.done.wait (!%p10218_p13), %s8211_s11, 1024  }
0x11d9   : > { %11034 = vsyncadd (!%p10218_p13), %s8211_s11, 4294966272  ;;  %s8228_s24 = scalar_lea.sflag [#allocation16], %s8210_s18 }
0x11da   : > { %11036 = dma.done.wait (!%p10218_p13), %s8228_s24, 16  }
0x11db   : > { %11038 = vsyncadd (!%p10218_p13), %s8228_s24, 4294967280  ;;  %s14137_s27 = sld [smem:[#allocation26_spill]]  ;;  %s14138_s3 = sld [smem:[#allocation24_spill]] }
0x11dc   : > { %s14139_s26 = sld [smem:[#allocation27_spill]]  ;;  %s14140_s2 = smov %s11045_s25 }
0x11e1   : > { %p39_p7 = scmp.ge.s32.totalorder %s14137_s27, 4   ;;  %s14141_s25 = smov %s14138_s3 }
0x11e3   :  { %41 = sbr.rel (!%p39_p7) target bundleno = 21 (0x15), region = 221 }
0x11ea   :  { %8238 = vsyncpa [#allocation3], 1 }
0x11eb   :  { %8240 = vsyncpa [#allocation3 + $0x1], 1 }
0x11ec   :  { %8241 = vsyncpa [#allocation6], 1 }
0x11ed   :  { %8242 = vsyncpa [#allocation9], 1 }
0x11ee   :  { %8243 = vsyncpa [#allocation12], 1 }
0x11ef   :  { %8244 = vsyncpa [#allocation4], 1 }
0x11f0   :  { %8246 = vsyncpa [#allocation4 + $0x1], 1 }
0x11f1   :  { %8247 = vsyncpa [#allocation16], 1 }
0x11f2   :  { %8249 = vsyncpa [#allocation16 + $0x1], 1 }

</bundles_post_ra>
